<compile_context>
chip_gen: v5e
topology: v5e:2x2
jax: 0.10.0
libtpu: 0.0.40
codegen_flags: <defaults>
</compile_context>

<pallas_src>
import math

import jax
import jax.numpy as jnp
from jax import lax
from jax.experimental import pallas as pl
from jax.experimental.pallas import tpu as pltpu


# ----------------------------------------------------------------------------------
# In-kernel helpers
# ----------------------------------------------------------------------------------
def _ln(x, g_ref, b_ref, eps=1e-12):
    mu = jnp.mean(x, axis=-1, keepdims=True)
    var = jnp.mean((x - mu) ** 2, axis=-1, keepdims=True)
    return (x - mu) * lax.rsqrt(var + eps) * g_ref[...] + b_ref[...]


def _gelu(x):
    c = 0.7978845608028654  # sqrt(2/pi)
    return 0.5 * x * (1.0 + jnp.tanh(c * (x + 0.044715 * x * x * x)))


def _subnet(x, ws):
    w1, b1, w2, b2, w3, b3 = ws
    y1 = jnp.tanh(jnp.dot(x, w1[...], preferred_element_type=jnp.float32) + b1[...])
    y2 = jnp.tanh(jnp.dot(y1, w2[...], preferred_element_type=jnp.float32) + b2[...])
    return jnp.dot(y2, w3[...], preferred_element_type=jnp.float32) + b3[...]


def _lstm_cell(xg_t, h, c, whh_ref, H, alive_f):
    gates = xg_t + jnp.dot(h, whh_ref[...], preferred_element_type=jnp.float32)   # (TB, 4H)
    # TODO(synk): gate slices are 16-lane sub-slices of one vreg; acceptable at H=16,
    #             pad H / use per-gate weights if ever scaled up.
    i = jax.nn.sigmoid(gates[:, 0:H])
    f = jax.nn.sigmoid(gates[:, H:2 * H])
    g = jnp.tanh(gates[:, 2 * H:3 * H])
    o = jax.nn.sigmoid(gates[:, 3 * H:4 * H])
    c_n = f * c + i * g
    h_n = o * jnp.tanh(c_n)
    # pack_padded_sequence semantics: freeze state past the true length (vectorized over batch)
    h = h + alive_f * (h_n - h)
    c = c + alive_f * (c_n - c)
    return h, c


# ----------------------------------------------------------------------------------
# Fused kernel: text encoder + 2 LSTM encoders + 3 SubNets + late fusion
# One grid step == one batch TILE (up to 8 batch rows).
# ----------------------------------------------------------------------------------
def msa_lf_kernel(*refs):
    (emb_ref, mask_ref, vlen_ref, alen_ref,
     ge, be, wq, bq, wk, bk, wv, bv, wo_t, bo_t, g1, b1,
     wf1, bf1, wf2, bf2, g2, b2,
     xv_ref, wih_v, whh_v, bg_v, wlv, blv,
     xa_ref, wih_a, whh_a, bg_a, wla, bla,
     tw1, tb1, tw2, tb2, tw3, tb3,
     vw1, vb1, vw2, vb2, vw3, vb3,
     aw1, ab1, aw2, ab2, aw3, ab3,
     out_ref) = refs

    # ---------------- text encoder (one synthetic BERT layer, CLS pooled) ----------
    TB, Lp, D = emb_ref.shape
    xf = emb_ref[...].reshape(TB * Lp, D)            # batch*seq flattened (Lp multiple of 8)
    msk = mask_ref[...]                              # (TB, 1, Lp) key-padding mask

    x = _ln(xf, ge, be)
    q = jnp.dot(x, wq[...], preferred_element_type=jnp.float32) + bq[...]
    k = jnp.dot(x, wk[...], preferred_element_type=jnp.float32) + bk[...]
    v = jnp.dot(x, wv[...], preferred_element_type=jnp.float32) + bv[...]
    q3 = q.reshape(TB, Lp, D)
    k3 = k.reshape(TB, Lp, D)
    v3 = v.reshape(TB, Lp, D)

    scores = jnp.einsum('bqd,bkd->bqk', q3, k3,
                        preferred_element_type=jnp.float32) * (1.0 / math.sqrt(D))
    scores = scores + (1.0 - msk) * (-1e9)           # mask padded keys (broadcast over queries)
    scores = scores - jnp.max(scores, axis=-1, keepdims=True)
    p = jnp.exp(scores)
    p = p * pl.reciprocal(jnp.sum(p, axis=-1, keepdims=True), approx=True)   # divide on EUP slot
    ctx = jnp.einsum('bqk,bkd->bqd', p, v3,
                     preferred_element_type=jnp.float32).reshape(TB * Lp, D)

    attn = jnp.dot(ctx, wo_t[...], preferred_element_type=jnp.float32) + bo_t[...]
    h1 = _ln(xf + attn, g1, b1)
    ff = jnp.dot(_gelu(jnp.dot(h1, wf1[...], preferred_element_type=jnp.float32) + bf1[...]),
                 wf2[...], preferred_element_type=jnp.float32) + bf2[...]
    h2 = _ln(h1 + ff, g2, b2)
    text_feat = h2.reshape(TB, Lp, D)[:, 0, :]       # enc_word[:, 0, :] (CLS), (TB, D)

    # ---------------- visual + acoustic LSTMs: shared, fully unrolled time loop ----
    T = xv_ref.shape[1]
    Dv = xv_ref.shape[2]
    Da = xa_ref.shape[2]
    Hv = whh_v.shape[0]
    Ha = whh_a.shape[0]

    # Input projections hoisted out of the recurrence: one (TB*T, Din) matmul each; the serial
    # loop only carries the unavoidable h @ Whh dependency.
    xg_v = (jnp.dot(xv_ref[...].reshape(TB * T, Dv), wih_v[...],
                    preferred_element_type=jnp.float32) + bg_v[...]).reshape(TB, T, 4 * Hv)
    xg_a = (jnp.dot(xa_ref[...].reshape(TB * T, Da), wih_a[...],
                    preferred_element_type=jnp.float32) + bg_a[...]).reshape(TB, T, 4 * Ha)

    vlen = vlen_ref[...]                             # (TB, 1) int32
    alen = alen_ref[...]                             # (TB, 1) int32

    h_v = jnp.zeros((TB, Hv), jnp.float32)
    c_v = jnp.zeros((TB, Hv), jnp.float32)
    h_a = jnp.zeros((TB, Ha), jnp.float32)
    c_a = jnp.zeros((TB, Ha), jnp.float32)
    for t in range(T):                               # static unroll: full scheduler visibility
        av = (vlen > t).astype(jnp.float32)          # (TB, 1) alive masks, vectorized
        aa = (alen > t).astype(jnp.float32)
        h_v, c_v = _lstm_cell(xg_v[:, t, :], h_v, c_v, whh_v, Hv, av)
        h_a, c_a = _lstm_cell(xg_a[:, t, :], h_a, c_a, whh_a, Ha, aa)

    vis_feat = jnp.dot(h_v, wlv[...], preferred_element_type=jnp.float32) + blv[...]  # (TB, Dvout)
    aco_feat = jnp.dot(h_a, wla[...], preferred_element_type=jnp.float32) + bla[...]  # (TB, Daout)

    # ---------------- late-fusion classifiers (w3/b3 pre-padded to 128 lanes) ------
    pred = (_subnet(text_feat, (tw1, tb1, tw2, tb2, tw3, tb3))
            + _subnet(vis_feat, (vw1, vb1, vw2, vb2, vw3, vb3))
            + _subnet(aco_feat, (aw1, ab1, aw2, ab2, aw3, ab3))) * (1.0 / 3.0)
    out_ref[...] = pred                               # (TB, 128) unmasked lane-dense store


# ----------------------------------------------------------------------------------
# Wrapper: build args/specs, one pallas_call for the whole forward
# ----------------------------------------------------------------------------------
def msa_lf_forward(params, sentences, visual, acoustic, v_len, a_len,
                   bert_sent, bert_sent_type, bert_sent_mask):
    del sentences  # unused on the BERT path, exactly as in the PyTorch module
    tp = params["text"]
    B, L = bert_sent.shape
    assert visual.shape[1] == acoustic.shape[1], "shared LSTM time loop assumes equal T"

    # glue: embedding gather (word + token-type + position); transformer math is in-kernel
    emb = (tp["word_emb"][bert_sent]
           + tp["type_emb"][bert_sent_type]
           + tp["pos_emb"][None, :L, :])
    mask = bert_sent_mask.astype(jnp.float32)

    # pad the text sequence length to a sublane multiple (padded keys are masked out)
    Lp = ((L + 7) // 8) * 8
    if Lp != L:
        emb = jnp.pad(emb, ((0, 0), (0, Lp - L), (0, 0)))
        mask = jnp.pad(mask, ((0, 0), (0, Lp - L)))
    mask3 = mask.reshape(B, 1, Lp)

    # batch tiling: up to 8 rows per grid step (sublane-aligned); pad batch if needed
    TB = B if B <= 8 else 8
    BP = ((B + TB - 1) // TB) * TB
    v_len = v_len.astype(jnp.int32)
    a_len = a_len.astype(jnp.int32)
    if BP != B:
        pb = BP - B
        emb = jnp.pad(emb, ((0, pb), (0, 0), (0, 0)))
        mask3 = jnp.pad(mask3, ((0, pb), (0, 0), (0, 0)))
        visual = jnp.pad(visual, ((0, pb), (0, 0), (0, 0)))
        acoustic = jnp.pad(acoustic, ((0, pb), (0, 0), (0, 0)))
        v_len = jnp.pad(v_len, (0, pb))
        a_len = jnp.pad(a_len, (0, pb))
    vlen2 = v_len.reshape(BP, 1)
    alen2 = a_len.reshape(BP, 1)

    # pad final classifier layers to a lane-dense (128-wide) output slab
    n_class = params["clf"]["text"][4].shape[1]
    out_lanes = ((n_class + 127) // 128) * 128

    def pad_clf(ws):
        w1, b1, w2, b2, w3, b3 = ws
        return (w1, b1, w2, b2,
                jnp.pad(w3, ((0, 0), (0, out_lanes - n_class))),
                jnp.pad(b3, ((0, 0), (0, out_lanes - n_class))))

    clf_t = pad_clf(params["clf"]["text"])
    clf_v = pad_clf(params["clf"]["visual"])
    clf_a = pad_clf(params["clf"]["acoustic"])

    pv = params["visual"]
    pa = params["acoustic"]

    args = []
    specs = []

    def add(arr, batched=False):
        args.append(arr)
        if batched:
            blk = (TB,) + tuple(arr.shape[1:])
            tail = (0,) * (arr.ndim - 1)
            specs.append(pl.BlockSpec(blk, lambda i, _t=tail: (i,) + _t))
        else:
            zero = (0,) * arr.ndim
            specs.append(pl.BlockSpec(arr.shape, lambda i, _z=zero: _z))

    add(emb, batched=True)
    add(mask3, batched=True)
    add(vlen2, batched=True)
    add(alen2, batched=True)
    for name in ("ge", "be", "wq", "bq", "wk", "bk", "wv", "bv",
                 "wo", "bo", "g1", "b1", "wf1", "bf1", "wf2", "bf2", "g2", "b2"):
        add(tp[name])
    add(visual, batched=True)
    for name in ("wih", "whh", "b", "wo", "bo"):
        add(pv[name])
    add(acoustic, batched=True)
    for name in ("wih", "whh", "b", "wo", "bo"):
        add(pa[name])
    for w in clf_t + clf_v + clf_a:
        add(w)

    out = pl.pallas_call(
        msa_lf_kernel,
        out_shape=jax.ShapeDtypeStruct((BP, out_lanes), jnp.float32),
        grid=(BP // TB,),
        in_specs=specs,
        out_specs=pl.BlockSpec((TB, out_lanes), lambda i: (i, 0)),
        compiler_params=pltpu.CompilerParams(
            dimension_semantics=("parallel",),        # batch-tile axis -> both TCs on v7x
        ),
    )(*args)

    return out[:B, :n_class]


# ----------------------------------------------------------------------------------
# Parameter construction (deterministic, synthetic)
# ----------------------------------------------------------------------------------
def init_params(key, hp, vocab, max_len):
    keys = iter(jax.random.split(key, 64))

    def lin(din, dout):
        s = 1.0 / math.sqrt(din)
        w = jax.random.uniform(next(keys), (din, dout), jnp.float32, -s, s)
        b = jax.random.uniform(next(keys), (1, dout), jnp.float32, -s, s)
        return w, b

    D = hp.d_tin
    F = 4 * D
    text = dict(
        word_emb=0.02 * jax.random.normal(next(keys), (vocab, D), jnp.float32),
        type_emb=0.02 * jax.random.normal(next(keys), (2, D), jnp.float32),
        pos_emb=0.02 * jax.random.normal(next(keys), (max_len, D), jnp.float32),
        ge=jnp.ones((1, D), jnp.float32), be=jnp.zeros((1, D), jnp.float32),
        g1=jnp.ones((1, D), jnp.float32), b1=jnp.zeros((1, D), jnp.float32),
        g2=jnp.ones((1, D), jnp.float32), b2=jnp.zeros((1, D), jnp.float32),
    )
    text["wq"], text["bq"] = lin(D, D)
    text["wk"], text["bk"] = lin(D, D)
    text["wv"], text["bv"] = lin(D, D)
    text["wo"], text["bo"] = lin(D, D)
    text["wf1"], text["bf1"] = lin(D, F)
    text["wf2"], text["bf2"] = lin(F, D)

    def lstm(din, h, dout):
        s = 1.0 / math.sqrt(h)
        p = dict(
            wih=jax.random.uniform(next(keys), (din, 4 * h), jnp.float32, -s, s),
            whh=jax.random.uniform(next(keys), (h, 4 * h), jnp.float32, -s, s),
            b=jax.random.uniform(next(keys), (1, 4 * h), jnp.float32, -s, s),  # b_ih + b_hh merged
        )
        p["wo"], p["bo"] = lin(h, dout)
        return p

    def subnet(din):
        w1, b1 = lin(din, hp.d_prjh)
        w2, b2 = lin(hp.d_prjh, hp.d_prjh)
        w3, b3 = lin(hp.d_prjh, hp.n_class)
        return (w1, b1, w2, b2, w3, b3)

    return dict(
        text=text,
        visual=lstm(hp.d_vin, hp.d_vh, hp.d_vout),
        acoustic=lstm(hp.d_ain, hp.d_ah, hp.d_aout),
        clf=dict(text=subnet(hp.d_tout), visual=subnet(hp.d_vout), acoustic=subnet(hp.d_aout)),
    )


if __name__ == "__main__":
    class HP:
        pass

    hp = HP()
    hp.d_tin = 32; hp.d_tout = 32
    hp.d_vin = 16; hp.d_vh = 16; hp.d_vout = 16
    hp.d_ain = 12; hp.d_ah = 16; hp.d_aout = 16
    hp.d_prjh = 32; hp.n_class = 1
    hp.n_layer = 1; hp.bidirectional = False
    hp.dropout_v = hp.dropout_a = hp.dropout_prj = 0.0

    B, seq_len = 2, 8
    L_bert = seq_len + 2      # "For Bert input, the length of text is seq_len + 2"
    vocab = 50

    key = jax.random.PRNGKey(0)
    kp, k1, k2, k3 = jax.random.split(key, 4)
    params = init_params(kp, hp, vocab, L_bert)

    bert_sent = jax.random.randint(k1, (B, L_bert), 0, vocab, dtype=jnp.int32)
    bert_sent_type = jnp.zeros((B, L_bert), jnp.int32)
    bert_lens = jnp.array([L_bert, L_bert - 3], jnp.int32)
    bert_sent_mask = (jnp.arange(L_bert)[None, :] < bert_lens[:, None]).astype(jnp.float32)
    sentences = jnp.zeros((B, seq_len), jnp.int32)   # unused (BERT path)
    visual = jax.random.normal(k2, (B, seq_len, hp.d_vin), jnp.float32)
    acoustic = jax.random.normal(k3, (B, seq_len, hp.d_ain), jnp.float32)
    v_len = jnp.array([seq_len, seq_len - 2], jnp.int32)
    a_len = jnp.array([seq_len, seq_len - 3], jnp.int32)

    preds = msa_lf_forward(params, sentences, visual, acoustic, v_len, a_len,
                           bert_sent, bert_sent_type, bert_sent_mask)
    preds = jax.block_until_ready(preds)
    assert preds.shape == (B, hp.n_class), preds.shape
    assert bool(jnp.all(jnp.isfinite(preds)))
    print("KERNEL_OK")
</pallas_src>

<mosaic_0001>
module attributes {stable_mosaic.version = 11 : i64} {
  func.func @msa_lf_kernel(%arg0: i32, %arg1: memref<2x16x32xf32, #tpu.memory_space<vmem>>, %arg2: memref<2x1x16xf32, #tpu.memory_space<vmem>>, %arg3: memref<2x1xi32, #tpu.memory_space<vmem>>, %arg4: memref<2x1xi32, #tpu.memory_space<vmem>>, %arg5: memref<1x32xf32, #tpu.memory_space<vmem>>, %arg6: memref<1x32xf32, #tpu.memory_space<vmem>>, %arg7: memref<32x32xf32, #tpu.memory_space<vmem>>, %arg8: memref<1x32xf32, #tpu.memory_space<vmem>>, %arg9: memref<32x32xf32, #tpu.memory_space<vmem>>, %arg10: memref<1x32xf32, #tpu.memory_space<vmem>>, %arg11: memref<32x32xf32, #tpu.memory_space<vmem>>, %arg12: memref<1x32xf32, #tpu.memory_space<vmem>>, %arg13: memref<32x32xf32, #tpu.memory_space<vmem>>, %arg14: memref<1x32xf32, #tpu.memory_space<vmem>>, %arg15: memref<1x32xf32, #tpu.memory_space<vmem>>, %arg16: memref<1x32xf32, #tpu.memory_space<vmem>>, %arg17: memref<32x128xf32, #tpu.memory_space<vmem>>, %arg18: memref<1x128xf32, #tpu.memory_space<vmem>>, %arg19: memref<128x32xf32, #tpu.memory_space<vmem>>, %arg20: memref<1x32xf32, #tpu.memory_space<vmem>>, %arg21: memref<1x32xf32, #tpu.memory_space<vmem>>, %arg22: memref<1x32xf32, #tpu.memory_space<vmem>>, %arg23: memref<2x8x16xf32, #tpu.memory_space<vmem>>, %arg24: memref<16x64xf32, #tpu.memory_space<vmem>>, %arg25: memref<16x64xf32, #tpu.memory_space<vmem>>, %arg26: memref<1x64xf32, #tpu.memory_space<vmem>>, %arg27: memref<16x16xf32, #tpu.memory_space<vmem>>, %arg28: memref<1x16xf32, #tpu.memory_space<vmem>>, %arg29: memref<2x8x12xf32, #tpu.memory_space<vmem>>, %arg30: memref<12x64xf32, #tpu.memory_space<vmem>>, %arg31: memref<16x64xf32, #tpu.memory_space<vmem>>, %arg32: memref<1x64xf32, #tpu.memory_space<vmem>>, %arg33: memref<16x16xf32, #tpu.memory_space<vmem>>, %arg34: memref<1x16xf32, #tpu.memory_space<vmem>>, %arg35: memref<32x32xf32, #tpu.memory_space<vmem>>, %arg36: memref<1x32xf32, #tpu.memory_space<vmem>>, %arg37: memref<32x32xf32, #tpu.memory_space<vmem>>, %arg38: memref<1x32xf32, #tpu.memory_space<vmem>>, %arg39: memref<32x128xf32, #tpu.memory_space<vmem>>, %arg40: memref<1x128xf32, #tpu.memory_space<vmem>>, %arg41: memref<16x32xf32, #tpu.memory_space<vmem>>, %arg42: memref<1x32xf32, #tpu.memory_space<vmem>>, %arg43: memref<32x32xf32, #tpu.memory_space<vmem>>, %arg44: memref<1x32xf32, #tpu.memory_space<vmem>>, %arg45: memref<32x128xf32, #tpu.memory_space<vmem>>, %arg46: memref<1x128xf32, #tpu.memory_space<vmem>>, %arg47: memref<16x32xf32, #tpu.memory_space<vmem>>, %arg48: memref<1x32xf32, #tpu.memory_space<vmem>>, %arg49: memref<32x32xf32, #tpu.memory_space<vmem>>, %arg50: memref<1x32xf32, #tpu.memory_space<vmem>>, %arg51: memref<32x128xf32, #tpu.memory_space<vmem>>, %arg52: memref<1x128xf32, #tpu.memory_space<vmem>>, %arg53: memref<2x128xf32, #tpu.memory_space<vmem>>) attributes {dimension_semantics = [#tpu.dimension_semantics<parallel>], iteration_bounds = array<i64: 1>, scalar_prefetch = 0 : i64, scratch_operands = 0 : i64, tpu.core_type = #tpu.core_type<tc>, window_params = [{transform_indices = @transform_0, window_bounds = array<i64: 2, 16, 32>}, {transform_indices = @transform_1, window_bounds = array<i64: 2, 1, 16>}, {transform_indices = @transform_2, window_bounds = array<i64: 2, 1>}, {transform_indices = @transform_3, window_bounds = array<i64: 2, 1>}, {pipeline_mode = #tpu.pipeline_mode<synchronous>, transform_indices = @transform_4, window_bounds = array<i64: 1, 32>}, {pipeline_mode = #tpu.pipeline_mode<synchronous>, transform_indices = @transform_5, window_bounds = array<i64: 1, 32>}, {pipeline_mode = #tpu.pipeline_mode<synchronous>, transform_indices = @transform_6, window_bounds = array<i64: 32, 32>}, {pipeline_mode = #tpu.pipeline_mode<synchronous>, transform_indices = @transform_7, window_bounds = array<i64: 1, 32>}, {pipeline_mode = #tpu.pipeline_mode<synchronous>, transform_indices = @transform_8, window_bounds = array<i64: 32, 32>}, {pipeline_mode = #tpu.pipeline_mode<synchronous>, transform_indices = @transform_9, window_bounds = array<i64: 1, 32>}, {pipeline_mode = #tpu.pipeline_mode<synchronous>, transform_indices = @transform_10, window_bounds = array<i64: 32, 32>}, {pipeline_mode = #tpu.pipeline_mode<synchronous>, transform_indices = @transform_11, window_bounds = array<i64: 1, 32>}, {pipeline_mode = #tpu.pipeline_mode<synchronous>, transform_indices = @transform_12, window_bounds = array<i64: 32, 32>}, {pipeline_mode = #tpu.pipeline_mode<synchronous>, transform_indices = @transform_13, window_bounds = array<i64: 1, 32>}, {pipeline_mode = #tpu.pipeline_mode<synchronous>, transform_indices = @transform_14, window_bounds = array<i64: 1, 32>}, {pipeline_mode = #tpu.pipeline_mode<synchronous>, transform_indices = @transform_15, window_bounds = array<i64: 1, 32>}, {pipeline_mode = #tpu.pipeline_mode<synchronous>, transform_indices = @transform_16, window_bounds = array<i64: 32, 128>}, {pipeline_mode = #tpu.pipeline_mode<synchronous>, transform_indices = @transform_17, window_bounds = array<i64: 1, 128>}, {pipeline_mode = #tpu.pipeline_mode<synchronous>, transform_indices = @transform_18, window_bounds = array<i64: 128, 32>}, {pipeline_mode = #tpu.pipeline_mode<synchronous>, transform_indices = @transform_19, window_bounds = array<i64: 1, 32>}, {pipeline_mode = #tpu.pipeline_mode<synchronous>, transform_indices = @transform_20, window_bounds = array<i64: 1, 32>}, {pipeline_mode = #tpu.pipeline_mode<synchronous>, transform_indices = @transform_21, window_bounds = array<i64: 1, 32>}, {transform_indices = @transform_22, window_bounds = array<i64: 2, 8, 16>}, {pipeline_mode = #tpu.pipeline_mode<synchronous>, transform_indices = @transform_23, window_bounds = array<i64: 16, 64>}, {pipeline_mode = #tpu.pipeline_mode<synchronous>, transform_indices = @transform_24, window_bounds = array<i64: 16, 64>}, {pipeline_mode = #tpu.pipeline_mode<synchronous>, transform_indices = @transform_25, window_bounds = array<i64: 1, 64>}, {pipeline_mode = #tpu.pipeline_mode<synchronous>, transform_indices = @transform_26, window_bounds = array<i64: 16, 16>}, {pipeline_mode = #tpu.pipeline_mode<synchronous>, transform_indices = @transform_27, window_bounds = array<i64: 1, 16>}, {transform_indices = @transform_28, window_bounds = array<i64: 2, 8, 12>}, {pipeline_mode = #tpu.pipeline_mode<synchronous>, transform_indices = @transform_29, window_bounds = array<i64: 12, 64>}, {pipeline_mode = #tpu.pipeline_mode<synchronous>, transform_indices = @transform_30, window_bounds = array<i64: 16, 64>}, {pipeline_mode = #tpu.pipeline_mode<synchronous>, transform_indices = @transform_31, window_bounds = array<i64: 1, 64>}, {pipeline_mode = #tpu.pipeline_mode<synchronous>, transform_indices = @transform_32, window_bounds = array<i64: 16, 16>}, {pipeline_mode = #tpu.pipeline_mode<synchronous>, transform_indices = @transform_33, window_bounds = array<i64: 1, 16>}, {pipeline_mode = #tpu.pipeline_mode<synchronous>, transform_indices = @transform_34, window_bounds = array<i64: 32, 32>}, {pipeline_mode = #tpu.pipeline_mode<synchronous>, transform_indices = @transform_35, window_bounds = array<i64: 1, 32>}, {pipeline_mode = #tpu.pipeline_mode<synchronous>, transform_indices = @transform_36, window_bounds = array<i64: 32, 32>}, {pipeline_mode = #tpu.pipeline_mode<synchronous>, transform_indices = @transform_37, window_bounds = array<i64: 1, 32>}, {pipeline_mode = #tpu.pipeline_mode<synchronous>, transform_indices = @transform_38, window_bounds = array<i64: 32, 128>}, {pipeline_mode = #tpu.pipeline_mode<synchronous>, transform_indices = @transform_39, window_bounds = array<i64: 1, 128>}, {pipeline_mode = #tpu.pipeline_mode<synchronous>, transform_indices = @transform_40, window_bounds = array<i64: 16, 32>}, {pipeline_mode = #tpu.pipeline_mode<synchronous>, transform_indices = @transform_41, window_bounds = array<i64: 1, 32>}, {pipeline_mode = #tpu.pipeline_mode<synchronous>, transform_indices = @transform_42, window_bounds = array<i64: 32, 32>}, {pipeline_mode = #tpu.pipeline_mode<synchronous>, transform_indices = @transform_43, window_bounds = array<i64: 1, 32>}, {pipeline_mode = #tpu.pipeline_mode<synchronous>, transform_indices = @transform_44, window_bounds = array<i64: 32, 128>}, {pipeline_mode = #tpu.pipeline_mode<synchronous>, transform_indices = @transform_45, window_bounds = array<i64: 1, 128>}, {pipeline_mode = #tpu.pipeline_mode<synchronous>, transform_indices = @transform_46, window_bounds = array<i64: 16, 32>}, {pipeline_mode = #tpu.pipeline_mode<synchronous>, transform_indices = @transform_47, window_bounds = array<i64: 1, 32>}, {pipeline_mode = #tpu.pipeline_mode<synchronous>, transform_indices = @transform_48, window_bounds = array<i64: 32, 32>}, {pipeline_mode = #tpu.pipeline_mode<synchronous>, transform_indices = @transform_49, window_bounds = array<i64: 1, 32>}, {pipeline_mode = #tpu.pipeline_mode<synchronous>, transform_indices = @transform_50, window_bounds = array<i64: 32, 128>}, {pipeline_mode = #tpu.pipeline_mode<synchronous>, transform_indices = @transform_51, window_bounds = array<i64: 1, 128>}, {transform_indices = @transform_52, window_bounds = array<i64: 2, 128>}]} {
    %c0 = arith.constant 0 : index
    %c0_0 = arith.constant 0 : index
    %c0_1 = arith.constant 0 : index
    %0 = vector.load %arg1[%c0, %c0_0, %c0_1] : memref<2x16x32xf32, #tpu.memory_space<vmem>>, vector<2x16x32xf32>
    %1 = vector.shape_cast %0 : vector<2x16x32xf32> to vector<32x32xf32>
    %c0_2 = arith.constant 0 : index
    %c0_3 = arith.constant 0 : index
    %c0_4 = arith.constant 0 : index
    %2 = vector.load %arg2[%c0_2, %c0_3, %c0_4] : memref<2x1x16xf32, #tpu.memory_space<vmem>>, vector<2x1x16xf32>
    %cst = arith.constant dense<0.000000e+00> : vector<32xf32>
    %3 = vector.multi_reduction <add>, %1, %cst [1] : vector<32x32xf32> to vector<32xf32>
    %4 = vector.shape_cast %3 : vector<32xf32> to vector<32x1xf32>
    %cst_5 = arith.constant 3.200000e+01 : f32
    %5 = vector.broadcast %cst_5 : f32 to vector<32x1xf32>
    %6 = arith.divf %4, %5 : vector<32x1xf32>
    %7 = vector.broadcast %6 : vector<32x1xf32> to vector<32x32xf32>
    %8 = arith.subf %1, %7 : vector<32x32xf32>
    %9 = arith.mulf %8, %8 : vector<32x32xf32>
    %cst_6 = arith.constant dense<0.000000e+00> : vector<32xf32>
    %10 = vector.multi_reduction <add>, %9, %cst_6 [1] : vector<32x32xf32> to vector<32xf32>
    %11 = vector.shape_cast %10 : vector<32xf32> to vector<32x1xf32>
    %cst_7 = arith.constant 3.200000e+01 : f32
    %12 = vector.broadcast %cst_7 : f32 to vector<32x1xf32>
    %13 = arith.divf %11, %12 : vector<32x1xf32>
    %14 = vector.broadcast %6 : vector<32x1xf32> to vector<32x32xf32>
    %15 = arith.subf %1, %14 : vector<32x32xf32>
    %cst_8 = arith.constant 9.99999996E-13 : f32
    %16 = vector.broadcast %cst_8 : f32 to vector<32x1xf32>
    %17 = arith.addf %13, %16 : vector<32x1xf32>
    %18 = math.rsqrt %17 : vector<32x1xf32>
    %19 = vector.broadcast %18 : vector<32x1xf32> to vector<32x32xf32>
    %20 = arith.mulf %15, %19 : vector<32x32xf32>
    %c0_9 = arith.constant 0 : index
    %c0_10 = arith.constant 0 : index
    %21 = vector.load %arg5[%c0_9, %c0_10] : memref<1x32xf32, #tpu.memory_space<vmem>>, vector<1x32xf32>
    %22 = vector.broadcast %21 : vector<1x32xf32> to vector<32x32xf32>
    %23 = arith.mulf %20, %22 : vector<32x32xf32>
    %c0_11 = arith.constant 0 : index
    %c0_12 = arith.constant 0 : index
    %24 = vector.load %arg6[%c0_11, %c0_12] : memref<1x32xf32, #tpu.memory_space<vmem>>, vector<1x32xf32>
    %25 = vector.broadcast %24 : vector<1x32xf32> to vector<32x32xf32>
    %26 = arith.addf %23, %25 : vector<32x32xf32>
    %c0_13 = arith.constant 0 : index
    %c0_14 = arith.constant 0 : index
    %27 = vector.load %arg7[%c0_13, %c0_14] : memref<32x32xf32, #tpu.memory_space<vmem>>, vector<32x32xf32>
    %cst_15 = arith.constant dense<0.000000e+00> : vector<32x32xf32>
    %28 = tpu.matmul %26, %27, %cst_15 {dimension_numbers = #tpu.dot_dimension_numbers<[1], [0], [0], [1], [0, 0, 1, 1], [], []>} : vector<32x32xf32>, vector<32x32xf32>, vector<32x32xf32> -> vector<32x32xf32>
    %c0_16 = arith.constant 0 : index
    %c0_17 = arith.constant 0 : index
    %29 = vector.load %arg8[%c0_16, %c0_17] : memref<1x32xf32, #tpu.memory_space<vmem>>, vector<1x32xf32>
    %30 = vector.broadcast %29 : vector<1x32xf32> to vector<32x32xf32>
    %31 = arith.addf %28, %30 : vector<32x32xf32>
    %c0_18 = arith.constant 0 : index
    %c0_19 = arith.constant 0 : index
    %32 = vector.load %arg9[%c0_18, %c0_19] : memref<32x32xf32, #tpu.memory_space<vmem>>, vector<32x32xf32>
    %cst_20 = arith.constant dense<0.000000e+00> : vector<32x32xf32>
    %33 = tpu.matmul %26, %32, %cst_20 {dimension_numbers = #tpu.dot_dimension_numbers<[1], [0], [0], [1], [0, 0, 1, 1], [], []>} : vector<32x32xf32>, vector<32x32xf32>, vector<32x32xf32> -> vector<32x32xf32>
    %c0_21 = arith.constant 0 : index
    %c0_22 = arith.constant 0 : index
    %34 = vector.load %arg10[%c0_21, %c0_22] : memref<1x32xf32, #tpu.memory_space<vmem>>, vector<1x32xf32>
    %35 = vector.broadcast %34 : vector<1x32xf32> to vector<32x32xf32>
    %36 = arith.addf %33, %35 : vector<32x32xf32>
    %c0_23 = arith.constant 0 : index
    %c0_24 = arith.constant 0 : index
    %37 = vector.load %arg11[%c0_23, %c0_24] : memref<32x32xf32, #tpu.memory_space<vmem>>, vector<32x32xf32>
    %cst_25 = arith.constant dense<0.000000e+00> : vector<32x32xf32>
    %38 = tpu.matmul %26, %37, %cst_25 {dimension_numbers = #tpu.dot_dimension_numbers<[1], [0], [0], [1], [0, 0, 1, 1], [], []>} : vector<32x32xf32>, vector<32x32xf32>, vector<32x32xf32> -> vector<32x32xf32>
    %c0_26 = arith.constant 0 : index
    %c0_27 = arith.constant 0 : index
    %39 = vector.load %arg12[%c0_26, %c0_27] : memref<1x32xf32, #tpu.memory_space<vmem>>, vector<1x32xf32>
    %40 = vector.broadcast %39 : vector<1x32xf32> to vector<32x32xf32>
    %41 = arith.addf %38, %40 : vector<32x32xf32>
    %42 = vector.shape_cast %31 : vector<32x32xf32> to vector<2x16x32xf32>
    %43 = vector.shape_cast %36 : vector<32x32xf32> to vector<2x16x32xf32>
    %44 = vector.shape_cast %41 : vector<32x32xf32> to vector<2x16x32xf32>
    "tpu.trace_start"() <{level = 10 : i32, message = "bqd,bkd->bqk"}> : () -> ()
    %cst_28 = arith.constant dense<0.000000e+00> : vector<2x16x16xf32>
    %45 = tpu.matmul %42, %43, %cst_28 {dimension_numbers = #tpu.dot_dimension_numbers<[2], [2], [1], [1], [0, 0, 0, 1, 1, 1], [0], [0]>} : vector<2x16x32xf32>, vector<2x16x32xf32>, vector<2x16x16xf32> -> vector<2x16x16xf32>
    "tpu.trace_stop"() : () -> ()
    %cst_29 = arith.constant 0.176776692 : f32
    %46 = vector.broadcast %cst_29 : f32 to vector<2x16x16xf32>
    %47 = arith.mulf %45, %46 : vector<2x16x16xf32>
    %cst_30 = arith.constant 1.000000e+00 : f32
    %48 = vector.broadcast %cst_30 : f32 to vector<2x1x16xf32>
    %49 = arith.subf %48, %2 : vector<2x1x16xf32>
    %cst_31 = arith.constant -1.000000e+09 : f32
    %50 = vector.broadcast %cst_31 : f32 to vector<2x1x16xf32>
    %51 = arith.mulf %49, %50 : vector<2x1x16xf32>
    %52 = vector.broadcast %51 : vector<2x1x16xf32> to vector<2x16x16xf32>
    %53 = arith.addf %47, %52 : vector<2x16x16xf32>
    %cst_32 = arith.constant dense<0xFF800000> : vector<2x16xf32>
    %54 = vector.multi_reduction <maximumf>, %53, %cst_32 [2] : vector<2x16x16xf32> to vector<2x16xf32>
    %55 = vector.shape_cast %54 : vector<2x16xf32> to vector<2x16x1xf32>
    %56 = vector.broadcast %55 : vector<2x16x1xf32> to vector<2x16x16xf32>
    %57 = arith.subf %53, %56 : vector<2x16x16xf32>
    %58 = math.exp %57 : vector<2x16x16xf32>
    %cst_33 = arith.constant dense<0.000000e+00> : vector<2x16xf32>
    %59 = vector.multi_reduction <add>, %58, %cst_33 [2] : vector<2x16x16xf32> to vector<2x16xf32>
    %60 = vector.shape_cast %59 : vector<2x16xf32> to vector<2x16x1xf32>
    %61 = tpu.reciprocal %60 {approx = true} : vector<2x16x1xf32> -> vector<2x16x1xf32>
    %62 = vector.broadcast %61 : vector<2x16x1xf32> to vector<2x16x16xf32>
    %63 = arith.mulf %58, %62 : vector<2x16x16xf32>
    "tpu.trace_start"() <{level = 10 : i32, message = "bqk,bkd->bqd"}> : () -> ()
    %cst_34 = arith.constant dense<0.000000e+00> : vector<2x16x32xf32>
    %64 = tpu.matmul %63, %44, %cst_34 {dimension_numbers = #tpu.dot_dimension_numbers<[2], [1], [1], [2], [0, 0, 0, 1, 1, 2], [0], [0]>} : vector<2x16x16xf32>, vector<2x16x32xf32>, vector<2x16x32xf32> -> vector<2x16x32xf32>
    "tpu.trace_stop"() : () -> ()
    %65 = vector.shape_cast %64 : vector<2x16x32xf32> to vector<32x32xf32>
    %c0_35 = arith.constant 0 : index
    %c0_36 = arith.constant 0 : index
    %66 = vector.load %arg13[%c0_35, %c0_36] : memref<32x32xf32, #tpu.memory_space<vmem>>, vector<32x32xf32>
    %cst_37 = arith.constant dense<0.000000e+00> : vector<32x32xf32>
    %67 = tpu.matmul %65, %66, %cst_37 {dimension_numbers = #tpu.dot_dimension_numbers<[1], [0], [0], [1], [0, 0, 1, 1], [], []>} : vector<32x32xf32>, vector<32x32xf32>, vector<32x32xf32> -> vector<32x32xf32>
    %c0_38 = arith.constant 0 : index
    %c0_39 = arith.constant 0 : index
    %68 = vector.load %arg14[%c0_38, %c0_39] : memref<1x32xf32, #tpu.memory_space<vmem>>, vector<1x32xf32>
    %69 = vector.broadcast %68 : vector<1x32xf32> to vector<32x32xf32>
    %70 = arith.addf %67, %69 : vector<32x32xf32>
    %71 = arith.addf %1, %70 : vector<32x32xf32>
    %cst_40 = arith.constant dense<0.000000e+00> : vector<32xf32>
    %72 = vector.multi_reduction <add>, %71, %cst_40 [1] : vector<32x32xf32> to vector<32xf32>
    %73 = vector.shape_cast %72 : vector<32xf32> to vector<32x1xf32>
    %cst_41 = arith.constant 3.200000e+01 : f32
    %74 = vector.broadcast %cst_41 : f32 to vector<32x1xf32>
    %75 = arith.divf %73, %74 : vector<32x1xf32>
    %76 = vector.broadcast %75 : vector<32x1xf32> to vector<32x32xf32>
    %77 = arith.subf %71, %76 : vector<32x32xf32>
    %78 = arith.mulf %77, %77 : vector<32x32xf32>
    %cst_42 = arith.constant dense<0.000000e+00> : vector<32xf32>
    %79 = vector.multi_reduction <add>, %78, %cst_42 [1] : vector<32x32xf32> to vector<32xf32>
    %80 = vector.shape_cast %79 : vector<32xf32> to vector<32x1xf32>
    %cst_43 = arith.constant 3.200000e+01 : f32
    %81 = vector.broadcast %cst_43 : f32 to vector<32x1xf32>
    %82 = arith.divf %80, %81 : vector<32x1xf32>
    %83 = vector.broadcast %75 : vector<32x1xf32> to vector<32x32xf32>
    %84 = arith.subf %71, %83 : vector<32x32xf32>
    %cst_44 = arith.constant 9.99999996E-13 : f32
    %85 = vector.broadcast %cst_44 : f32 to vector<32x1xf32>
    %86 = arith.addf %82, %85 : vector<32x1xf32>
    %87 = math.rsqrt %86 : vector<32x1xf32>
    %88 = vector.broadcast %87 : vector<32x1xf32> to vector<32x32xf32>
    %89 = arith.mulf %84, %88 : vector<32x32xf32>
    %c0_45 = arith.constant 0 : index
    %c0_46 = arith.constant 0 : index
    %90 = vector.load %arg15[%c0_45, %c0_46] : memref<1x32xf32, #tpu.memory_space<vmem>>, vector<1x32xf32>
    %91 = vector.broadcast %90 : vector<1x32xf32> to vector<32x32xf32>
    %92 = arith.mulf %89, %91 : vector<32x32xf32>
    %c0_47 = arith.constant 0 : index
    %c0_48 = arith.constant 0 : index
    %93 = vector.load %arg16[%c0_47, %c0_48] : memref<1x32xf32, #tpu.memory_space<vmem>>, vector<1x32xf32>
    %94 = vector.broadcast %93 : vector<1x32xf32> to vector<32x32xf32>
    %95 = arith.addf %92, %94 : vector<32x32xf32>
    %c0_49 = arith.constant 0 : index
    %c0_50 = arith.constant 0 : index
    %96 = vector.load %arg17[%c0_49, %c0_50] : memref<32x128xf32, #tpu.memory_space<vmem>>, vector<32x128xf32>
    %cst_51 = arith.constant dense<0.000000e+00> : vector<32x128xf32>
    %97 = tpu.matmul %95, %96, %cst_51 {dimension_numbers = #tpu.dot_dimension_numbers<[1], [0], [0], [1], [0, 0, 1, 1], [], []>} : vector<32x32xf32>, vector<32x128xf32>, vector<32x128xf32> -> vector<32x128xf32>
    %c0_52 = arith.constant 0 : index
    %c0_53 = arith.constant 0 : index
    %98 = vector.load %arg18[%c0_52, %c0_53] : memref<1x128xf32, #tpu.memory_space<vmem>>, vector<1x128xf32>
    %99 = vector.broadcast %98 : vector<1x128xf32> to vector<32x128xf32>
    %100 = arith.addf %97, %99 : vector<32x128xf32>
    %cst_54 = arith.constant 5.000000e-01 : f32
    %101 = vector.broadcast %cst_54 : f32 to vector<32x128xf32>
    %102 = arith.mulf %101, %100 : vector<32x128xf32>
    %cst_55 = arith.constant 4.471500e-02 : f32
    %103 = vector.broadcast %cst_55 : f32 to vector<32x128xf32>
    %104 = arith.mulf %103, %100 : vector<32x128xf32>
    %105 = arith.mulf %104, %100 : vector<32x128xf32>
    %106 = arith.mulf %105, %100 : vector<32x128xf32>
    %107 = arith.addf %100, %106 : vector<32x128xf32>
    %cst_56 = arith.constant 0.797884583 : f32
    %108 = vector.broadcast %cst_56 : f32 to vector<32x128xf32>
    %109 = arith.mulf %108, %107 : vector<32x128xf32>
    %110 = math.tanh %109 : vector<32x128xf32>
    %cst_57 = arith.constant 1.000000e+00 : f32
    %111 = vector.broadcast %cst_57 : f32 to vector<32x128xf32>
    %112 = arith.addf %111, %110 : vector<32x128xf32>
    %113 = arith.mulf %102, %112 : vector<32x128xf32>
    %c0_58 = arith.constant 0 : index
    %c0_59 = arith.constant 0 : index
    %114 = vector.load %arg19[%c0_58, %c0_59] : memref<128x32xf32, #tpu.memory_space<vmem>>, vector<128x32xf32>
    %cst_60 = arith.constant dense<0.000000e+00> : vector<32x32xf32>
    %115 = tpu.matmul %113, %114, %cst_60 {dimension_numbers = #tpu.dot_dimension_numbers<[1], [0], [0], [1], [0, 0, 1, 1], [], []>} : vector<32x128xf32>, vector<128x32xf32>, vector<32x32xf32> -> vector<32x32xf32>
    %c0_61 = arith.constant 0 : index
    %c0_62 = arith.constant 0 : index
    %116 = vector.load %arg20[%c0_61, %c0_62] : memref<1x32xf32, #tpu.memory_space<vmem>>, vector<1x32xf32>
    %117 = vector.broadcast %116 : vector<1x32xf32> to vector<32x32xf32>
    %118 = arith.addf %115, %117 : vector<32x32xf32>
    %119 = arith.addf %95, %118 : vector<32x32xf32>
    %cst_63 = arith.constant dense<0.000000e+00> : vector<32xf32>
    %120 = vector.multi_reduction <add>, %119, %cst_63 [1] : vector<32x32xf32> to vector<32xf32>
    %121 = vector.shape_cast %120 : vector<32xf32> to vector<32x1xf32>
    %cst_64 = arith.constant 3.200000e+01 : f32
    %122 = vector.broadcast %cst_64 : f32 to vector<32x1xf32>
    %123 = arith.divf %121, %122 : vector<32x1xf32>
    %124 = vector.broadcast %123 : vector<32x1xf32> to vector<32x32xf32>
    %125 = arith.subf %119, %124 : vector<32x32xf32>
    %126 = arith.mulf %125, %125 : vector<32x32xf32>
    %cst_65 = arith.constant dense<0.000000e+00> : vector<32xf32>
    %127 = vector.multi_reduction <add>, %126, %cst_65 [1] : vector<32x32xf32> to vector<32xf32>
    %128 = vector.shape_cast %127 : vector<32xf32> to vector<32x1xf32>
    %cst_66 = arith.constant 3.200000e+01 : f32
    %129 = vector.broadcast %cst_66 : f32 to vector<32x1xf32>
    %130 = arith.divf %128, %129 : vector<32x1xf32>
    %131 = vector.broadcast %123 : vector<32x1xf32> to vector<32x32xf32>
    %132 = arith.subf %119, %131 : vector<32x32xf32>
    %cst_67 = arith.constant 9.99999996E-13 : f32
    %133 = vector.broadcast %cst_67 : f32 to vector<32x1xf32>
    %134 = arith.addf %130, %133 : vector<32x1xf32>
    %135 = math.rsqrt %134 : vector<32x1xf32>
    %136 = vector.broadcast %135 : vector<32x1xf32> to vector<32x32xf32>
    %137 = arith.mulf %132, %136 : vector<32x32xf32>
    %c0_68 = arith.constant 0 : index
    %c0_69 = arith.constant 0 : index
    %138 = vector.load %arg21[%c0_68, %c0_69] : memref<1x32xf32, #tpu.memory_space<vmem>>, vector<1x32xf32>
    %139 = vector.broadcast %138 : vector<1x32xf32> to vector<32x32xf32>
    %140 = arith.mulf %137, %139 : vector<32x32xf32>
    %c0_70 = arith.constant 0 : index
    %c0_71 = arith.constant 0 : index
    %141 = vector.load %arg22[%c0_70, %c0_71] : memref<1x32xf32, #tpu.memory_space<vmem>>, vector<1x32xf32>
    %142 = vector.broadcast %141 : vector<1x32xf32> to vector<32x32xf32>
    %143 = arith.addf %140, %142 : vector<32x32xf32>
    %144 = vector.shape_cast %143 : vector<32x32xf32> to vector<2x16x32xf32>
    %145 = vector.extract_strided_slice %144 {offsets = [0, 0, 0], sizes = [2, 1, 32], strides = [1, 1, 1]} : vector<2x16x32xf32> to vector<2x1x32xf32>
    %146 = vector.shape_cast %145 : vector<2x1x32xf32> to vector<2x32xf32>
    %c0_72 = arith.constant 0 : index
    %c0_73 = arith.constant 0 : index
    %c0_74 = arith.constant 0 : index
    %147 = vector.load %arg23[%c0_72, %c0_73, %c0_74] : memref<2x8x16xf32, #tpu.memory_space<vmem>>, vector<2x8x16xf32>
    %148 = vector.shape_cast %147 : vector<2x8x16xf32> to vector<16x16xf32>
    %c0_75 = arith.constant 0 : index
    %c0_76 = arith.constant 0 : index
    %149 = vector.load %arg24[%c0_75, %c0_76] : memref<16x64xf32, #tpu.memory_space<vmem>>, vector<16x64xf32>
    %cst_77 = arith.constant dense<0.000000e+00> : vector<16x64xf32>
    %150 = tpu.matmul %148, %149, %cst_77 {dimension_numbers = #tpu.dot_dimension_numbers<[1], [0], [0], [1], [0, 0, 1, 1], [], []>} : vector<16x16xf32>, vector<16x64xf32>, vector<16x64xf32> -> vector<16x64xf32>
    %c0_78 = arith.constant 0 : index
    %c0_79 = arith.constant 0 : index
    %151 = vector.load %arg26[%c0_78, %c0_79] : memref<1x64xf32, #tpu.memory_space<vmem>>, vector<1x64xf32>
    %152 = vector.broadcast %151 : vector<1x64xf32> to vector<16x64xf32>
    %153 = arith.addf %150, %152 : vector<16x64xf32>
    %154 = vector.shape_cast %153 : vector<16x64xf32> to vector<2x8x64xf32>
    %c0_80 = arith.constant 0 : index
    %c0_81 = arith.constant 0 : index
    %c0_82 = arith.constant 0 : index
    %155 = vector.load %arg29[%c0_80, %c0_81, %c0_82] : memref<2x8x12xf32, #tpu.memory_space<vmem>>, vector<2x8x12xf32>
    %156 = vector.shape_cast %155 : vector<2x8x12xf32> to vector<16x12xf32>
    %c0_83 = arith.constant 0 : index
    %c0_84 = arith.constant 0 : index
    %157 = vector.load %arg30[%c0_83, %c0_84] : memref<12x64xf32, #tpu.memory_space<vmem>>, vector<12x64xf32>
    %cst_85 = arith.constant dense<0.000000e+00> : vector<16x64xf32>
    %158 = tpu.matmul %156, %157, %cst_85 {dimension_numbers = #tpu.dot_dimension_numbers<[1], [0], [0], [1], [0, 0, 1, 1], [], []>} : vector<16x12xf32>, vector<12x64xf32>, vector<16x64xf32> -> vector<16x64xf32>
    %c0_86 = arith.constant 0 : index
    %c0_87 = arith.constant 0 : index
    %159 = vector.load %arg32[%c0_86, %c0_87] : memref<1x64xf32, #tpu.memory_space<vmem>>, vector<1x64xf32>
    %160 = vector.broadcast %159 : vector<1x64xf32> to vector<16x64xf32>
    %161 = arith.addf %158, %160 : vector<16x64xf32>
    %162 = vector.shape_cast %161 : vector<16x64xf32> to vector<2x8x64xf32>
    %c0_88 = arith.constant 0 : index
    %c0_89 = arith.constant 0 : index
    %163 = vector.load %arg3[%c0_88, %c0_89] : memref<2x1xi32, #tpu.memory_space<vmem>>, vector<2x1xi32>
    %c0_90 = arith.constant 0 : index
    %c0_91 = arith.constant 0 : index
    %164 = vector.load %arg4[%c0_90, %c0_91] : memref<2x1xi32, #tpu.memory_space<vmem>>, vector<2x1xi32>
    %cst_92 = arith.constant 0.000000e+00 : f32
    %165 = vector.broadcast %cst_92 : f32 to vector<2x16xf32>
    %cst_93 = arith.constant 0.000000e+00 : f32
    %166 = vector.broadcast %cst_93 : f32 to vector<2x16xf32>
    %cst_94 = arith.constant 0.000000e+00 : f32
    %167 = vector.broadcast %cst_94 : f32 to vector<2x16xf32>
    %cst_95 = arith.constant 0.000000e+00 : f32
    %168 = vector.broadcast %cst_95 : f32 to vector<2x16xf32>
    %c0_i32 = arith.constant 0 : i32
    %169 = vector.broadcast %c0_i32 : i32 to vector<2x1xi32>
    %170 = arith.cmpi sgt, %163, %169 : vector<2x1xi32>
    %171 = arith.extui %170 : vector<2x1xi1> to vector<2x1xi32>
    %172 = arith.sitofp %171 : vector<2x1xi32> to vector<2x1xf32>
    %c0_i32_96 = arith.constant 0 : i32
    %173 = vector.broadcast %c0_i32_96 : i32 to vector<2x1xi32>
    %174 = arith.cmpi sgt, %164, %173 : vector<2x1xi32>
    %175 = arith.extui %174 : vector<2x1xi1> to vector<2x1xi32>
    %176 = arith.sitofp %175 : vector<2x1xi32> to vector<2x1xf32>
    %177 = vector.extract_strided_slice %154 {offsets = [0, 0, 0], sizes = [2, 1, 64], strides = [1, 1, 1]} : vector<2x8x64xf32> to vector<2x1x64xf32>
    %178 = vector.shape_cast %177 : vector<2x1x64xf32> to vector<2x64xf32>
    %c0_97 = arith.constant 0 : index
    %c0_98 = arith.constant 0 : index
    %179 = vector.load %arg25[%c0_97, %c0_98] : memref<16x64xf32, #tpu.memory_space<vmem>>, vector<16x64xf32>
    %cst_99 = arith.constant dense<0.000000e+00> : vector<2x64xf32>
    %180 = tpu.matmul %165, %179, %cst_99 {dimension_numbers = #tpu.dot_dimension_numbers<[1], [0], [0], [1], [0, 0, 1, 1], [], []>} : vector<2x16xf32>, vector<16x64xf32>, vector<2x64xf32> -> vector<2x64xf32>
    %181 = arith.addf %178, %180 : vector<2x64xf32>
    %182 = vector.extract_strided_slice %181 {offsets = [0, 0], sizes = [2, 16], strides = [1, 1]} : vector<2x64xf32> to vector<2x16xf32>
    %183 = arith.negf %182 : vector<2x16xf32>
    %184 = math.exp %183 : vector<2x16xf32>
    %cst_100 = arith.constant 1.000000e+00 : f32
    %185 = vector.broadcast %cst_100 : f32 to vector<2x16xf32>
    %186 = arith.addf %185, %184 : vector<2x16xf32>
    %187 = arith.divf %185, %186 : vector<2x16xf32>
    %188 = vector.extract_strided_slice %181 {offsets = [0, 16], sizes = [2, 16], strides = [1, 1]} : vector<2x64xf32> to vector<2x16xf32>
    %189 = arith.negf %188 : vector<2x16xf32>
    %190 = math.exp %189 : vector<2x16xf32>
    %cst_101 = arith.constant 1.000000e+00 : f32
    %191 = vector.broadcast %cst_101 : f32 to vector<2x16xf32>
    %192 = arith.addf %191, %190 : vector<2x16xf32>
    %193 = arith.divf %191, %192 : vector<2x16xf32>
    %194 = vector.extract_strided_slice %181 {offsets = [0, 32], sizes = [2, 16], strides = [1, 1]} : vector<2x64xf32> to vector<2x16xf32>
    %195 = math.tanh %194 : vector<2x16xf32>
    %196 = vector.extract_strided_slice %181 {offsets = [0, 48], sizes = [2, 16], strides = [1, 1]} : vector<2x64xf32> to vector<2x16xf32>
    %197 = arith.negf %196 : vector<2x16xf32>
    %198 = math.exp %197 : vector<2x16xf32>
    %cst_102 = arith.constant 1.000000e+00 : f32
    %199 = vector.broadcast %cst_102 : f32 to vector<2x16xf32>
    %200 = arith.addf %199, %198 : vector<2x16xf32>
    %201 = arith.divf %199, %200 : vector<2x16xf32>
    %202 = arith.mulf %193, %166 : vector<2x16xf32>
    %203 = arith.mulf %187, %195 : vector<2x16xf32>
    %204 = arith.addf %202, %203 : vector<2x16xf32>
    %205 = math.tanh %204 : vector<2x16xf32>
    %206 = arith.mulf %201, %205 : vector<2x16xf32>
    %207 = arith.subf %206, %165 : vector<2x16xf32>
    %208 = vector.broadcast %172 : vector<2x1xf32> to vector<2x16xf32>
    %209 = arith.mulf %208, %207 : vector<2x16xf32>
    %210 = arith.addf %165, %209 : vector<2x16xf32>
    %211 = arith.subf %204, %166 : vector<2x16xf32>
    %212 = vector.broadcast %172 : vector<2x1xf32> to vector<2x16xf32>
    %213 = arith.mulf %212, %211 : vector<2x16xf32>
    %214 = arith.addf %166, %213 : vector<2x16xf32>
    %215 = vector.extract_strided_slice %162 {offsets = [0, 0, 0], sizes = [2, 1, 64], strides = [1, 1, 1]} : vector<2x8x64xf32> to vector<2x1x64xf32>
    %216 = vector.shape_cast %215 : vector<2x1x64xf32> to vector<2x64xf32>
    %c0_103 = arith.constant 0 : index
    %c0_104 = arith.constant 0 : index
    %217 = vector.load %arg31[%c0_103, %c0_104] : memref<16x64xf32, #tpu.memory_space<vmem>>, vector<16x64xf32>
    %cst_105 = arith.constant dense<0.000000e+00> : vector<2x64xf32>
    %218 = tpu.matmul %167, %217, %cst_105 {dimension_numbers = #tpu.dot_dimension_numbers<[1], [0], [0], [1], [0, 0, 1, 1], [], []>} : vector<2x16xf32>, vector<16x64xf32>, vector<2x64xf32> -> vector<2x64xf32>
    %219 = arith.addf %216, %218 : vector<2x64xf32>
    %220 = vector.extract_strided_slice %219 {offsets = [0, 0], sizes = [2, 16], strides = [1, 1]} : vector<2x64xf32> to vector<2x16xf32>
    %221 = arith.negf %220 : vector<2x16xf32>
    %222 = math.exp %221 : vector<2x16xf32>
    %cst_106 = arith.constant 1.000000e+00 : f32
    %223 = vector.broadcast %cst_106 : f32 to vector<2x16xf32>
    %224 = arith.addf %223, %222 : vector<2x16xf32>
    %225 = arith.divf %223, %224 : vector<2x16xf32>
    %226 = vector.extract_strided_slice %219 {offsets = [0, 16], sizes = [2, 16], strides = [1, 1]} : vector<2x64xf32> to vector<2x16xf32>
    %227 = arith.negf %226 : vector<2x16xf32>
    %228 = math.exp %227 : vector<2x16xf32>
    %cst_107 = arith.constant 1.000000e+00 : f32
    %229 = vector.broadcast %cst_107 : f32 to vector<2x16xf32>
    %230 = arith.addf %229, %228 : vector<2x16xf32>
    %231 = arith.divf %229, %230 : vector<2x16xf32>
    %232 = vector.extract_strided_slice %219 {offsets = [0, 32], sizes = [2, 16], strides = [1, 1]} : vector<2x64xf32> to vector<2x16xf32>
    %233 = math.tanh %232 : vector<2x16xf32>
    %234 = vector.extract_strided_slice %219 {offsets = [0, 48], sizes = [2, 16], strides = [1, 1]} : vector<2x64xf32> to vector<2x16xf32>
    %235 = arith.negf %234 : vector<2x16xf32>
    %236 = math.exp %235 : vector<2x16xf32>
    %cst_108 = arith.constant 1.000000e+00 : f32
    %237 = vector.broadcast %cst_108 : f32 to vector<2x16xf32>
    %238 = arith.addf %237, %236 : vector<2x16xf32>
    %239 = arith.divf %237, %238 : vector<2x16xf32>
    %240 = arith.mulf %231, %168 : vector<2x16xf32>
    %241 = arith.mulf %225, %233 : vector<2x16xf32>
    %242 = arith.addf %240, %241 : vector<2x16xf32>
    %243 = math.tanh %242 : vector<2x16xf32>
    %244 = arith.mulf %239, %243 : vector<2x16xf32>
    %245 = arith.subf %244, %167 : vector<2x16xf32>
    %246 = vector.broadcast %176 : vector<2x1xf32> to vector<2x16xf32>
    %247 = arith.mulf %246, %245 : vector<2x16xf32>
    %248 = arith.addf %167, %247 : vector<2x16xf32>
    %249 = arith.subf %242, %168 : vector<2x16xf32>
    %250 = vector.broadcast %176 : vector<2x1xf32> to vector<2x16xf32>
    %251 = arith.mulf %250, %249 : vector<2x16xf32>
    %252 = arith.addf %168, %251 : vector<2x16xf32>
    %c1_i32 = arith.constant 1 : i32
    %253 = vector.broadcast %c1_i32 : i32 to vector<2x1xi32>
    %254 = arith.cmpi sgt, %163, %253 : vector<2x1xi32>
    %255 = arith.extui %254 : vector<2x1xi1> to vector<2x1xi32>
    %256 = arith.sitofp %255 : vector<2x1xi32> to vector<2x1xf32>
    %c1_i32_109 = arith.constant 1 : i32
    %257 = vector.broadcast %c1_i32_109 : i32 to vector<2x1xi32>
    %258 = arith.cmpi sgt, %164, %257 : vector<2x1xi32>
    %259 = arith.extui %258 : vector<2x1xi1> to vector<2x1xi32>
    %260 = arith.sitofp %259 : vector<2x1xi32> to vector<2x1xf32>
    %261 = vector.extract_strided_slice %154 {offsets = [0, 1, 0], sizes = [2, 1, 64], strides = [1, 1, 1]} : vector<2x8x64xf32> to vector<2x1x64xf32>
    %262 = vector.shape_cast %261 : vector<2x1x64xf32> to vector<2x64xf32>
    %c0_110 = arith.constant 0 : index
    %c0_111 = arith.constant 0 : index
    %263 = vector.load %arg25[%c0_110, %c0_111] : memref<16x64xf32, #tpu.memory_space<vmem>>, vector<16x64xf32>
    %cst_112 = arith.constant dense<0.000000e+00> : vector<2x64xf32>
    %264 = tpu.matmul %210, %263, %cst_112 {dimension_numbers = #tpu.dot_dimension_numbers<[1], [0], [0], [1], [0, 0, 1, 1], [], []>} : vector<2x16xf32>, vector<16x64xf32>, vector<2x64xf32> -> vector<2x64xf32>
    %265 = arith.addf %262, %264 : vector<2x64xf32>
    %266 = vector.extract_strided_slice %265 {offsets = [0, 0], sizes = [2, 16], strides = [1, 1]} : vector<2x64xf32> to vector<2x16xf32>
    %267 = arith.negf %266 : vector<2x16xf32>
    %268 = math.exp %267 : vector<2x16xf32>
    %cst_113 = arith.constant 1.000000e+00 : f32
    %269 = vector.broadcast %cst_113 : f32 to vector<2x16xf32>
    %270 = arith.addf %269, %268 : vector<2x16xf32>
    %271 = arith.divf %269, %270 : vector<2x16xf32>
    %272 = vector.extract_strided_slice %265 {offsets = [0, 16], sizes = [2, 16], strides = [1, 1]} : vector<2x64xf32> to vector<2x16xf32>
    %273 = arith.negf %272 : vector<2x16xf32>
    %274 = math.exp %273 : vector<2x16xf32>
    %cst_114 = arith.constant 1.000000e+00 : f32
    %275 = vector.broadcast %cst_114 : f32 to vector<2x16xf32>
    %276 = arith.addf %275, %274 : vector<2x16xf32>
    %277 = arith.divf %275, %276 : vector<2x16xf32>
    %278 = vector.extract_strided_slice %265 {offsets = [0, 32], sizes = [2, 16], strides = [1, 1]} : vector<2x64xf32> to vector<2x16xf32>
    %279 = math.tanh %278 : vector<2x16xf32>
    %280 = vector.extract_strided_slice %265 {offsets = [0, 48], sizes = [2, 16], strides = [1, 1]} : vector<2x64xf32> to vector<2x16xf32>
    %281 = arith.negf %280 : vector<2x16xf32>
    %282 = math.exp %281 : vector<2x16xf32>
    %cst_115 = arith.constant 1.000000e+00 : f32
    %283 = vector.broadcast %cst_115 : f32 to vector<2x16xf32>
    %284 = arith.addf %283, %282 : vector<2x16xf32>
    %285 = arith.divf %283, %284 : vector<2x16xf32>
    %286 = arith.mulf %277, %214 : vector<2x16xf32>
    %287 = arith.mulf %271, %279 : vector<2x16xf32>
    %288 = arith.addf %286, %287 : vector<2x16xf32>
    %289 = math.tanh %288 : vector<2x16xf32>
    %290 = arith.mulf %285, %289 : vector<2x16xf32>
    %291 = arith.subf %290, %210 : vector<2x16xf32>
    %292 = vector.broadcast %256 : vector<2x1xf32> to vector<2x16xf32>
    %293 = arith.mulf %292, %291 : vector<2x16xf32>
    %294 = arith.addf %210, %293 : vector<2x16xf32>
    %295 = arith.subf %288, %214 : vector<2x16xf32>
    %296 = vector.broadcast %256 : vector<2x1xf32> to vector<2x16xf32>
    %297 = arith.mulf %296, %295 : vector<2x16xf32>
    %298 = arith.addf %214, %297 : vector<2x16xf32>
    %299 = vector.extract_strided_slice %162 {offsets = [0, 1, 0], sizes = [2, 1, 64], strides = [1, 1, 1]} : vector<2x8x64xf32> to vector<2x1x64xf32>
    %300 = vector.shape_cast %299 : vector<2x1x64xf32> to vector<2x64xf32>
    %c0_116 = arith.constant 0 : index
    %c0_117 = arith.constant 0 : index
    %301 = vector.load %arg31[%c0_116, %c0_117] : memref<16x64xf32, #tpu.memory_space<vmem>>, vector<16x64xf32>
    %cst_118 = arith.constant dense<0.000000e+00> : vector<2x64xf32>
    %302 = tpu.matmul %248, %301, %cst_118 {dimension_numbers = #tpu.dot_dimension_numbers<[1], [0], [0], [1], [0, 0, 1, 1], [], []>} : vector<2x16xf32>, vector<16x64xf32>, vector<2x64xf32> -> vector<2x64xf32>
    %303 = arith.addf %300, %302 : vector<2x64xf32>
    %304 = vector.extract_strided_slice %303 {offsets = [0, 0], sizes = [2, 16], strides = [1, 1]} : vector<2x64xf32> to vector<2x16xf32>
    %305 = arith.negf %304 : vector<2x16xf32>
    %306 = math.exp %305 : vector<2x16xf32>
    %cst_119 = arith.constant 1.000000e+00 : f32
    %307 = vector.broadcast %cst_119 : f32 to vector<2x16xf32>
    %308 = arith.addf %307, %306 : vector<2x16xf32>
    %309 = arith.divf %307, %308 : vector<2x16xf32>
    %310 = vector.extract_strided_slice %303 {offsets = [0, 16], sizes = [2, 16], strides = [1, 1]} : vector<2x64xf32> to vector<2x16xf32>
    %311 = arith.negf %310 : vector<2x16xf32>
    %312 = math.exp %311 : vector<2x16xf32>
    %cst_120 = arith.constant 1.000000e+00 : f32
    %313 = vector.broadcast %cst_120 : f32 to vector<2x16xf32>
    %314 = arith.addf %313, %312 : vector<2x16xf32>
    %315 = arith.divf %313, %314 : vector<2x16xf32>
    %316 = vector.extract_strided_slice %303 {offsets = [0, 32], sizes = [2, 16], strides = [1, 1]} : vector<2x64xf32> to vector<2x16xf32>
    %317 = math.tanh %316 : vector<2x16xf32>
    %318 = vector.extract_strided_slice %303 {offsets = [0, 48], sizes = [2, 16], strides = [1, 1]} : vector<2x64xf32> to vector<2x16xf32>
    %319 = arith.negf %318 : vector<2x16xf32>
    %320 = math.exp %319 : vector<2x16xf32>
    %cst_121 = arith.constant 1.000000e+00 : f32
    %321 = vector.broadcast %cst_121 : f32 to vector<2x16xf32>
    %322 = arith.addf %321, %320 : vector<2x16xf32>
    %323 = arith.divf %321, %322 : vector<2x16xf32>
    %324 = arith.mulf %315, %252 : vector<2x16xf32>
    %325 = arith.mulf %309, %317 : vector<2x16xf32>
    %326 = arith.addf %324, %325 : vector<2x16xf32>
    %327 = math.tanh %326 : vector<2x16xf32>
    %328 = arith.mulf %323, %327 : vector<2x16xf32>
    %329 = arith.subf %328, %248 : vector<2x16xf32>
    %330 = vector.broadcast %260 : vector<2x1xf32> to vector<2x16xf32>
    %331 = arith.mulf %330, %329 : vector<2x16xf32>
    %332 = arith.addf %248, %331 : vector<2x16xf32>
    %333 = arith.subf %326, %252 : vector<2x16xf32>
    %334 = vector.broadcast %260 : vector<2x1xf32> to vector<2x16xf32>
    %335 = arith.mulf %334, %333 : vector<2x16xf32>
    %336 = arith.addf %252, %335 : vector<2x16xf32>
    %c2_i32 = arith.constant 2 : i32
    %337 = vector.broadcast %c2_i32 : i32 to vector<2x1xi32>
    %338 = arith.cmpi sgt, %163, %337 : vector<2x1xi32>
    %339 = arith.extui %338 : vector<2x1xi1> to vector<2x1xi32>
    %340 = arith.sitofp %339 : vector<2x1xi32> to vector<2x1xf32>
    %c2_i32_122 = arith.constant 2 : i32
    %341 = vector.broadcast %c2_i32_122 : i32 to vector<2x1xi32>
    %342 = arith.cmpi sgt, %164, %341 : vector<2x1xi32>
    %343 = arith.extui %342 : vector<2x1xi1> to vector<2x1xi32>
    %344 = arith.sitofp %343 : vector<2x1xi32> to vector<2x1xf32>
    %345 = vector.extract_strided_slice %154 {offsets = [0, 2, 0], sizes = [2, 1, 64], strides = [1, 1, 1]} : vector<2x8x64xf32> to vector<2x1x64xf32>
    %346 = vector.shape_cast %345 : vector<2x1x64xf32> to vector<2x64xf32>
    %c0_123 = arith.constant 0 : index
    %c0_124 = arith.constant 0 : index
    %347 = vector.load %arg25[%c0_123, %c0_124] : memref<16x64xf32, #tpu.memory_space<vmem>>, vector<16x64xf32>
    %cst_125 = arith.constant dense<0.000000e+00> : vector<2x64xf32>
    %348 = tpu.matmul %294, %347, %cst_125 {dimension_numbers = #tpu.dot_dimension_numbers<[1], [0], [0], [1], [0, 0, 1, 1], [], []>} : vector<2x16xf32>, vector<16x64xf32>, vector<2x64xf32> -> vector<2x64xf32>
    %349 = arith.addf %346, %348 : vector<2x64xf32>
    %350 = vector.extract_strided_slice %349 {offsets = [0, 0], sizes = [2, 16], strides = [1, 1]} : vector<2x64xf32> to vector<2x16xf32>
    %351 = arith.negf %350 : vector<2x16xf32>
    %352 = math.exp %351 : vector<2x16xf32>
    %cst_126 = arith.constant 1.000000e+00 : f32
    %353 = vector.broadcast %cst_126 : f32 to vector<2x16xf32>
    %354 = arith.addf %353, %352 : vector<2x16xf32>
    %355 = arith.divf %353, %354 : vector<2x16xf32>
    %356 = vector.extract_strided_slice %349 {offsets = [0, 16], sizes = [2, 16], strides = [1, 1]} : vector<2x64xf32> to vector<2x16xf32>
    %357 = arith.negf %356 : vector<2x16xf32>
    %358 = math.exp %357 : vector<2x16xf32>
    %cst_127 = arith.constant 1.000000e+00 : f32
    %359 = vector.broadcast %cst_127 : f32 to vector<2x16xf32>
    %360 = arith.addf %359, %358 : vector<2x16xf32>
    %361 = arith.divf %359, %360 : vector<2x16xf32>
    %362 = vector.extract_strided_slice %349 {offsets = [0, 32], sizes = [2, 16], strides = [1, 1]} : vector<2x64xf32> to vector<2x16xf32>
    %363 = math.tanh %362 : vector<2x16xf32>
    %364 = vector.extract_strided_slice %349 {offsets = [0, 48], sizes = [2, 16], strides = [1, 1]} : vector<2x64xf32> to vector<2x16xf32>
    %365 = arith.negf %364 : vector<2x16xf32>
    %366 = math.exp %365 : vector<2x16xf32>
    %cst_128 = arith.constant 1.000000e+00 : f32
    %367 = vector.broadcast %cst_128 : f32 to vector<2x16xf32>
    %368 = arith.addf %367, %366 : vector<2x16xf32>
    %369 = arith.divf %367, %368 : vector<2x16xf32>
    %370 = arith.mulf %361, %298 : vector<2x16xf32>
    %371 = arith.mulf %355, %363 : vector<2x16xf32>
    %372 = arith.addf %370, %371 : vector<2x16xf32>
    %373 = math.tanh %372 : vector<2x16xf32>
    %374 = arith.mulf %369, %373 : vector<2x16xf32>
    %375 = arith.subf %374, %294 : vector<2x16xf32>
    %376 = vector.broadcast %340 : vector<2x1xf32> to vector<2x16xf32>
    %377 = arith.mulf %376, %375 : vector<2x16xf32>
    %378 = arith.addf %294, %377 : vector<2x16xf32>
    %379 = arith.subf %372, %298 : vector<2x16xf32>
    %380 = vector.broadcast %340 : vector<2x1xf32> to vector<2x16xf32>
    %381 = arith.mulf %380, %379 : vector<2x16xf32>
    %382 = arith.addf %298, %381 : vector<2x16xf32>
    %383 = vector.extract_strided_slice %162 {offsets = [0, 2, 0], sizes = [2, 1, 64], strides = [1, 1, 1]} : vector<2x8x64xf32> to vector<2x1x64xf32>
    %384 = vector.shape_cast %383 : vector<2x1x64xf32> to vector<2x64xf32>
    %c0_129 = arith.constant 0 : index
    %c0_130 = arith.constant 0 : index
    %385 = vector.load %arg31[%c0_129, %c0_130] : memref<16x64xf32, #tpu.memory_space<vmem>>, vector<16x64xf32>
    %cst_131 = arith.constant dense<0.000000e+00> : vector<2x64xf32>
    %386 = tpu.matmul %332, %385, %cst_131 {dimension_numbers = #tpu.dot_dimension_numbers<[1], [0], [0], [1], [0, 0, 1, 1], [], []>} : vector<2x16xf32>, vector<16x64xf32>, vector<2x64xf32> -> vector<2x64xf32>
    %387 = arith.addf %384, %386 : vector<2x64xf32>
    %388 = vector.extract_strided_slice %387 {offsets = [0, 0], sizes = [2, 16], strides = [1, 1]} : vector<2x64xf32> to vector<2x16xf32>
    %389 = arith.negf %388 : vector<2x16xf32>
    %390 = math.exp %389 : vector<2x16xf32>
    %cst_132 = arith.constant 1.000000e+00 : f32
    %391 = vector.broadcast %cst_132 : f32 to vector<2x16xf32>
    %392 = arith.addf %391, %390 : vector<2x16xf32>
    %393 = arith.divf %391, %392 : vector<2x16xf32>
    %394 = vector.extract_strided_slice %387 {offsets = [0, 16], sizes = [2, 16], strides = [1, 1]} : vector<2x64xf32> to vector<2x16xf32>
    %395 = arith.negf %394 : vector<2x16xf32>
    %396 = math.exp %395 : vector<2x16xf32>
    %cst_133 = arith.constant 1.000000e+00 : f32
    %397 = vector.broadcast %cst_133 : f32 to vector<2x16xf32>
    %398 = arith.addf %397, %396 : vector<2x16xf32>
    %399 = arith.divf %397, %398 : vector<2x16xf32>
    %400 = vector.extract_strided_slice %387 {offsets = [0, 32], sizes = [2, 16], strides = [1, 1]} : vector<2x64xf32> to vector<2x16xf32>
    %401 = math.tanh %400 : vector<2x16xf32>
    %402 = vector.extract_strided_slice %387 {offsets = [0, 48], sizes = [2, 16], strides = [1, 1]} : vector<2x64xf32> to vector<2x16xf32>
    %403 = arith.negf %402 : vector<2x16xf32>
    %404 = math.exp %403 : vector<2x16xf32>
    %cst_134 = arith.constant 1.000000e+00 : f32
    %405 = vector.broadcast %cst_134 : f32 to vector<2x16xf32>
    %406 = arith.addf %405, %404 : vector<2x16xf32>
    %407 = arith.divf %405, %406 : vector<2x16xf32>
    %408 = arith.mulf %399, %336 : vector<2x16xf32>
    %409 = arith.mulf %393, %401 : vector<2x16xf32>
    %410 = arith.addf %408, %409 : vector<2x16xf32>
    %411 = math.tanh %410 : vector<2x16xf32>
    %412 = arith.mulf %407, %411 : vector<2x16xf32>
    %413 = arith.subf %412, %332 : vector<2x16xf32>
    %414 = vector.broadcast %344 : vector<2x1xf32> to vector<2x16xf32>
    %415 = arith.mulf %414, %413 : vector<2x16xf32>
    %416 = arith.addf %332, %415 : vector<2x16xf32>
    %417 = arith.subf %410, %336 : vector<2x16xf32>
    %418 = vector.broadcast %344 : vector<2x1xf32> to vector<2x16xf32>
    %419 = arith.mulf %418, %417 : vector<2x16xf32>
    %420 = arith.addf %336, %419 : vector<2x16xf32>
    %c3_i32 = arith.constant 3 : i32
    %421 = vector.broadcast %c3_i32 : i32 to vector<2x1xi32>
    %422 = arith.cmpi sgt, %163, %421 : vector<2x1xi32>
    %423 = arith.extui %422 : vector<2x1xi1> to vector<2x1xi32>
    %424 = arith.sitofp %423 : vector<2x1xi32> to vector<2x1xf32>
    %c3_i32_135 = arith.constant 3 : i32
    %425 = vector.broadcast %c3_i32_135 : i32 to vector<2x1xi32>
    %426 = arith.cmpi sgt, %164, %425 : vector<2x1xi32>
    %427 = arith.extui %426 : vector<2x1xi1> to vector<2x1xi32>
    %428 = arith.sitofp %427 : vector<2x1xi32> to vector<2x1xf32>
    %429 = vector.extract_strided_slice %154 {offsets = [0, 3, 0], sizes = [2, 1, 64], strides = [1, 1, 1]} : vector<2x8x64xf32> to vector<2x1x64xf32>
    %430 = vector.shape_cast %429 : vector<2x1x64xf32> to vector<2x64xf32>
    %c0_136 = arith.constant 0 : index
    %c0_137 = arith.constant 0 : index
    %431 = vector.load %arg25[%c0_136, %c0_137] : memref<16x64xf32, #tpu.memory_space<vmem>>, vector<16x64xf32>
    %cst_138 = arith.constant dense<0.000000e+00> : vector<2x64xf32>
    %432 = tpu.matmul %378, %431, %cst_138 {dimension_numbers = #tpu.dot_dimension_numbers<[1], [0], [0], [1], [0, 0, 1, 1], [], []>} : vector<2x16xf32>, vector<16x64xf32>, vector<2x64xf32> -> vector<2x64xf32>
    %433 = arith.addf %430, %432 : vector<2x64xf32>
    %434 = vector.extract_strided_slice %433 {offsets = [0, 0], sizes = [2, 16], strides = [1, 1]} : vector<2x64xf32> to vector<2x16xf32>
    %435 = arith.negf %434 : vector<2x16xf32>
    %436 = math.exp %435 : vector<2x16xf32>
    %cst_139 = arith.constant 1.000000e+00 : f32
    %437 = vector.broadcast %cst_139 : f32 to vector<2x16xf32>
    %438 = arith.addf %437, %436 : vector<2x16xf32>
    %439 = arith.divf %437, %438 : vector<2x16xf32>
    %440 = vector.extract_strided_slice %433 {offsets = [0, 16], sizes = [2, 16], strides = [1, 1]} : vector<2x64xf32> to vector<2x16xf32>
    %441 = arith.negf %440 : vector<2x16xf32>
    %442 = math.exp %441 : vector<2x16xf32>
    %cst_140 = arith.constant 1.000000e+00 : f32
    %443 = vector.broadcast %cst_140 : f32 to vector<2x16xf32>
    %444 = arith.addf %443, %442 : vector<2x16xf32>
    %445 = arith.divf %443, %444 : vector<2x16xf32>
    %446 = vector.extract_strided_slice %433 {offsets = [0, 32], sizes = [2, 16], strides = [1, 1]} : vector<2x64xf32> to vector<2x16xf32>
    %447 = math.tanh %446 : vector<2x16xf32>
    %448 = vector.extract_strided_slice %433 {offsets = [0, 48], sizes = [2, 16], strides = [1, 1]} : vector<2x64xf32> to vector<2x16xf32>
    %449 = arith.negf %448 : vector<2x16xf32>
    %450 = math.exp %449 : vector<2x16xf32>
    %cst_141 = arith.constant 1.000000e+00 : f32
    %451 = vector.broadcast %cst_141 : f32 to vector<2x16xf32>
    %452 = arith.addf %451, %450 : vector<2x16xf32>
    %453 = arith.divf %451, %452 : vector<2x16xf32>
    %454 = arith.mulf %445, %382 : vector<2x16xf32>
    %455 = arith.mulf %439, %447 : vector<2x16xf32>
    %456 = arith.addf %454, %455 : vector<2x16xf32>
    %457 = math.tanh %456 : vector<2x16xf32>
    %458 = arith.mulf %453, %457 : vector<2x16xf32>
    %459 = arith.subf %458, %378 : vector<2x16xf32>
    %460 = vector.broadcast %424 : vector<2x1xf32> to vector<2x16xf32>
    %461 = arith.mulf %460, %459 : vector<2x16xf32>
    %462 = arith.addf %378, %461 : vector<2x16xf32>
    %463 = arith.subf %456, %382 : vector<2x16xf32>
    %464 = vector.broadcast %424 : vector<2x1xf32> to vector<2x16xf32>
    %465 = arith.mulf %464, %463 : vector<2x16xf32>
    %466 = arith.addf %382, %465 : vector<2x16xf32>
    %467 = vector.extract_strided_slice %162 {offsets = [0, 3, 0], sizes = [2, 1, 64], strides = [1, 1, 1]} : vector<2x8x64xf32> to vector<2x1x64xf32>
    %468 = vector.shape_cast %467 : vector<2x1x64xf32> to vector<2x64xf32>
    %c0_142 = arith.constant 0 : index
    %c0_143 = arith.constant 0 : index
    %469 = vector.load %arg31[%c0_142, %c0_143] : memref<16x64xf32, #tpu.memory_space<vmem>>, vector<16x64xf32>
    %cst_144 = arith.constant dense<0.000000e+00> : vector<2x64xf32>
    %470 = tpu.matmul %416, %469, %cst_144 {dimension_numbers = #tpu.dot_dimension_numbers<[1], [0], [0], [1], [0, 0, 1, 1], [], []>} : vector<2x16xf32>, vector<16x64xf32>, vector<2x64xf32> -> vector<2x64xf32>
    %471 = arith.addf %468, %470 : vector<2x64xf32>
    %472 = vector.extract_strided_slice %471 {offsets = [0, 0], sizes = [2, 16], strides = [1, 1]} : vector<2x64xf32> to vector<2x16xf32>
    %473 = arith.negf %472 : vector<2x16xf32>
    %474 = math.exp %473 : vector<2x16xf32>
    %cst_145 = arith.constant 1.000000e+00 : f32
    %475 = vector.broadcast %cst_145 : f32 to vector<2x16xf32>
    %476 = arith.addf %475, %474 : vector<2x16xf32>
    %477 = arith.divf %475, %476 : vector<2x16xf32>
    %478 = vector.extract_strided_slice %471 {offsets = [0, 16], sizes = [2, 16], strides = [1, 1]} : vector<2x64xf32> to vector<2x16xf32>
    %479 = arith.negf %478 : vector<2x16xf32>
    %480 = math.exp %479 : vector<2x16xf32>
    %cst_146 = arith.constant 1.000000e+00 : f32
    %481 = vector.broadcast %cst_146 : f32 to vector<2x16xf32>
    %482 = arith.addf %481, %480 : vector<2x16xf32>
    %483 = arith.divf %481, %482 : vector<2x16xf32>
    %484 = vector.extract_strided_slice %471 {offsets = [0, 32], sizes = [2, 16], strides = [1, 1]} : vector<2x64xf32> to vector<2x16xf32>
    %485 = math.tanh %484 : vector<2x16xf32>
    %486 = vector.extract_strided_slice %471 {offsets = [0, 48], sizes = [2, 16], strides = [1, 1]} : vector<2x64xf32> to vector<2x16xf32>
    %487 = arith.negf %486 : vector<2x16xf32>
    %488 = math.exp %487 : vector<2x16xf32>
    %cst_147 = arith.constant 1.000000e+00 : f32
    %489 = vector.broadcast %cst_147 : f32 to vector<2x16xf32>
    %490 = arith.addf %489, %488 : vector<2x16xf32>
    %491 = arith.divf %489, %490 : vector<2x16xf32>
    %492 = arith.mulf %483, %420 : vector<2x16xf32>
    %493 = arith.mulf %477, %485 : vector<2x16xf32>
    %494 = arith.addf %492, %493 : vector<2x16xf32>
    %495 = math.tanh %494 : vector<2x16xf32>
    %496 = arith.mulf %491, %495 : vector<2x16xf32>
    %497 = arith.subf %496, %416 : vector<2x16xf32>
    %498 = vector.broadcast %428 : vector<2x1xf32> to vector<2x16xf32>
    %499 = arith.mulf %498, %497 : vector<2x16xf32>
    %500 = arith.addf %416, %499 : vector<2x16xf32>
    %501 = arith.subf %494, %420 : vector<2x16xf32>
    %502 = vector.broadcast %428 : vector<2x1xf32> to vector<2x16xf32>
    %503 = arith.mulf %502, %501 : vector<2x16xf32>
    %504 = arith.addf %420, %503 : vector<2x16xf32>
    %c4_i32 = arith.constant 4 : i32
    %505 = vector.broadcast %c4_i32 : i32 to vector<2x1xi32>
    %506 = arith.cmpi sgt, %163, %505 : vector<2x1xi32>
    %507 = arith.extui %506 : vector<2x1xi1> to vector<2x1xi32>
    %508 = arith.sitofp %507 : vector<2x1xi32> to vector<2x1xf32>
    %c4_i32_148 = arith.constant 4 : i32
    %509 = vector.broadcast %c4_i32_148 : i32 to vector<2x1xi32>
    %510 = arith.cmpi sgt, %164, %509 : vector<2x1xi32>
    %511 = arith.extui %510 : vector<2x1xi1> to vector<2x1xi32>
    %512 = arith.sitofp %511 : vector<2x1xi32> to vector<2x1xf32>
    %513 = vector.extract_strided_slice %154 {offsets = [0, 4, 0], sizes = [2, 1, 64], strides = [1, 1, 1]} : vector<2x8x64xf32> to vector<2x1x64xf32>
    %514 = vector.shape_cast %513 : vector<2x1x64xf32> to vector<2x64xf32>
    %c0_149 = arith.constant 0 : index
    %c0_150 = arith.constant 0 : index
    %515 = vector.load %arg25[%c0_149, %c0_150] : memref<16x64xf32, #tpu.memory_space<vmem>>, vector<16x64xf32>
    %cst_151 = arith.constant dense<0.000000e+00> : vector<2x64xf32>
    %516 = tpu.matmul %462, %515, %cst_151 {dimension_numbers = #tpu.dot_dimension_numbers<[1], [0], [0], [1], [0, 0, 1, 1], [], []>} : vector<2x16xf32>, vector<16x64xf32>, vector<2x64xf32> -> vector<2x64xf32>
    %517 = arith.addf %514, %516 : vector<2x64xf32>
    %518 = vector.extract_strided_slice %517 {offsets = [0, 0], sizes = [2, 16], strides = [1, 1]} : vector<2x64xf32> to vector<2x16xf32>
    %519 = arith.negf %518 : vector<2x16xf32>
    %520 = math.exp %519 : vector<2x16xf32>
    %cst_152 = arith.constant 1.000000e+00 : f32
    %521 = vector.broadcast %cst_152 : f32 to vector<2x16xf32>
    %522 = arith.addf %521, %520 : vector<2x16xf32>
    %523 = arith.divf %521, %522 : vector<2x16xf32>
    %524 = vector.extract_strided_slice %517 {offsets = [0, 16], sizes = [2, 16], strides = [1, 1]} : vector<2x64xf32> to vector<2x16xf32>
    %525 = arith.negf %524 : vector<2x16xf32>
    %526 = math.exp %525 : vector<2x16xf32>
    %cst_153 = arith.constant 1.000000e+00 : f32
    %527 = vector.broadcast %cst_153 : f32 to vector<2x16xf32>
    %528 = arith.addf %527, %526 : vector<2x16xf32>
    %529 = arith.divf %527, %528 : vector<2x16xf32>
    %530 = vector.extract_strided_slice %517 {offsets = [0, 32], sizes = [2, 16], strides = [1, 1]} : vector<2x64xf32> to vector<2x16xf32>
    %531 = math.tanh %530 : vector<2x16xf32>
    %532 = vector.extract_strided_slice %517 {offsets = [0, 48], sizes = [2, 16], strides = [1, 1]} : vector<2x64xf32> to vector<2x16xf32>
    %533 = arith.negf %532 : vector<2x16xf32>
    %534 = math.exp %533 : vector<2x16xf32>
    %cst_154 = arith.constant 1.000000e+00 : f32
    %535 = vector.broadcast %cst_154 : f32 to vector<2x16xf32>
    %536 = arith.addf %535, %534 : vector<2x16xf32>
    %537 = arith.divf %535, %536 : vector<2x16xf32>
    %538 = arith.mulf %529, %466 : vector<2x16xf32>
    %539 = arith.mulf %523, %531 : vector<2x16xf32>
    %540 = arith.addf %538, %539 : vector<2x16xf32>
    %541 = math.tanh %540 : vector<2x16xf32>
    %542 = arith.mulf %537, %541 : vector<2x16xf32>
    %543 = arith.subf %542, %462 : vector<2x16xf32>
    %544 = vector.broadcast %508 : vector<2x1xf32> to vector<2x16xf32>
    %545 = arith.mulf %544, %543 : vector<2x16xf32>
    %546 = arith.addf %462, %545 : vector<2x16xf32>
    %547 = arith.subf %540, %466 : vector<2x16xf32>
    %548 = vector.broadcast %508 : vector<2x1xf32> to vector<2x16xf32>
    %549 = arith.mulf %548, %547 : vector<2x16xf32>
    %550 = arith.addf %466, %549 : vector<2x16xf32>
    %551 = vector.extract_strided_slice %162 {offsets = [0, 4, 0], sizes = [2, 1, 64], strides = [1, 1, 1]} : vector<2x8x64xf32> to vector<2x1x64xf32>
    %552 = vector.shape_cast %551 : vector<2x1x64xf32> to vector<2x64xf32>
    %c0_155 = arith.constant 0 : index
    %c0_156 = arith.constant 0 : index
    %553 = vector.load %arg31[%c0_155, %c0_156] : memref<16x64xf32, #tpu.memory_space<vmem>>, vector<16x64xf32>
    %cst_157 = arith.constant dense<0.000000e+00> : vector<2x64xf32>
    %554 = tpu.matmul %500, %553, %cst_157 {dimension_numbers = #tpu.dot_dimension_numbers<[1], [0], [0], [1], [0, 0, 1, 1], [], []>} : vector<2x16xf32>, vector<16x64xf32>, vector<2x64xf32> -> vector<2x64xf32>
    %555 = arith.addf %552, %554 : vector<2x64xf32>
    %556 = vector.extract_strided_slice %555 {offsets = [0, 0], sizes = [2, 16], strides = [1, 1]} : vector<2x64xf32> to vector<2x16xf32>
    %557 = arith.negf %556 : vector<2x16xf32>
    %558 = math.exp %557 : vector<2x16xf32>
    %cst_158 = arith.constant 1.000000e+00 : f32
    %559 = vector.broadcast %cst_158 : f32 to vector<2x16xf32>
    %560 = arith.addf %559, %558 : vector<2x16xf32>
    %561 = arith.divf %559, %560 : vector<2x16xf32>
    %562 = vector.extract_strided_slice %555 {offsets = [0, 16], sizes = [2, 16], strides = [1, 1]} : vector<2x64xf32> to vector<2x16xf32>
    %563 = arith.negf %562 : vector<2x16xf32>
    %564 = math.exp %563 : vector<2x16xf32>
    %cst_159 = arith.constant 1.000000e+00 : f32
    %565 = vector.broadcast %cst_159 : f32 to vector<2x16xf32>
    %566 = arith.addf %565, %564 : vector<2x16xf32>
    %567 = arith.divf %565, %566 : vector<2x16xf32>
    %568 = vector.extract_strided_slice %555 {offsets = [0, 32], sizes = [2, 16], strides = [1, 1]} : vector<2x64xf32> to vector<2x16xf32>
    %569 = math.tanh %568 : vector<2x16xf32>
    %570 = vector.extract_strided_slice %555 {offsets = [0, 48], sizes = [2, 16], strides = [1, 1]} : vector<2x64xf32> to vector<2x16xf32>
    %571 = arith.negf %570 : vector<2x16xf32>
    %572 = math.exp %571 : vector<2x16xf32>
    %cst_160 = arith.constant 1.000000e+00 : f32
    %573 = vector.broadcast %cst_160 : f32 to vector<2x16xf32>
    %574 = arith.addf %573, %572 : vector<2x16xf32>
    %575 = arith.divf %573, %574 : vector<2x16xf32>
    %576 = arith.mulf %567, %504 : vector<2x16xf32>
    %577 = arith.mulf %561, %569 : vector<2x16xf32>
    %578 = arith.addf %576, %577 : vector<2x16xf32>
    %579 = math.tanh %578 : vector<2x16xf32>
    %580 = arith.mulf %575, %579 : vector<2x16xf32>
    %581 = arith.subf %580, %500 : vector<2x16xf32>
    %582 = vector.broadcast %512 : vector<2x1xf32> to vector<2x16xf32>
    %583 = arith.mulf %582, %581 : vector<2x16xf32>
    %584 = arith.addf %500, %583 : vector<2x16xf32>
    %585 = arith.subf %578, %504 : vector<2x16xf32>
    %586 = vector.broadcast %512 : vector<2x1xf32> to vector<2x16xf32>
    %587 = arith.mulf %586, %585 : vector<2x16xf32>
    %588 = arith.addf %504, %587 : vector<2x16xf32>
    %c5_i32 = arith.constant 5 : i32
    %589 = vector.broadcast %c5_i32 : i32 to vector<2x1xi32>
    %590 = arith.cmpi sgt, %163, %589 : vector<2x1xi32>
    %591 = arith.extui %590 : vector<2x1xi1> to vector<2x1xi32>
    %592 = arith.sitofp %591 : vector<2x1xi32> to vector<2x1xf32>
    %c5_i32_161 = arith.constant 5 : i32
    %593 = vector.broadcast %c5_i32_161 : i32 to vector<2x1xi32>
    %594 = arith.cmpi sgt, %164, %593 : vector<2x1xi32>
    %595 = arith.extui %594 : vector<2x1xi1> to vector<2x1xi32>
    %596 = arith.sitofp %595 : vector<2x1xi32> to vector<2x1xf32>
    %597 = vector.extract_strided_slice %154 {offsets = [0, 5, 0], sizes = [2, 1, 64], strides = [1, 1, 1]} : vector<2x8x64xf32> to vector<2x1x64xf32>
    %598 = vector.shape_cast %597 : vector<2x1x64xf32> to vector<2x64xf32>
    %c0_162 = arith.constant 0 : index
    %c0_163 = arith.constant 0 : index
    %599 = vector.load %arg25[%c0_162, %c0_163] : memref<16x64xf32, #tpu.memory_space<vmem>>, vector<16x64xf32>
    %cst_164 = arith.constant dense<0.000000e+00> : vector<2x64xf32>
    %600 = tpu.matmul %546, %599, %cst_164 {dimension_numbers = #tpu.dot_dimension_numbers<[1], [0], [0], [1], [0, 0, 1, 1], [], []>} : vector<2x16xf32>, vector<16x64xf32>, vector<2x64xf32> -> vector<2x64xf32>
    %601 = arith.addf %598, %600 : vector<2x64xf32>
    %602 = vector.extract_strided_slice %601 {offsets = [0, 0], sizes = [2, 16], strides = [1, 1]} : vector<2x64xf32> to vector<2x16xf32>
    %603 = arith.negf %602 : vector<2x16xf32>
    %604 = math.exp %603 : vector<2x16xf32>
    %cst_165 = arith.constant 1.000000e+00 : f32
    %605 = vector.broadcast %cst_165 : f32 to vector<2x16xf32>
    %606 = arith.addf %605, %604 : vector<2x16xf32>
    %607 = arith.divf %605, %606 : vector<2x16xf32>
    %608 = vector.extract_strided_slice %601 {offsets = [0, 16], sizes = [2, 16], strides = [1, 1]} : vector<2x64xf32> to vector<2x16xf32>
    %609 = arith.negf %608 : vector<2x16xf32>
    %610 = math.exp %609 : vector<2x16xf32>
    %cst_166 = arith.constant 1.000000e+00 : f32
    %611 = vector.broadcast %cst_166 : f32 to vector<2x16xf32>
    %612 = arith.addf %611, %610 : vector<2x16xf32>
    %613 = arith.divf %611, %612 : vector<2x16xf32>
    %614 = vector.extract_strided_slice %601 {offsets = [0, 32], sizes = [2, 16], strides = [1, 1]} : vector<2x64xf32> to vector<2x16xf32>
    %615 = math.tanh %614 : vector<2x16xf32>
    %616 = vector.extract_strided_slice %601 {offsets = [0, 48], sizes = [2, 16], strides = [1, 1]} : vector<2x64xf32> to vector<2x16xf32>
    %617 = arith.negf %616 : vector<2x16xf32>
    %618 = math.exp %617 : vector<2x16xf32>
    %cst_167 = arith.constant 1.000000e+00 : f32
    %619 = vector.broadcast %cst_167 : f32 to vector<2x16xf32>
    %620 = arith.addf %619, %618 : vector<2x16xf32>
    %621 = arith.divf %619, %620 : vector<2x16xf32>
    %622 = arith.mulf %613, %550 : vector<2x16xf32>
    %623 = arith.mulf %607, %615 : vector<2x16xf32>
    %624 = arith.addf %622, %623 : vector<2x16xf32>
    %625 = math.tanh %624 : vector<2x16xf32>
    %626 = arith.mulf %621, %625 : vector<2x16xf32>
    %627 = arith.subf %626, %546 : vector<2x16xf32>
    %628 = vector.broadcast %592 : vector<2x1xf32> to vector<2x16xf32>
    %629 = arith.mulf %628, %627 : vector<2x16xf32>
    %630 = arith.addf %546, %629 : vector<2x16xf32>
    %631 = arith.subf %624, %550 : vector<2x16xf32>
    %632 = vector.broadcast %592 : vector<2x1xf32> to vector<2x16xf32>
    %633 = arith.mulf %632, %631 : vector<2x16xf32>
    %634 = arith.addf %550, %633 : vector<2x16xf32>
    %635 = vector.extract_strided_slice %162 {offsets = [0, 5, 0], sizes = [2, 1, 64], strides = [1, 1, 1]} : vector<2x8x64xf32> to vector<2x1x64xf32>
    %636 = vector.shape_cast %635 : vector<2x1x64xf32> to vector<2x64xf32>
    %c0_168 = arith.constant 0 : index
    %c0_169 = arith.constant 0 : index
    %637 = vector.load %arg31[%c0_168, %c0_169] : memref<16x64xf32, #tpu.memory_space<vmem>>, vector<16x64xf32>
    %cst_170 = arith.constant dense<0.000000e+00> : vector<2x64xf32>
    %638 = tpu.matmul %584, %637, %cst_170 {dimension_numbers = #tpu.dot_dimension_numbers<[1], [0], [0], [1], [0, 0, 1, 1], [], []>} : vector<2x16xf32>, vector<16x64xf32>, vector<2x64xf32> -> vector<2x64xf32>
    %639 = arith.addf %636, %638 : vector<2x64xf32>
    %640 = vector.extract_strided_slice %639 {offsets = [0, 0], sizes = [2, 16], strides = [1, 1]} : vector<2x64xf32> to vector<2x16xf32>
    %641 = arith.negf %640 : vector<2x16xf32>
    %642 = math.exp %641 : vector<2x16xf32>
    %cst_171 = arith.constant 1.000000e+00 : f32
    %643 = vector.broadcast %cst_171 : f32 to vector<2x16xf32>
    %644 = arith.addf %643, %642 : vector<2x16xf32>
    %645 = arith.divf %643, %644 : vector<2x16xf32>
    %646 = vector.extract_strided_slice %639 {offsets = [0, 16], sizes = [2, 16], strides = [1, 1]} : vector<2x64xf32> to vector<2x16xf32>
    %647 = arith.negf %646 : vector<2x16xf32>
    %648 = math.exp %647 : vector<2x16xf32>
    %cst_172 = arith.constant 1.000000e+00 : f32
    %649 = vector.broadcast %cst_172 : f32 to vector<2x16xf32>
    %650 = arith.addf %649, %648 : vector<2x16xf32>
    %651 = arith.divf %649, %650 : vector<2x16xf32>
    %652 = vector.extract_strided_slice %639 {offsets = [0, 32], sizes = [2, 16], strides = [1, 1]} : vector<2x64xf32> to vector<2x16xf32>
    %653 = math.tanh %652 : vector<2x16xf32>
    %654 = vector.extract_strided_slice %639 {offsets = [0, 48], sizes = [2, 16], strides = [1, 1]} : vector<2x64xf32> to vector<2x16xf32>
    %655 = arith.negf %654 : vector<2x16xf32>
    %656 = math.exp %655 : vector<2x16xf32>
    %cst_173 = arith.constant 1.000000e+00 : f32
    %657 = vector.broadcast %cst_173 : f32 to vector<2x16xf32>
    %658 = arith.addf %657, %656 : vector<2x16xf32>
    %659 = arith.divf %657, %658 : vector<2x16xf32>
    %660 = arith.mulf %651, %588 : vector<2x16xf32>
    %661 = arith.mulf %645, %653 : vector<2x16xf32>
    %662 = arith.addf %660, %661 : vector<2x16xf32>
    %663 = math.tanh %662 : vector<2x16xf32>
    %664 = arith.mulf %659, %663 : vector<2x16xf32>
    %665 = arith.subf %664, %584 : vector<2x16xf32>
    %666 = vector.broadcast %596 : vector<2x1xf32> to vector<2x16xf32>
    %667 = arith.mulf %666, %665 : vector<2x16xf32>
    %668 = arith.addf %584, %667 : vector<2x16xf32>
    %669 = arith.subf %662, %588 : vector<2x16xf32>
    %670 = vector.broadcast %596 : vector<2x1xf32> to vector<2x16xf32>
    %671 = arith.mulf %670, %669 : vector<2x16xf32>
    %672 = arith.addf %588, %671 : vector<2x16xf32>
    %c6_i32 = arith.constant 6 : i32
    %673 = vector.broadcast %c6_i32 : i32 to vector<2x1xi32>
    %674 = arith.cmpi sgt, %163, %673 : vector<2x1xi32>
    %675 = arith.extui %674 : vector<2x1xi1> to vector<2x1xi32>
    %676 = arith.sitofp %675 : vector<2x1xi32> to vector<2x1xf32>
    %c6_i32_174 = arith.constant 6 : i32
    %677 = vector.broadcast %c6_i32_174 : i32 to vector<2x1xi32>
    %678 = arith.cmpi sgt, %164, %677 : vector<2x1xi32>
    %679 = arith.extui %678 : vector<2x1xi1> to vector<2x1xi32>
    %680 = arith.sitofp %679 : vector<2x1xi32> to vector<2x1xf32>
    %681 = vector.extract_strided_slice %154 {offsets = [0, 6, 0], sizes = [2, 1, 64], strides = [1, 1, 1]} : vector<2x8x64xf32> to vector<2x1x64xf32>
    %682 = vector.shape_cast %681 : vector<2x1x64xf32> to vector<2x64xf32>
    %c0_175 = arith.constant 0 : index
    %c0_176 = arith.constant 0 : index
    %683 = vector.load %arg25[%c0_175, %c0_176] : memref<16x64xf32, #tpu.memory_space<vmem>>, vector<16x64xf32>
    %cst_177 = arith.constant dense<0.000000e+00> : vector<2x64xf32>
    %684 = tpu.matmul %630, %683, %cst_177 {dimension_numbers = #tpu.dot_dimension_numbers<[1], [0], [0], [1], [0, 0, 1, 1], [], []>} : vector<2x16xf32>, vector<16x64xf32>, vector<2x64xf32> -> vector<2x64xf32>
    %685 = arith.addf %682, %684 : vector<2x64xf32>
    %686 = vector.extract_strided_slice %685 {offsets = [0, 0], sizes = [2, 16], strides = [1, 1]} : vector<2x64xf32> to vector<2x16xf32>
    %687 = arith.negf %686 : vector<2x16xf32>
    %688 = math.exp %687 : vector<2x16xf32>
    %cst_178 = arith.constant 1.000000e+00 : f32
    %689 = vector.broadcast %cst_178 : f32 to vector<2x16xf32>
    %690 = arith.addf %689, %688 : vector<2x16xf32>
    %691 = arith.divf %689, %690 : vector<2x16xf32>
    %692 = vector.extract_strided_slice %685 {offsets = [0, 16], sizes = [2, 16], strides = [1, 1]} : vector<2x64xf32> to vector<2x16xf32>
    %693 = arith.negf %692 : vector<2x16xf32>
    %694 = math.exp %693 : vector<2x16xf32>
    %cst_179 = arith.constant 1.000000e+00 : f32
    %695 = vector.broadcast %cst_179 : f32 to vector<2x16xf32>
    %696 = arith.addf %695, %694 : vector<2x16xf32>
    %697 = arith.divf %695, %696 : vector<2x16xf32>
    %698 = vector.extract_strided_slice %685 {offsets = [0, 32], sizes = [2, 16], strides = [1, 1]} : vector<2x64xf32> to vector<2x16xf32>
    %699 = math.tanh %698 : vector<2x16xf32>
    %700 = vector.extract_strided_slice %685 {offsets = [0, 48], sizes = [2, 16], strides = [1, 1]} : vector<2x64xf32> to vector<2x16xf32>
    %701 = arith.negf %700 : vector<2x16xf32>
    %702 = math.exp %701 : vector<2x16xf32>
    %cst_180 = arith.constant 1.000000e+00 : f32
    %703 = vector.broadcast %cst_180 : f32 to vector<2x16xf32>
    %704 = arith.addf %703, %702 : vector<2x16xf32>
    %705 = arith.divf %703, %704 : vector<2x16xf32>
    %706 = arith.mulf %697, %634 : vector<2x16xf32>
    %707 = arith.mulf %691, %699 : vector<2x16xf32>
    %708 = arith.addf %706, %707 : vector<2x16xf32>
    %709 = math.tanh %708 : vector<2x16xf32>
    %710 = arith.mulf %705, %709 : vector<2x16xf32>
    %711 = arith.subf %710, %630 : vector<2x16xf32>
    %712 = vector.broadcast %676 : vector<2x1xf32> to vector<2x16xf32>
    %713 = arith.mulf %712, %711 : vector<2x16xf32>
    %714 = arith.addf %630, %713 : vector<2x16xf32>
    %715 = arith.subf %708, %634 : vector<2x16xf32>
    %716 = vector.broadcast %676 : vector<2x1xf32> to vector<2x16xf32>
    %717 = arith.mulf %716, %715 : vector<2x16xf32>
    %718 = arith.addf %634, %717 : vector<2x16xf32>
    %719 = vector.extract_strided_slice %162 {offsets = [0, 6, 0], sizes = [2, 1, 64], strides = [1, 1, 1]} : vector<2x8x64xf32> to vector<2x1x64xf32>
    %720 = vector.shape_cast %719 : vector<2x1x64xf32> to vector<2x64xf32>
    %c0_181 = arith.constant 0 : index
    %c0_182 = arith.constant 0 : index
    %721 = vector.load %arg31[%c0_181, %c0_182] : memref<16x64xf32, #tpu.memory_space<vmem>>, vector<16x64xf32>
    %cst_183 = arith.constant dense<0.000000e+00> : vector<2x64xf32>
    %722 = tpu.matmul %668, %721, %cst_183 {dimension_numbers = #tpu.dot_dimension_numbers<[1], [0], [0], [1], [0, 0, 1, 1], [], []>} : vector<2x16xf32>, vector<16x64xf32>, vector<2x64xf32> -> vector<2x64xf32>
    %723 = arith.addf %720, %722 : vector<2x64xf32>
    %724 = vector.extract_strided_slice %723 {offsets = [0, 0], sizes = [2, 16], strides = [1, 1]} : vector<2x64xf32> to vector<2x16xf32>
    %725 = arith.negf %724 : vector<2x16xf32>
    %726 = math.exp %725 : vector<2x16xf32>
    %cst_184 = arith.constant 1.000000e+00 : f32
    %727 = vector.broadcast %cst_184 : f32 to vector<2x16xf32>
    %728 = arith.addf %727, %726 : vector<2x16xf32>
    %729 = arith.divf %727, %728 : vector<2x16xf32>
    %730 = vector.extract_strided_slice %723 {offsets = [0, 16], sizes = [2, 16], strides = [1, 1]} : vector<2x64xf32> to vector<2x16xf32>
    %731 = arith.negf %730 : vector<2x16xf32>
    %732 = math.exp %731 : vector<2x16xf32>
    %cst_185 = arith.constant 1.000000e+00 : f32
    %733 = vector.broadcast %cst_185 : f32 to vector<2x16xf32>
    %734 = arith.addf %733, %732 : vector<2x16xf32>
    %735 = arith.divf %733, %734 : vector<2x16xf32>
    %736 = vector.extract_strided_slice %723 {offsets = [0, 32], sizes = [2, 16], strides = [1, 1]} : vector<2x64xf32> to vector<2x16xf32>
    %737 = math.tanh %736 : vector<2x16xf32>
    %738 = vector.extract_strided_slice %723 {offsets = [0, 48], sizes = [2, 16], strides = [1, 1]} : vector<2x64xf32> to vector<2x16xf32>
    %739 = arith.negf %738 : vector<2x16xf32>
    %740 = math.exp %739 : vector<2x16xf32>
    %cst_186 = arith.constant 1.000000e+00 : f32
    %741 = vector.broadcast %cst_186 : f32 to vector<2x16xf32>
    %742 = arith.addf %741, %740 : vector<2x16xf32>
    %743 = arith.divf %741, %742 : vector<2x16xf32>
    %744 = arith.mulf %735, %672 : vector<2x16xf32>
    %745 = arith.mulf %729, %737 : vector<2x16xf32>
    %746 = arith.addf %744, %745 : vector<2x16xf32>
    %747 = math.tanh %746 : vector<2x16xf32>
    %748 = arith.mulf %743, %747 : vector<2x16xf32>
    %749 = arith.subf %748, %668 : vector<2x16xf32>
    %750 = vector.broadcast %680 : vector<2x1xf32> to vector<2x16xf32>
    %751 = arith.mulf %750, %749 : vector<2x16xf32>
    %752 = arith.addf %668, %751 : vector<2x16xf32>
    %753 = arith.subf %746, %672 : vector<2x16xf32>
    %754 = vector.broadcast %680 : vector<2x1xf32> to vector<2x16xf32>
    %755 = arith.mulf %754, %753 : vector<2x16xf32>
    %756 = arith.addf %672, %755 : vector<2x16xf32>
    %c7_i32 = arith.constant 7 : i32
    %757 = vector.broadcast %c7_i32 : i32 to vector<2x1xi32>
    %758 = arith.cmpi sgt, %163, %757 : vector<2x1xi32>
    %759 = arith.extui %758 : vector<2x1xi1> to vector<2x1xi32>
    %760 = arith.sitofp %759 : vector<2x1xi32> to vector<2x1xf32>
    %c7_i32_187 = arith.constant 7 : i32
    %761 = vector.broadcast %c7_i32_187 : i32 to vector<2x1xi32>
    %762 = arith.cmpi sgt, %164, %761 : vector<2x1xi32>
    %763 = arith.extui %762 : vector<2x1xi1> to vector<2x1xi32>
    %764 = arith.sitofp %763 : vector<2x1xi32> to vector<2x1xf32>
    %765 = vector.extract_strided_slice %154 {offsets = [0, 7, 0], sizes = [2, 1, 64], strides = [1, 1, 1]} : vector<2x8x64xf32> to vector<2x1x64xf32>
    %766 = vector.shape_cast %765 : vector<2x1x64xf32> to vector<2x64xf32>
    %c0_188 = arith.constant 0 : index
    %c0_189 = arith.constant 0 : index
    %767 = vector.load %arg25[%c0_188, %c0_189] : memref<16x64xf32, #tpu.memory_space<vmem>>, vector<16x64xf32>
    %cst_190 = arith.constant dense<0.000000e+00> : vector<2x64xf32>
    %768 = tpu.matmul %714, %767, %cst_190 {dimension_numbers = #tpu.dot_dimension_numbers<[1], [0], [0], [1], [0, 0, 1, 1], [], []>} : vector<2x16xf32>, vector<16x64xf32>, vector<2x64xf32> -> vector<2x64xf32>
    %769 = arith.addf %766, %768 : vector<2x64xf32>
    %770 = vector.extract_strided_slice %769 {offsets = [0, 0], sizes = [2, 16], strides = [1, 1]} : vector<2x64xf32> to vector<2x16xf32>
    %771 = arith.negf %770 : vector<2x16xf32>
    %772 = math.exp %771 : vector<2x16xf32>
    %cst_191 = arith.constant 1.000000e+00 : f32
    %773 = vector.broadcast %cst_191 : f32 to vector<2x16xf32>
    %774 = arith.addf %773, %772 : vector<2x16xf32>
    %775 = arith.divf %773, %774 : vector<2x16xf32>
    %776 = vector.extract_strided_slice %769 {offsets = [0, 16], sizes = [2, 16], strides = [1, 1]} : vector<2x64xf32> to vector<2x16xf32>
    %777 = arith.negf %776 : vector<2x16xf32>
    %778 = math.exp %777 : vector<2x16xf32>
    %cst_192 = arith.constant 1.000000e+00 : f32
    %779 = vector.broadcast %cst_192 : f32 to vector<2x16xf32>
    %780 = arith.addf %779, %778 : vector<2x16xf32>
    %781 = arith.divf %779, %780 : vector<2x16xf32>
    %782 = vector.extract_strided_slice %769 {offsets = [0, 32], sizes = [2, 16], strides = [1, 1]} : vector<2x64xf32> to vector<2x16xf32>
    %783 = math.tanh %782 : vector<2x16xf32>
    %784 = vector.extract_strided_slice %769 {offsets = [0, 48], sizes = [2, 16], strides = [1, 1]} : vector<2x64xf32> to vector<2x16xf32>
    %785 = arith.negf %784 : vector<2x16xf32>
    %786 = math.exp %785 : vector<2x16xf32>
    %cst_193 = arith.constant 1.000000e+00 : f32
    %787 = vector.broadcast %cst_193 : f32 to vector<2x16xf32>
    %788 = arith.addf %787, %786 : vector<2x16xf32>
    %789 = arith.divf %787, %788 : vector<2x16xf32>
    %790 = arith.mulf %781, %718 : vector<2x16xf32>
    %791 = arith.mulf %775, %783 : vector<2x16xf32>
    %792 = arith.addf %790, %791 : vector<2x16xf32>
    %793 = math.tanh %792 : vector<2x16xf32>
    %794 = arith.mulf %789, %793 : vector<2x16xf32>
    %795 = arith.subf %794, %714 : vector<2x16xf32>
    %796 = vector.broadcast %760 : vector<2x1xf32> to vector<2x16xf32>
    %797 = arith.mulf %796, %795 : vector<2x16xf32>
    %798 = arith.addf %714, %797 : vector<2x16xf32>
    %799 = vector.extract_strided_slice %162 {offsets = [0, 7, 0], sizes = [2, 1, 64], strides = [1, 1, 1]} : vector<2x8x64xf32> to vector<2x1x64xf32>
    %800 = vector.shape_cast %799 : vector<2x1x64xf32> to vector<2x64xf32>
    %c0_194 = arith.constant 0 : index
    %c0_195 = arith.constant 0 : index
    %801 = vector.load %arg31[%c0_194, %c0_195] : memref<16x64xf32, #tpu.memory_space<vmem>>, vector<16x64xf32>
    %cst_196 = arith.constant dense<0.000000e+00> : vector<2x64xf32>
    %802 = tpu.matmul %752, %801, %cst_196 {dimension_numbers = #tpu.dot_dimension_numbers<[1], [0], [0], [1], [0, 0, 1, 1], [], []>} : vector<2x16xf32>, vector<16x64xf32>, vector<2x64xf32> -> vector<2x64xf32>
    %803 = arith.addf %800, %802 : vector<2x64xf32>
    %804 = vector.extract_strided_slice %803 {offsets = [0, 0], sizes = [2, 16], strides = [1, 1]} : vector<2x64xf32> to vector<2x16xf32>
    %805 = arith.negf %804 : vector<2x16xf32>
    %806 = math.exp %805 : vector<2x16xf32>
    %cst_197 = arith.constant 1.000000e+00 : f32
    %807 = vector.broadcast %cst_197 : f32 to vector<2x16xf32>
    %808 = arith.addf %807, %806 : vector<2x16xf32>
    %809 = arith.divf %807, %808 : vector<2x16xf32>
    %810 = vector.extract_strided_slice %803 {offsets = [0, 16], sizes = [2, 16], strides = [1, 1]} : vector<2x64xf32> to vector<2x16xf32>
    %811 = arith.negf %810 : vector<2x16xf32>
    %812 = math.exp %811 : vector<2x16xf32>
    %cst_198 = arith.constant 1.000000e+00 : f32
    %813 = vector.broadcast %cst_198 : f32 to vector<2x16xf32>
    %814 = arith.addf %813, %812 : vector<2x16xf32>
    %815 = arith.divf %813, %814 : vector<2x16xf32>
    %816 = vector.extract_strided_slice %803 {offsets = [0, 32], sizes = [2, 16], strides = [1, 1]} : vector<2x64xf32> to vector<2x16xf32>
    %817 = math.tanh %816 : vector<2x16xf32>
    %818 = vector.extract_strided_slice %803 {offsets = [0, 48], sizes = [2, 16], strides = [1, 1]} : vector<2x64xf32> to vector<2x16xf32>
    %819 = arith.negf %818 : vector<2x16xf32>
    %820 = math.exp %819 : vector<2x16xf32>
    %cst_199 = arith.constant 1.000000e+00 : f32
    %821 = vector.broadcast %cst_199 : f32 to vector<2x16xf32>
    %822 = arith.addf %821, %820 : vector<2x16xf32>
    %823 = arith.divf %821, %822 : vector<2x16xf32>
    %824 = arith.mulf %815, %756 : vector<2x16xf32>
    %825 = arith.mulf %809, %817 : vector<2x16xf32>
    %826 = arith.addf %824, %825 : vector<2x16xf32>
    %827 = math.tanh %826 : vector<2x16xf32>
    %828 = arith.mulf %823, %827 : vector<2x16xf32>
    %829 = arith.subf %828, %752 : vector<2x16xf32>
    %830 = vector.broadcast %764 : vector<2x1xf32> to vector<2x16xf32>
    %831 = arith.mulf %830, %829 : vector<2x16xf32>
    %832 = arith.addf %752, %831 : vector<2x16xf32>
    %c0_200 = arith.constant 0 : index
    %c0_201 = arith.constant 0 : index
    %833 = vector.load %arg27[%c0_200, %c0_201] : memref<16x16xf32, #tpu.memory_space<vmem>>, vector<16x16xf32>
    %cst_202 = arith.constant dense<0.000000e+00> : vector<2x16xf32>
    %834 = tpu.matmul %798, %833, %cst_202 {dimension_numbers = #tpu.dot_dimension_numbers<[1], [0], [0], [1], [0, 0, 1, 1], [], []>} : vector<2x16xf32>, vector<16x16xf32>, vector<2x16xf32> -> vector<2x16xf32>
    %c0_203 = arith.constant 0 : index
    %c0_204 = arith.constant 0 : index
    %835 = vector.load %arg28[%c0_203, %c0_204] : memref<1x16xf32, #tpu.memory_space<vmem>>, vector<1x16xf32>
    %836 = vector.broadcast %835 : vector<1x16xf32> to vector<2x16xf32>
    %837 = arith.addf %834, %836 : vector<2x16xf32>
    %c0_205 = arith.constant 0 : index
    %c0_206 = arith.constant 0 : index
    %838 = vector.load %arg33[%c0_205, %c0_206] : memref<16x16xf32, #tpu.memory_space<vmem>>, vector<16x16xf32>
    %cst_207 = arith.constant dense<0.000000e+00> : vector<2x16xf32>
    %839 = tpu.matmul %832, %838, %cst_207 {dimension_numbers = #tpu.dot_dimension_numbers<[1], [0], [0], [1], [0, 0, 1, 1], [], []>} : vector<2x16xf32>, vector<16x16xf32>, vector<2x16xf32> -> vector<2x16xf32>
    %c0_208 = arith.constant 0 : index
    %c0_209 = arith.constant 0 : index
    %840 = vector.load %arg34[%c0_208, %c0_209] : memref<1x16xf32, #tpu.memory_space<vmem>>, vector<1x16xf32>
    %841 = vector.broadcast %840 : vector<1x16xf32> to vector<2x16xf32>
    %842 = arith.addf %839, %841 : vector<2x16xf32>
    %c0_210 = arith.constant 0 : index
    %c0_211 = arith.constant 0 : index
    %843 = vector.load %arg35[%c0_210, %c0_211] : memref<32x32xf32, #tpu.memory_space<vmem>>, vector<32x32xf32>
    %cst_212 = arith.constant dense<0.000000e+00> : vector<2x32xf32>
    %844 = tpu.matmul %146, %843, %cst_212 {dimension_numbers = #tpu.dot_dimension_numbers<[1], [0], [0], [1], [0, 0, 1, 1], [], []>} : vector<2x32xf32>, vector<32x32xf32>, vector<2x32xf32> -> vector<2x32xf32>
    %c0_213 = arith.constant 0 : index
    %c0_214 = arith.constant 0 : index
    %845 = vector.load %arg36[%c0_213, %c0_214] : memref<1x32xf32, #tpu.memory_space<vmem>>, vector<1x32xf32>
    %846 = vector.broadcast %845 : vector<1x32xf32> to vector<2x32xf32>
    %847 = arith.addf %844, %846 : vector<2x32xf32>
    %848 = math.tanh %847 : vector<2x32xf32>
    %c0_215 = arith.constant 0 : index
    %c0_216 = arith.constant 0 : index
    %849 = vector.load %arg37[%c0_215, %c0_216] : memref<32x32xf32, #tpu.memory_space<vmem>>, vector<32x32xf32>
    %cst_217 = arith.constant dense<0.000000e+00> : vector<2x32xf32>
    %850 = tpu.matmul %848, %849, %cst_217 {dimension_numbers = #tpu.dot_dimension_numbers<[1], [0], [0], [1], [0, 0, 1, 1], [], []>} : vector<2x32xf32>, vector<32x32xf32>, vector<2x32xf32> -> vector<2x32xf32>
    %c0_218 = arith.constant 0 : index
    %c0_219 = arith.constant 0 : index
    %851 = vector.load %arg38[%c0_218, %c0_219] : memref<1x32xf32, #tpu.memory_space<vmem>>, vector<1x32xf32>
    %852 = vector.broadcast %851 : vector<1x32xf32> to vector<2x32xf32>
    %853 = arith.addf %850, %852 : vector<2x32xf32>
    %854 = math.tanh %853 : vector<2x32xf32>
    %c0_220 = arith.constant 0 : index
    %c0_221 = arith.constant 0 : index
    %855 = vector.load %arg39[%c0_220, %c0_221] : memref<32x128xf32, #tpu.memory_space<vmem>>, vector<32x128xf32>
    %cst_222 = arith.constant dense<0.000000e+00> : vector<2x128xf32>
    %856 = tpu.matmul %854, %855, %cst_222 {dimension_numbers = #tpu.dot_dimension_numbers<[1], [0], [0], [1], [0, 0, 1, 1], [], []>} : vector<2x32xf32>, vector<32x128xf32>, vector<2x128xf32> -> vector<2x128xf32>
    %c0_223 = arith.constant 0 : index
    %c0_224 = arith.constant 0 : index
    %857 = vector.load %arg40[%c0_223, %c0_224] : memref<1x128xf32, #tpu.memory_space<vmem>>, vector<1x128xf32>
    %858 = vector.broadcast %857 : vector<1x128xf32> to vector<2x128xf32>
    %859 = arith.addf %856, %858 : vector<2x128xf32>
    %c0_225 = arith.constant 0 : index
    %c0_226 = arith.constant 0 : index
    %860 = vector.load %arg41[%c0_225, %c0_226] : memref<16x32xf32, #tpu.memory_space<vmem>>, vector<16x32xf32>
    %cst_227 = arith.constant dense<0.000000e+00> : vector<2x32xf32>
    %861 = tpu.matmul %837, %860, %cst_227 {dimension_numbers = #tpu.dot_dimension_numbers<[1], [0], [0], [1], [0, 0, 1, 1], [], []>} : vector<2x16xf32>, vector<16x32xf32>, vector<2x32xf32> -> vector<2x32xf32>
    %c0_228 = arith.constant 0 : index
    %c0_229 = arith.constant 0 : index
    %862 = vector.load %arg42[%c0_228, %c0_229] : memref<1x32xf32, #tpu.memory_space<vmem>>, vector<1x32xf32>
    %863 = vector.broadcast %862 : vector<1x32xf32> to vector<2x32xf32>
    %864 = arith.addf %861, %863 : vector<2x32xf32>
    %865 = math.tanh %864 : vector<2x32xf32>
    %c0_230 = arith.constant 0 : index
    %c0_231 = arith.constant 0 : index
    %866 = vector.load %arg43[%c0_230, %c0_231] : memref<32x32xf32, #tpu.memory_space<vmem>>, vector<32x32xf32>
    %cst_232 = arith.constant dense<0.000000e+00> : vector<2x32xf32>
    %867 = tpu.matmul %865, %866, %cst_232 {dimension_numbers = #tpu.dot_dimension_numbers<[1], [0], [0], [1], [0, 0, 1, 1], [], []>} : vector<2x32xf32>, vector<32x32xf32>, vector<2x32xf32> -> vector<2x32xf32>
    %c0_233 = arith.constant 0 : index
    %c0_234 = arith.constant 0 : index
    %868 = vector.load %arg44[%c0_233, %c0_234] : memref<1x32xf32, #tpu.memory_space<vmem>>, vector<1x32xf32>
    %869 = vector.broadcast %868 : vector<1x32xf32> to vector<2x32xf32>
    %870 = arith.addf %867, %869 : vector<2x32xf32>
    %871 = math.tanh %870 : vector<2x32xf32>
    %c0_235 = arith.constant 0 : index
    %c0_236 = arith.constant 0 : index
    %872 = vector.load %arg45[%c0_235, %c0_236] : memref<32x128xf32, #tpu.memory_space<vmem>>, vector<32x128xf32>
    %cst_237 = arith.constant dense<0.000000e+00> : vector<2x128xf32>
    %873 = tpu.matmul %871, %872, %cst_237 {dimension_numbers = #tpu.dot_dimension_numbers<[1], [0], [0], [1], [0, 0, 1, 1], [], []>} : vector<2x32xf32>, vector<32x128xf32>, vector<2x128xf32> -> vector<2x128xf32>
    %c0_238 = arith.constant 0 : index
    %c0_239 = arith.constant 0 : index
    %874 = vector.load %arg46[%c0_238, %c0_239] : memref<1x128xf32, #tpu.memory_space<vmem>>, vector<1x128xf32>
    %875 = vector.broadcast %874 : vector<1x128xf32> to vector<2x128xf32>
    %876 = arith.addf %873, %875 : vector<2x128xf32>
    %877 = arith.addf %859, %876 : vector<2x128xf32>
    %c0_240 = arith.constant 0 : index
    %c0_241 = arith.constant 0 : index
    %878 = vector.load %arg47[%c0_240, %c0_241] : memref<16x32xf32, #tpu.memory_space<vmem>>, vector<16x32xf32>
    %cst_242 = arith.constant dense<0.000000e+00> : vector<2x32xf32>
    %879 = tpu.matmul %842, %878, %cst_242 {dimension_numbers = #tpu.dot_dimension_numbers<[1], [0], [0], [1], [0, 0, 1, 1], [], []>} : vector<2x16xf32>, vector<16x32xf32>, vector<2x32xf32> -> vector<2x32xf32>
    %c0_243 = arith.constant 0 : index
    %c0_244 = arith.constant 0 : index
    %880 = vector.load %arg48[%c0_243, %c0_244] : memref<1x32xf32, #tpu.memory_space<vmem>>, vector<1x32xf32>
    %881 = vector.broadcast %880 : vector<1x32xf32> to vector<2x32xf32>
    %882 = arith.addf %879, %881 : vector<2x32xf32>
    %883 = math.tanh %882 : vector<2x32xf32>
    %c0_245 = arith.constant 0 : index
    %c0_246 = arith.constant 0 : index
    %884 = vector.load %arg49[%c0_245, %c0_246] : memref<32x32xf32, #tpu.memory_space<vmem>>, vector<32x32xf32>
    %cst_247 = arith.constant dense<0.000000e+00> : vector<2x32xf32>
    %885 = tpu.matmul %883, %884, %cst_247 {dimension_numbers = #tpu.dot_dimension_numbers<[1], [0], [0], [1], [0, 0, 1, 1], [], []>} : vector<2x32xf32>, vector<32x32xf32>, vector<2x32xf32> -> vector<2x32xf32>
    %c0_248 = arith.constant 0 : index
    %c0_249 = arith.constant 0 : index
    %886 = vector.load %arg50[%c0_248, %c0_249] : memref<1x32xf32, #tpu.memory_space<vmem>>, vector<1x32xf32>
    %887 = vector.broadcast %886 : vector<1x32xf32> to vector<2x32xf32>
    %888 = arith.addf %885, %887 : vector<2x32xf32>
    %889 = math.tanh %888 : vector<2x32xf32>
    %c0_250 = arith.constant 0 : index
    %c0_251 = arith.constant 0 : index
    %890 = vector.load %arg51[%c0_250, %c0_251] : memref<32x128xf32, #tpu.memory_space<vmem>>, vector<32x128xf32>
    %cst_252 = arith.constant dense<0.000000e+00> : vector<2x128xf32>
    %891 = tpu.matmul %889, %890, %cst_252 {dimension_numbers = #tpu.dot_dimension_numbers<[1], [0], [0], [1], [0, 0, 1, 1], [], []>} : vector<2x32xf32>, vector<32x128xf32>, vector<2x128xf32> -> vector<2x128xf32>
    %c0_253 = arith.constant 0 : index
    %c0_254 = arith.constant 0 : index
    %892 = vector.load %arg52[%c0_253, %c0_254] : memref<1x128xf32, #tpu.memory_space<vmem>>, vector<1x128xf32>
    %893 = vector.broadcast %892 : vector<1x128xf32> to vector<2x128xf32>
    %894 = arith.addf %891, %893 : vector<2x128xf32>
    %895 = arith.addf %877, %894 : vector<2x128xf32>
    %cst_255 = arith.constant 0.333333343 : f32
    %896 = vector.broadcast %cst_255 : f32 to vector<2x128xf32>
    %897 = arith.mulf %895, %896 : vector<2x128xf32>
    %c0_256 = arith.constant 0 : index
    %c0_257 = arith.constant 0 : index
    %898 = vector.load %arg53[%c0_256, %c0_257] : memref<2x128xf32, #tpu.memory_space<vmem>>, vector<2x128xf32>
    tpu.vector_store %arg53[%c0_256, %c0_257], %897 {strides = array<i32>} : memref<2x128xf32, #tpu.memory_space<vmem>>, vector<2x128xf32>,
    return
  }
  func.func @transform_0(%arg0: i32) -> (i32, i32, i32) {
    %c0_i32 = arith.constant 0 : i32
    %c0_i32_0 = arith.constant 0 : i32
    %c0_i32_1 = arith.constant 0 : i32
    return %arg0, %c0_i32, %c0_i32_0 : i32, i32, i32
  }
  func.func @transform_1(%arg0: i32) -> (i32, i32, i32) {
    %c0_i32 = arith.constant 0 : i32
    %c0_i32_0 = arith.constant 0 : i32
    %c0_i32_1 = arith.constant 0 : i32
    return %arg0, %c0_i32, %c0_i32_0 : i32, i32, i32
  }
  func.func @transform_2(%arg0: i32) -> (i32, i32) {
    %c0_i32 = arith.constant 0 : i32
    %c0_i32_0 = arith.constant 0 : i32
    return %arg0, %c0_i32 : i32, i32
  }
  func.func @transform_3(%arg0: i32) -> (i32, i32) {
    %c0_i32 = arith.constant 0 : i32
    %c0_i32_0 = arith.constant 0 : i32
    return %arg0, %c0_i32 : i32, i32
  }
  func.func @transform_4(%arg0: i32) -> (i32, i32) {
    %c0_i32 = arith.constant 0 : i32
    %c0_i32_0 = arith.constant 0 : i32
    %c0_i32_1 = arith.constant 0 : i32
    return %c0_i32, %c0_i32_0 : i32, i32
  }
  func.func @transform_5(%arg0: i32) -> (i32, i32) {
    %c0_i32 = arith.constant 0 : i32
    %c0_i32_0 = arith.constant 0 : i32
    %c0_i32_1 = arith.constant 0 : i32
    return %c0_i32, %c0_i32_0 : i32, i32
  }
  func.func @transform_6(%arg0: i32) -> (i32, i32) {
    %c0_i32 = arith.constant 0 : i32
    %c0_i32_0 = arith.constant 0 : i32
    %c0_i32_1 = arith.constant 0 : i32
    return %c0_i32, %c0_i32_0 : i32, i32
  }
  func.func @transform_7(%arg0: i32) -> (i32, i32) {
    %c0_i32 = arith.constant 0 : i32
    %c0_i32_0 = arith.constant 0 : i32
    %c0_i32_1 = arith.constant 0 : i32
    return %c0_i32, %c0_i32_0 : i32, i32
  }
  func.func @transform_8(%arg0: i32) -> (i32, i32) {
    %c0_i32 = arith.constant 0 : i32
    %c0_i32_0 = arith.constant 0 : i32
    %c0_i32_1 = arith.constant 0 : i32
    return %c0_i32, %c0_i32_0 : i32, i32
  }
  func.func @transform_9(%arg0: i32) -> (i32, i32) {
    %c0_i32 = arith.constant 0 : i32
    %c0_i32_0 = arith.constant 0 : i32
    %c0_i32_1 = arith.constant 0 : i32
    return %c0_i32, %c0_i32_0 : i32, i32
  }
  func.func @transform_10(%arg0: i32) -> (i32, i32) {
    %c0_i32 = arith.constant 0 : i32
    %c0_i32_0 = arith.constant 0 : i32
    %c0_i32_1 = arith.constant 0 : i32
    return %c0_i32, %c0_i32_0 : i32, i32
  }
  func.func @transform_11(%arg0: i32) -> (i32, i32) {
    %c0_i32 = arith.constant 0 : i32
    %c0_i32_0 = arith.constant 0 : i32
    %c0_i32_1 = arith.constant 0 : i32
    return %c0_i32, %c0_i32_0 : i32, i32
  }
  func.func @transform_12(%arg0: i32) -> (i32, i32) {
    %c0_i32 = arith.constant 0 : i32
    %c0_i32_0 = arith.constant 0 : i32
    %c0_i32_1 = arith.constant 0 : i32
    return %c0_i32, %c0_i32_0 : i32, i32
  }
  func.func @transform_13(%arg0: i32) -> (i32, i32) {
    %c0_i32 = arith.constant 0 : i32
    %c0_i32_0 = arith.constant 0 : i32
    %c0_i32_1 = arith.constant 0 : i32
    return %c0_i32, %c0_i32_0 : i32, i32
  }
  func.func @transform_14(%arg0: i32) -> (i32, i32) {
    %c0_i32 = arith.constant 0 : i32
    %c0_i32_0 = arith.constant 0 : i32
    %c0_i32_1 = arith.constant 0 : i32
    return %c0_i32, %c0_i32_0 : i32, i32
  }
  func.func @transform_15(%arg0: i32) -> (i32, i32) {
    %c0_i32 = arith.constant 0 : i32
    %c0_i32_0 = arith.constant 0 : i32
    %c0_i32_1 = arith.constant 0 : i32
    return %c0_i32, %c0_i32_0 : i32, i32
  }
  func.func @transform_16(%arg0: i32) -> (i32, i32) {
    %c0_i32 = arith.constant 0 : i32
    %c0_i32_0 = arith.constant 0 : i32
    %c0_i32_1 = arith.constant 0 : i32
    return %c0_i32, %c0_i32_0 : i32, i32
  }
  func.func @transform_17(%arg0: i32) -> (i32, i32) {
    %c0_i32 = arith.constant 0 : i32
    %c0_i32_0 = arith.constant 0 : i32
    %c0_i32_1 = arith.constant 0 : i32
    return %c0_i32, %c0_i32_0 : i32, i32
  }
  func.func @transform_18(%arg0: i32) -> (i32, i32) {
    %c0_i32 = arith.constant 0 : i32
    %c0_i32_0 = arith.constant 0 : i32
    %c0_i32_1 = arith.constant 0 : i32
    return %c0_i32, %c0_i32_0 : i32, i32
  }
  func.func @transform_19(%arg0: i32) -> (i32, i32) {
    %c0_i32 = arith.constant 0 : i32
    %c0_i32_0 = arith.constant 0 : i32
    %c0_i32_1 = arith.constant 0 : i32
    return %c0_i32, %c0_i32_0 : i32, i32
  }
  func.func @transform_20(%arg0: i32) -> (i32, i32) {
    %c0_i32 = arith.constant 0 : i32
    %c0_i32_0 = arith.constant 0 : i32
    %c0_i32_1 = arith.constant 0 : i32
    return %c0_i32, %c0_i32_0 : i32, i32
  }
  func.func @transform_21(%arg0: i32) -> (i32, i32) {
    %c0_i32 = arith.constant 0 : i32
    %c0_i32_0 = arith.constant 0 : i32
    %c0_i32_1 = arith.constant 0 : i32
    return %c0_i32, %c0_i32_0 : i32, i32
  }
  func.func @transform_22(%arg0: i32) -> (i32, i32, i32) {
    %c0_i32 = arith.constant 0 : i32
    %c0_i32_0 = arith.constant 0 : i32
    %c0_i32_1 = arith.constant 0 : i32
    return %arg0, %c0_i32, %c0_i32_0 : i32, i32, i32
  }
  func.func @transform_23(%arg0: i32) -> (i32, i32) {
    %c0_i32 = arith.constant 0 : i32
    %c0_i32_0 = arith.constant 0 : i32
    %c0_i32_1 = arith.constant 0 : i32
    return %c0_i32, %c0_i32_0 : i32, i32
  }
  func.func @transform_24(%arg0: i32) -> (i32, i32) {
    %c0_i32 = arith.constant 0 : i32
    %c0_i32_0 = arith.constant 0 : i32
    %c0_i32_1 = arith.constant 0 : i32
    return %c0_i32, %c0_i32_0 : i32, i32
  }
  func.func @transform_25(%arg0: i32) -> (i32, i32) {
    %c0_i32 = arith.constant 0 : i32
    %c0_i32_0 = arith.constant 0 : i32
    %c0_i32_1 = arith.constant 0 : i32
    return %c0_i32, %c0_i32_0 : i32, i32
  }
  func.func @transform_26(%arg0: i32) -> (i32, i32) {
    %c0_i32 = arith.constant 0 : i32
    %c0_i32_0 = arith.constant 0 : i32
    %c0_i32_1 = arith.constant 0 : i32
    return %c0_i32, %c0_i32_0 : i32, i32
  }
  func.func @transform_27(%arg0: i32) -> (i32, i32) {
    %c0_i32 = arith.constant 0 : i32
    %c0_i32_0 = arith.constant 0 : i32
    %c0_i32_1 = arith.constant 0 : i32
    return %c0_i32, %c0_i32_0 : i32, i32
  }
  func.func @transform_28(%arg0: i32) -> (i32, i32, i32) {
    %c0_i32 = arith.constant 0 : i32
    %c0_i32_0 = arith.constant 0 : i32
    %c0_i32_1 = arith.constant 0 : i32
    return %arg0, %c0_i32, %c0_i32_0 : i32, i32, i32
  }
  func.func @transform_29(%arg0: i32) -> (i32, i32) {
    %c0_i32 = arith.constant 0 : i32
    %c0_i32_0 = arith.constant 0 : i32
    %c0_i32_1 = arith.constant 0 : i32
    return %c0_i32, %c0_i32_0 : i32, i32
  }
  func.func @transform_30(%arg0: i32) -> (i32, i32) {
    %c0_i32 = arith.constant 0 : i32
    %c0_i32_0 = arith.constant 0 : i32
    %c0_i32_1 = arith.constant 0 : i32
    return %c0_i32, %c0_i32_0 : i32, i32
  }
  func.func @transform_31(%arg0: i32) -> (i32, i32) {
    %c0_i32 = arith.constant 0 : i32
    %c0_i32_0 = arith.constant 0 : i32
    %c0_i32_1 = arith.constant 0 : i32
    return %c0_i32, %c0_i32_0 : i32, i32
  }
  func.func @transform_32(%arg0: i32) -> (i32, i32) {
    %c0_i32 = arith.constant 0 : i32
    %c0_i32_0 = arith.constant 0 : i32
    %c0_i32_1 = arith.constant 0 : i32
    return %c0_i32, %c0_i32_0 : i32, i32
  }
  func.func @transform_33(%arg0: i32) -> (i32, i32) {
    %c0_i32 = arith.constant 0 : i32
    %c0_i32_0 = arith.constant 0 : i32
    %c0_i32_1 = arith.constant 0 : i32
    return %c0_i32, %c0_i32_0 : i32, i32
  }
  func.func @transform_34(%arg0: i32) -> (i32, i32) {
    %c0_i32 = arith.constant 0 : i32
    %c0_i32_0 = arith.constant 0 : i32
    %c0_i32_1 = arith.constant 0 : i32
    return %c0_i32, %c0_i32_0 : i32, i32
  }
  func.func @transform_35(%arg0: i32) -> (i32, i32) {
    %c0_i32 = arith.constant 0 : i32
    %c0_i32_0 = arith.constant 0 : i32
    %c0_i32_1 = arith.constant 0 : i32
    return %c0_i32, %c0_i32_0 : i32, i32
  }
  func.func @transform_36(%arg0: i32) -> (i32, i32) {
    %c0_i32 = arith.constant 0 : i32
    %c0_i32_0 = arith.constant 0 : i32
    %c0_i32_1 = arith.constant 0 : i32
    return %c0_i32, %c0_i32_0 : i32, i32
  }
  func.func @transform_37(%arg0: i32) -> (i32, i32) {
    %c0_i32 = arith.constant 0 : i32
    %c0_i32_0 = arith.constant 0 : i32
    %c0_i32_1 = arith.constant 0 : i32
    return %c0_i32, %c0_i32_0 : i32, i32
  }
  func.func @transform_38(%arg0: i32) -> (i32, i32) {
    %c0_i32 = arith.constant 0 : i32
    %c0_i32_0 = arith.constant 0 : i32
    %c0_i32_1 = arith.constant 0 : i32
    return %c0_i32, %c0_i32_0 : i32, i32
  }
  func.func @transform_39(%arg0: i32) -> (i32, i32) {
    %c0_i32 = arith.constant 0 : i32
    %c0_i32_0 = arith.constant 0 : i32
    %c0_i32_1 = arith.constant 0 : i32
    return %c0_i32, %c0_i32_0 : i32, i32
  }
  func.func @transform_40(%arg0: i32) -> (i32, i32) {
    %c0_i32 = arith.constant 0 : i32
    %c0_i32_0 = arith.constant 0 : i32
    %c0_i32_1 = arith.constant 0 : i32
    return %c0_i32, %c0_i32_0 : i32, i32
  }
  func.func @transform_41(%arg0: i32) -> (i32, i32) {
    %c0_i32 = arith.constant 0 : i32
    %c0_i32_0 = arith.constant 0 : i32
    %c0_i32_1 = arith.constant 0 : i32
    return %c0_i32, %c0_i32_0 : i32, i32
  }
  func.func @transform_42(%arg0: i32) -> (i32, i32) {
    %c0_i32 = arith.constant 0 : i32
    %c0_i32_0 = arith.constant 0 : i32
    %c0_i32_1 = arith.constant 0 : i32
    return %c0_i32, %c0_i32_0 : i32, i32
  }
  func.func @transform_43(%arg0: i32) -> (i32, i32) {
    %c0_i32 = arith.constant 0 : i32
    %c0_i32_0 = arith.constant 0 : i32
    %c0_i32_1 = arith.constant 0 : i32
    return %c0_i32, %c0_i32_0 : i32, i32
  }
  func.func @transform_44(%arg0: i32) -> (i32, i32) {
    %c0_i32 = arith.constant 0 : i32
    %c0_i32_0 = arith.constant 0 : i32
    %c0_i32_1 = arith.constant 0 : i32
    return %c0_i32, %c0_i32_0 : i32, i32
  }
  func.func @transform_45(%arg0: i32) -> (i32, i32) {
    %c0_i32 = arith.constant 0 : i32
    %c0_i32_0 = arith.constant 0 : i32
    %c0_i32_1 = arith.constant 0 : i32
    return %c0_i32, %c0_i32_0 : i32, i32
  }
  func.func @transform_46(%arg0: i32) -> (i32, i32) {
    %c0_i32 = arith.constant 0 : i32
    %c0_i32_0 = arith.constant 0 : i32
    %c0_i32_1 = arith.constant 0 : i32
    return %c0_i32, %c0_i32_0 : i32, i32
  }
  func.func @transform_47(%arg0: i32) -> (i32, i32) {
    %c0_i32 = arith.constant 0 : i32
    %c0_i32_0 = arith.constant 0 : i32
    %c0_i32_1 = arith.constant 0 : i32
    return %c0_i32, %c0_i32_0 : i32, i32
  }
  func.func @transform_48(%arg0: i32) -> (i32, i32) {
    %c0_i32 = arith.constant 0 : i32
    %c0_i32_0 = arith.constant 0 : i32
    %c0_i32_1 = arith.constant 0 : i32
    return %c0_i32, %c0_i32_0 : i32, i32
  }
  func.func @transform_49(%arg0: i32) -> (i32, i32) {
    %c0_i32 = arith.constant 0 : i32
    %c0_i32_0 = arith.constant 0 : i32
    %c0_i32_1 = arith.constant 0 : i32
    return %c0_i32, %c0_i32_0 : i32, i32
  }
  func.func @transform_50(%arg0: i32) -> (i32, i32) {
    %c0_i32 = arith.constant 0 : i32
    %c0_i32_0 = arith.constant 0 : i32
    %c0_i32_1 = arith.constant 0 : i32
    return %c0_i32, %c0_i32_0 : i32, i32
  }
  func.func @transform_51(%arg0: i32) -> (i32, i32) {
    %c0_i32 = arith.constant 0 : i32
    %c0_i32_0 = arith.constant 0 : i32
    %c0_i32_1 = arith.constant 0 : i32
    return %c0_i32, %c0_i32_0 : i32, i32
  }
  func.func @transform_52(%arg0: i32) -> (i32, i32) {
    %c0_i32 = arith.constant 0 : i32
    %c0_i32_0 = arith.constant 0 : i32
    return %arg0, %c0_i32 : i32, i32
  }
}

</mosaic_0001>

<bundles_post_ra>
// kernel: tpu_custom_call.1
= control target key start
LH: loop header
LB: loop body
LE: loop exit
PB: predicated region body
PF: predicated region fallthrough
CT: control target
= control target key end

     0   :  { %s5724_s6 = smov 1   ;;  %s5725_s10 = smov 2   ;;  %s7245_s0 = inlined_call_operand.smem [shape: u32[53], index: -1, kind: input, shape index: {}] }
   0x1   :  { %s5827_s5 = sld [smem:[%s7245_s0]]   ;;  %s5726_s14 = smov 3  }
   0x2   :  { %s5832_s9 = sld [smem:[%s7245_s0 + %s5724_s6]]   ;;  %s5727_s18 = smov 4  }
   0x3   :  { %s5837_s13 = sld [smem:[%s7245_s0 + %s5725_s10]]   ;;  %s5728_s22 = smov 5  }
   0x4   :  { %s5842_s17 = sld [smem:[%s7245_s0 + %s5726_s14]]   ;;  %s5729_s26 = smov 6  }
   0x5   :  { %s5847_s21 = sld [smem:[%s7245_s0 + %s5727_s18]]   ;;  %s5730_s30 = smov 7  }
   0x6   :  { %s5852_s25 = sld [smem:[%s7245_s0 + %s5728_s22]]   ;;  %s5731_s4 = smov 8  }
   0x7   :  { %7272 = sst [smem:[#allocation68_spill]] %s5827_s5  ;;  %s5732_s10 = smov 9  }
   0x8   :  { %7273 = sst [smem:[#allocation69_spill]] %s5832_s9  ;;  %s5733_s15 = smov 10  }
   0x9   :  { %7274 = sst [smem:[#allocation70_spill]] %s5837_s13  ;;  %s5734_s20 = smov 11  }
   0xa   :  { %7275 = sst [smem:[#allocation71_spill]] %s5842_s17  ;;  %s5736_s1 = smov 13  }
   0xb   :  { %7276 = sst [smem:[#allocation72_spill]] %s5847_s21  ;;  %s5737_s7 = smov 14  }
   0xc   :  { %7277 = sst [smem:[#allocation73_spill]] %s5852_s25  ;;  %s5739_s22 = smov 16  }
   0xd   :  { %s5857_s29 = sld [smem:[%s7245_s0 + %s5729_s26]]   ;;  %s5735_s26 = smov 12  }
   0xe   :  { %s5862_s3 = sld [smem:[%s7245_s0 + %s5730_s30]]   ;;  %s5740_s28 = smov 17  }
   0xf   :  { %s5867_s8 = sld [smem:[%s7245_s0 + %s5731_s4]]  }
  0x10   :  { %s5872_s14 = sld [smem:[%s7245_s0 + %s5732_s10]]  }
  0x11   :  { %s5877_s19 = sld [smem:[%s7245_s0 + %s5733_s15]]   ;;  %s5738_s15 = smov 15  }
  0x12   :  { %s5882_s24 = sld [smem:[%s7245_s0 + %s5734_s20]]  }
  0x13   :  { %7278 = sst [smem:[#allocation74_spill]] %s5857_s29 }
  0x14   :  { %7279 = sst [smem:[#allocation75_spill]] %s5862_s3 }
  0x15   :  { %7280 = sst [smem:[#allocation76_spill]] %s5867_s8 }
  0x16   :  { %7281 = sst [smem:[#allocation77_spill]] %s5872_s14 }
  0x17   :  { %7282 = sst [smem:[#allocation78_spill]] %s5877_s19 }
  0x18   :  { %7283 = sst [smem:[#allocation79_spill]] %s5882_s24 }
  0x19   :  { %s5887_s30 = sld [smem:[%s7245_s0 + %s5735_s26]]  }
  0x1a   :  { %s5892_s6 = sld [smem:[%s7245_s0 + %s5736_s1]]  }
  0x1b   :  { %s5897_s12 = sld [smem:[%s7245_s0 + %s5737_s7]]   ;;  %s5741_s7 = smov 18  }
  0x1c   :  { %s5902_s20 = sld [smem:[%s7245_s0 + %s5738_s15]]   ;;  %s5742_s15 = smov 19  }
  0x1d   :  { %s5907_s27 = sld [smem:[%s7245_s0 + %s5739_s22]]   ;;  %s5743_s22 = smov 20  }
  0x1e   :  { %s5912_s4 = sld [smem:[%s7245_s0 + %s5740_s28]]   ;;  %s5744_s28 = smov 21  }
  0x1f   :  { %7284 = sst [smem:[#allocation80_spill]] %s5887_s30 }
  0x20   :  { %s5917_s17 = sld [smem:[%s7245_s0 + %s5741_s7]]   ;;  %s5745_s7 = smov 22  }
  0x21   :  { %7285 = sst [smem:[#allocation81_spill]] %s5897_s12 }
  0x22   :  { %s5922_s13 = sld [smem:[%s7245_s0 + %s5742_s15]]   ;;  %s5746_s15 = smov 23  }
  0x23   :  { %7286 = sst [smem:[#allocation82_spill]] %s5907_s27 }
  0x24   :  { %s5927_s30 = sld [smem:[%s7245_s0 + %s5743_s22]]   ;;  %s5747_s22 = smov 24  }
  0x25   :  { %s5932_s9 = sld [smem:[%s7245_s0 + %s5744_s28]]   ;;  %s5748_s28 = smov 25  }
  0x26   :  { %7287 = sst [smem:[#allocation83_spill]] %s5917_s17 }
  0x27   :  { %s5937_s17 = sld [smem:[%s7245_s0 + %s5745_s7]]   ;;  %s5749_s7 = smov 26  }
  0x28   :  { %7288 = sst [smem:[#allocation84_spill]] %s5922_s13 }
  0x29   :  { %s5942_s3 = sld [smem:[%s7245_s0 + %s5746_s15]]   ;;  %s5750_s15 = smov 27  }
  0x2a   :  { %s5947_s14 = sld [smem:[%s7245_s0 + %s5747_s22]]   ;;  %s5751_s22 = smov 28  }
  0x2b   :  { %7289 = sst [smem:[#allocation85_spill]] %s5932_s9 }
  0x2c   :  { %s5952_s25 = sld [smem:[%s7245_s0 + %s5748_s28]]   ;;  %s5752_s28 = smov 29  }
  0x2d   :  { %s5957_s21 = sld [smem:[%s7245_s0 + %s5749_s7]]   ;;  %s5753_s7 = smov 30  }
  0x2e   :  { %s5962_s19 = sld [smem:[%s7245_s0 + %s5750_s15]]   ;;  %s5754_s15 = smov 31  }
  0x2f   :  { %7290 = sst [smem:[#allocation86_spill]] %s5942_s3 }
  0x30   :  { %s5967_s8 = sld [smem:[%s7245_s0 + %s5751_s22]]   ;;  %s5755_s22 = smov 32  }
  0x31   :  { %s5972_s29 = sld [smem:[%s7245_s0 + %s5752_s28]]   ;;  %s5756_s28 = smov 33  }
  0x32   :  { %7291 = sst [smem:[#allocation87_spill]] %s5952_s25 }
  0x33   :  { %s5977_s5 = sld [smem:[%s7245_s0 + %s5753_s7]]   ;;  %s5757_s7 = smov 34  }
  0x34   :  { %7292 = sst [smem:[#allocation88_spill]] %s5962_s19 }
  0x35   :  { %s5982_s19 = sld [smem:[%s7245_s0 + %s5754_s15]]   ;;  %s5758_s15 = smov 35  }
  0x36   :  { %s5987_s25 = sld [smem:[%s7245_s0 + %s5755_s22]]   ;;  %s5759_s22 = smov 36  }
  0x37   :  { %7293 = sst [smem:[#allocation89_spill]] %s5972_s29 }
  0x38   :  { %s5992_s29 = sld [smem:[%s7245_s0 + %s5756_s28]]   ;;  %s5760_s28 = smov 37  }
  0x39   :  { %s5997_s3 = sld [smem:[%s7245_s0 + %s5757_s7]]   ;;  %s5761_s7 = smov 38  }
  0x3a   :  { %s6007_s9 = sld [smem:[%s7245_s0 + %s5759_s22]]   ;;  %s5763_s22 = smov 40  }
  0x3b   :  { %7294 = sst [smem:[#allocation90_spill]] %s5982_s19 }
  0x3c   :  { %s6002_s19 = sld [smem:[%s7245_s0 + %s5758_s15]]   ;;  %s5762_s15 = smov 39  }
  0x3d   :  { %s6017_s13 = sld [smem:[%s7245_s0 + %s5761_s7]]   ;;  %s5765_s7 = smov 42  }
  0x3e   :  { %7295 = sst [smem:[#allocation91_spill]] %s5992_s29 }
  0x3f   :  { %s6012_s29 = sld [smem:[%s7245_s0 + %s5760_s28]]   ;;  %s5764_s28 = smov 41  }
  0x40   :  { %7297 = sst [smem:[#allocation93_spill]] %s6007_s9 }
  0x41   :  { %s6027_s9 = sld [smem:[%s7245_s0 + %s5763_s22]]   ;;  %s5767_s22 = smov 44  }
  0x42   :  { %7296 = sst [smem:[#allocation92_spill]] %s6002_s19 }
  0x43   :  { %7298 = sst [smem:[#allocation94_spill]] %s6017_s13 }
  0x44   :  { %s6022_s19 = sld [smem:[%s7245_s0 + %s5762_s15]]   ;;  %s5766_s15 = smov 43  }
  0x45   :  { %s6032_s27 = sld [smem:[%s7245_s0 + %s5764_s28]]   ;;  %s5768_s28 = smov 45  }
  0x46   :  { %s6037_s13 = sld [smem:[%s7245_s0 + %s5765_s7]]   ;;  %s5769_s7 = smov 46  }
  0x47   :  { %s6047_s12 = sld [smem:[%s7245_s0 + %s5767_s22]]   ;;  %s5771_s22 = smov 48  }
  0x48   :  { %s6067_s24 = sld [smem:[%s7245_s0 + %s5771_s22]]   ;;  %s5775_s22 = smov 52  }
  0x4a   :  { %7299 = sst [smem:[#allocation95_spill]] %s6022_s19 }
  0x4b   :  { %7300 = sst [smem:[#allocation96_spill]] %s6032_s27 }
  0x4c   :  { %7301 = sst [smem:[#allocation97_spill]] %s6037_s13 }
  0x4d   :  { %s6042_s19 = sld [smem:[%s7245_s0 + %s5766_s15]]   ;;  %s5770_s15 = smov 47  }
  0x4e   :  { %s6052_s27 = sld [smem:[%s7245_s0 + %s5768_s28]]   ;;  %s5772_s28 = smov 49  }
  0x4f   :  { %s6057_s13 = sld [smem:[%s7245_s0 + %s5769_s7]]   ;;  %s5773_s7 = smov 50  }
  0x50   :  { %7306 = sst [smem:[#allocation102_spill]] %s6067_s24 }
  0x51   :  { %s6087_s24 = sld [smem:[%s7245_s0 + %s5775_s22]]  }
  0x53   :  { %7302 = sst [smem:[#allocation98_spill]] %s6042_s19 }
  0x54   :  { %7303 = sst [smem:[#allocation99_spill]] %s6052_s27 }
  0x55   :  { %7304 = sst [smem:[#allocation100_spill]] %s6057_s13 }
  0x56   :  { %s6062_s19 = sld [smem:[%s7245_s0 + %s5770_s15]]   ;;  %s5774_s15 = smov 51  }
  0x57   :  { %s6072_s27 = sld [smem:[%s7245_s0 + %s5772_s28]]  }
  0x58   :  { %s6077_s13 = sld [smem:[%s7245_s0 + %s5773_s7]]  }
  0x5c   :  { %7305 = sst [smem:[#allocation101_spill]] %s6062_s19 }
  0x5d   :  { %s6082_s19 = sld [smem:[%s7245_s0 + %s5774_s15]]  }
  0x5e   :  { %110 = vsyncpa [#allocation3], 0 }
  0x5f   :  { %111 = vsyncpa [#allocation6], 0 }
  0x60   :  { %112 = vsyncpa [#allocation9], 0 }
  0x61   :  { %113 = vsyncpa [#allocation12], 0 }
  0x62   :  { %114 = vsyncpa [#allocation15], 0 }
  0x63   :  { %115 = vsyncpa [#allocation18], 0 }
  0x64   :  { %116 = vsyncpa [#allocation21], 0 }
  0x65   :  { %117 = vsyncpa [#allocation24], 0 }
  0x66   :  { %118 = vsyncpa [#allocation27], 0 }
  0x67   :  { %119 = vsyncpa [#allocation30], 0 }
  0x68   :  { %120 = vsyncpa [#allocation33], 0 }
  0x69   :  { %121 = vsyncpa [#allocation36], 0 }
  0x6a   :  { %122 = vsyncpa [#allocation39], 0 }
  0x6b   :  { %123 = vsyncpa [#allocation42], 0 }
  0x6c   :  { %124 = vsyncpa [#allocation45], 0 }
  0x6d   :  { %125 = vsyncpa [#allocation48], 0  ;;  %s167_s28 = sshll.u32 %s5892_s6, 4  ;;  %s168_s28 = int_to_ptr.hbm [resolvable:$true] %s167_s28 }
  0x6e   :  { %126 = vsyncpa [#allocation4], 0  ;;  %s5776_s0 = smov [#allocation5]   ;;  %s189_s2 = sshll.u32 %s5902_s20, 4  ;;  %s190_s2 = int_to_ptr.hbm [resolvable:$true] %s189_s2 }
  0x6f   :  { %s169_s1 = sshll.u32 %s5776_s0, 4  ;;  %s4922_s7 = sshra.s32 %s168_s28, 4  ;;  %s170_s1 = int_to_ptr.vmem [resolvable:$true] %s169_s1  ;;  %s4923_s7 = int_to_ptr.hbm [resolvable:$true] %s4922_s7 }
  0x70   :  { %s4924_s10 = scalar_lea.hbm %s4923_s7, 1  ;;  %s4926_s11 = scalar_lea.hbm %s5892_s6, 1 }
  0x71   :  { %p4925_p0 = scmp.ne.s32.totalorder %s4923_s7, %s4924_s10  ;;  %p4927_p1 = scmp.lt.s32.totalorder %s4923_s7, %s5892_s6 }
  0x72   :  { %p4928_p2 = scmp.lt.s32.totalorder %s4926_s11, %s4924_s10 }
  0x74   :  { %p4929_p3 = por %p4928_p2, %p4927_p1 }
  0x76   :  { %p4930_p4 = pnand %p4929_p3, %p4925_p0 }
  0x78   :  { %4933 = shalt.err (!%p4930_p4)
}
  0x79   :  { %172 = dma.hbm_to_vmem [thread:$0]  %s168_s28, 16, %s170_s1, [#allocation6]  }
  0x7a   :  { %s5777_s15 = smov [#allocation8]   ;;  %s213_s18 = sshll.u32 %s5912_s4, 4  ;;  %s214_s18 = int_to_ptr.hbm [resolvable:$true] %s213_s18 }
  0x7b   :  { %s191_s16 = sshll.u32 %s5777_s15, 4  ;;  %s4946_s22 = sshra.s32 %s190_s2, 4  ;;  %s192_s16 = int_to_ptr.vmem [resolvable:$true] %s191_s16  ;;  %s4947_s22 = int_to_ptr.hbm [resolvable:$true] %s4946_s22 }
  0x7c   :  { %s4948_s23 = scalar_lea.hbm %s4947_s22, 1  ;;  %s4950_s26 = scalar_lea.hbm %s5902_s20, 1 }
  0x7d   :  { %p4949_p5 = scmp.ne.s32.totalorder %s4947_s22, %s4948_s23  ;;  %p4951_p6 = scmp.lt.s32.totalorder %s4947_s22, %s5902_s20 }
  0x7e   :  { %p4952_p7 = scmp.lt.s32.totalorder %s4950_s26, %s4948_s23 }
  0x80   :  { %p4953_p8 = por %p4952_p7, %p4951_p6 }
  0x82   :  { %p4954_p9 = pnand %p4953_p8, %p4949_p5 }
  0x84   :  { %4957 = shalt.err (!%p4954_p9)
}
  0x85   :  { %194 = dma.hbm_to_vmem [thread:$0]  %s190_s2, 16, %s192_s16, [#allocation9]  }
  0x86   :  { %s237_s6 = sshll.u32 %s5927_s30, 4  ;;  %s5778_s28 = smov [#allocation11]   ;;  %s238_s6 = int_to_ptr.hbm [resolvable:$true] %s237_s6 }
  0x87   :  { %s215_s0 = sshll.u32 %s5778_s28, 4  ;;  %s4970_s1 = sshra.s32 %s214_s18, 4  ;;  %s216_s0 = int_to_ptr.vmem [resolvable:$true] %s215_s0  ;;  %s4971_s1 = int_to_ptr.hbm [resolvable:$true] %s4970_s1 }
  0x88   :  { %s4972_s7 = scalar_lea.hbm %s4971_s1, 1  ;;  %s4974_s10 = scalar_lea.hbm %s5912_s4, 1 }
  0x89   :  { %p4973_p10 = scmp.ne.s32.totalorder %s4971_s1, %s4972_s7  ;;  %p4975_p11 = scmp.lt.s32.totalorder %s4971_s1, %s5912_s4 }
  0x8a   :  { %p4976_p12 = scmp.lt.s32.totalorder %s4974_s10, %s4972_s7 }
  0x8c   :  { %p4977_p13 = por %p4976_p12, %p4975_p11 }
  0x8e   :  { %p4978_p0 = pnand %p4977_p13, %p4973_p10 }
  0x90   :  { %4981 = shalt.err (!%p4978_p0)
}
  0x91   :  { %218 = dma.hbm_to_vmem [thread:$0]  %s214_s18, 16, %s216_s0, [#allocation12]  }
  0x92   :  { %s5779_s20 = smov [#allocation14]   ;;  %s4994_s11 = sshra.s32 %s238_s6, 4  ;;  %s4995_s11 = int_to_ptr.hbm [resolvable:$true] %s4994_s11 }
  0x93   :  { %s239_s2 = sshll.u32 %s5779_s20, 4  ;;  %s4996_s15 = scalar_lea.hbm %s4995_s11, 1  ;;  %s240_s2 = int_to_ptr.vmem [resolvable:$true] %s239_s2 }
  0x94   :  { %p4997_p1 = scmp.ne.s32.totalorder %s4995_s11, %s4996_s15  ;;  %s4998_s16 = scalar_lea.hbm %s5927_s30, 1 }
  0x95   :  { %p4999_p2 = scmp.lt.s32.totalorder %s4995_s11, %s5927_s30  ;;  %p5000_p3 = scmp.lt.s32.totalorder %s4998_s16, %s4996_s15 }
  0x97   :  { %p5001_p4 = por %p5000_p3, %p4999_p2 }
  0x99   :  { %p5002_p5 = pnand %p5001_p4, %p4997_p1 }
  0x9b   :  { %5005 = shalt.err (!%p5002_p5)
}
  0x9c   :  { %242 = dma.hbm_to_vmem [thread:$0]  %s238_s6, 16, %s240_s2, [#allocation15]  }
  0x9d   :  { %s258_s4 = sshll.u32 %s5937_s17, 4  ;;  %s5780_s18 = smov [#allocation17]   ;;  %s259_s4 = int_to_ptr.hbm [resolvable:$true] %s258_s4 }
  0x9e   :  { %s260_s22 = sshll.u32 %s5780_s18, 4  ;;  %s284_s23 = sshll.u32 %s5947_s14, 4  ;;  %s261_s22 = int_to_ptr.vmem [resolvable:$true] %s260_s22  ;;  %s285_s23 = int_to_ptr.hbm [resolvable:$true] %s284_s23 }
  0x9f   :  { %s5018_s26 = sshra.s32 %s259_s4, 4  ;;  %s5022_s30 = scalar_lea.hbm %s5937_s17, 16  ;;  %s5019_s26 = int_to_ptr.hbm [resolvable:$true] %s5018_s26 }
  0xa0   :  { %s5020_s28 = scalar_lea.hbm %s5019_s26, 16  ;;  %p5023_p7 = scmp.lt.s32.totalorder %s5019_s26, %s5937_s17 }
  0xa1   :  { %p5021_p6 = scmp.ne.s32.totalorder %s5019_s26, %s5020_s28  ;;  %p5024_p8 = scmp.lt.s32.totalorder %s5022_s30, %s5020_s28 }
  0xa3   :  { %p5025_p9 = por %p5024_p8, %p5023_p7 }
  0xa5   :  { %p5026_p10 = pnand %p5025_p9, %p5021_p6 }
  0xa7   :  { %5029 = shalt.err (!%p5026_p10)
}
  0xa8   :  { %s5781_s6 = smov 128   ;;  %s5782_s0 = smov 8  }
  0xa9   :  { %266 = dma.hbm_to_vmem [thread:$0]  %s259_s4, 256, %s261_s22, [#allocation18], %s5781_s6, %s5781_s6, %s5782_s0  }
  0xaa   :  { %s5783_s1 = smov [#allocation20]   ;;  %s308_s10 = sshll.u32 %s5957_s21, 4  ;;  %s6109_s10 = int_to_ptr.hbm [resolvable:$true] %s308_s10 }
  0xab   :  { %s286_s7 = sshll.u32 %s5783_s1, 4  ;;  %s5042_s17 = sshra.s32 %s285_s23, 4  ;;  %s287_s7 = int_to_ptr.vmem [resolvable:$true] %s286_s7  ;;  %s5043_s17 = int_to_ptr.hbm [resolvable:$true] %s5042_s17 }
  0xac   :  { %s5044_s20 = scalar_lea.hbm %s5043_s17, 16  ;;  %s5046_s2 = scalar_lea.hbm %s5947_s14, 16 }
  0xad   :  { %p5045_p11 = scmp.ne.s32.totalorder %s5043_s17, %s5044_s20  ;;  %p5047_p12 = scmp.lt.s32.totalorder %s5043_s17, %s5947_s14 }
  0xae   :  { %p5048_p13 = scmp.lt.s32.totalorder %s5046_s2, %s5044_s20 }
  0xb0   :  { %p5049_p0 = por %p5048_p13, %p5047_p12 }
  0xb2   :  { %p5050_p1 = pnand %p5049_p0, %p5045_p11 }
  0xb4   :  { %5053 = shalt.err (!%p5050_p1)
}
  0xb5   :  { %292 = dma.hbm_to_vmem [thread:$0]  %s285_s23, 256, %s287_s7, [#allocation21], %s5781_s6, %s5781_s6, %s5782_s0  }
  0xb6   :  { %s332_s11 = sshll.u32 %s5967_s8, 4  ;;  %s5784_s15 = smov [#allocation23]   ;;  %s6117_s11 = int_to_ptr.hbm [resolvable:$true] %s332_s11 }
  0xb7   :  { %s310_s16 = sshll.u32 %s5784_s15, 4  ;;  %s5066_s4 = sshra.s32 %s6109_s10, 4  ;;  %s311_s16 = int_to_ptr.vmem [resolvable:$true] %s310_s16  ;;  %s5067_s4 = int_to_ptr.hbm [resolvable:$true] %s5066_s4 }
  0xb8   :  { %s5068_s14 = scalar_lea.hbm %s5067_s4, 16  ;;  %s5070_s18 = scalar_lea.hbm %s5957_s21, 16 }
  0xb9   :  { %p5069_p2 = scmp.ne.s32.totalorder %s5067_s4, %s5068_s14  ;;  %p5071_p3 = scmp.lt.s32.totalorder %s5067_s4, %s5957_s21 }
  0xba   :  { %p5072_p4 = scmp.lt.s32.totalorder %s5070_s18, %s5068_s14 }
  0xbc   :  { %p5073_p5 = por %p5072_p4, %p5071_p3 }
  0xbe   :  { %p5074_p6 = pnand %p5073_p5, %p5069_p2 }
  0xc0   :  { %5077 = shalt.err (!%p5074_p6)
}
  0xc1   :  { %316 = dma.hbm_to_vmem [thread:$0]  %s6109_s10, 256, %s311_s16, [#allocation24], %s5781_s6, %s5781_s6, %s5782_s0  }
  0xc2   :  { %s5785_s22 = smov [#allocation26]   ;;  %s358_s26 = sshll.u32 %s5977_s5, 4  ;;  %s6127_s26 = int_to_ptr.hbm [resolvable:$true] %s358_s26 }
  0xc3   :  { %s334_s23 = sshll.u32 %s5785_s22, 4  ;;  %s5090_s21 = sshra.s32 %s6117_s11, 4  ;;  %s335_s23 = int_to_ptr.vmem [resolvable:$true] %s334_s23  ;;  %s5091_s21 = int_to_ptr.hbm [resolvable:$true] %s5090_s21 }
  0xc4   :  { %s5092_s28 = scalar_lea.hbm %s5091_s21, 16  ;;  %s5094_s30 = scalar_lea.hbm %s5967_s8, 16 }
  0xc5   :  { %p5093_p7 = scmp.ne.s32.totalorder %s5091_s21, %s5092_s28  ;;  %p5095_p8 = scmp.lt.s32.totalorder %s5091_s21, %s5967_s8 }
  0xc6   :  { %p5096_p9 = scmp.lt.s32.totalorder %s5094_s30, %s5092_s28 }
  0xc8   :  { %p5097_p10 = por %p5096_p9, %p5095_p8 }
  0xca   :  { %p5098_p11 = pnand %p5097_p10, %p5093_p7 }
  0xcc   :  { %5101 = shalt.err (!%p5098_p11)
}
  0xcd   :  { %340 = dma.hbm_to_vmem [thread:$0]  %s6117_s11, 256, %s335_s23, [#allocation27], %s5781_s6, %s5781_s6, %s5782_s0  }
  0xce   :  { %s382_s1 = sshll.u32 %s5987_s25, 4  ;;  %s5786_s7 = smov [#allocation29]   ;;  %s6137_s1 = int_to_ptr.hbm [resolvable:$true] %s382_s1 }
  0xcf   :  { %s360_s10 = sshll.u32 %s5786_s7, 4  ;;  %s5114_s8 = sshra.s32 %s6127_s26, 4  ;;  %s361_s10 = int_to_ptr.vmem [resolvable:$true] %s360_s10  ;;  %s5115_s8 = int_to_ptr.hbm [resolvable:$true] %s5114_s8 }
  0xd0   :  { %s5116_s17 = scalar_lea.hbm %s5115_s8, 16  ;;  %s5118_s20 = scalar_lea.hbm %s5977_s5, 16 }
  0xd1   :  { %p5117_p12 = scmp.ne.s32.totalorder %s5115_s8, %s5116_s17  ;;  %p5119_p13 = scmp.lt.s32.totalorder %s5115_s8, %s5977_s5 }
  0xd2   :  { %p5120_p0 = scmp.lt.s32.totalorder %s5118_s20, %s5116_s17 }
  0xd4   :  { %p5121_p1 = por %p5120_p0, %p5119_p13 }
  0xd6   :  { %p5122_p2 = pnand %p5121_p1, %p5117_p12 }
  0xd8   :  { %5125 = shalt.err (!%p5122_p2)
}
  0xd9   :  { %366 = dma.hbm_to_vmem [thread:$0]  %s6127_s26, 256, %s361_s10, [#allocation30], %s5781_s6, %s5781_s6, %s5782_s0  }
  0xda   :  { %s5787_s2 = smov [#allocation32]   ;;  %s406_s15 = sshll.u32 %s5997_s3, 4  ;;  %s6147_s15 = int_to_ptr.hbm [resolvable:$true] %s406_s15 }
  0xdb   :  { %s384_s11 = sshll.u32 %s5787_s2, 4  ;;  %s5138_s5 = sshra.s32 %s6137_s1, 4  ;;  %s385_s11 = int_to_ptr.vmem [resolvable:$true] %s384_s11  ;;  %s5139_s5 = int_to_ptr.hbm [resolvable:$true] %s5138_s5 }
  0xdc   :  { %s5140_s16 = scalar_lea.hbm %s5139_s5, 16  ;;  %s5142_s4 = scalar_lea.hbm %s5987_s25, 16 }
  0xdd   :  { %p5141_p3 = scmp.ne.s32.totalorder %s5139_s5, %s5140_s16  ;;  %p5143_p4 = scmp.lt.s32.totalorder %s5139_s5, %s5987_s25 }
  0xde   :  { %p5144_p5 = scmp.lt.s32.totalorder %s5142_s4, %s5140_s16 }
  0xe0   :  { %p5145_p6 = por %p5144_p5, %p5143_p4 }
  0xe2   :  { %p5146_p7 = pnand %p5145_p6, %p5141_p3 }
  0xe4   :  { %5149 = shalt.err (!%p5146_p7)
}
  0xe5   :  { %390 = dma.hbm_to_vmem [thread:$0]  %s6137_s1, 256, %s385_s11, [#allocation33], %s5781_s6, %s5781_s6, %s5782_s0  }
  0xe6   :  { %s433_s14 = sshll.u32 %s6012_s29, 4  ;;  %s5788_s18 = smov [#allocation35]   ;;  %s434_s14 = int_to_ptr.hbm [resolvable:$true] %s433_s14 }
  0xe7   :  { %s408_s22 = sshll.u32 %s5788_s18, 4  ;;  %s5162_s23 = sshra.s32 %s6147_s15, 4  ;;  %s409_s22 = int_to_ptr.vmem [resolvable:$true] %s408_s22  ;;  %s5163_s23 = int_to_ptr.hbm [resolvable:$true] %s5162_s23 }
  0xe8   :  { %s5164_s25 = scalar_lea.hbm %s5163_s23, 32  ;;  %s5166_s26 = scalar_lea.hbm %s5997_s3, 32 }
  0xe9   :  { %p5165_p8 = scmp.ne.s32.totalorder %s5163_s23, %s5164_s25  ;;  %p5167_p9 = scmp.lt.s32.totalorder %s5163_s23, %s5997_s3 }
  0xea   :  { %p5168_p10 = scmp.lt.s32.totalorder %s5166_s26, %s5164_s25 }
  0xec   :  { %p5169_p11 = por %p5168_p10, %p5167_p9 }
  0xee   :  { %p5170_p12 = pnand %p5169_p11, %p5165_p8 }
  0xf0   :  { %5173 = shalt.err (!%p5170_p12)
}
  0xf1   :  { %414 = dma.hbm_to_vmem [thread:$0]  %s6147_s15, 512, %s409_s22, [#allocation36], %s5781_s6, %s5781_s6, %s5782_s0  }
  0xf2   :  { %s5789_s21 = smov [#allocation38]   ;;  %s458_s30 = sshll.u32 %s6027_s9, 4  ;;  %s6165_s30 = int_to_ptr.hbm [resolvable:$true] %s458_s30 }
  0xf3   :  { %s435_s28 = sshll.u32 %s5789_s21, 4  ;;  %s5186_s1 = sshra.s32 %s434_s14, 4  ;;  %s436_s28 = int_to_ptr.vmem [resolvable:$true] %s435_s28  ;;  %s5187_s1 = int_to_ptr.hbm [resolvable:$true] %s5186_s1 }
  0xf4   :  { %s5188_s3 = scalar_lea.hbm %s5187_s1, 1  ;;  %s5190_s7 = scalar_lea.hbm %s6012_s29, 1 }
  0xf5   :  { %p5189_p13 = scmp.ne.s32.totalorder %s5187_s1, %s5188_s3  ;;  %p5191_p0 = scmp.lt.s32.totalorder %s5187_s1, %s6012_s29 }
  0xf6   :  { %p5192_p1 = scmp.lt.s32.totalorder %s5190_s7, %s5188_s3 }
  0xf8   :  { %p5193_p2 = por %p5192_p1, %p5191_p0 }
  0xfa   :  { %p5194_p3 = pnand %p5193_p2, %p5189_p13 }
  0xfc   :  { %5197 = shalt.err (!%p5194_p3)
}
  0xfd   :  { %438 = dma.hbm_to_vmem [thread:$0]  %s434_s14, 16, %s436_s28, [#allocation39]  }
  0xfe   :  { %s488_s10 = sshll.u32 %s6047_s12, 4  ;;  %s5790_s8 = smov [#allocation41]   ;;  %s6170_s10 = int_to_ptr.hbm [resolvable:$true] %s488_s10 }
  0xff   :  { %s460_s17 = sshll.u32 %s5790_s8, 4  ;;  %s5210_s20 = sshra.s32 %s6165_s30, 4  ;;  %s461_s17 = int_to_ptr.vmem [resolvable:$true] %s460_s17  ;;  %s5211_s20 = int_to_ptr.hbm [resolvable:$true] %s5210_s20 }
 0x100   :  { %s5212_s2 = scalar_lea.hbm %s5211_s20, 16  ;;  %s5214_s29 = scalar_lea.hbm %s6027_s9, 16 }
 0x101   :  { %p5213_p4 = scmp.ne.s32.totalorder %s5211_s20, %s5212_s2  ;;  %p5215_p5 = scmp.lt.s32.totalorder %s5211_s20, %s6027_s9 }
 0x102   :  { %p5216_p6 = scmp.lt.s32.totalorder %s5214_s29, %s5212_s2 }
 0x104   :  { %p5217_p7 = por %p5216_p6, %p5215_p5 }
 0x106   :  { %p5218_p8 = pnand %p5217_p7, %p5213_p4 }
 0x108   :  { %5221 = shalt.err (!%p5218_p8)
}
 0x109   :  { %s7307_s11 = sld [smem:[#allocation102_spill]]  ;;  %s5791_s15 = smov [#allocation44]  }
 0x10a   :  { %466 = dma.hbm_to_vmem [thread:$0]  %s6165_s30, 256, %s461_s17, [#allocation42], %s5781_s6, %s5781_s6, %s5782_s0  }
 0x10b   :  { %s490_s5 = sshll.u32 %s5791_s15, 4  ;;  %s5234_s9 = sshra.s32 %s6170_s10, 4  ;;  %s491_s5 = int_to_ptr.vmem [resolvable:$true] %s490_s5  ;;  %s5235_s9 = int_to_ptr.hbm [resolvable:$true] %s5234_s9 }
 0x10c   :  { %s5236_s4 = scalar_lea.hbm %s5235_s9, 32  ;;  %s5238_s14 = scalar_lea.hbm %s6047_s12, 32 }
 0x10d   :  { %p5237_p9 = scmp.ne.s32.totalorder %s5235_s9, %s5236_s4  ;;  %p5239_p10 = scmp.lt.s32.totalorder %s5235_s9, %s6047_s12 }
 0x10e   :  { %p5240_p11 = scmp.lt.s32.totalorder %s5238_s14, %s5236_s4 }
 0x10f   :  { %s518_s16 = sshll.u32 %s7307_s11, 4  ;;  %s6180_s16 = int_to_ptr.hbm [resolvable:$true] %s518_s16 }
 0x110   :  { %p5241_p12 = por %p5240_p11, %p5239_p10 }
 0x112   :  { %p5242_p13 = pnand %p5241_p12, %p5237_p9 }
 0x114   :  { %5245 = shalt.err (!%p5242_p13)
}
 0x115   :  { %s7308_s18 = sld [smem:[#allocation79_spill]]  ;;  %s5792_s23 = smov [#allocation47]  }
 0x116   :  { %496 = dma.hbm_to_vmem [thread:$0]  %s6170_s10, 512, %s491_s5, [#allocation45], %s5781_s6, %s5781_s6, %s5782_s0  }
 0x117   :  { %s520_s25 = sshll.u32 %s5792_s23, 4  ;;  %s5258_s26 = sshra.s32 %s6180_s16, 4  ;;  %s521_s25 = int_to_ptr.vmem [resolvable:$true] %s520_s25  ;;  %s5259_s26 = int_to_ptr.hbm [resolvable:$true] %s5258_s26 }
 0x118   :  { %s5260_s12 = scalar_lea.hbm %s5259_s26, 32  ;;  %s5262_s21 = scalar_lea.hbm %s7307_s11, 32 }
 0x119   :  { %p5261_p0 = scmp.ne.s32.totalorder %s5259_s26, %s5260_s12  ;;  %p5263_p1 = scmp.lt.s32.totalorder %s5259_s26, %s7307_s11 }
 0x11a   :  { %p5264_p2 = scmp.lt.s32.totalorder %s5262_s21, %s5260_s12 }
 0x11b   :  { %s154_s22 = sshll.u32 %s7308_s18, 4  ;;  %s155_s22 = int_to_ptr.hbm [resolvable:$true] %s154_s22 }
 0x11c   :  { %p5265_p3 = por %p5264_p2, %p5263_p1 }
 0x11e   :  { %p5266_p4 = pnand %p5265_p3, %p5261_p0 }
 0x120   :  { %5269 = shalt.err (!%p5266_p4)
}
 0x121   :  { %s7309_s28 = sld [smem:[#allocation81_spill]]  ;;  %s5793_s30 = smov [#allocation2]  }
 0x122   :  { %526 = dma.hbm_to_vmem [thread:$0]  %s6180_s16, 512, %s521_s25, [#allocation48], %s5781_s6, %s5781_s6, %s5782_s0  }
 0x123   :  { %s156_s1 = sshll.u32 %s5793_s30, 4  ;;  %s5282_s7 = sshra.s32 %s155_s22, 4  ;;  %s157_s1 = int_to_ptr.vmem [resolvable:$true] %s156_s1  ;;  %s5283_s7 = int_to_ptr.hbm [resolvable:$true] %s5282_s7 }
 0x124   :  { %s5284_s10 = scalar_lea.hbm %s5283_s7, 1  ;;  %s5286_s8 = scalar_lea.hbm %s7308_s18, 1 }
 0x125   :  { %p5285_p5 = scmp.ne.s32.totalorder %s5283_s7, %s5284_s10  ;;  %p5287_p6 = scmp.lt.s32.totalorder %s5283_s7, %s7308_s18 }
 0x126   :  { %p5288_p7 = scmp.lt.s32.totalorder %s5286_s8, %s5284_s10 }
 0x127   :  { %s178_s3 = sshll.u32 %s7309_s28, 4  ;;  %s179_s3 = int_to_ptr.hbm [resolvable:$true] %s178_s3 }
 0x128   :  { %p5289_p8 = por %p5288_p7, %p5287_p6 }
 0x12a   :  { %p5290_p9 = pnand %p5289_p8, %p5285_p5 }
 0x12c   :  { %5293 = shalt.err (!%p5290_p9)
}
 0x12d   :  { %159 = dma.hbm_to_vmem [thread:$0]  %s155_s22, 16, %s157_s1, [#allocation3]  }
 0x12e   :  { %s7310_s17 = sld [smem:[#allocation82_spill]]  ;;  %s5794_s2 = smov [#allocation7]  }
 0x12f   :  { %s180_s29 = sshll.u32 %s5794_s2, 4  ;;  %s5306_s11 = sshra.s32 %s179_s3, 4  ;;  %s181_s29 = int_to_ptr.vmem [resolvable:$true] %s180_s29  ;;  %s5307_s11 = int_to_ptr.hbm [resolvable:$true] %s5306_s11 }
 0x130   :  { %s5308_s15 = scalar_lea.hbm %s5307_s11, 1  ;;  %s5310_s5 = scalar_lea.hbm %s7309_s28, 1 }
 0x131   :  { %p5309_p10 = scmp.ne.s32.totalorder %s5307_s11, %s5308_s15  ;;  %p5311_p11 = scmp.lt.s32.totalorder %s5307_s11, %s7309_s28 }
 0x132   :  { %p5312_p12 = scmp.lt.s32.totalorder %s5310_s5, %s5308_s15 }
 0x134   :  { %s199_s20 = sshll.u32 %s7310_s17, 4  ;;  %p5313_p13 = por %p5312_p12, %p5311_p11  ;;  %s6201_s20 = int_to_ptr.hbm [resolvable:$true] %s199_s20 }
 0x136   :  { %p5314_p0 = pnand %p5313_p13, %p5309_p10 }
 0x138   :  { %5317 = shalt.err (!%p5314_p0)
}
 0x139   :  { %183 = dma.hbm_to_vmem [thread:$0]  %s179_s3, 16, %s181_s29, [#allocation6]  }
 0x13a   :  { %s7311_s16 = sld [smem:[#allocation84_spill]]  ;;  %s5795_s9 = smov [#allocation10]  }
 0x13b   :  { %s201_s4 = sshll.u32 %s5795_s9, 4  ;;  %s5330_s18 = sshra.s32 %s6201_s20, 4  ;;  %s202_s4 = int_to_ptr.vmem [resolvable:$true] %s201_s4  ;;  %s5331_s18 = int_to_ptr.hbm [resolvable:$true] %s5330_s18 }
 0x13c   :  { %s5332_s22 = scalar_lea.hbm %s5331_s18, 32  ;;  %s5334_s23 = scalar_lea.hbm %s7310_s17, 32 }
 0x13d   :  { %p5333_p1 = scmp.ne.s32.totalorder %s5331_s18, %s5332_s22  ;;  %p5335_p2 = scmp.lt.s32.totalorder %s5331_s18, %s7310_s17 }
 0x13e   :  { %p5336_p3 = scmp.lt.s32.totalorder %s5334_s23, %s5332_s22 }
 0x140   :  { %s226_s14 = sshll.u32 %s7311_s16, 4  ;;  %p5337_p4 = por %p5336_p3, %p5335_p2  ;;  %s227_s14 = int_to_ptr.hbm [resolvable:$true] %s226_s14 }
 0x142   :  { %p5338_p5 = pnand %p5337_p4, %p5333_p1 }
 0x144   :  { %5341 = shalt.err (!%p5338_p5)
}
 0x145   :  { %s7312_s25 = sld [smem:[#allocation85_spill]]  ;;  %s5796_s12 = smov [#allocation13]  }
 0x146   :  { %207 = dma.hbm_to_vmem [thread:$0]  %s6201_s20, 512, %s202_s4, [#allocation9], %s5781_s6, %s5781_s6, %s5782_s0  }
 0x147   :  { %s228_s21 = sshll.u32 %s5796_s12, 4  ;;  %s5354_s28 = sshra.s32 %s227_s14, 4  ;;  %s229_s21 = int_to_ptr.vmem [resolvable:$true] %s228_s21  ;;  %s5355_s28 = int_to_ptr.hbm [resolvable:$true] %s5354_s28 }
 0x148   :  { %s5356_s30 = scalar_lea.hbm %s5355_s28, 1  ;;  %s5358_s1 = scalar_lea.hbm %s7311_s16, 1 }
 0x149   :  { %p5357_p6 = scmp.ne.s32.totalorder %s5355_s28, %s5356_s30  ;;  %p5359_p7 = scmp.lt.s32.totalorder %s5355_s28, %s7311_s16 }
 0x14a   :  { %p5360_p8 = scmp.lt.s32.totalorder %s5358_s1, %s5356_s30 }
 0x14b   :  { %s248_s26 = sshll.u32 %s7312_s25, 4  ;;  %s249_s26 = int_to_ptr.hbm [resolvable:$true] %s248_s26 }
 0x14c   :  { %p5361_p9 = por %p5360_p8, %p5359_p7 }
 0x14e   :  { %p5362_p10 = pnand %p5361_p9, %p5357_p6 }
 0x150   :  { %5365 = shalt.err (!%p5362_p10)
}
 0x151   :  { %231 = dma.hbm_to_vmem [thread:$0]  %s227_s14, 16, %s229_s21, [#allocation12]  }
 0x152   :  { %s7313_s3 = sld [smem:[#allocation86_spill]]  ;;  %s5797_s7 = smov [#allocation16]  }
 0x153   :  { %s250_s10 = sshll.u32 %s5797_s7, 4  ;;  %s5378_s17 = sshra.s32 %s249_s26, 4  ;;  %s251_s10 = int_to_ptr.vmem [resolvable:$true] %s250_s10  ;;  %s5379_s17 = int_to_ptr.hbm [resolvable:$true] %s5378_s17 }
 0x154   :  { %s5380_s20 = scalar_lea.hbm %s5379_s17, 1  ;;  %s5382_s2 = scalar_lea.hbm %s7312_s25, 1 }
 0x155   :  { %p5381_p11 = scmp.ne.s32.totalorder %s5379_s17, %s5380_s20  ;;  %p5383_p12 = scmp.lt.s32.totalorder %s5379_s17, %s7312_s25 }
 0x156   :  { %p5384_p13 = scmp.lt.s32.totalorder %s5382_s2, %s5380_s20 }
 0x158   :  { %s271_s8 = sshll.u32 %s7313_s3, 4  ;;  %p5385_p0 = por %p5384_p13, %p5383_p12  ;;  %s6217_s8 = int_to_ptr.hbm [resolvable:$true] %s271_s8 }
 0x15a   :  { %p5386_p1 = pnand %p5385_p0, %p5381_p11 }
 0x15c   :  { %5389 = shalt.err (!%p5386_p1)
}
 0x15d   :  { %253 = dma.hbm_to_vmem [thread:$0]  %s249_s26, 16, %s251_s10, [#allocation15]  }
 0x15e   :  { %s7314_s29 = sld [smem:[#allocation87_spill]]  ;;  %s5798_s15 = smov [#allocation19]  }
 0x15f   :  { %s273_s5 = sshll.u32 %s5798_s15, 4  ;;  %s5402_s16 = sshra.s32 %s6217_s8, 4  ;;  %s274_s5 = int_to_ptr.vmem [resolvable:$true] %s273_s5  ;;  %s5403_s16 = int_to_ptr.hbm [resolvable:$true] %s5402_s16 }
 0x160   :  { %s5404_s9 = scalar_lea.hbm %s5403_s16, 16  ;;  %s5406_s4 = scalar_lea.hbm %s7313_s3, 16 }
 0x161   :  { %p5405_p2 = scmp.ne.s32.totalorder %s5403_s16, %s5404_s9  ;;  %p5407_p3 = scmp.lt.s32.totalorder %s5403_s16, %s7313_s3 }
 0x162   :  { %p5408_p4 = scmp.lt.s32.totalorder %s5406_s4, %s5404_s9 }
 0x164   :  { %s298_s11 = sshll.u32 %s7314_s29, 4  ;;  %p5409_p5 = por %p5408_p4, %p5407_p3  ;;  %s299_s11 = int_to_ptr.hbm [resolvable:$true] %s298_s11 }
 0x166   :  { %p5410_p6 = pnand %p5409_p5, %p5405_p2 }
 0x168   :  { %5413 = shalt.err (!%p5410_p6)
}
 0x169   :  { %s7315_s14 = sld [smem:[#allocation88_spill]]  ;;  %s5799_s18 = smov [#allocation22]  }
 0x16a   :  { %279 = dma.hbm_to_vmem [thread:$0]  %s6217_s8, 256, %s274_s5, [#allocation18], %s5781_s6, %s5781_s6, %s5782_s0  }
 0x16b   :  { %s300_s22 = sshll.u32 %s5799_s18, 4  ;;  %s5426_s25 = sshra.s32 %s299_s11, 4  ;;  %s301_s22 = int_to_ptr.vmem [resolvable:$true] %s300_s22  ;;  %s5427_s25 = int_to_ptr.hbm [resolvable:$true] %s5426_s25 }
 0x16c   :  { %s5428_s26 = scalar_lea.hbm %s5427_s25, 1  ;;  %s5430_s12 = scalar_lea.hbm %s7314_s29, 1 }
 0x16d   :  { %p5429_p7 = scmp.ne.s32.totalorder %s5427_s25, %s5428_s26  ;;  %p5431_p8 = scmp.lt.s32.totalorder %s5427_s25, %s7314_s29 }
 0x16e   :  { %p5432_p9 = scmp.lt.s32.totalorder %s5430_s12, %s5428_s26 }
 0x16f   :  { %s322_s23 = sshll.u32 %s7315_s14, 4  ;;  %s323_s23 = int_to_ptr.hbm [resolvable:$true] %s322_s23 }
 0x170   :  { %p5433_p10 = por %p5432_p9, %p5431_p8 }
 0x172   :  { %p5434_p11 = pnand %p5433_p10, %p5429_p7 }
 0x174   :  { %5437 = shalt.err (!%p5434_p11)
}
 0x175   :  { %303 = dma.hbm_to_vmem [thread:$0]  %s299_s11, 16, %s301_s22, [#allocation21]  }
 0x176   :  { %s7316_s21 = sld [smem:[#allocation89_spill]]  ;;  %s5800_s30 = smov [#allocation25]  }
 0x177   :  { %s324_s1 = sshll.u32 %s5800_s30, 4  ;;  %s5450_s3 = sshra.s32 %s323_s23, 4  ;;  %s325_s1 = int_to_ptr.vmem [resolvable:$true] %s324_s1  ;;  %s5451_s3 = int_to_ptr.hbm [resolvable:$true] %s5450_s3 }
 0x178   :  { %s5452_s7 = scalar_lea.hbm %s5451_s3, 1  ;;  %s5454_s10 = scalar_lea.hbm %s7315_s14, 1 }
 0x179   :  { %p5453_p12 = scmp.ne.s32.totalorder %s5451_s3, %s5452_s7  ;;  %p5455_p13 = scmp.lt.s32.totalorder %s5451_s3, %s7315_s14 }
 0x17a   :  { %p5456_p0 = scmp.lt.s32.totalorder %s5454_s10, %s5452_s7 }
 0x17c   :  { %s345_s28 = sshll.u32 %s7316_s21, 4  ;;  %p5457_p1 = por %p5456_p0, %p5455_p13  ;;  %s6233_s28 = int_to_ptr.hbm [resolvable:$true] %s345_s28 }
 0x17e   :  { %p5458_p2 = pnand %p5457_p1, %p5453_p12 }
 0x180   :  { %5461 = shalt.err (!%p5458_p2)
}
 0x181   :  { %327 = dma.hbm_to_vmem [thread:$0]  %s323_s23, 16, %s325_s1, [#allocation24]  }
 0x182   :  { %s7317_s8 = sld [smem:[#allocation90_spill]]  ;;  %s5801_s17 = smov [#allocation28]  }
 0x183   :  { %s347_s20 = sshll.u32 %s5801_s17, 4  ;;  %s5474_s29 = sshra.s32 %s6233_s28, 4  ;;  %s348_s20 = int_to_ptr.vmem [resolvable:$true] %s347_s20  ;;  %s5475_s29 = int_to_ptr.hbm [resolvable:$true] %s5474_s29 }
 0x184   :  { %s5476_s11 = scalar_lea.hbm %s5475_s29, 16  ;;  %s5478_s15 = scalar_lea.hbm %s7316_s21, 16 }
 0x185   :  { %p5477_p3 = scmp.ne.s32.totalorder %s5475_s29, %s5476_s11  ;;  %p5479_p4 = scmp.lt.s32.totalorder %s5475_s29, %s7316_s21 }
 0x186   :  { %p5480_p5 = scmp.lt.s32.totalorder %s5478_s15, %s5476_s11 }
 0x188   :  { %s372_s2 = sshll.u32 %s7317_s8, 4  ;;  %p5481_p6 = por %p5480_p5, %p5479_p4  ;;  %s373_s2 = int_to_ptr.hbm [resolvable:$true] %s372_s2 }
 0x18a   :  { %p5482_p7 = pnand %p5481_p6, %p5477_p3 }
 0x18c   :  { %5485 = shalt.err (!%p5482_p7)
}
 0x18d   :  { %s7318_s5 = sld [smem:[#allocation91_spill]]  ;;  %s5802_s9 = smov [#allocation31]  }
 0x18e   :  { %353 = dma.hbm_to_vmem [thread:$0]  %s6233_s28, 256, %s348_s20, [#allocation27], %s5781_s6, %s5781_s6, %s5782_s0  }
 0x18f   :  { %s374_s4 = sshll.u32 %s5802_s9, 4  ;;  %s5498_s14 = sshra.s32 %s373_s2, 4  ;;  %s375_s4 = int_to_ptr.vmem [resolvable:$true] %s374_s4  ;;  %s5499_s14 = int_to_ptr.hbm [resolvable:$true] %s5498_s14 }
 0x190   :  { %s5500_s18 = scalar_lea.hbm %s5499_s14, 1  ;;  %s5502_s22 = scalar_lea.hbm %s7317_s8, 1 }
 0x191   :  { %p5501_p8 = scmp.ne.s32.totalorder %s5499_s14, %s5500_s18  ;;  %p5503_p9 = scmp.lt.s32.totalorder %s5499_s14, %s7317_s8 }
 0x192   :  { %p5504_p10 = scmp.lt.s32.totalorder %s5502_s22, %s5500_s18 }
 0x193   :  { %s396_s16 = sshll.u32 %s7318_s5, 4  ;;  %s397_s16 = int_to_ptr.hbm [resolvable:$true] %s396_s16 }
 0x194   :  { %p5505_p11 = por %p5504_p10, %p5503_p9 }
 0x196   :  { %p5506_p12 = pnand %p5505_p11, %p5501_p8 }
 0x198   :  { %5509 = shalt.err (!%p5506_p12)
}
 0x199   :  { %377 = dma.hbm_to_vmem [thread:$0]  %s373_s2, 16, %s375_s4, [#allocation30]  }
 0x19a   :  { %s7319_s23 = sld [smem:[#allocation92_spill]]  ;;  %s5803_s25 = smov [#allocation34]  }
 0x19b   :  { %s398_s26 = sshll.u32 %s5803_s25, 4  ;;  %s5522_s21 = sshra.s32 %s397_s16, 4  ;;  %s399_s26 = int_to_ptr.vmem [resolvable:$true] %s398_s26  ;;  %s5523_s21 = int_to_ptr.hbm [resolvable:$true] %s5522_s21 }
 0x19c   :  { %s5524_s28 = scalar_lea.hbm %s5523_s21, 1  ;;  %s5526_s30 = scalar_lea.hbm %s7318_s5, 1 }
 0x19d   :  { %p5525_p13 = scmp.ne.s32.totalorder %s5523_s21, %s5524_s28  ;;  %p5527_p0 = scmp.lt.s32.totalorder %s5523_s21, %s7318_s5 }
 0x19e   :  { %p5528_p1 = scmp.lt.s32.totalorder %s5526_s30, %s5524_s28 }
 0x1a0   :  { %s420_s12 = sshll.u32 %s7319_s23, 4  ;;  %p5529_p2 = por %p5528_p1, %p5527_p0  ;;  %s421_s12 = int_to_ptr.hbm [resolvable:$true] %s420_s12 }
 0x1a2   :  { %p5530_p3 = pnand %p5529_p2, %p5525_p13 }
 0x1a4   :  { %5533 = shalt.err (!%p5530_p3)
}
 0x1a5   :  { %401 = dma.hbm_to_vmem [thread:$0]  %s397_s16, 16, %s399_s26, [#allocation33]  }
 0x1a6   :  { %s7320_s1 = sld [smem:[#allocation94_spill]]  ;;  %s5804_s7 = smov [#allocation37]  }
 0x1a7   :  { %s422_s10 = sshll.u32 %s5804_s7, 4  ;;  %s5546_s8 = sshra.s32 %s421_s12, 4  ;;  %s423_s10 = int_to_ptr.vmem [resolvable:$true] %s422_s10  ;;  %s5547_s8 = int_to_ptr.hbm [resolvable:$true] %s5546_s8 }
 0x1a8   :  { %s5548_s17 = scalar_lea.hbm %s5547_s8, 1  ;;  %s5550_s20 = scalar_lea.hbm %s7319_s23, 1 }
 0x1a9   :  { %p5549_p4 = scmp.ne.s32.totalorder %s5547_s8, %s5548_s17  ;;  %p5551_p5 = scmp.lt.s32.totalorder %s5547_s8, %s7319_s23 }
 0x1aa   :  { %p5552_p6 = scmp.lt.s32.totalorder %s5550_s20, %s5548_s17 }
 0x1ac   :  { %s443_s3 = sshll.u32 %s7320_s1, 4  ;;  %p5553_p7 = por %p5552_p6, %p5551_p5  ;;  %s6252_s3 = int_to_ptr.hbm [resolvable:$true] %s443_s3 }
 0x1ae   :  { %p5554_p8 = pnand %p5553_p7, %p5549_p4 }
 0x1b0   :  { %5557 = shalt.err (!%p5554_p8)
}
 0x1b1   :  { %425 = dma.hbm_to_vmem [thread:$0]  %s421_s12, 16, %s423_s10, [#allocation36]  }
 0x1b2   :  { %s7321_s2 = sld [smem:[#allocation97_spill]]  ;;  %s5805_s29 = smov [#allocation40]  }
 0x1b3   :  { %s445_s11 = sshll.u32 %s5805_s29, 4  ;;  %s5570_s5 = sshra.s32 %s6252_s3, 4  ;;  %s446_s11 = int_to_ptr.vmem [resolvable:$true] %s445_s11  ;;  %s5571_s5 = int_to_ptr.hbm [resolvable:$true] %s5570_s5 }
 0x1b4   :  { %s5572_s16 = scalar_lea.hbm %s5571_s5, 32  ;;  %s5574_s9 = scalar_lea.hbm %s7320_s1, 32 }
 0x1b5   :  { %p5573_p9 = scmp.ne.s32.totalorder %s5571_s5, %s5572_s16  ;;  %p5575_p10 = scmp.lt.s32.totalorder %s5571_s5, %s7320_s1 }
 0x1b6   :  { %p5576_p11 = scmp.lt.s32.totalorder %s5574_s9, %s5572_s16 }
 0x1b8   :  { %s473_s15 = sshll.u32 %s7321_s2, 4  ;;  %p5577_p12 = por %p5576_p11, %p5575_p10  ;;  %s6257_s15 = int_to_ptr.hbm [resolvable:$true] %s473_s15 }
 0x1ba   :  { %p5578_p13 = pnand %p5577_p12, %p5573_p9 }
 0x1bc   :  { %5581 = shalt.err (!%p5578_p13)
}
 0x1bd   :  { %s7322_s4 = sld [smem:[#allocation100_spill]]  ;;  %s5806_s18 = smov [#allocation43]  }
 0x1be   :  { %451 = dma.hbm_to_vmem [thread:$0]  %s6252_s3, 512, %s446_s11, [#allocation39], %s5781_s6, %s5781_s6, %s5782_s0  }
 0x1bf   :  { %s475_s22 = sshll.u32 %s5806_s18, 4  ;;  %s5594_s23 = sshra.s32 %s6257_s15, 4  ;;  %s476_s22 = int_to_ptr.vmem [resolvable:$true] %s475_s22  ;;  %s5595_s23 = int_to_ptr.hbm [resolvable:$true] %s5594_s23 }
 0x1c0   :  { %s5596_s25 = scalar_lea.hbm %s5595_s23, 32  ;;  %s5598_s26 = scalar_lea.hbm %s7321_s2, 32 }
 0x1c1   :  { %p5597_p0 = scmp.ne.s32.totalorder %s5595_s23, %s5596_s25  ;;  %p5599_p1 = scmp.lt.s32.totalorder %s5595_s23, %s7321_s2 }
 0x1c2   :  { %p5600_p2 = scmp.lt.s32.totalorder %s5598_s26, %s5596_s25 }
 0x1c3   :  { %s503_s14 = sshll.u32 %s7322_s4, 4  ;;  %s6267_s14 = int_to_ptr.hbm [resolvable:$true] %s503_s14 }
 0x1c4   :  { %p5601_p3 = por %p5600_p2, %p5599_p1 }
 0x1c6   :  { %p5602_p4 = pnand %p5601_p3, %p5597_p0 }
 0x1c8   :  { %5605 = shalt.err (!%p5602_p4)
}
 0x1c9   :  { %481 = dma.hbm_to_vmem [thread:$0]  %s6257_s15, 512, %s476_s22, [#allocation42], %s5781_s6, %s5781_s6, %s5782_s0  }
 0x1ca   :  { %s5807_s12 = smov [#allocation46]   ;;  %s533_s28 = sshll.u32 %s6077_s13, 4  ;;  %s534_s28 = int_to_ptr.hbm [resolvable:$true] %s533_s28 }
 0x1cb   :  { %s505_s21 = sshll.u32 %s5807_s12, 4  ;;  %s5618_s30 = sshra.s32 %s6267_s14, 4  ;;  %s506_s21 = int_to_ptr.vmem [resolvable:$true] %s505_s21  ;;  %s5619_s30 = int_to_ptr.hbm [resolvable:$true] %s5618_s30 }
 0x1cc   :  { %s5620_s1 = scalar_lea.hbm %s5619_s30, 16  ;;  %s5622_s3 = scalar_lea.hbm %s7322_s4, 16 }
 0x1cd   :  { %p5621_p5 = scmp.ne.s32.totalorder %s5619_s30, %s5620_s1  ;;  %p5623_p6 = scmp.lt.s32.totalorder %s5619_s30, %s7322_s4 }
 0x1ce   :  { %p5624_p7 = scmp.lt.s32.totalorder %s5622_s3, %s5620_s1 }
 0x1d0   :  { %p5625_p8 = por %p5624_p7, %p5623_p6 }
 0x1d2   :  { %p5626_p9 = pnand %p5625_p8, %p5621_p5 }
 0x1d4   :  { %5629 = shalt.err (!%p5626_p9)
}
 0x1d5   :  { %511 = dma.hbm_to_vmem [thread:$0]  %s6267_s14, 256, %s506_s21, [#allocation45], %s5781_s6, %s5781_s6, %s5782_s0  }
 0x1d6   :  { %s5808_s7 = smov [#allocation49]   ;;  %s5642_s8 = sshra.s32 %s534_s28, 4  ;;  %s5643_s8 = int_to_ptr.hbm [resolvable:$true] %s5642_s8 }
 0x1d7   :  { %s535_s10 = sshll.u32 %s5808_s7, 4  ;;  %s5644_s17 = scalar_lea.hbm %s5643_s8, 32  ;;  %s536_s10 = int_to_ptr.vmem [resolvable:$true] %s535_s10 }
 0x1d8   :  { %p5645_p10 = scmp.ne.s32.totalorder %s5643_s8, %s5644_s17  ;;  %s5646_s20 = scalar_lea.hbm %s6077_s13, 32 }
 0x1d9   :  { %p5647_p11 = scmp.lt.s32.totalorder %s5643_s8, %s6077_s13  ;;  %p5648_p12 = scmp.lt.s32.totalorder %s5646_s20, %s5644_s17 }
 0x1db   :  { %p5649_p13 = por %p5648_p12, %p5647_p11 }
 0x1dd   :  { %p5650_p0 = pnand %p5649_p13, %p5645_p10 }
 0x1df   :  { %5653 = shalt.err (!%p5650_p0)
}
 0x1e0   :  { %541 = dma.hbm_to_vmem [thread:$0]  %s534_s28, 512, %s536_s10, [#allocation48], %s5781_s6, %s5781_s6, %s5782_s0  }
 0x1e1   :  { %5690 = dma.done.wait [#allocation3], 16  }
 0x1e2   :  { %5691 = vsyncadd [#allocation3], 4294967280 }
 0x1e3   :  { %5692 = dma.done.wait [#allocation6], 32  }
 0x1e4   :  { %5693 = vsyncadd [#allocation6], 4294967264 }
 0x1e5   :  { %5694 = dma.done.wait [#allocation9], 528  }
 0x1e6   :  { %5695 = vsyncadd [#allocation9], 4294966768 }
 0x1e7   :  { %5696 = dma.done.wait [#allocation12], 32  }
 0x1e8   :  { %5697 = vsyncadd [#allocation12], 4294967264 }
 0x1e9   :  { %5698 = dma.done.wait [#allocation15], 32  }
 0x1ea   :  { %5699 = vsyncadd [#allocation15], 4294967264 }
 0x1eb   :  { %5700 = dma.done.wait [#allocation18], 512  }
 0x1ec   :  { %5701 = vsyncadd [#allocation18], 4294966784 }
 0x1ed   :  { %5702 = dma.done.wait [#allocation21], 272  }
 0x1ee   :  { %5703 = vsyncadd [#allocation21], 4294967024 }
 0x1ef   :  { %5704 = dma.done.wait [#allocation24], 272  }
 0x1f0   :  { %5705 = vsyncadd [#allocation24], 4294967024 }
 0x1f1   :  { %5706 = dma.done.wait [#allocation27], 512  }
 0x1f2   :  { %5707 = vsyncadd [#allocation27], 4294966784 }
 0x1f3   :  { %5708 = dma.done.wait [#allocation30], 272  }
 0x1f4   :  { %5709 = vsyncadd [#allocation30], 4294967024 }
 0x1f5   :  { %5710 = dma.done.wait [#allocation33], 272  }
 0x1f6   :  { %5711 = vsyncadd [#allocation33], 4294967024 }
 0x1f7   :  { %5712 = dma.done.wait [#allocation36], 528  }
 0x1f8   :  { %5713 = vsyncadd [#allocation36], 4294966768 }
 0x1f9   :  { %5714 = dma.done.wait [#allocation39], 528  }
 0x1fa   :  { %5715 = vsyncadd [#allocation39], 4294966768 }
 0x1fb   :  { %5716 = dma.done.wait [#allocation42], 768  }
 0x1fc   :  { %5717 = vsyncadd [#allocation42], 4294966528 }
 0x1fd   :  { %5718 = dma.done.wait [#allocation45], 768  }
 0x1fe   :  { %5719 = vsyncadd [#allocation45], 4294966528 }
 0x1ff   :  { %5720 = dma.done.wait [#allocation48], 1024  }
 0x200   :  { %5721 = vsyncadd [#allocation48], 4294966272  ;;  %s7323_s13 = sld [smem:[#allocation68_spill]]  ;;  %vm674_vm0 = vcmask 261120   ;;  %v5809_v8 = vmov 32.0   ;;  %vm997_vm14 = vcmask 130048  }
 0x201   :  { %4599 = vrcp.f32 %v5809_v8  ;;  %s7324_s6 = sld [smem:[#allocation74_spill]]  ;;  %s5811_s14 = smov 96  }
 0x202   :  { %s7325_s0 = sld [smem:[#allocation76_spill]]  ;;  %s5812_s18 = smov 16  }
 0x203   :  { %s7326_s2 = sld [smem:[#allocation78_spill]]  ;;  %s5813_s22 = smov 32  }
 0x204   :  { %s7327_s29 = sld [smem:[#allocation72_spill]]  ;;  %s5815_s26 = smov 80  }
 0x205   :  { %s7328_s11 = sld [smem:[#allocation73_spill]]  ;;  %s5816_s12 = smov 112  }
 0x206   :  { %v6290_v0 = vld [vmem:[%s7323_s13 + $0x10] sm:$0xff]  ;;  %v6293_v1 = vld [vmem:[%s7323_s13] sm:$0xff]  ;;  %v6296_v2 = vld [vmem:[%s7323_s13 + $0x18] sm:$0xff]  ;;  %s7331_s15 = sld [smem:[#allocation77_spill]]  ;;  %s5817_s21 = smov 48  }
 0x207   :  { %v681_v3 = vsel %vm674_vm0, %v6290_v0, 0.0  ;;  %v675_v4 = vsel %vm674_vm0, %v6293_v1, 0.0  ;;  %v6303_v5 = vld [vmem:[%s7323_s13 + $0x8] sm:$0xff]  ;;  %v684_v6 = vsel %vm674_vm0, %v6296_v2, 0.0  ;;  %v4600_v9 = vpop.eup %4599  ;;  %v789_v35 = vld [vmem:[%s7324_s6 + $0x18] sm:$0xff]  ;;  %v788_v38 = vld [vmem:[%s7324_s6 + $0x10] sm:$0xff] }
 0x208   :  { %682 = vadd.xlane.f32.xlu1 %v681_v3  ;;  %676 = vadd.xlane.f32.xlu0 %v675_v4  ;;  %v678_v7 = vsel %vm674_vm0, %v6303_v5, 0.0  ;;  %v688_v10 = vmul.f32 32.0, %v4600_v9  ;;  %vm692_vm1 = vweird.f32 %v4600_v9  ;;  %v838_v36 = vld [vmem:[%s7325_s0 + $0x18] sm:$0xff]  ;;  %v837_v39 = vld [vmem:[%s7325_s0 + $0x10] sm:$0xff]  ;;  %v787_v41 = vld [vmem:[%s7324_s6 + $0x8] sm:$0xff]  ;;  %s7332_s5 = sld [smem:[#allocation75_spill]] }
 0x209   :  { %v875_v37 = vld [vmem:[%s7326_s2 + $0x18] sm:$0xff]  ;;  %818 = vmatpush.msra.mxu0 %v789_v35  ;;  %855 = vmatpush.msra.mxu1 %v838_v36  ;;  %v874_v40 = vld [vmem:[%s7326_s2 + $0x10] sm:$0xff]  ;;  %v836_v42 = vld [vmem:[%s7325_s0 + $0x8] sm:$0xff]  ;;  %s7333_s16 = sld [smem:[#allocation69_spill]]  ;;  %s4249_s17 = sshll.u32 %s6087_s24, 4  ;;  %s4250_s17 = int_to_ptr.hbm [resolvable:$true] %s4249_s17 }
 0x20a   :  { %v689_v11 = vsub.f32 1.0, %v688_v10  ;;  %892 = vmatpush.msra.mxu2 %v875_v37  ;;  %v873_v43 = vld [vmem:[%s7326_s2 + $0x8] sm:$0xff]  ;;  %v786_v44 = vld [vmem:[%s7324_s6] sm:$0xff]  ;;  %s7334_s9 = sld [smem:[#allocation80_spill]]  ;;  %s5678_s20 = sshra.s32 %s4250_s17, 4  ;;  %s5679_s20 = int_to_ptr.hbm [resolvable:$true] %s5678_s20 }
 0x20b   :  { %819 = vmatpush.msra.mxu0 %v788_v38  ;;  %856 = vmatpush.msra.mxu1 %v837_v39  ;;  %v835_v45 = vld [vmem:[%s7325_s0] sm:$0xff]  ;;  %s7335_s4 = sld [smem:[#allocation83_spill]]  ;;  %s5680_s13 = scalar_lea.hbm %s5679_s20, 2 }
 0x20c   :  { %v690_v12 = vmul.f32 %v4600_v9, %v689_v11  ;;  %893 = vmatpush.msra.mxu2 %v874_v40  ;;  %v872_v46 = vld [vmem:[%s7326_s2] sm:$0xff]  ;;  %s7336_s23 = sld [smem:[#allocation70_spill]]  ;;  %p5681_p1 = scmp.ne.s32.totalorder %s5679_s20, %s5680_s13 }
 0x20d   :  { %820 = vmatpush.msra.mxu0 %v787_v41  ;;  %857 = vmatpush.msra.mxu1 %v836_v42  ;;  %s7337_s25 = sld [smem:[#allocation71_spill]]  ;;  %p5683_p2 = scmp.lt.s32.totalorder %s5679_s20, %s6087_s24 }
 0x20e   :  { %v691_v13 = vadd.f32 %v4600_v9, %v690_v12  ;;  %894 = vmatpush.msra.mxu2 %v873_v43  ;;  %s7338_s28 = sld [smem:[#allocation93_spill]] }
 0x20f   :  { %821 = vmatpush.msra.mxu0 %v786_v44  ;;  %858 = vmatpush.msra.mxu1 %v835_v45  ;;  %s7339_s30 = sld [smem:[#allocation101_spill]] }
 0x210   :  { %685 = vadd.xlane.f32.xlu1 %v684_v6  ;;  %679 = vadd.xlane.f32.xlu0 %v678_v7  ;;  %v6309_v14 = vsel %vm692_vm1, %v4600_v9, %v691_v13  ;;  %v4574_v13 = vld [vmem:[%s7327_s29] ss:$0 sm:$0xff]  ;;  %s7340_s1 = sld [smem:[#allocation96_spill]] }
 0x211   :  { %895 = vmatpush.msra.mxu2 %v872_v46  ;;  %s7341_s3 = sld [smem:[#allocation98_spill]] }
 0x212   :  { %s7342_s7 = sld [smem:[#allocation95_spill]] }
 0x213   :  { %s7343_s10 = sld [smem:[#allocation99_spill]] }
 0x27b   :  { %v683_v15 = vpop.xlane.xlu1 %682  ;;  %v677_v16 = vpop.xlane.xlu0 %676 }
 0x27c   :  { %v696_v17 = vmul.f32 %v6309_v14, %v683_v15  ;;  %v694_v18 = vmul.f32 %v6309_v14, %v677_v16 }
 0x27e   :  { %v6314_v19 = vsub.f32 %v6290_v0, %v696_v17  ;;  %v6317_v20 = vsub.f32 %v6293_v1, %v694_v18  ;;  %v4575_v18 = vld [vmem:[%s7328_s11] ss:$0 sm:$0xff] }
 0x280   :  { %v704_v21 = vmul.f32 %v6314_v19, %v6314_v19  ;;  %v702_v22 = vmul.f32 %v6317_v20, %v6317_v20 }
 0x282   :  { %v712_v23 = vsel %vm674_vm0, %v704_v21, 0.0  ;;  %v706_v24 = vsel %vm674_vm0, %v702_v22, 0.0 }
 0x283   :  { %v686_v25 = vpop.xlane.xlu1 %685  ;;  %713 = vadd.xlane.f32.xlu0 %v712_v23  ;;  %707 = vadd.xlane.f32.xlu2 %v706_v24  ;;  %v680_v26 = vpop.xlane.xlu0 %679 }
 0x284   :  { %v697_v27 = vmul.f32 %v6309_v14, %v686_v25  ;;  %v695_v28 = vmul.f32 %v6309_v14, %v680_v26 }
 0x286   :  { %v6328_v29 = vsub.f32 %v6296_v2, %v697_v27  ;;  %v6331_v30 = vsub.f32 %v6303_v5, %v695_v28 }
 0x288   :  { %v705_v31 = vmul.f32 %v6328_v29, %v6328_v29  ;;  %v703_v32 = vmul.f32 %v6331_v30, %v6331_v30 }
 0x28a   :  { %v715_v33 = vsel %vm674_vm0, %v705_v31, 0.0  ;;  %v709_v34 = vsel %vm674_vm0, %v703_v32, 0.0 }
 0x28b   :  { %716 = vadd.xlane.f32.xlu1 %v715_v33  ;;  %710 = vadd.xlane.f32.xlu2 %v709_v34 }
 0x2f6   :  { %v708_v47 = vpop.xlane.xlu2 %707  ;;  %v714_v48 = vpop.xlane.xlu0 %713 }
 0x2f7   :  { %v718_v49 = vmul.f32 %v708_v47, %v6309_v14  ;;  %v720_v50 = vmul.f32 %v714_v48, %v6309_v14  ;;  %v4577_v47 = vld [vmem:[%s7331_s15] ss:$0 sm:$0xff] }
 0x2f9   :  { %v722_v51 = vadd.f32 1e-12, %v718_v49  ;;  %v724_v52 = vadd.f32 1e-12, %v720_v50  ;;  %v4576_v49 = vld [vmem:[%s7332_s5] ss:$0 sm:$0xff] }
 0x2fb   :  { %4601 = vrsqrt.f32 %v722_v51  ;;  %vm732_vm3 = vweird.f32 %v722_v51  ;;  %vm752_vm5 = vweird.f32 %v724_v52 }
 0x2fc   :  { %4603 = vrsqrt.f32 %v724_v52 }
 0x2fe   :  { %v717_v53 = vpop.xlane.xlu1 %716  ;;  %v711_v54 = vpop.xlane.xlu2 %710 }
 0x2ff   :  { %v721_v55 = vmul.f32 %v717_v53, %v6309_v14  ;;  %v719_v56 = vmul.f32 %v711_v54, %v6309_v14 }
 0x301   :  { %v4602_v57 = vpop.eup %4601  ;;  %v725_v58 = vadd.f32 1e-12, %v721_v55  ;;  %v723_v59 = vadd.f32 1e-12, %v719_v56 }
 0x302   :  { %v4604_v60 = vpop.eup %4603  ;;  %v727_v61 = vmul.f32 %v4602_v57, %v722_v51  ;;  %vm733_vm2 = vweird.f32 %v4602_v57  ;;  %v4578_v51 = vld [vmem:[#allocation2] ss:$0 sm:$0xff] }
 0x303   :  { %v747_v62 = vmul.f32 %v4604_v60, %v724_v52  ;;  %4605 = vrsqrt.f32 %v725_v58  ;;  %vm734_vm4 = vmor %vm732_vm3, %vm733_vm2  ;;  %vm753_vm6 = vweird.f32 %v4604_v60  ;;  %vm742_vm9 = vweird.f32 %v723_v59 }
 0x304   :  { %v728_v63 = vmul.f32 %v4602_v57, %v727_v61  ;;  %4607 = vrsqrt.f32 %v723_v59  ;;  %vm6358_vm8 = vmor %vm752_vm5, %vm753_vm6  ;;  %vm762_vm11 = vweird.f32 %v725_v58  ;;  %vm1499_vm3 = vcmask 1043456  }
 0x305   :  { %v748_v4 = vmul.f32 %v4604_v60, %v747_v62 }
 0x306   :  { %v729_v3 = vmul.f32 0.5, %v728_v63 }
 0x307   :  { %v749_v10 = vmul.f32 0.5, %v748_v4 }
 0x308   :  { %v730_v6 = vsub.f32 1.5, %v729_v3 }
 0x309   :  { %v4606_v7 = vpop.eup %4605  ;;  %v750_v21 = vsub.f32 1.5, %v749_v10  ;;  %v672_v10 = vld [vmem:[%s7333_s16] sm:$0x1] }
 0x30a   :  { %v4608_v8 = vpop.eup %4607  ;;  %v731_v9 = vmul.f32 %v4602_v57, %v730_v6  ;;  %v757_v11 = vmul.f32 %v4606_v7, %v725_v58  ;;  %vm763_vm12 = vweird.f32 %v4606_v7 }
 0x30b   :  { %v737_v12 = vmul.f32 %v4608_v8, %v723_v59  ;;  %vm743_vm7 = vweird.f32 %v4608_v8  ;;  %v751_v27 = vmul.f32 %v4604_v60, %v750_v21  ;;  %vm764_vm13 = vmor %vm762_vm11, %vm763_vm12 }
 0x30c   :  { %v735_v15 = vsel %vm734_vm4, %v4602_v57, %v731_v9  ;;  %v758_v22 = vmul.f32 %v4606_v7, %v757_v11  ;;  %vm744_vm10 = vmor %vm742_vm9, %vm743_vm7  ;;  %v983_v11 = vsub.f32 1.0, %v672_v10  ;;  %v1100_v10 = vld [vmem:[%s7334_s9] sm:$0xff]  ;;  %vm1492_vm4 = vcmask 97280  }
 0x30d   :  { %v738_v16 = vmul.f32 %v4608_v8, %v737_v12  ;;  %v766_v17 = vmul.f32 %v735_v15, %v6317_v20  ;;  %v755_v35 = vsel %vm6358_vm8, %v4604_v60, %v751_v27 }
 0x30e   :  { %v759_v31 = vmul.f32 0.5, %v758_v22  ;;  %v768_v38 = vmul.f32 %v755_v35, %v6314_v19  ;;  %v985_v12 = vmul.f32 -1e+09, %v983_v11 }
 0x30f   :  { %v739_v23 = vmul.f32 0.5, %v738_v16  ;;  %v774_v24 = vmul.f32 %v4574_v13, %v766_v17 }
 0x310   :  { %v760_v34 = vsub.f32 1.5, %v759_v31 }
 0x311   :  { %v740_v25 = vsub.f32 1.5, %v739_v23  ;;  %v782_v26 = vadd.f32 %v4575_v18, %v774_v24 }
 0x312   :  { %v761_v39 = vmul.f32 %v4606_v7, %v760_v34 }
 0x313   :  { %v741_v32 = vmul.f32 %v4608_v8, %v740_v25  ;;  %4326 = vmatmul.msk.f32.vlgmr.msra.gmra.mxu0 %vm674_vm0, %v782_v26  ;;  %4330 = vmatmul.msk.f32.vlgmr.msra.gmra.mxu1 %vm674_vm0, %v782_v26 }
 0x314   :  { %4334 = vmatmul.msk.f32.vlgmr.msra.gmra.mxu2 %vm674_vm0, %v782_v26  ;;  %v765_v40 = vsel %vm764_vm13, %v4606_v7, %v761_v39 }
 0x315   :  { %v745_v20 = vsel %vm744_vm10, %v4608_v8, %v741_v32  ;;  %v769_v42 = vmul.f32 %v765_v40, %v6328_v29 }
 0x316   :  { %v767_v33 = vmul.f32 %v745_v20, %v6331_v30  ;;  %v776_v30 = vmul.f32 %v4574_v13, %v768_v38 }
 0x317   :  { %v777_v19 = vmul.f32 %v4574_v13, %v769_v42 }
 0x318   :  { %v775_v36 = vmul.f32 %v4574_v13, %v767_v33  ;;  %v784_v41 = vadd.f32 %v4575_v18, %v776_v30  ;;  %v989_v13 = vperm.slane %v985_v12, 0 }
 0x319   :  { %v785_v43 = vadd.f32 %v4575_v18, %v777_v19 }
 0x31a   :  { %v783_v37 = vadd.f32 %v4575_v18, %v775_v36  ;;  %v673_v18 = vld [vmem:[%s7333_s16 + $0x1] sm:$0x1] }
 0x31b   :  { %v984_v22 = vsub.f32 1.0, %v673_v18 }
 0x31c   :  { %4327 = vmatmul.msk.f32.gmra.mxu0 %vm674_vm0, %v783_v37  ;;  %4331 = vmatmul.msk.f32.gmra.mxu1 %vm674_vm0, %v783_v37 }
 0x31d   :  { %4335 = vmatmul.msk.f32.gmra.mxu2 %vm674_vm0, %v783_v37  ;;  %v986_v26 = vmul.f32 -1e+09, %v984_v22 }
 0x31f   :  { %v990_v28 = vperm.slane %v986_v26, 0 }
 0x324   :  { %4328 = vmatmul.msk.f32.gmra.mxu0 %vm674_vm0, %v784_v41  ;;  %4332 = vmatmul.msk.f32.gmra.mxu1 %vm674_vm0, %v784_v41 }
 0x325   :  { %4336 = vmatmul.msk.f32.gmra.mxu2 %vm674_vm0, %v784_v41 }
 0x32c   :  { %4329 = vmatmul.msk.f32.gmra.mxu0 %vm674_vm0, %v785_v43  ;;  %4333 = vmatmul.msk.f32.gmra.mxu1 %vm674_vm0, %v785_v43 }
 0x32d   :  { %4337 = vmatmul.msk.f32.gmra.mxu2 %vm674_vm0, %v785_v43 }
 0x390   :  { %v860_v44 = vpop.f32.mrf.mxu1  ;;  %v823_v46 = vpop.f32.mrf.mxu0 }
 0x391   :  { %v861_v50 = vadd.f32 %v4577_v47, %v860_v44  ;;  %v824_v53 = vadd.f32 %v4576_v49, %v823_v46 }
 0x397   :  { %v897_v45 = vpop.f32.mrf.mxu2 }
 0x398   :  { %v898_v57 = vadd.f32 %v4578_v51, %v897_v45 }
 0x399   :  { %v863_v29 = vpop.f32.mrf.mxu1  ;;  %v826_v56 = vpop.f32.mrf.mxu0 }
 0x39a   :  { %v864_v48 = vadd.f32 %v4577_v47, %v863_v29  ;;  %v827_v59 = vadd.f32 %v4576_v49, %v826_v56  ;;  %v1103_v56 = vld [vmem:[%s7334_s9 + $0x18] sm:$0xff] }
 0x39b   :  { %1132 = vmatpush.msrb.mxu2 %v1103_v56  ;;  %v1260_v56 = vld [vmem:[#allocation10 + $0x18] sm:$0xff] }
 0x39c   :  { %4338 = vmatpush.xpose.msk.msra.mxu3 %vm674_vm0, %v864_v48 }
 0x3a0   :  { %v900_v52 = vpop.f32.mrf.mxu2  ;;  %4339 = vmatpush.xpose.msk.msra.mxu3 %vm674_vm0, %v861_v50 }
 0x3a1   :  { %v901_v54 = vadd.f32 %v4578_v51, %v900_v52  ;;  %v866_v55 = vpop.f32.mrf.mxu1  ;;  %v829_v62 = vpop.f32.mrf.mxu0 }
 0x3a2   :  { %v867_v63 = vadd.f32 %v4577_v47, %v866_v55  ;;  %v830_v4 = vadd.f32 %v4576_v49, %v829_v62 }
 0x3a3   :  { %1062 = vmatpush.msrb.mxu0 %v901_v54  ;;  %4340 = vmatmul.msk.f32.vlgmr.msra.gmra.mxu3 %vm674_vm0, %v824_v53 }
 0x3a5   :  { %1063 = vmatpush.msrb.mxu0 %v898_v57  ;;  %v1102_v57 = vld [vmem:[%s7334_s9 + $0x10] sm:$0xff] }
 0x3a6   :  { %1133 = vmatpush.msrb.mxu2 %v1102_v57  ;;  %v1259_v57 = vld [vmem:[#allocation10 + $0x10] sm:$0xff] }
 0x3a8   :  { %v903_v58 = vpop.f32.mrf.mxu2 }
 0x3a9   :  { %v869_v60 = vpop.f32.mrf.mxu1  ;;  %v904_v7 = vadd.f32 %v4578_v51, %v903_v58  ;;  %v832_v8 = vpop.f32.mrf.mxu0  ;;  %v1101_v58 = vld [vmem:[%s7334_s9 + $0x8] sm:$0xff] }
 0x3aa   :  { %v870_v61 = vadd.f32 %v4577_v47, %v869_v60  ;;  %v833_v9 = vadd.f32 %v4576_v49, %v832_v8  ;;  %1134 = vmatpush.msrb.mxu2 %v1101_v58  ;;  %v1258_v58 = vld [vmem:[#allocation10 + $0x8] sm:$0xff] }
 0x3ab   :  { %4341 = vmatmul.msk.f32.gmra.mxu3 %vm674_vm0, %v827_v59 }
 0x3ac   :  { %4342 = vmatpush.xpose.msk.msrb.mxu3 %vm674_vm0, %v870_v61  ;;  %1135 = vmatpush.msrb.mxu2 %v1100_v10 }
 0x3b0   :  { %v906_v3 = vpop.f32.mrf.mxu2  ;;  %4343 = vmatpush.xpose.msk.msrb.mxu3 %vm674_vm0, %v867_v63 }
 0x3b1   :  { %v907_v6 = vadd.f32 %v4578_v51, %v906_v3 }
 0x3b3   :  { %1091 = vmatpush.msrb.mxu1 %v907_v6  ;;  %4344 = vmatmul.msk.f32.vlgmr.msrb.gmra.mxu3 %vm674_vm0, %v830_v4 }
 0x3b4   :  { %1289 = vmatpush.msra.mxu3 %v1260_v56 }
 0x3b5   :  { %1092 = vmatpush.msrb.mxu1 %v904_v7 }
 0x3b6   :  { %1290 = vmatpush.msra.mxu3 %v1259_v57 }
 0x3b8   :  { %1291 = vmatpush.msra.mxu3 %v1258_v58 }
 0x3bb   :  { %4345 = vmatmul.msk.f32.gmra.mxu3 %vm674_vm0, %v833_v9 }
 0x426   :  { %v938_v15 = vpop.f32.mrf.mxu3 }
 0x427   :  { %v979_v16 = vmul.f32 0.17677669, %v938_v15 }
 0x429   :  { %v993_v17 = vadd.f32 %v989_v13, %v979_v16  ;;  %v4579_v16 = vld [vmem:[#allocation5] ss:$0 sm:$0xff] }
 0x42b   :  { %v998_v21 = vsel %vm997_vm14, %v993_v17, -inf }
 0x42c   :  { %999 = vmax.xlane.f32.xlu2 %v998_v21 }
 0x42e   :  { %v941_v23 = vpop.f32.mrf.mxu3 }
 0x42f   :  { %v980_v24 = vmul.f32 0.17677669, %v941_v23 }
 0x431   :  { %v994_v25 = vadd.f32 %v989_v13, %v980_v24 }
 0x433   :  { %v1001_v27 = vsel %vm997_vm14, %v994_v25, -inf }
 0x434   :  { %1002 = vmax.xlane.f32.xlu0 %v1001_v27 }
 0x436   :  { %v973_v31 = vpop.f32.mrf.mxu3 }
 0x437   :  { %v981_v32 = vmul.f32 0.17677669, %v973_v31 }
 0x439   :  { %v995_v20 = vadd.f32 %v990_v28, %v981_v32 }
 0x43b   :  { %v1004_v33 = vsel %vm997_vm14, %v995_v20, -inf }
 0x43c   :  { %1005 = vmax.xlane.f32.xlu1 %v1004_v33 }
 0x43e   :  { %v976_v34 = vpop.f32.mrf.mxu3 }
 0x43f   :  { %v982_v35 = vmul.f32 0.17677669, %v976_v34 }
 0x441   :  { %v996_v36 = vadd.f32 %v990_v28, %v982_v35 }
 0x443   :  { %v1007_v37 = vsel %vm997_vm14, %v996_v36, -inf }
 0x444   :  { %1008 = vmax.xlane.f32.xlu2 %v1007_v37  ;;  %v6419_v37 = vld [vmem:[#allocation20 + $0x8] sm:$0xff] }
 0x445   :  { %1553 = vmatpush.msra.mxu2 %v6419_v37 }
 0x49f   :  { %v1000_v38 = vpop.xlane.xlu2 %999 }
 0x4a0   :  { %v1010_v39 = vsub.f32 %v993_v17, %v1000_v38 }
 0x4a2   :  { %v1014_v30 = vmul.f32 1.442695, %v1010_v39  ;;  %v6423_v39 = vld [vmem:[#allocation20] sm:$0xff] }
 0x4a3   :  { %1554 = vmatpush.msra.mxu2 %v6423_v39 }
 0x4a4   :  { %4609 = vpow2.f32 %v1014_v30 }
 0x4a7   :  { %v1003_v40 = vpop.xlane.xlu0 %1002 }
 0x4a8   :  { %v1011_v41 = vsub.f32 %v994_v25, %v1003_v40 }
 0x4aa   :  { %v4610_v42 = vpop.eup %4609  ;;  %v1016_v19 = vmul.f32 1.442695, %v1011_v41 }
 0x4ab   :  { %v1022_v43 = vsel %vm997_vm14, %v4610_v42, 0.0 }
 0x4ac   :  { %4611 = vpow2.f32 %v1016_v19  ;;  %1023 = vadd.xlane.f32.xlu0 %v1022_v43  ;;  %v1448_v43 = vld [vmem:[#allocation17 + $0x8] sm:$0xff] }
 0x4af   :  { %v1006_v44 = vpop.xlane.xlu1 %1005 }
 0x4b0   :  { %v1012_v45 = vsub.f32 %v995_v20, %v1006_v44 }
 0x4b2   :  { %v4612_v46 = vpop.eup %4611  ;;  %v1018_v47 = vmul.f32 1.442695, %v1012_v45 }
 0x4b3   :  { %v1025_v29 = vsel %vm997_vm14, %v4612_v46, 0.0 }
 0x4b4   :  { %4613 = vpow2.f32 %v1018_v47  ;;  %1026 = vadd.xlane.f32.xlu1 %v1025_v29 }
 0x4b7   :  { %v1009_v48 = vpop.xlane.xlu2 %1008 }
 0x4b8   :  { %v1013_v49 = vsub.f32 %v996_v36, %v1009_v48  ;;  %v1450_v36 = vld [vmem:[#allocation19 + $0x8] sm:$0xff] }
 0x4b9   :  { %1475 = vmatpush.msra.mxu1 %v1450_v36 }
 0x4ba   :  { %v4614_v50 = vpop.eup %4613  ;;  %v1020_v51 = vmul.f32 1.442695, %v1013_v49 }
 0x4bb   :  { %v1028_v52 = vsel %vm997_vm14, %v4614_v50, 0.0 }
 0x4bc   :  { %4615 = vpow2.f32 %v1020_v51  ;;  %1029 = vadd.xlane.f32.xlu2 %v1028_v52 }
 0x4c2   :  { %v4616_v53 = vpop.eup %4615 }
 0x4c3   :  { %v1031_v54 = vsel %vm997_vm14, %v4616_v53, 0.0 }
 0x4c4   :  { %1032 = vadd.xlane.f32.xlu0 %v1031_v54 }
 0x51f   :  { %v1024_v55 = vpop.xlane.xlu0 %1023 }
 0x520   :  { %4617 = vrcp.f32 %v1024_v55 }
 0x526   :  { %v4618_v59 = vpop.eup %4617 }
 0x527   :  { %v1027_v60 = vpop.xlane.xlu1 %1026  ;;  %v1038_v61 = vmul.f32 %v4618_v59, %v4610_v42  ;;  %v1257_v59 = vld [vmem:[#allocation10] sm:$0xff] }
 0x528   :  { %4619 = vrcp.f32 %v1027_v60  ;;  %1292 = vmatpush.msra.mxu3 %v1257_v59 }
 0x529   :  { %4346 = vmatmul.msk.f32.vlgmr.msrb.gmra.mxu0 %vm997_vm14, %v1038_v61 }
 0x52e   :  { %v4620_v62 = vpop.eup %4619 }
 0x52f   :  { %v1030_v63 = vpop.xlane.xlu2 %1029  ;;  %v1039_v3 = vmul.f32 %v4620_v62, %v4612_v46 }
 0x530   :  { %4621 = vrcp.f32 %v1030_v63 }
 0x531   :  { %4347 = vmatmul.msk.f32.gmra.mxu0 %vm997_vm14, %v1039_v3 }
 0x536   :  { %v4622_v4 = vpop.eup %4621 }
 0x537   :  { %v1033_v6 = vpop.xlane.xlu0 %1032  ;;  %v1040_v7 = vmul.f32 %v4622_v4, %v4614_v50 }
 0x538   :  { %4623 = vrcp.f32 %v1033_v6 }
 0x539   :  { %4348 = vmatmul.msk.f32.vlgmr.msrb.gmra.mxu1 %vm997_vm14, %v1040_v7 }
 0x53e   :  { %v4624_v8 = vpop.eup %4623 }
 0x53f   :  { %v1041_v9 = vmul.f32 %v4624_v8, %v4616_v53  ;;  %v6456_v8 = vld [vmem:[#allocation29 + $0x8] sm:$0xff] }
 0x540   :  { %1679 = vmatpush.msrb.mxu3 %v6456_v8 }
 0x541   :  { %4349 = vmatmul.msk.f32.gmra.mxu1 %vm997_vm14, %v1041_v9 }
 0x5a6   :  { %v1065_v11 = vpop.f32.mrf.mxu0 }
 0x5a7   :  { %4350 = vmatmul.msk.f32.vlgmr.msrb.gmra.mxu2 %vm674_vm0, %v1065_v11 }
 0x5a8   :  { %1811 = vmatpush.msrb.mxu2 %v6419_v37 }
 0x5aa   :  { %1812 = vmatpush.msrb.mxu2 %v6423_v39 }
 0x5ae   :  { %v1068_v12 = vpop.f32.mrf.mxu0 }
 0x5af   :  { %4351 = vmatmul.msk.f32.gmra.mxu2 %vm674_vm0, %v1068_v12 }
 0x5b6   :  { %v1094_v13 = vpop.f32.mrf.mxu1 }
 0x5b7   :  { %4352 = vmatmul.msk.f32.gmra.mxu2 %vm674_vm0, %v1094_v13 }
 0x5be   :  { %v1097_v15 = vpop.f32.mrf.mxu1 }
 0x5bf   :  { %4353 = vmatmul.msk.f32.gmra.mxu2 %vm674_vm0, %v1097_v15 }
 0x62a   :  { %v1137_v17 = vpop.f32.mrf.mxu2 }
 0x62b   :  { %v1138_v18 = vadd.f32 %v4579_v16, %v1137_v17  ;;  %v6463_v17 = vld [vmem:[#allocation7] ss:$0 sm:$0xff] }
 0x62d   :  { %v1149_v21 = vadd.f32 %v1138_v18, %v6293_v1 }
 0x62f   :  { %v1153_v22 = vsel %vm674_vm0, %v1149_v21, 0.0 }
 0x630   :  { %1154 = vadd.xlane.f32.xlu1 %v1153_v22  ;;  %v6466_v22 = vld [vmem:[#allocation29] sm:$0xff] }
 0x631   :  { %1680 = vmatpush.msrb.mxu3 %v6466_v22 }
 0x632   :  { %v1140_v23 = vpop.f32.mrf.mxu2 }
 0x633   :  { %v1141_v24 = vadd.f32 %v4579_v16, %v1140_v23  ;;  %v1487_v23 = vld [vmem:[#allocation28 + $0x8] sm:$0xf] }
 0x635   :  { %v1150_v25 = vadd.f32 %v1141_v24, %v6303_v5  ;;  %v1449_v5 = vld [vmem:[#allocation19] sm:$0xff] }
 0x636   :  { %1476 = vmatpush.msra.mxu1 %v1449_v5 }
 0x637   :  { %v1156_v26 = vsel %vm674_vm0, %v1150_v25, 0.0 }
 0x638   :  { %1157 = vadd.xlane.f32.xlu2 %v1156_v26  ;;  %4360 = vmatpush.msk.msrb.mxu1 %vm1499_vm3, %v1487_v23  ;;  %v1486_v26 = vld [vmem:[#allocation28] sm:$0xff]  ;;  %v1348_v23 = vld [vmem:[%s7335_s4 + $0x30] sm:$0xff] }
 0x63a   :  { %v1143_v27 = vpop.f32.mrf.mxu2  ;;  %1518 = vmatpush.msrb.mxu1 %v1486_v26  ;;  %v1345_v26 = vld [vmem:[%s7335_s4 + $0x18] sm:$0xff] }
 0x63b   :  { %v1144_v28 = vadd.f32 %v4579_v16, %v1143_v27  ;;  %v1484_v27 = vld [vmem:[#allocation26] sm:$0xff] }
 0x63d   :  { %v1151_v31 = vadd.f32 %v1144_v28, %v6290_v0  ;;  %v1447_v0 = vld [vmem:[#allocation17] sm:$0xff] }
 0x63e   :  { %4358 = vmatmul.msk.f32.vlgmr.msra.gmra.mxu1 %vm997_vm14, %v1447_v0 }
 0x63f   :  { %v1159_v32 = vsel %vm674_vm0, %v1151_v31, 0.0  ;;  %2107 = vmatpush.msra.mxu1 %v6419_v37 }
 0x640   :  { %1160 = vadd.xlane.f32.xlu0 %v1159_v32 }
 0x641   :  { %2108 = vmatpush.msra.mxu1 %v6423_v39 }
 0x642   :  { %v1146_v20 = vpop.f32.mrf.mxu2 }
 0x643   :  { %v1147_v33 = vadd.f32 %v4579_v16, %v1146_v20 }
 0x645   :  { %v1152_v1 = vadd.f32 %v1147_v33, %v6296_v2  ;;  %v5810_v2 = vmov 0.0  }
 0x646   :  { %1555 = vmatmul.f32.vlgmr.msra.gmra.mxu2 %v5810_v2  ;;  %4359 = vmatmul.msk.f32.gmra.mxu1 %vm997_vm14, %v1448_v43  ;;  %v1357_v43 = vld [vmem:[%s7335_s4 + $0x78] sm:$0xff] }
 0x647   :  { %v1162_v34 = vsel %vm674_vm0, %v1152_v1, 0.0  ;;  %2257 = vmatpush.msra.mxu2 %v6456_v8  ;;  %1362 = vmatpush.msra.mxu0 %v1357_v43 }
 0x648   :  { %1163 = vadd.xlane.f32.xlu1 %v1162_v34 }
 0x649   :  { %2258 = vmatpush.msra.mxu2 %v6466_v22 }
 0x64e   :  { %4361 = vmatmul.msk.f32.vlgmr.msrb.gmra.mxu1 %vm1492_vm4, %v1484_v27  ;;  %v1344_v27 = vld [vmem:[%s7335_s4 + $0x10] sm:$0xff] }
 0x64f   :  { %2563 = vmatpush.msrb.mxu1 %v6456_v8 }
 0x651   :  { %2564 = vmatpush.msrb.mxu1 %v6466_v22 }
 0x6a3   :  { %v1155_v35 = vpop.xlane.xlu1 %1154 }
 0x6a4   :  { %v1165_v38 = vmul.f32 %v1155_v35, %v6309_v14 }
 0x6a6   :  { %v6425_v30 = vsub.f32 %v1149_v21, %v1165_v38 }
 0x6a8   :  { %v1173_v40 = vmul.f32 %v6425_v30, %v6425_v30 }
 0x6aa   :  { %v1177_v41 = vsel %vm674_vm0, %v1173_v40, 0.0 }
 0x6ab   :  { %1178 = vadd.xlane.f32.xlu2 %v1177_v41  ;;  %v1158_v42 = vpop.xlane.xlu2 %1157 }
 0x6ac   :  { %v1166_v19 = vmul.f32 %v1158_v42, %v6309_v14 }
 0x6ae   :  { %v6436_v44 = vsub.f32 %v1150_v25, %v1166_v19  ;;  %v1485_v19 = vld [vmem:[#allocation26 + $0x8] sm:$0xff] }
 0x6af   :  { %4362 = vmatmul.msk.f32.gmra.mxu1 %vm1492_vm4, %v1485_v19 }
 0x6b0   :  { %v1174_v45 = vmul.f32 %v6436_v44, %v6436_v44 }
 0x6b2   :  { %v1180_v46 = vsel %vm674_vm0, %v1174_v45, 0.0  ;;  %v1356_v45 = vld [vmem:[%s7335_s4 + $0x70] sm:$0xff] }
 0x6b3   :  { %1181 = vadd.xlane.f32.xlu0 %v1180_v46  ;;  %v1161_v47 = vpop.xlane.xlu0 %1160  ;;  %1363 = vmatpush.msra.mxu0 %v1356_v45 }
 0x6b4   :  { %v1167_v29 = vmul.f32 %v1161_v47, %v6309_v14 }
 0x6b6   :  { %v6443_v48 = vsub.f32 %v1151_v31, %v1167_v29  ;;  %v6470_v31 = vld [vmem:[#allocation8] ss:$0 sm:$0xff] }
 0x6b8   :  { %v1175_v49 = vmul.f32 %v6443_v48, %v6443_v48 }
 0x6ba   :  { %v1183_v50 = vsel %vm674_vm0, %v1175_v49, 0.0  ;;  %v1355_v49 = vld [vmem:[%s7335_s4 + $0x68] sm:$0xff] }
 0x6bb   :  { %v1164_v51 = vpop.xlane.xlu1 %1163  ;;  %1184 = vadd.xlane.f32.xlu1 %v1183_v50  ;;  %v1478_v40 = vpop.f32.mrf.mxu1  ;;  %1364 = vmatpush.msra.mxu0 %v1355_v49 }
 0x6bc   :  { %v1168_v52 = vmul.f32 %v1164_v51, %v6309_v14 }
 0x6be   :  { %v6449_v53 = vsub.f32 %v1152_v1, %v1168_v52 }
 0x6c0   :  { %v1176_v54 = vmul.f32 %v6449_v53, %v6449_v53 }
 0x6c2   :  { %v1186_v55 = vsel %vm674_vm0, %v1176_v54, 0.0  ;;  %v1354_v54 = vld [vmem:[%s7335_s4 + $0x60] sm:$0xff] }
 0x6c3   :  { %1187 = vadd.xlane.f32.xlu2 %v1186_v55  ;;  %v1481_v59 = vpop.f32.mrf.mxu1  ;;  %1365 = vmatpush.msra.mxu0 %v1354_v54 }
 0x6c9   :  { %v6496_v51 = vpop.f32.mrf.mxu2 }
 0x6ca   :  { %v1560_v58 = vrot.slane %v6496_v51, 1 }
 0x71e   :  { %v1179_v60 = vpop.xlane.xlu2 %1178 }
 0x71f   :  { %v1189_v61 = vmul.f32 %v1179_v60, %v6309_v14 }
 0x721   :  { %v1193_v62 = vadd.f32 1e-12, %v1189_v61 }
 0x723   :  { %4625 = vrsqrt.f32 %v1193_v62  ;;  %vm1203_vm1 = vweird.f32 %v1193_v62 }
 0x726   :  { %v1182_v63 = vpop.xlane.xlu0 %1181 }
 0x727   :  { %v1190_v3 = vmul.f32 %v1182_v63, %v6309_v14 }
 0x729   :  { %v4626_v4 = vpop.eup %4625  ;;  %v1194_v6 = vadd.f32 1e-12, %v1190_v3 }
 0x72a   :  { %v1198_v7 = vmul.f32 %v4626_v4, %v1193_v62  ;;  %vm1204_vm15 = vweird.f32 %v4626_v4 }
 0x72b   :  { %4627 = vrsqrt.f32 %v1194_v6  ;;  %vm1205_vm2 = vmor %vm1203_vm1, %vm1204_vm15  ;;  %vm1213_vm6 = vweird.f32 %v1194_v6 }
 0x72c   :  { %v1199_v9 = vmul.f32 %v4626_v4, %v1198_v7 }
 0x72e   :  { %v1200_v10 = vmul.f32 0.5, %v1199_v9  ;;  %v1185_v11 = vpop.xlane.xlu1 %1184 }
 0x72f   :  { %v1191_v12 = vmul.f32 %v1185_v11, %v6309_v14 }
 0x730   :  { %v1201_v13 = vsub.f32 1.5, %v1200_v10 }
 0x731   :  { %v4628_v15 = vpop.eup %4627  ;;  %v6461_v16 = vadd.f32 1e-12, %v1191_v12 }
 0x732   :  { %v1202_v18 = vmul.f32 %v4626_v4, %v1201_v13  ;;  %v1208_v21 = vmul.f32 %v4628_v15, %v1194_v6  ;;  %vm1214_vm5 = vweird.f32 %v4628_v15 }
 0x733   :  { %4629 = vrsqrt.f32 %v6461_v16  ;;  %vm1215_vm7 = vmor %vm1213_vm6, %vm1214_vm5  ;;  %vm1223_vm9 = vweird.f32 %v6461_v16 }
 0x734   :  { %v1206_v24 = vsel %vm1205_vm2, %v4626_v4, %v1202_v18  ;;  %v1209_v25 = vmul.f32 %v4628_v15, %v1208_v21  ;;  %v1350_v18 = vld [vmem:[%s7335_s4 + $0x40] sm:$0xff]  ;;  %v1349_v21 = vld [vmem:[%s7335_s4 + $0x38] sm:$0xff] }
 0x735   :  { %v1237_v28 = vmul.f32 %v1206_v24, %v6425_v30  ;;  %v4582_v30 = vld [vmem:[#allocation22] ss:$0 sm:$0xff]  ;;  %v1347_v24 = vld [vmem:[%s7335_s4 + $0x28] sm:$0xff] }
 0x736   :  { %v1210_v32 = vmul.f32 0.5, %v1209_v25  ;;  %v1188_v20 = vpop.xlane.xlu2 %1187  ;;  %v6489_v47 = vadd.f32 %v4582_v30, %v1478_v40  ;;  %v6503_v62 = vadd.f32 %v4582_v30, %v1481_v59  ;;  %v1346_v25 = vld [vmem:[%s7335_s4 + $0x20] sm:$0xff] }
 0x737   :  { %v1245_v33 = vmul.f32 %v6463_v17, %v1237_v28  ;;  %v1192_v1 = vmul.f32 %v1188_v20, %v6309_v14  ;;  %v1343_v28 = vld [vmem:[%s7335_s4 + $0x8] sm:$0xff] }
 0x738   :  { %v1211_v34 = vsub.f32 1.5, %v1210_v32  ;;  %v1564_v4 = vadd.f32 %v1560_v58, %v6503_v62  ;;  %v4583_v32 = vld [vmem:[#allocation11] ss:$0 sm:$0xff] }
 0x739   :  { %v4630_v35 = vpop.eup %4629  ;;  %v1196_v36 = vadd.f32 1e-12, %v1192_v1  ;;  %v6478_v5 = vadd.f32 %v6470_v31, %v1245_v33 }
 0x73a   :  { %v1212_v38 = vmul.f32 %v4628_v15, %v1211_v34  ;;  %v1218_v0 = vmul.f32 %v4630_v35, %v6461_v16  ;;  %vm1224_vm8 = vweird.f32 %v4630_v35  ;;  %v1352_v16 = vld [vmem:[%s7335_s4 + $0x50] sm:$0xff]  ;;  %v4366_v30 = vmul.f32 -1.442695, %v1564_v4 }
 0x73b   :  { %4631 = vrsqrt.f32 %v1196_v36  ;;  %4354 = vmatmul.msk.f32.vlgmr.msra.gmra.mxu3 %vm674_vm0, %v6478_v5  ;;  %vm1225_vm10 = vmor %vm1223_vm9, %vm1224_vm8  ;;  %vm1233_vm12 = vweird.f32 %v1196_v36 }
 0x73c   :  { %v1219_v41 = vmul.f32 %v4630_v35, %v1218_v0  ;;  %v1216_v42 = vsel %vm1215_vm7, %v4628_v15, %v1212_v38  ;;  %1956 = vmatpush.msra.mxu3 %v6456_v8  ;;  %4633 = vtanh.f32 %v1564_v4 }
 0x73d   :  { %v1238_v46 = vmul.f32 %v1216_v42, %v6436_v44 }
 0x73e   :  { %v1220_v29 = vmul.f32 0.5, %v1219_v41  ;;  %1957 = vmatpush.msra.mxu3 %v6466_v22 }
 0x73f   :  { %v1246_v50 = vmul.f32 %v6463_v17, %v1238_v46 }
 0x740   :  { %v1221_v52 = vsub.f32 1.5, %v1220_v29  ;;  %v1520_v29 = vpop.f32.mrf.mxu1 }
 0x741   :  { %v4632_v44 = vpop.eup %4631  ;;  %v1254_v55 = vadd.f32 %v6470_v31, %v1246_v50 }
 0x742   :  { %v1222_v56 = vmul.f32 %v4630_v35, %v1221_v52  ;;  %v1228_v57 = vmul.f32 %v4632_v44, %v1196_v36  ;;  %vm1234_vm11 = vweird.f32 %v4632_v44  ;;  %v4634_v12 = vpop.eup %4633 }
 0x743   :  { %4355 = vmatmul.msk.f32.gmra.mxu3 %vm674_vm0, %v1254_v55  ;;  %vm1235_vm13 = vmor %vm1233_vm12, %vm1234_vm11  ;;  %1611 = vrot.lane.b32.xlu2 %v4634_v12, %s5811_s14 }
 0x744   :  { %v1229_v60 = vmul.f32 %v4632_v44, %v1228_v57  ;;  %v1226_v61 = vsel %vm1225_vm10, %v4630_v35, %v1222_v56 }
 0x745   :  { %v1239_v63 = vmul.f32 %v1226_v61, %v6443_v48 }
 0x746   :  { %v1230_v3 = vmul.f32 0.5, %v1229_v60 }
 0x747   :  { %v1247_v6 = vmul.f32 %v6463_v17, %v1239_v63  ;;  %v4584_v63 = vld [vmem:[#allocation31] ss:$0 sm:$0xff] }
 0x748   :  { %v1231_v7 = vsub.f32 1.5, %v1230_v3  ;;  %v6537_v12 = vadd.f32 %v4584_v63, %v1520_v29 }
 0x749   :  { %v6509_v9 = vadd.f32 %v6470_v31, %v1247_v6 }
 0x74a   :  { %v1232_v10 = vmul.f32 %v4632_v44, %v1231_v7 }
 0x74b   :  { %4356 = vmatmul.msk.f32.gmra.mxu3 %vm674_vm0, %v6509_v9 }
 0x74c   :  { %v1236_v48 = vsel %vm1235_vm13, %v4632_v44, %v1232_v10 }
 0x74d   :  { %v1240_v11 = vmul.f32 %v1236_v48, %v6449_v53  ;;  %v1353_v53 = vld [vmem:[%s7335_s4 + $0x58] sm:$0xff] }
 0x74e   :  { %1366 = vmatpush.msra.mxu0 %v1353_v53 }
 0x74f   :  { %v1248_v13 = vmul.f32 %v6463_v17, %v1240_v11  ;;  %v1351_v17 = vld [vmem:[%s7335_s4 + $0x48] sm:$0xff]  ;;  %v1523_v11 = vpop.f32.mrf.mxu1 }
 0x750   :  { %1367 = vmatpush.msra.mxu0 %v1352_v16  ;;  %v6539_v53 = vadd.f32 %v4584_v63, %v1523_v11 }
 0x751   :  { %v1256_v15 = vadd.f32 %v6470_v31, %v1248_v13  ;;  %v1342_v31 = vld [vmem:[%s7335_s4] sm:$0xff] }
 0x752   :  { %1368 = vmatpush.msra.mxu0 %v1351_v17 }
 0x753   :  { %4357 = vmatmul.msk.f32.gmra.mxu3 %vm674_vm0, %v1256_v15 }
 0x754   :  { %1369 = vmatpush.msra.mxu0 %v1350_v18 }
 0x756   :  { %1370 = vmatpush.msra.mxu0 %v1349_v21 }
 0x758   :  { %1371 = vmatpush.msra.mxu0 %v1348_v23 }
 0x75a   :  { %1372 = vmatpush.msra.mxu0 %v1347_v24 }
 0x75b   :  { %1681 = vmatmul.f32.vlgmr.msrb.gmra.mxu3 %v5810_v2 }
 0x75c   :  { %2413 = vmatpush.msrb.mxu3 %v6419_v37  ;;  %1373 = vmatpush.msra.mxu0 %v1346_v25 }
 0x75e   :  { %2414 = vmatpush.msrb.mxu3 %v6423_v39  ;;  %1374 = vmatpush.msra.mxu0 %v1345_v26 }
 0x760   :  { %1375 = vmatpush.msra.mxu0 %v1344_v27 }
 0x762   :  { %1376 = vmatpush.msra.mxu0 %v1343_v28 }
 0x764   :  { %1377 = vmatpush.msra.mxu0 %v1342_v31 }
 0x766   :  { %3025 = vmatpush.msrb.mxu0 %v6419_v37 }
 0x768   :  { %3026 = vmatpush.msrb.mxu0 %v6423_v39 }
 0x79d   :  { %v1612_v29 = vpop.permute.xlu2 %1611 }
 0x7be   :  { %v1294_v20 = vpop.f32.mrf.mxu3 }
 0x7bf   :  { %v1295_v33 = vadd.f32 %v4583_v32, %v1294_v20 }
 0x7c1   :  { %v1310_v1 = vmul.f32 0.044715, %v1295_v33  ;;  %v1306_v54 = vmul.f32 0.5, %v1295_v33 }
 0x7c3   :  { %v1314_v34 = vmul.f32 %v1310_v1, %v1295_v33 }
 0x7c5   :  { %v1318_v35 = vmul.f32 %v1314_v34, %v1295_v33 }
 0x7c6   :  { %v1297_v36 = vpop.f32.mrf.mxu3 }
 0x7c7   :  { %v1298_v38 = vadd.f32 %v4583_v32, %v1297_v36  ;;  %v1322_v0 = vadd.f32 %v1318_v35, %v1295_v33  ;;  %v1563_v35 = vadd.f32 %v6496_v51, %v6489_v47 }
 0x7c9   :  { %v1326_v40 = vmul.f32 0.7978846, %v1322_v0  ;;  %v1311_v41 = vmul.f32 0.044715, %v1298_v38  ;;  %v1307_v10 = vmul.f32 0.5, %v1298_v38 }
 0x7cb   :  { %4635 = vtanh.f32 %v1326_v40  ;;  %v1315_v42 = vmul.f32 %v1311_v41, %v1298_v38 }
 0x7cc   :  { %4637 = vpow2.f32 %v4366_v30 }
 0x7cd   :  { %v1319_v19 = vmul.f32 %v1315_v42, %v1298_v38 }
 0x7ce   :  { %v1300_v43 = vpop.f32.mrf.mxu3 }
 0x7cf   :  { %v1301_v45 = vadd.f32 %v4583_v32, %v1300_v43  ;;  %v1323_v46 = vadd.f32 %v1319_v19, %v1298_v38 }
 0x7d1   :  { %v4636_v49 = vpop.eup %4635  ;;  %v1327_v50 = vmul.f32 0.7978846, %v1323_v46  ;;  %v1312_v52 = vmul.f32 0.044715, %v1301_v45  ;;  %v1308_v27 = vmul.f32 0.5, %v1301_v45 }
 0x7d2   :  { %v1334_v44 = vadd.f32 1.0, %v4636_v49  ;;  %v4638_v55 = vpop.eup %4637 }
 0x7d3   :  { %4639 = vtanh.f32 %v1327_v50  ;;  %v1316_v56 = vmul.f32 %v1312_v52, %v1301_v45  ;;  %v1572_v59 = vadd.f32 1.0, %v4638_v55 }
 0x7d4   :  { %v1338_v57 = vmul.f32 %v1334_v44, %v1306_v54  ;;  %v4365_v44 = vmul.f32 -1.442695, %v1563_v35 }
 0x7d5   :  { %v1320_v58 = vmul.f32 %v1316_v56, %v1301_v45  ;;  %4641 = vrcp.f32 %v1572_v59  ;;  %vm1593_vm15 = vweird.f32 %v1572_v59  ;;  %v1599_v40 = vand.u32 2147483648, %v1572_v59 }
 0x7d6   :  { %v1303_v60 = vpop.f32.mrf.mxu3  ;;  %1378 = vmatmul.f32.vlgmr.msra.gmra.mxu0 %v1338_v57  ;;  %v1597_v19 = vand.u32 2147483647, %v1572_v59 }
 0x7d7   :  { %v1304_v61 = vadd.f32 %v4583_v32, %v1303_v60  ;;  %v1324_v3 = vadd.f32 %v1320_v58, %v1301_v45  ;;  %3637 = vmatpush.msra.mxu0 %v6419_v37  ;;  %v1600_v45 = vor.u32 1.1754944e-38, %v1599_v40 }
 0x7d8   :  { %vm1598_vm3 = vcmp.eq.f32.partialorder %v1597_v19, 8.507059e+37 }
 0x7d9   :  { %v4640_v4 = vpop.eup %4639  ;;  %v1328_v6 = vmul.f32 0.7978846, %v1324_v3  ;;  %v1313_v7 = vmul.f32 0.044715, %v1304_v61  ;;  %3638 = vmatpush.msra.mxu0 %v6423_v39  ;;  %v1309_v0 = vmul.f32 0.5, %v1304_v61 }
 0x7da   :  { %v1335_v48 = vadd.f32 1.0, %v4640_v4 }
 0x7db   :  { %4643 = vtanh.f32 %v1328_v6  ;;  %v1317_v13 = vmul.f32 %v1313_v7, %v1304_v61  ;;  %v4642_v24 = vpop.eup %4641 }
 0x7dc   :  { %v1339_v15 = vmul.f32 %v1335_v48, %v1307_v10  ;;  %v1589_v32 = vmul.f32 %v4642_v24, %v1572_v59  ;;  %vm1594_vm1 = vweird.f32 %v4642_v24  ;;  %v4585_v48 = vld [vmem:[#allocation13] ss:$0 sm:$0xff] }
 0x7dd   :  { %v1321_v16 = vmul.f32 %v1317_v13, %v1304_v61  ;;  %vm1595_vm2 = vmor %vm1593_vm15, %vm1594_vm1 }
 0x7de   :  { %1381 = vmatmul.f32.gmra.mxu0 %v1339_v15  ;;  %v1682_v17 = vpop.f32.mrf.mxu3  ;;  %v1590_v1 = vsub.f32 1.0, %v1589_v32 }
 0x7df   :  { %v1686_v18 = vrot.slane %v1682_v17, 1  ;;  %v1689_v21 = vadd.f32 %v1682_v17, %v6537_v12  ;;  %v1325_v23 = vadd.f32 %v1321_v16, %v1304_v61 }
 0x7e0   :  { %v1591_v36 = vmul.f32 %v4642_v24, %v1590_v1 }
 0x7e1   :  { %v4644_v25 = vpop.eup %4643  ;;  %v1690_v26 = vadd.f32 %v1686_v18, %v6539_v53  ;;  %4645 = vtanh.f32 %v1689_v21  ;;  %v1329_v31 = vmul.f32 0.7978846, %v1325_v23  ;;  %v4367_v50 = vmul.f32 -1.442695, %v1689_v21 }
 0x7e2   :  { %v1336_v28 = vadd.f32 1.0, %v4644_v25  ;;  %v1592_v42 = vadd.f32 %v4642_v24, %v1591_v36 }
 0x7e3   :  { %4647 = vtanh.f32 %v1690_v26  ;;  %v4368_v52 = vmul.f32 -1.442695, %v1690_v26 }
 0x7e4   :  { %v1340_v20 = vmul.f32 %v1336_v28, %v1308_v27  ;;  %4649 = vtanh.f32 %v1329_v31  ;;  %v1596_v46 = vsel %vm1595_vm2, %v4642_v24, %v1592_v42  ;;  %vm1647_vm2 = vcmask 1041409  }
 0x7e5   :  { %4651 = vtanh.f32 %v1563_v35  ;;  %v6548_v51 = vsel %vm1598_vm3, %v1600_v45, %v1596_v46 }
 0x7e6   :  { %1383 = vmatmul.f32.gmra.mxu0 %v1340_v20  ;;  %v1616_v49 = vmul.f32 %v1612_v29, %v6548_v51  ;;  %4653 = vpow2.f32 %v4367_v50 }
 0x7e7   :  { %v4646_v33 = vpop.eup %4645  ;;  %4655 = vpow2.f32 %v4368_v52 }
 0x7e8   :  { %1735 = vrot.lane.b32.xlu1 %v4646_v33, %s5811_s14  ;;  %4657 = vpow2.f32 %v4365_v44 }
 0x7e9   :  { %v4648_v34 = vpop.eup %4647 }
 0x7ea   :  { %1737 = vrot.lane.b32.xlu0 %v4648_v34, %s5811_s14  ;;  %v4650_v38 = vpop.eup %4649 }
 0x7eb   :  { %v1337_v30 = vadd.f32 1.0, %v4650_v38  ;;  %v4652_v43 = vpop.eup %4651 }
 0x7ec   :  { %v4654_v54 = vpop.eup %4653 }
 0x7ed   :  { %v1341_v41 = vmul.f32 %v1337_v30, %v1309_v0  ;;  %v4656_v55 = vpop.eup %4655  ;;  %v1697_v56 = vadd.f32 1.0, %v4654_v54 }
 0x7ee   :  { %v1698_v57 = vadd.f32 1.0, %v4656_v55  ;;  %v4658_v58 = vpop.eup %4657 }
 0x7ef   :  { %1386 = vmatmul.f32.gmra.mxu0 %v1341_v41  ;;  %4659 = vrcp.f32 %v1697_v56  ;;  %v1571_v60 = vadd.f32 1.0, %v4658_v58  ;;  %v1710_v18 = vand.u32 2147483648, %v1697_v56  ;;  %vm1704_vm5 = vweird.f32 %v1697_v56 }
 0x7f0   :  { %4661 = vrcp.f32 %v1698_v57  ;;  %v1708_v21 = vand.u32 2147483647, %v1697_v56  ;;  %v1725_v26 = vand.u32 2147483648, %v1698_v57  ;;  %vm1719_vm8 = vweird.f32 %v1698_v57 }
 0x7f1   :  { %4663 = vrcp.f32 %v1571_v60  ;;  %v1711_v27 = vor.u32 1.1754944e-38, %v1710_v18  ;;  %v1723_v28 = vand.u32 2147483647, %v1698_v57  ;;  %vm1578_vm12 = vweird.f32 %v1571_v60 }
 0x7f2   :  { %1609 = vrot.lane.b32.xlu0 %v4652_v43, %s5811_s14  ;;  %vm1709_vm9 = vcmp.eq.f32.partialorder %v1708_v21, 8.507059e+37  ;;  %v1726_v35 = vor.u32 1.1754944e-38, %v1725_v26  ;;  %v1584_v0 = vand.u32 2147483648, %v1571_v60  ;;  %v1582_v41 = vand.u32 2147483647, %v1571_v60 }
 0x7f3   :  { %vm1724_vm11 = vcmp.eq.f32.partialorder %v1723_v28, 8.507059e+37 }
 0x7f4   :  { %v1585_v42 = vor.u32 1.1754944e-38, %v1584_v0  ;;  %vm1583_vm1 = vcmp.eq.f32.partialorder %v1582_v41, 8.507059e+37 }
 0x7f5   :  { %v4660_v59 = vpop.eup %4659 }
 0x7f6   :  { %v4662_v61 = vpop.eup %4661  ;;  %v1700_v63 = vmul.f32 %v4660_v59, %v1697_v56  ;;  %vm1705_vm4 = vweird.f32 %v4660_v59 }
 0x7f7   :  { %v1715_v3 = vmul.f32 %v4662_v61, %v1698_v57  ;;  %v4664_v7 = vpop.eup %4663  ;;  %vm1706_vm6 = vmor %vm1704_vm5, %vm1705_vm4  ;;  %vm1720_vm7 = vweird.f32 %v4662_v61  ;;  %v5814_v57 = vmov 0  }
 0x7f8   :  { %v1701_v4 = vsub.f32 1.0, %v1700_v63  ;;  %v1574_v13 = vmul.f32 %v4664_v7, %v1571_v60  ;;  %vm1721_vm10 = vmor %vm1719_vm8, %vm1720_vm7  ;;  %vm1579_vm13 = vweird.f32 %v4664_v7  ;;  %4531 = vset.pattern.permute.xlu0 %v5814_v57  ;;  %4537 = vset.pattern.permute.xlu1 %v5814_v57 }
 0x7f9   :  { %v1716_v6 = vsub.f32 1.0, %v1715_v3  ;;  %vm1580_vm15 = vmor %vm1578_vm12, %vm1579_vm13  ;;  %4548 = vset.pattern.permute.xlu2 %v5814_v57 }
 0x7fa   :  { %1621 = vrot.lane.b32.xlu0 %v1616_v49, %s5812_s18  ;;  %v1702_v10 = vmul.f32 %v4660_v59, %v1701_v4  ;;  %v1575_v24 = vsub.f32 1.0, %v1574_v13  ;;  %v1606_v49 = vmul.f32 0.0, %v6548_v51 }
 0x7fb   :  { %v1717_v11 = vmul.f32 %v4662_v61, %v1716_v6 }
 0x7fc   :  { %v1703_v16 = vadd.f32 %v4660_v59, %v1702_v10  ;;  %v1576_v33 = vmul.f32 %v4664_v7, %v1575_v24 }
 0x7fd   :  { %v1718_v23 = vadd.f32 %v4662_v61, %v1717_v11 }
 0x7fe   :  { %v1707_v25 = vsel %vm1706_vm6, %v4660_v59, %v1703_v16  ;;  %v1577_v40 = vadd.f32 %v4664_v7, %v1576_v33  ;;  %v6577_v16 = vld [vmem:[%s7337_s25] sm:$0x3] }
 0x7ff   :  { %v6554_v32 = vsel %vm1709_vm9, %v1711_v27, %v1707_v25  ;;  %v1722_v20 = vsel %vm1721_vm10, %v4662_v61, %v1718_v23  ;;  %vm1531_vm4 = vcmp.gt.s32.totalorder %v6577_v16, 0 }
 0x800   :  { %v6557_v38 = vsel %vm1724_vm11, %v1726_v35, %v1722_v20  ;;  %v1581_v19 = vsel %vm1580_vm15, %v4664_v7, %v1577_v40  ;;  %v1731_v7 = vmul.f32 0.0, %v6554_v32  ;;  %v4364_v23 = vsel %vm1531_vm4, 1.0, %v5810_v2 }
 0x801   :  { %v1586_v45 = vsel %vm1583_vm1, %v1585_v42, %v1581_v19  ;;  %v1732_v55 = vmul.f32 0.0, %v6557_v38 }
 0x802   :  { %v1605_v59 = vmul.f32 0.0, %v1586_v45 }
 0x853   :  { %v1379_v15 = vpop.f32.mrf.mxu0 }
 0x854   :  { %v6552_v17 = vadd.f32 %v4585_v48, %v1379_v15  ;;  %v6574_v15 = vld [vmem:[%s7336_s23] sm:$0x3] }
 0x855   :  { %vm1528_vm3 = vcmp.gt.s32.totalorder %v6574_v15, 0 }
 0x856   :  { %v4363_v21 = vsel %vm1528_vm3, 1.0, %v5810_v2 }
 0x857   :  { %v4532_v24 = vpack.i.bf16 %v4363_v21, %v4364_v23 }
 0x85a   :  { %v1736_v31 = vpop.permute.xlu1 %1735 }
 0x85b   :  { %v1741_v1 = vmul.f32 %v1736_v31, %v6554_v32  ;;  %v1382_v34 = vpop.f32.mrf.mxu0 }
 0x85c   :  { %v1738_v36 = vpop.permute.xlu0 %1737 }
 0x85d   :  { %1745 = vrot.lane.b32.xlu1 %v1741_v1, %s5812_s18  ;;  %v1742_v30 = vmul.f32 %v1738_v36, %v6557_v38 }
 0x85f   :  { %1747 = vrot.lane.b32.xlu2 %v1742_v30, %s5812_s18 }
 0x863   :  { %v6562_v43 = vpop.f32.mrf.mxu0 }
 0x864   :  { %v1610_v46 = vpop.permute.xlu0 %1609 }
 0x865   :  { %v1615_v29 = vmul.f32 %v1610_v46, %v1586_v45 }
 0x867   :  { %1619 = vrot.lane.b32.xlu2 %v1615_v29, %s5812_s18 }
 0x86c   :  { %v1622_v50 = vpop.permute.xlu0 %1621  ;;  %v1387_v52 = vpop.f32.mrf.mxu0 }
 0x86d   :  { %v1626_v54 = vadd.f32 %v1622_v50, %v1606_v49 }
 0x86f   :  { %4665 = vtanh.f32 %v1626_v54  ;;  %v1656_v63 = vrot.slane %v1626_v54, 7 }
 0x875   :  { %v4666_v44 = vpop.eup %4665 }
 0x876   :  { %1633 = vrot.lane.b32.xlu2 %v4666_v44, %s5813_s22 }
 0x8b9   :  { %v1748_v56 = vpop.permute.xlu2 %1747 }
 0x8ba   :  { %v1752_v58 = vadd.f32 %v1748_v56, %v1732_v55 }
 0x8bc   :  { %4667 = vtanh.f32 %v1752_v58  ;;  %v1781_v48 = vrot.slane %v1752_v58, 7 }
 0x8c1   :  { %v1620_v60 = vpop.permute.xlu2 %1619 }
 0x8c2   :  { %v4668_v61 = vpop.eup %4667  ;;  %v1625_v3 = vadd.f32 %v1620_v60, %v1605_v59 }
 0x8c3   :  { %1759 = vrot.lane.b32.xlu1 %v4668_v61, %s5813_s22 }
 0x8c4   :  { %4669 = vtanh.f32 %v1625_v3  ;;  %v1657_v4 = vsel %vm1647_vm2, %v1656_v63, %v1625_v3 }
 0x8ca   :  { %v4670_v6 = vpop.eup %4669 }
 0x8cb   :  { %1631 = vrot.lane.b32.xlu1 %v4670_v6, %s5813_s22 }
 0x8cf   :  { %v1746_v10 = vpop.permute.xlu1 %1745 }
 0x8d0   :  { %v1751_v11 = vadd.f32 %v1746_v10, %v1731_v7  ;;  %v1634_v26 = vpop.permute.xlu2 %1633 }
 0x8d1   :  { %v1638_v27 = vmul.f32 %v1634_v26, %v6548_v51 }
 0x8d2   :  { %4671 = vtanh.f32 %v1751_v11  ;;  %v1782_v13 = vsel %vm1647_vm2, %v1781_v48, %v1751_v11 }
 0x8d3   :  { %v1646_v31 = vrot.slane %v1638_v27, 7 }
 0x8d8   :  { %v4672_v18 = vpop.eup %4671 }
 0x8d9   :  { %1757 = vrot.lane.b32.xlu0 %v4672_v18, %s5813_s22 }
 0x8e1   :  { %4533 = vperm.xlu0 %4531, %v4532_v24  }
 0x935   :  { %v1760_v25 = vpop.permute.xlu1 %1759 }
 0x936   :  { %v1764_v1 = vmul.f32 %v1760_v25, %v6557_v38 }
 0x938   :  { %v1772_v35 = vrot.slane %v1764_v1, 7 }
 0x93d   :  { %v1632_v28 = vpop.permute.xlu1 %1631 }
 0x93e   :  { %v1637_v20 = vmul.f32 %v1632_v28, %v1586_v45 }
 0x940   :  { %v1648_v33 = vsel %vm1647_vm2, %v1646_v31, %v1637_v20 }
 0x941   :  { %1649 = vrot.lane.b32.xlu1 %v1648_v33, %s5815_s26 }
 0x949   :  { %1658 = vrot.lane.b32.xlu1 %v1657_v4, %s5816_s12 }
 0x94b   :  { %v1758_v34 = vpop.permute.xlu0 %1757 }
 0x94c   :  { %v1763_v36 = vmul.f32 %v1758_v34, %v6554_v32 }
 0x94e   :  { %v1773_v0 = vsel %vm1647_vm2, %v1772_v35, %v1763_v36 }
 0x94f   :  { %1774 = vrot.lane.b32.xlu2 %v1773_v0, %s5815_s26 }
 0x953   :  { %v4534_v51 = vpop.permute.xlu0 %4533 }
 0x954   :  { %v4535_v30 = vunpack.i.l.bf16 %v4534_v51  ;;  %v4536_v38 = vunpack.i.h.bf16 %v4534_v51 }
 0x957   :  { %1783 = vrot.lane.b32.xlu2 %v1782_v13, %s5816_s12 }
 0x9a9   :  { %v1775_v40 = vpop.permute.xlu2 %1774 }
 0x9aa   :  { %v6593_v41 = vmul.f32 %v4535_v30, %v1775_v40 }
 0x9ac   :  { %4374 = vmatmul.msk.f32.vlgmr.msra.gmra.mxu3 %vm997_vm14, %v6593_v41 }
 0x9ad   :  { %2869 = vmatpush.msra.mxu3 %v6456_v8 }
 0x9af   :  { %2870 = vmatpush.msra.mxu3 %v6466_v22 }
 0x9b1   :  { %v1784_v22 = vpop.permute.xlu2 %1783 }
 0x9b2   :  { %v6608_v52 = vmul.f32 %v4535_v30, %v1784_v22 }
 0x9b3   :  { %v1650_v32 = vpop.permute.xlu1 %1649 }
 0x9b4   :  { %v6599_v42 = vmul.f32 %v4536_v38, %v1650_v32  ;;  %v2009_v44 = vrot.slane %v6608_v52, 7 }
 0x9b6   :  { %4371 = vmatmul.msk.f32.vlgmr.msrb.gmra.mxu2 %vm997_vm14, %v6599_v42 }
 0x9b7   :  { %2719 = vmatpush.msrb.mxu2 %v6419_v37 }
 0x9b9   :  { %2720 = vmatpush.msrb.mxu2 %v6423_v39 }
 0x9bb   :  { %v1659_v55 = vpop.permute.xlu1 %1658 }
 0x9bc   :  { %v6615_v56 = vmul.f32 %v4536_v38, %v1659_v55 }
 0x9be   :  { %v1864_v58 = vrot.slane %v6615_v56, 7 }
 0xa2f   :  { %v1959_v19 = vpop.f32.mrf.mxu3 }
 0xa30   :  { %v1963_v45 = vrot.slane %v1959_v19, 7  ;;  %v1967_v46 = vadd.f32 %v1959_v19, %v6539_v53 }
 0xa32   :  { %v1966_v29 = vadd.f32 %v1963_v45, %v6537_v12  ;;  %4673 = vtanh.f32 %v1967_v46  ;;  %v4376_v60 = vmul.f32 -1.442695, %v1967_v46 }
 0xa34   :  { %4675 = vtanh.f32 %v1966_v29  ;;  %v4375_v4 = vmul.f32 -1.442695, %v1966_v29 }
 0xa38   :  { %v4674_v8 = vpop.eup %4673 }
 0xa39   :  { %2022 = vrot.lane.b32.xlu2 %v4674_v8, %s5811_s14  ;;  %v1814_v49 = vpop.f32.mrf.mxu2 }
 0xa3a   :  { %v4676_v50 = vpop.eup %4675  ;;  %v1818_v54 = vrot.slane %v1814_v49, 7  ;;  %v1822_v37 = vadd.f32 %v1814_v49, %v6503_v62 }
 0xa3b   :  { %2020 = vrot.lane.b32.xlu0 %v4676_v50, %s5811_s14 }
 0xa3c   :  { %v1821_v39 = vadd.f32 %v1818_v54, %v6489_v47  ;;  %4677 = vtanh.f32 %v1822_v37  ;;  %v4373_v11 = vmul.f32 -1.442695, %v1822_v37 }
 0xa3e   :  { %4679 = vtanh.f32 %v1821_v39  ;;  %v4372_v23 = vmul.f32 -1.442695, %v1821_v39 }
 0xa3f   :  { %4681 = vpow2.f32 %v4376_v60 }
 0xa41   :  { %2010 = vrot.lane.b32.xlu2 %v2009_v44, %s5812_s18 }
 0xa42   :  { %v4678_v57 = vpop.eup %4677 }
 0xa43   :  { %1877 = vrot.lane.b32.xlu0 %v4678_v57, %s5811_s14 }
 0xa44   :  { %v4680_v59 = vpop.eup %4679 }
 0xa45   :  { %1875 = vrot.lane.b32.xlu1 %v4680_v59, %s5811_s14  ;;  %v4682_v61 = vpop.eup %4681 }
 0xa46   :  { %v1975_v63 = vadd.f32 1.0, %v4682_v61 }
 0xa48   :  { %4683 = vrcp.f32 %v1975_v63  ;;  %v2002_v21 = vand.u32 2147483648, %v1975_v63  ;;  %vm1996_vm6 = vweird.f32 %v1975_v63  ;;  %v2000_v24 = vand.u32 2147483647, %v1975_v63 }
 0xa49   :  { %1865 = vrot.lane.b32.xlu2 %v1864_v58, %s5812_s18  ;;  %4685 = vpow2.f32 %v4375_v4 }
 0xa4a   :  { %4687 = vpow2.f32 %v4373_v11  ;;  %v2003_v26 = vor.u32 1.1754944e-38, %v2002_v21  ;;  %vm2001_vm8 = vcmp.eq.f32.partialorder %v2000_v24, 8.507059e+37  ;;  %v2050_v21 = vrot.slane %v6593_v41, 7 }
 0xa4d   :  { %2012 = vrot.lane.b32.xlu1 %v6608_v52, %s5812_s18 }
 0xa4e   :  { %v4684_v3 = vpop.eup %4683 }
 0xa4f   :  { %v1992_v6 = vmul.f32 %v4684_v3, %v1975_v63  ;;  %v4686_v48 = vpop.eup %4685  ;;  %vm1997_vm5 = vweird.f32 %v4684_v3 }
 0xa50   :  { %v1974_v18 = vadd.f32 1.0, %v4686_v48  ;;  %vm1998_vm7 = vmor %vm1996_vm6, %vm1997_vm5  ;;  %v4688_v31 = vpop.eup %4687 }
 0xa51   :  { %v1993_v7 = vsub.f32 1.0, %v1992_v6  ;;  %v1830_v1 = vadd.f32 1.0, %v4688_v31 }
 0xa52   :  { %4689 = vrcp.f32 %v1974_v18  ;;  %v1987_v19 = vand.u32 2147483648, %v1974_v18  ;;  %vm1981_vm10 = vweird.f32 %v1974_v18  ;;  %v1985_v29 = vand.u32 2147483647, %v1974_v18 }
 0xa53   :  { %v1994_v10 = vmul.f32 %v4684_v3, %v1993_v7  ;;  %4691 = vpow2.f32 %v4372_v23  ;;  %v1857_v57 = vand.u32 2147483648, %v1830_v1  ;;  %vm1851_vm15 = vweird.f32 %v1830_v1 }
 0xa54   :  { %4693 = vrcp.f32 %v1830_v1  ;;  %v1988_v22 = vor.u32 1.1754944e-38, %v1987_v19  ;;  %vm1986_vm12 = vcmp.eq.f32.partialorder %v1985_v29, 8.507059e+37  ;;  %v1855_v58 = vand.u32 2147483647, %v1830_v1 }
 0xa55   :  { %v1995_v13 = vadd.f32 %v4684_v3, %v1994_v10  ;;  %v1858_v63 = vor.u32 1.1754944e-38, %v1857_v57 }
 0xa56   :  { %vm1856_vm5 = vcmp.eq.f32.partialorder %v1855_v58, 8.507059e+37 }
 0xa57   :  { %v1999_v25 = vsel %vm1998_vm7, %v4684_v3, %v1995_v13 }
 0xa58   :  { %v6623_v27 = vsel %vm2001_vm8, %v2003_v26, %v1999_v25  ;;  %v4690_v33 = vpop.eup %4689  ;;  %vm1788_vm8 = vcmp.gt.s32.totalorder %v6574_v15, 1 }
 0xa59   :  { %v4692_v34 = vpop.eup %4691  ;;  %v1977_v36 = vmul.f32 %v4690_v33, %v1974_v18  ;;  %vm1982_vm9 = vweird.f32 %v4690_v33 }
 0xa5a   :  { %v1829_v35 = vadd.f32 1.0, %v4692_v34  ;;  %v4694_v51 = vpop.eup %4693  ;;  %vm1983_vm11 = vmor %vm1981_vm10, %vm1982_vm9  ;;  %vm1791_vm9 = vcmp.gt.s32.totalorder %v6577_v16, 1 }
 0xa5b   :  { %v1978_v0 = vsub.f32 1.0, %v1977_v36  ;;  %v1847_v40 = vmul.f32 %v4694_v51, %v1830_v1  ;;  %vm1852_vm13 = vweird.f32 %v4694_v51 }
 0xa5c   :  { %4695 = vrcp.f32 %v1829_v35  ;;  %vm1853_vm1 = vmor %vm1851_vm15, %vm1852_vm13  ;;  %v1842_v61 = vand.u32 2147483648, %v1829_v35  ;;  %vm1836_vm4 = vweird.f32 %v1829_v35  ;;  %v1840_v3 = vand.u32 2147483647, %v1829_v35 }
 0xa5d   :  { %v1979_v30 = vmul.f32 %v4690_v33, %v1978_v0  ;;  %v1848_v46 = vsub.f32 1.0, %v1847_v40 }
 0xa5e   :  { %v1843_v48 = vor.u32 1.1754944e-38, %v1842_v61  ;;  %vm1841_vm7 = vcmp.eq.f32.partialorder %v1840_v3, 8.507059e+37 }
 0xa5f   :  { %v1980_v32 = vadd.f32 %v4690_v33, %v1979_v30  ;;  %v1849_v50 = vmul.f32 %v4694_v51, %v1848_v46 }
 0xa61   :  { %v1984_v8 = vsel %vm1983_vm11, %v4690_v33, %v1980_v32  ;;  %v1850_v55 = vadd.f32 %v4694_v51, %v1849_v50  ;;  %v4369_v50 = vsel %vm1788_vm8, 1.0, %v5810_v2 }
 0xa62   :  { %v4696_v38 = vpop.eup %4695  ;;  %v6627_v54 = vsel %vm1986_vm12, %v1988_v22, %v1984_v8  ;;  %v1905_v22 = vrot.slane %v6599_v42, 7 }
 0xa63   :  { %v1832_v45 = vmul.f32 %v4696_v38, %v1829_v35  ;;  %vm1837_vm3 = vweird.f32 %v4696_v38  ;;  %v1854_v60 = vsel %vm1853_vm1, %v4694_v51, %v1850_v55 }
 0xa64   :  { %vm1838_vm6 = vmor %vm1836_vm4, %vm1837_vm3  ;;  %v6631_v6 = vsel %vm1856_vm5, %v1858_v63, %v1854_v60 }
 0xa65   :  { %v1833_v49 = vsub.f32 1.0, %v1832_v45 }
 0xa67   :  { %v1834_v44 = vmul.f32 %v4696_v38, %v1833_v49 }
 0xa69   :  { %v1835_v59 = vadd.f32 %v4696_v38, %v1834_v44 }
 0xa6b   :  { %v1839_v7 = vsel %vm1838_vm6, %v4696_v38, %v1835_v59 }
 0xa6c   :  { %v6637_v11 = vsel %vm1841_vm7, %v1843_v48, %v1839_v7 }
 0xa93   :  { %v2023_v28 = vpop.permute.xlu2 %2022 }
 0xa94   :  { %v2027_v20 = vmul.f32 %v2023_v28, %v6623_v27 }
 0xa96   :  { %2032 = vrot.lane.b32.xlu1 %v2027_v20, %s5812_s18 }
 0xa9b   :  { %v2011_v24 = vpop.permute.xlu2 %2010 }
 0xa9c   :  { %v2016_v36 = vmul.f32 %v2011_v24, %v6627_v54 }
 0xaa3   :  { %v1866_v31 = vpop.permute.xlu2 %1865 }
 0xaa4   :  { %v1871_v33 = vmul.f32 %v1866_v31, %v6637_v11 }
 0xaad   :  { %v2021_v37 = vpop.permute.xlu0 %2020 }
 0xaae   :  { %v2026_v39 = vmul.f32 %v2021_v37, %v6627_v54  ;;  %v4370_v37 = vsel %vm1791_vm9, 1.0, %v5810_v2 }
 0xab0   :  { %2030 = vrot.lane.b32.xlu0 %v2026_v39, %s5812_s18  ;;  %v4538_v39 = vpack.i.bf16 %v4369_v50, %v4370_v37 }
 0xab5   :  { %v1878_v4 = vpop.permute.xlu0 %1877 }
 0xab6   :  { %v1882_v10 = vmul.f32 %v1878_v4, %v6631_v6 }
 0xab7   :  { %v1876_v13 = vpop.permute.xlu1 %1875 }
 0xab8   :  { %1867 = vrot.lane.b32.xlu0 %v6615_v56, %s5812_s18  ;;  %1887 = vrot.lane.b32.xlu1 %v1882_v10, %s5812_s18  ;;  %v1881_v18 = vmul.f32 %v1876_v13, %v6637_v11 }
 0xaba   :  { %1885 = vrot.lane.b32.xlu2 %v1881_v18, %s5812_s18 }
 0xabf   :  { %v2013_v23 = vpop.permute.xlu1 %2012 }
 0xac0   :  { %2051 = vrot.lane.b32.xlu1 %v2050_v21, %s5817_s21  ;;  %v2017_v25 = vmul.f32 %v2013_v23, %v6623_v27 }
 0xac2   :  { %2053 = vrot.lane.b32.xlu2 %v6593_v41, %s5817_s21 }
 0xb08   :  { %v2033_v26 = vpop.permute.xlu1 %2032 }
 0xb09   :  { %v2037_v28 = vadd.f32 %v2033_v26, %v2017_v25 }
 0xb0b   :  { %4697 = vtanh.f32 %v2037_v28  ;;  %v2074_v40 = vsub.f32 %v2037_v28, %v2013_v23 }
 0xb11   :  { %v4698_v20 = vpop.eup %4697 }
 0xb12   :  { %2044 = vrot.lane.b32.xlu2 %v4698_v20, %s5813_s22 }
 0xb14   :  { %v1886_v1 = vpop.permute.xlu2 %1885 }
 0xb15   :  { %v1891_v34 = vadd.f32 %v1886_v1, %v1871_v33 }
 0xb17   :  { %4699 = vtanh.f32 %v1891_v34  ;;  %v1928_v44 = vsub.f32 %v1891_v34, %v1866_v31 }
 0xb19   :  { %v1932_v57 = vrot.slane %v1928_v44, 1 }
 0xb1a   :  { %1908 = vrot.lane.b32.xlu2 %v6599_v42, %s5817_s21 }
 0xb1c   :  { %v2054_v59 = vpop.permute.xlu2 %2053 }
 0xb1d   :  { %v4700_v35 = vpop.eup %4699 }
 0xb1e   :  { %1897 = vrot.lane.b32.xlu0 %v4700_v35, %s5813_s22  ;;  %v6681_v35 = vld [vmem:[#allocation29] sm:$0xff] }
 0xb22   :  { %v2031_v0 = vpop.permute.xlu0 %2030 }
 0xb23   :  { %v2036_v51 = vadd.f32 %v2031_v0, %v2016_v36 }
 0xb25   :  { %4701 = vtanh.f32 %v2036_v51  ;;  %v2073_v30 = vsub.f32 %v2036_v51, %v2011_v24 }
 0xb27   :  { %v2077_v38 = vrot.slane %v2073_v30, 1 }
 0xb29   :  { %v2078_v32 = vsel %vm1647_vm2, %v2074_v40, %v2077_v38  ;;  %v4916_v40 = vld [vmem:[#allocation20] sm:$0xff] }
 0xb2a   :  { %v1868_v19 = vpop.permute.xlu0 %1867  ;;  %v1888_v29 = vpop.permute.xlu1 %1887 }
 0xb2b   :  { %v4702_v45 = vpop.eup %4701  ;;  %v1872_v46 = vmul.f32 %v1868_v19, %v6631_v6 }
 0xb2c   :  { %2042 = vrot.lane.b32.xlu0 %v4702_v45, %s5813_s22 }
 0xb2d   :  { %v1892_v8 = vadd.f32 %v1888_v29, %v1872_v46 }
 0xb2f   :  { %4703 = vtanh.f32 %v1892_v8  ;;  %v1929_v55 = vsub.f32 %v1892_v8, %v1868_v19 }
 0xb31   :  { %v1933_v58 = vsel %vm1647_vm2, %v1929_v55, %v1932_v57 }
 0xb32   :  { %v2052_v7 = vpop.permute.xlu1 %2051 }
 0xb34   :  { %1906 = vrot.lane.b32.xlu0 %v1905_v22, %s5817_s21 }
 0xb35   :  { %v4704_v49 = vpop.eup %4703 }
 0xb36   :  { %1899 = vrot.lane.b32.xlu1 %v4704_v49, %s5813_s22 }
 0xb3e   :  { %4539 = vperm.xlu1 %4537, %v4538_v39  }
 0xb46   :  { %1934 = vrot.lane.b32.xlu1 %v1933_v58, %s5816_s12 }
 0xb6c   :  { %v2045_v61 = vpop.permute.xlu2 %2044 }
 0xb6d   :  { %v2049_v3 = vmul.f32 %v2045_v61, %v6623_v27 }
 0xb6f   :  { %v2058_v48 = vsub.f32 %v2049_v3, %v2054_v59 }
 0xb74   :  { %v1909_v28 = vpop.permute.xlu2 %1908 }
 0xb90   :  { %v1898_v60 = vpop.permute.xlu0 %1897 }
 0xb91   :  { %v1903_v18 = vmul.f32 %v1898_v60, %v6637_v11 }
 0xb9e   :  { %v2043_v63 = vpop.permute.xlu0 %2042 }
 0xb9f   :  { %v2048_v4 = vmul.f32 %v2043_v63, %v6627_v54 }
 0xba1   :  { %v2057_v10 = vsub.f32 %v2048_v4, %v2052_v7 }
 0xba3   :  { %v2066_v13 = vrot.slane %v2057_v10, 1 }
 0xba5   :  { %v2067_v21 = vsel %vm1647_vm2, %v2058_v48, %v2066_v13 }
 0xba6   :  { %v1907_v23 = vpop.permute.xlu0 %1906  ;;  %2068 = vrot.lane.b32.xlu0 %v2067_v21, %s5815_s26 }
 0xba7   :  { %v1912_v24 = vsub.f32 %v1903_v18, %v1907_v23 }
 0xba8   :  { %v1900_v25 = vpop.permute.xlu1 %1899 }
 0xba9   :  { %v1904_v26 = vmul.f32 %v1900_v25, %v6631_v6  ;;  %v1921_v31 = vrot.slane %v1912_v24, 1  ;;  %v6678_v6 = vld [vmem:[#allocation29 + $0x8] sm:$0xff] }
 0xbab   :  { %v1913_v27 = vsub.f32 %v1904_v26, %v1909_v28 }
 0xbad   :  { %v1922_v54 = vsel %vm1647_vm2, %v1913_v27, %v1921_v31 }
 0xbae   :  { %2079 = vrot.lane.b32.xlu0 %v2078_v32, %s5816_s12  ;;  %1923 = vrot.lane.b32.xlu2 %v1922_v54, %s5815_s26 }
 0xbb0   :  { %v4540_v20 = vpop.permute.xlu1 %4539 }
 0xbb1   :  { %v4542_v11 = vunpack.i.h.bf16 %v4540_v20  ;;  %v4541_v36 = vunpack.i.l.bf16 %v4540_v20 }
 0xbb8   :  { %v1935_v29 = vpop.permute.xlu1 %1934 }
 0xc08   :  { %v1924_v33 = vpop.permute.xlu2 %1923 }
 0xc09   :  { %v1926_v1 = vmul.f32 %v4542_v11, %v1924_v33 }
 0xc0b   :  { %v6674_v34 = vadd.f32 %v1926_v1, %v6599_v42  ;;  %v4915_v42 = vld [vmem:[#allocation20 + $0x8] sm:$0xff] }
 0xc0d   :  { %4379 = vmatmul.msk.f32.vlgmr.msra.gmra.mxu1 %vm997_vm14, %v6674_v34 }
 0xc0e   :  { %3175 = vmatpush.msra.mxu1 %v6678_v6 }
 0xc10   :  { %3176 = vmatpush.msra.mxu1 %v6681_v35 }
 0xc18   :  { %v2069_v0 = vpop.permute.xlu0 %2068 }
 0xc19   :  { %v2071_v51 = vmul.f32 %v4541_v36, %v2069_v0 }
 0xc1b   :  { %v6685_v30 = vadd.f32 %v2071_v51, %v6593_v41  ;;  %v1937_v41 = vmul.f32 %v4542_v11, %v1935_v29 }
 0xc1d   :  { %4382 = vmatmul.msk.f32.vlgmr.msra.gmra.mxu2 %vm997_vm14, %v6685_v30  ;;  %v6694_v49 = vadd.f32 %v1937_v41, %v6615_v56 }
 0xc1e   :  { %3331 = vmatpush.msra.mxu2 %v4915_v42 }
 0xc1f   :  { %v2161_v50 = vrot.slane %v6694_v49, 6  ;;  %v2162_v61 = vrot.slane %v6694_v49, 7 }
 0xc20   :  { %3332 = vmatpush.msra.mxu2 %v4916_v40  ;;  %v2080_v56 = vpop.permute.xlu0 %2079 }
 0xc21   :  { %v2082_v60 = vmul.f32 %v4541_v36, %v2080_v56 }
 0xc23   :  { %v6705_v63 = vadd.f32 %v2082_v60, %v6608_v52 }
 0xc25   :  { %v2311_v3 = vrot.slane %v6705_v63, 6 }
 0xc8a   :  { %v2110_v38 = vpop.f32.mrf.mxu1 }
 0xc8b   :  { %v2114_v32 = vrot.slane %v2110_v38, 6  ;;  %v2115_v19 = vrot.slane %v2110_v38, 7 }
 0xc8d   :  { %v2118_v45 = vadd.f32 %v2114_v32, %v6489_v47  ;;  %v2119_v46 = vadd.f32 %v2115_v19, %v6503_v62  ;;  %v2312_v19 = vrot.slane %v6705_v63, 7 }
 0xc8f   :  { %4705 = vtanh.f32 %v2118_v45  ;;  %v4380_v4 = vmul.f32 -1.442695, %v2118_v45  ;;  %v4381_v18 = vmul.f32 -1.442695, %v2119_v46 }
 0xc90   :  { %4707 = vtanh.f32 %v2119_v46 }
 0xc95   :  { %v4706_v8 = vpop.eup %4705 }
 0xc96   :  { %v4708_v22 = vpop.eup %4707  ;;  %2173 = vrot.lane.b32.xlu2 %v4706_v8, %s5811_s14 }
 0xc97   :  { %2175 = vrot.lane.b32.xlu1 %v4708_v22, %s5811_s14 }
 0xc9f   :  { %2163 = vrot.lane.b32.xlu1 %v2161_v50, %s5812_s18 }
 0xca0   :  { %v2260_v37 = vpop.f32.mrf.mxu2 }
 0xca1   :  { %v2264_v39 = vrot.slane %v2260_v37, 6  ;;  %v2265_v44 = vrot.slane %v2260_v37, 7 }
 0xca3   :  { %v2268_v55 = vadd.f32 %v2264_v39, %v6537_v12  ;;  %v2269_v57 = vadd.f32 %v2265_v44, %v6539_v53 }
 0xca5   :  { %4709 = vtanh.f32 %v2268_v55  ;;  %v4384_v13 = vmul.f32 -1.442695, %v2269_v57  ;;  %v4383_v0 = vmul.f32 -1.442695, %v2268_v55 }
 0xca6   :  { %4711 = vtanh.f32 %v2269_v57 }
 0xca7   :  { %4713 = vpow2.f32 %v4380_v4 }
 0xcab   :  { %v4710_v58 = vpop.eup %4709 }
 0xcac   :  { %v4712_v59 = vpop.eup %4711  ;;  %2323 = vrot.lane.b32.xlu0 %v4710_v58, %s5811_s14 }
 0xcad   :  { %2325 = vrot.lane.b32.xlu2 %v4712_v59, %s5811_s14  ;;  %v4714_v7 = vpop.eup %4713 }
 0xcae   :  { %v2126_v10 = vadd.f32 1.0, %v4714_v7 }
 0xcb0   :  { %4715 = vrcp.f32 %v2126_v10  ;;  %v2139_v27 = vand.u32 2147483648, %v2126_v10  ;;  %vm2133_vm11 = vweird.f32 %v2126_v10  ;;  %v2137_v54 = vand.u32 2147483647, %v2126_v10 }
 0xcb1   :  { %4717 = vpow2.f32 %v4384_v13 }
 0xcb2   :  { %4719 = vpow2.f32 %v4381_v18  ;;  %v2140_v11 = vor.u32 1.1754944e-38, %v2139_v27  ;;  %vm2138_vm13 = vcmp.eq.f32.partialorder %v2137_v54, 8.507059e+37 }
 0xcb4   :  { %2165 = vrot.lane.b32.xlu0 %v2162_v61, %s5812_s18 }
 0xcb6   :  { %v4716_v48 = vpop.eup %4715 }
 0xcb7   :  { %v2129_v21 = vmul.f32 %v4716_v48, %v2126_v10  ;;  %v4718_v24 = vpop.eup %4717  ;;  %vm2134_vm10 = vweird.f32 %v4716_v48 }
 0xcb8   :  { %v4720_v52 = vpop.eup %4719  ;;  %v2277_v26 = vadd.f32 1.0, %v4718_v24  ;;  %vm2135_vm12 = vmor %vm2133_vm11, %vm2134_vm10 }
 0xcb9   :  { %v2130_v23 = vsub.f32 1.0, %v2129_v21  ;;  %v2127_v28 = vadd.f32 1.0, %v4720_v52  ;;  %v2203_v21 = vrot.slane %v6674_v34, 6 }
 0xcba   :  { %4721 = vrcp.f32 %v2277_v26  ;;  %v2304_v50 = vand.u32 2147483648, %v2277_v26  ;;  %vm2298_vm3 = vweird.f32 %v2277_v26  ;;  %v2302_v37 = vand.u32 2147483647, %v2277_v26 }
 0xcbb   :  { %v2131_v25 = vmul.f32 %v4716_v48, %v2130_v23  ;;  %4723 = vrcp.f32 %v2127_v28  ;;  %v2154_v44 = vand.u32 2147483648, %v2127_v28  ;;  %vm2148_vm5 = vweird.f32 %v2127_v28 }
 0xcbc   :  { %2313 = vrot.lane.b32.xlu0 %v2311_v3, %s5812_s18  ;;  %4725 = vpow2.f32 %v4383_v0  ;;  %v2152_v57 = vand.u32 2147483647, %v2127_v28  ;;  %v2305_v58 = vor.u32 1.1754944e-38, %v2304_v50  ;;  %vm2303_vm7 = vcmp.eq.f32.partialorder %v2302_v37, 8.507059e+37 }
 0xcbd   :  { %v2132_v31 = vadd.f32 %v4716_v48, %v2131_v25  ;;  %v2155_v61 = vor.u32 1.1754944e-38, %v2154_v44 }
 0xcbe   :  { %vm2153_vm8 = vcmp.eq.f32.partialorder %v2152_v57, 8.507059e+37 }
 0xcbf   :  { %v2136_v20 = vsel %vm2135_vm12, %v4716_v48, %v2132_v31 }
 0xcc0   :  { %v6709_v1 = vsel %vm2138_vm13, %v2140_v11, %v2136_v20  ;;  %v4722_v36 = vpop.eup %4721  ;;  %vm2084_vm13 = vcmp.gt.s32.totalorder %v6574_v15, 2 }
 0xcc1   :  { %v4724_v42 = vpop.eup %4723  ;;  %v2294_v40 = vmul.f32 %v4722_v36, %v2277_v26  ;;  %vm2299_vm15 = vweird.f32 %v4722_v36 }
 0xcc2   :  { %v2144_v38 = vmul.f32 %v4724_v42, %v2127_v28  ;;  %v4726_v46 = vpop.eup %4725  ;;  %vm2149_vm1 = vweird.f32 %v4724_v42  ;;  %vm2300_vm4 = vmor %vm2298_vm3, %vm2299_vm15  ;;  %vm2087_vm15 = vcmp.gt.s32.totalorder %v6577_v16, 2 }
 0xcc3   :  { %v2295_v32 = vsub.f32 1.0, %v2294_v40  ;;  %v2276_v8 = vadd.f32 1.0, %v4726_v46  ;;  %vm2150_vm6 = vmor %vm2148_vm5, %vm2149_vm1 }
 0xcc4   :  { %v2145_v45 = vsub.f32 1.0, %v2144_v38 }
 0xcc5   :  { %v2296_v29 = vmul.f32 %v4722_v36, %v2295_v32  ;;  %4727 = vrcp.f32 %v2276_v8  ;;  %v2289_v25 = vand.u32 2147483648, %v2276_v8  ;;  %vm2283_vm10 = vweird.f32 %v2276_v8 }
 0xcc6   :  { %v2146_v41 = vmul.f32 %v4724_v42, %v2145_v45  ;;  %v2287_v52 = vand.u32 2147483647, %v2276_v8 }
 0xcc7   :  { %v2297_v22 = vadd.f32 %v4722_v36, %v2296_v29  ;;  %v2290_v28 = vor.u32 1.1754944e-38, %v2289_v25 }
 0xcc8   :  { %v2147_v39 = vadd.f32 %v4724_v42, %v2146_v41  ;;  %vm2288_vm12 = vcmp.eq.f32.partialorder %v2287_v52, 8.507059e+37 }
 0xcc9   :  { %v2301_v55 = vsel %vm2300_vm4, %v4722_v36, %v2297_v22 }
 0xcca   :  { %v2151_v59 = vsel %vm2150_vm6, %v4724_v42, %v2147_v39  ;;  %v6715_v60 = vsel %vm2303_vm7, %v2305_v58, %v2301_v55  ;;  %v2353_v42 = vrot.slane %v6685_v30, 6  ;;  %v4377_v58 = vsel %vm2084_vm13, 1.0, %v5810_v2 }
 0xccb   :  { %v4728_v3 = vpop.eup %4727  ;;  %v6718_v10 = vsel %vm2153_vm8, %v2155_v61, %v2151_v59  ;;  %v4378_v59 = vsel %vm2087_vm15, 1.0, %v5810_v2 }
 0xccc   :  { %v2279_v13 = vmul.f32 %v4728_v3, %v2276_v8  ;;  %vm2284_vm9 = vweird.f32 %v4728_v3 }
 0xccd   :  { %vm2285_vm11 = vmor %vm2283_vm10, %vm2284_vm9 }
 0xcce   :  { %v2280_v18 = vsub.f32 1.0, %v2279_v13 }
 0xcd0   :  { %v2281_v23 = vmul.f32 %v4728_v3, %v2280_v18 }
 0xcd2   :  { %v2282_v24 = vadd.f32 %v4728_v3, %v2281_v23 }
 0xcd4   :  { %v2286_v26 = vsel %vm2285_vm11, %v4728_v3, %v2282_v24 }
 0xcd5   :  { %v6725_v27 = vsel %vm2288_vm12, %v2290_v28, %v2286_v26 }
 0xcf0   :  { %v2174_v33 = vpop.permute.xlu2 %2173 }
 0xcf1   :  { %v2179_v51 = vmul.f32 %v2174_v33, %v6709_v1 }
 0xcf3   :  { %2183 = vrot.lane.b32.xlu2 %v2179_v51, %s5812_s18  ;;  %v2204_v51 = vrot.slane %v6674_v34, 7 }
 0xcfb   :  { %2315 = vrot.lane.b32.xlu2 %v2312_v19, %s5812_s18 }
 0xd07   :  { %v2326_v56 = vpop.permute.xlu2 %2325 }
 0xd08   :  { %v2330_v4 = vmul.f32 %v2326_v56, %v6715_v60  ;;  %v4543_v56 = vpack.i.bf16 %v4378_v59, %v4377_v58 }
 0xd09   :  { %v2176_v7 = vpop.permute.xlu1 %2175 }
 0xd0a   :  { %v2180_v48 = vmul.f32 %v2176_v7, %v6718_v10  ;;  %2335 = vrot.lane.b32.xlu0 %v2330_v4, %s5812_s18 }
 0xd0c   :  { %2185 = vrot.lane.b32.xlu1 %v2180_v48, %s5812_s18 }
 0xd11   :  { %v2164_v20 = vpop.permute.xlu1 %2163 }
 0xd12   :  { %2205 = vrot.lane.b32.xlu0 %v2203_v21, %s5817_s21  ;;  %v2169_v11 = vmul.f32 %v2164_v20, %v6709_v1  ;;  %v2354_v21 = vrot.slane %v6685_v30, 7 }
 0xd1e   :  { %v2324_v31 = vpop.permute.xlu0 %2323 }
 0xd1f   :  { %v2329_v54 = vmul.f32 %v2324_v31, %v6725_v27 }
 0xd21   :  { %2333 = vrot.lane.b32.xlu1 %v2329_v54, %s5812_s18 }
 0xd26   :  { %v2166_v40 = vpop.permute.xlu0 %2165 }
 0xd27   :  { %v2170_v29 = vmul.f32 %v2166_v40, %v6718_v10 }
 0xd2e   :  { %v2314_v38 = vpop.permute.xlu0 %2313 }
 0xd2f   :  { %v2319_v61 = vmul.f32 %v2314_v38, %v6725_v27 }
 0xd4d   :  { %v2184_v33 = vpop.permute.xlu2 %2183 }
 0xd4e   :  { %v2189_v36 = vadd.f32 %v2184_v33, %v2169_v11 }
 0xd50   :  { %4729 = vtanh.f32 %v2189_v36  ;;  %v2228_v41 = vsub.f32 %v2189_v36, %v2164_v20 }
 0xd52   :  { %v2232_v37 = vrot.slane %v2228_v41, 2 }
 0xd55   :  { %v2316_v32 = vpop.permute.xlu2 %2315 }
 0xd56   :  { %v4730_v0 = vpop.eup %4729  ;;  %v2320_v19 = vmul.f32 %v2316_v32, %v6715_v60 }
 0xd57   :  { %2195 = vrot.lane.b32.xlu2 %v4730_v0, %s5813_s22 }
 0xd5f   :  { %2207 = vrot.lane.b32.xlu2 %v2204_v51, %s5817_s21 }
 0xd67   :  { %2355 = vrot.lane.b32.xlu2 %v2353_v42, %s5817_s21 }
 0xd7c   :  { %v2336_v45 = vpop.permute.xlu0 %2335 }
 0xd7d   :  { %v2340_v46 = vadd.f32 %v2336_v45, %v2320_v19 }
 0xd7e   :  { %v2186_v8 = vpop.permute.xlu1 %2185 }
 0xd7f   :  { %4731 = vtanh.f32 %v2340_v46  ;;  %v2190_v22 = vadd.f32 %v2186_v8, %v2170_v29  ;;  %v2379_v15 = vsub.f32 %v2340_v46, %v2316_v32 }
 0xd81   :  { %4733 = vtanh.f32 %v2190_v22  ;;  %v2229_v50 = vsub.f32 %v2190_v22, %v2166_v40  ;;  %v2383_v7 = vrot.slane %v2379_v15, 1 }
 0xd83   :  { %v2233_v39 = vrot.slane %v2229_v50, 1 }
 0xd84   :  { %v2206_v25 = vpop.permute.xlu0 %2205 }
 0xd85   :  { %v4732_v44 = vpop.eup %4731  ;;  %v2234_v55 = vsel %vm1647_vm2, %v2233_v39, %v2232_v37 }
 0xd86   :  { %2347 = vrot.lane.b32.xlu0 %v4732_v44, %s5813_s22 }
 0xd87   :  { %v4734_v57 = vpop.eup %4733 }
 0xd88   :  { %2197 = vrot.lane.b32.xlu1 %v4734_v57, %s5813_s22 }
 0xd8e   :  { %4544 = vperm.xlu0 %4531, %v4543_v56  }
 0xd93   :  { %v2334_v3 = vpop.permute.xlu1 %2333 }
 0xd94   :  { %v2339_v4 = vadd.f32 %v2334_v3, %v2319_v61 }
 0xd96   :  { %4735 = vtanh.f32 %v2339_v4  ;;  %v2378_v16 = vsub.f32 %v2339_v4, %v2314_v38 }
 0xd98   :  { %v2382_v48 = vrot.slane %v2378_v16, 2 }
 0xd9a   :  { %v2384_v13 = vsel %vm1647_vm2, %v2383_v7, %v2382_v48 }
 0xd9b   :  { %2385 = vrot.lane.b32.xlu0 %v2384_v13, %s5816_s12 }
 0xd9c   :  { %v4736_v18 = vpop.eup %4735 }
 0xd9d   :  { %2345 = vrot.lane.b32.xlu1 %v4736_v18, %s5813_s22 }
 0xda5   :  { %2357 = vrot.lane.b32.xlu1 %v2354_v21, %s5817_s21 }
 0xdb1   :  { %v2196_v23 = vpop.permute.xlu2 %2195 }
 0xdb2   :  { %v2201_v24 = vmul.f32 %v2196_v23, %v6709_v1 }
 0xdb4   :  { %v2211_v26 = vsub.f32 %v2201_v24, %v2206_v25 }
 0xdb6   :  { %v2220_v20 = vrot.slane %v2211_v26, 2 }
 0xdb9   :  { %v2208_v31 = vpop.permute.xlu2 %2207 }
 0xdc1   :  { %v2356_v1 = vpop.permute.xlu2 %2355 }
 0xdf8   :  { %v2348_v51 = vpop.permute.xlu0 %2347 }
 0xdf9   :  { %v2352_v42 = vmul.f32 %v2348_v51, %v6715_v60 }
 0xdfa   :  { %v2198_v52 = vpop.permute.xlu1 %2197 }
 0xdfb   :  { %v2202_v28 = vmul.f32 %v2198_v52, %v6718_v10 }
 0xdfd   :  { %v2212_v54 = vsub.f32 %v2202_v28, %v2208_v31 }
 0xdff   :  { %v2221_v11 = vrot.slane %v2212_v54, 1 }
 0xe00   :  { %v4545_v46 = vpop.permute.xlu0 %4544 }
 0xe01   :  { %v2222_v33 = vsel %vm1647_vm2, %v2221_v11, %v2220_v20  ;;  %v4546_v29 = vunpack.i.l.bf16 %v4545_v46  ;;  %v4547_v60 = vunpack.i.h.bf16 %v4545_v46 }
 0xe02   :  { %2223 = vrot.lane.b32.xlu2 %v2222_v33, %s5815_s26 }
 0xe0a   :  { %2235 = vrot.lane.b32.xlu2 %v2234_v55, %s5816_s12 }
 0xe0d   :  { %v2386_v55 = vpop.permute.xlu0 %2385 }
 0xe0e   :  { %v2388_v57 = vmul.f32 %v4547_v60, %v2386_v55 }
 0xe0f   :  { %v2346_v36 = vpop.permute.xlu1 %2345 }
 0xe10   :  { %v2351_v0 = vmul.f32 %v2346_v36, %v6725_v27 }
 0xe12   :  { %v2361_v40 = vsub.f32 %v2351_v0, %v2356_v1 }
 0xe14   :  { %v2370_v32 = vrot.slane %v2361_v40, 2 }
 0xe17   :  { %v2358_v38 = vpop.permute.xlu1 %2357 }
 0xe18   :  { %v2362_v10 = vsub.f32 %v2352_v42, %v2358_v38 }
 0xe1a   :  { %v2371_v19 = vrot.slane %v2362_v10, 1 }
 0xe1c   :  { %v2372_v45 = vsel %vm1647_vm2, %v2371_v19, %v2370_v32 }
 0xe1d   :  { %2373 = vrot.lane.b32.xlu1 %v2372_v45, %s5815_s26 }
 0xe5c   :  { %v2224_v8 = vpop.permute.xlu2 %2223 }
 0xe5d   :  { %v2226_v41 = vmul.f32 %v4546_v29, %v2224_v8 }
 0xe5f   :  { %v6760_v22 = vadd.f32 %v2226_v41, %v6674_v34 }
 0xe61   :  { %4387 = vmatmul.msk.f32.vlgmr.msrb.gmra.mxu3 %vm997_vm14, %v6760_v22 }
 0xe62   :  { %3481 = vmatpush.msrb.mxu3 %v6678_v6 }
 0xe64   :  { %3482 = vmatpush.msrb.mxu3 %v6681_v35  ;;  %v2236_v59 = vpop.permute.xlu2 %2235 }
 0xe65   :  { %v2238_v56 = vmul.f32 %v4546_v29, %v2236_v59 }
 0xe8f   :  { %v2374_v27 = vpop.permute.xlu1 %2373 }
 0xe90   :  { %v2376_v50 = vmul.f32 %v4547_v60, %v2374_v27 }
 0xe92   :  { %v6767_v37 = vadd.f32 %v2376_v50, %v6685_v30  ;;  %v6776_v30 = vadd.f32 %v2388_v57, %v6705_v63 }
 0xe94   :  { %4390 = vmatmul.msk.f32.vlgmr.msrb.gmra.mxu1 %vm997_vm14, %v6767_v37  ;;  %v2618_v61 = vrot.slane %v6776_v30, 6  ;;  %v2617_v21 = vrot.slane %v6776_v30, 5 }
 0xe95   :  { %3775 = vmatpush.msrb.mxu1 %v6678_v6  ;;  %v6781_v6 = vadd.f32 %v2238_v56, %v6694_v49 }
 0xe97   :  { %3776 = vmatpush.msrb.mxu1 %v6681_v35  ;;  %v2467_v35 = vrot.slane %v6781_v6, 5 }
 0xee4   :  { %v2416_v34 = vpop.f32.mrf.mxu3 }
 0xee5   :  { %v2420_v39 = vrot.slane %v2416_v34, 5  ;;  %v2421_v7 = vrot.slane %v2416_v34, 6 }
 0xee7   :  { %v2424_v44 = vadd.f32 %v2420_v39, %v6489_v47  ;;  %v2425_v48 = vadd.f32 %v2421_v7, %v6503_v62 }
 0xee9   :  { %4737 = vtanh.f32 %v2424_v44  ;;  %v4389_v25 = vmul.f32 -1.442695, %v2425_v48  ;;  %v4388_v52 = vmul.f32 -1.442695, %v2424_v44 }
 0xeef   :  { %v4738_v58 = vpop.eup %4737 }
 0xef0   :  { %2479 = vrot.lane.b32.xlu2 %v4738_v58, %s5811_s14 }
 0xef8   :  { %2621 = vrot.lane.b32.xlu2 %v2618_v61, %s5812_s18 }
 0xf00   :  { %2469 = vrot.lane.b32.xlu2 %v2467_v35, %s5812_s18 }
 0xf11   :  { %v2566_v3 = vpop.f32.mrf.mxu1 }
 0xf12   :  { %v2570_v15 = vrot.slane %v2566_v3, 5  ;;  %v2571_v4 = vrot.slane %v2566_v3, 6 }
 0xf14   :  { %v2574_v16 = vadd.f32 %v2570_v15, %v6537_v12  ;;  %v2575_v63 = vadd.f32 %v2571_v4, %v6539_v53 }
 0xf16   :  { %4739 = vtanh.f32 %v2574_v16  ;;  %v4391_v23 = vmul.f32 -1.442695, %v2574_v16  ;;  %v4392_v24 = vmul.f32 -1.442695, %v2575_v63 }
 0xf17   :  { %4741 = vtanh.f32 %v2575_v63 }
 0xf18   :  { %4743 = vtanh.f32 %v2425_v48 }
 0xf19   :  { %4745 = vpow2.f32 %v4391_v23 }
 0xf1a   :  { %4747 = vpow2.f32 %v4392_v24 }
 0xf1b   :  { %4749 = vpow2.f32 %v4389_v25 }
 0xf1c   :  { %v4740_v13 = vpop.eup %4739  ;;  %4751 = vpow2.f32 %v4388_v52 }
 0xf1d   :  { %v4742_v18 = vpop.eup %4741  ;;  %2629 = vrot.lane.b32.xlu1 %v4740_v13, %s5811_s14 }
 0xf1e   :  { %2631 = vrot.lane.b32.xlu0 %v4742_v18, %s5811_s14  ;;  %v4744_v49 = vpop.eup %4743 }
 0xf1f   :  { %v4746_v26 = vpop.eup %4745 }
 0xf20   :  { %v4748_v28 = vpop.eup %4747  ;;  %v2582_v31 = vadd.f32 1.0, %v4746_v26 }
 0xf21   :  { %v2583_v54 = vadd.f32 1.0, %v4748_v28  ;;  %v4750_v20 = vpop.eup %4749 }
 0xf22   :  { %4753 = vrcp.f32 %v2582_v31  ;;  %v4752_v11 = vpop.eup %4751  ;;  %v6793_v33 = vadd.f32 1.0, %v4750_v20  ;;  %v2595_v50 = vand.u32 2147483648, %v2582_v31  ;;  %vm2589_vm4 = vweird.f32 %v2582_v31 }
 0xf23   :  { %4755 = vrcp.f32 %v2583_v54  ;;  %v6795_v36 = vadd.f32 1.0, %v4752_v11  ;;  %v2610_v34 = vand.u32 2147483648, %v2583_v54  ;;  %v2593_v39 = vand.u32 2147483647, %v2582_v31 }
 0xf24   :  { %4757 = vrcp.f32 %v6793_v33  ;;  %vm2604_vm5 = vweird.f32 %v2583_v54  ;;  %v2608_v44 = vand.u32 2147483647, %v2583_v54  ;;  %v2596_v56 = vor.u32 1.1754944e-38, %v2595_v50 }
 0xf25   :  { %2481 = vrot.lane.b32.xlu1 %v4744_v49, %s5811_s14  ;;  %4759 = vrcp.f32 %v6795_v36  ;;  %v2611_v61 = vor.u32 1.1754944e-38, %v2610_v34  ;;  %vm2594_vm8 = vcmp.eq.f32.partialorder %v2593_v39, 8.507059e+37  ;;  %v2460_v13 = vand.u32 2147483648, %v6793_v33 }
 0xf26   :  { %2619 = vrot.lane.b32.xlu0 %v2617_v21, %s5812_s18  ;;  %vm2609_vm9 = vcmp.eq.f32.partialorder %v2608_v44, 8.507059e+37  ;;  %v2445_v18 = vand.u32 2147483648, %v6795_v36  ;;  %vm2454_vm12 = vweird.f32 %v6793_v33  ;;  %v2458_v49 = vand.u32 2147483647, %v6793_v33 }
 0xf27   :  { %vm2439_vm13 = vweird.f32 %v6795_v36  ;;  %v2443_v21 = vand.u32 2147483647, %v6795_v36  ;;  %v2461_v25 = vor.u32 1.1754944e-38, %v2460_v13  ;;  %v2468_v11 = vrot.slane %v6781_v6, 6 }
 0xf28   :  { %v4754_v0 = vpop.eup %4753  ;;  %v2446_v52 = vor.u32 1.1754944e-38, %v2445_v18 }
 0xf29   :  { %v4756_v51 = vpop.eup %4755  ;;  %v2585_v1 = vmul.f32 %v4754_v0, %v2582_v31  ;;  %vm2590_vm1 = vweird.f32 %v4754_v0 }
 0xf2a   :  { %v2600_v42 = vmul.f32 %v4756_v51, %v2583_v54  ;;  %v4758_v38 = vpop.eup %4757  ;;  %vm2605_vm3 = vweird.f32 %v4756_v51  ;;  %vm2591_vm6 = vmor %vm2589_vm4, %vm2590_vm1  ;;  %vm2444_vm4 = vcmp.eq.f32.partialorder %v2443_v21, 8.507059e+37 }
 0xf2b   :  { %v2586_v40 = vsub.f32 1.0, %v2585_v1  ;;  %v4760_v32 = vpop.eup %4759  ;;  %v2450_v45 = vmul.f32 %v4758_v38, %v6793_v33  ;;  %vm2606_vm7 = vmor %vm2604_vm5, %vm2605_vm3  ;;  %vm2455_vm10 = vweird.f32 %v4758_v38  ;;  %vm2459_vm3 = vcmp.eq.f32.partialorder %v2458_v49, 8.507059e+37 }
 0xf2c   :  { %v2601_v10 = vsub.f32 1.0, %v2600_v42  ;;  %v2435_v46 = vmul.f32 %v4760_v32, %v6795_v36  ;;  %vm2440_vm11 = vweird.f32 %v4760_v32  ;;  %vm2456_vm15 = vmor %vm2454_vm12, %vm2455_vm10  ;;  %v2659_v36 = vrot.slane %v6767_v37, 5 }
 0xf2d   :  { %v2587_v19 = vmul.f32 %v4754_v0, %v2586_v40  ;;  %v2451_v41 = vsub.f32 1.0, %v2450_v45  ;;  %vm2441_vm1 = vmor %vm2439_vm13, %vm2440_vm11 }
 0xf2e   :  { %v2602_v29 = vmul.f32 %v4756_v51, %v2601_v10  ;;  %v2436_v60 = vsub.f32 1.0, %v2435_v46 }
 0xf2f   :  { %v2588_v8 = vadd.f32 %v4754_v0, %v2587_v19  ;;  %v2452_v57 = vmul.f32 %v4758_v38, %v2451_v41 }
 0xf30   :  { %v2603_v27 = vadd.f32 %v4756_v51, %v2602_v29  ;;  %v2437_v58 = vmul.f32 %v4760_v32, %v2436_v60 }
 0xf31   :  { %v2592_v55 = vsel %vm2591_vm6, %v4754_v0, %v2588_v8  ;;  %v2453_v63 = vadd.f32 %v4758_v38, %v2452_v57  ;;  %v2660_v0 = vrot.slane %v6767_v37, 6 }
 0xf32   :  { %v2607_v59 = vsel %vm2606_vm7, %v4756_v51, %v2603_v27  ;;  %v6801_v3 = vsel %vm2594_vm8, %v2596_v56, %v2592_v55  ;;  %v2438_v7 = vadd.f32 %v4760_v32, %v2437_v58  ;;  %v2509_v58 = vrot.slane %v6760_v22, 5 }
 0xf33   :  { %v6803_v15 = vsel %vm2609_vm9, %v2611_v61, %v2607_v59  ;;  %v2457_v23 = vsel %vm2456_vm15, %v4758_v38, %v2453_v63  ;;  %v6838_v61 = vld [vmem:[%s7336_s23] sm:$0x3] }
 0xf34   :  { %v2442_v24 = vsel %vm2441_vm1, %v4760_v32, %v2438_v7  ;;  %v6815_v28 = vsel %vm2459_vm3, %v2461_v25, %v2457_v23  ;;  %vm2390_vm5 = vcmp.gt.s32.totalorder %v6838_v61, 3  ;;  %v2510_v23 = vrot.slane %v6760_v22, 6 }
 0xf35   :  { %v6817_v54 = vsel %vm2444_vm4, %v2446_v52, %v2442_v24 }
 0xf4a   :  { %v2480_v26 = vpop.permute.xlu2 %2479 }
 0xf4b   :  { %v2485_v33 = vmul.f32 %v2480_v26, %v6817_v54 }
 0xf52   :  { %v2622_v51 = vpop.permute.xlu2 %2621 }
 0xf53   :  { %v2626_v39 = vmul.f32 %v2622_v51, %v6803_v15 }
 0xf5a   :  { %v2470_v32 = vpop.permute.xlu2 %2469 }
 0xf5b   :  { %v2475_v19 = vmul.f32 %v2470_v32, %v6817_v54 }
 0xf8f   :  { %v2630_v35 = vpop.permute.xlu1 %2629 }
 0xf90   :  { %v2632_v4 = vpop.permute.xlu0 %2631  ;;  %v2635_v16 = vmul.f32 %v2630_v35, %v6801_v3  ;;  %v6842_v35 = vld [vmem:[%s7337_s25] sm:$0x3] }
 0xf91   :  { %v2636_v48 = vmul.f32 %v2632_v4, %v6803_v15  ;;  %vm2393_vm6 = vcmp.gt.s32.totalorder %v6842_v35, 3 }
 0xf92   :  { %2639 = vrot.lane.b32.xlu1 %v2635_v16, %s5812_s18  ;;  %v4385_v16 = vsel %vm2390_vm5, 1.0, %v5810_v2  ;;  %v4386_v63 = vsel %vm2393_vm6, 1.0, %v5810_v2 }
 0xf93   :  { %2641 = vrot.lane.b32.xlu0 %v2636_v48, %s5812_s18  ;;  %v4549_v7 = vpack.i.bf16 %v4385_v16, %v4386_v63 }
 0xf97   :  { %v2482_v31 = vpop.permute.xlu1 %2481 }
 0xf98   :  { %v2486_v20 = vmul.f32 %v2482_v31, %v6815_v28  ;;  %v2620_v1 = vpop.permute.xlu0 %2619 }
 0xf99   :  { %v2625_v42 = vmul.f32 %v2620_v1, %v6801_v3 }
 0xf9a   :  { %2491 = vrot.lane.b32.xlu2 %v2486_v20, %s5812_s18  ;;  %2471 = vrot.lane.b32.xlu1 %v2468_v11, %s5812_s18 }
 0xf9b   :  { %2489 = vrot.lane.b32.xlu0 %v2485_v33, %s5812_s18 }
 0xfa2   :  { %2661 = vrot.lane.b32.xlu2 %v2659_v36, %s5817_s21  ;;  %2663 = vrot.lane.b32.xlu1 %v2660_v0, %s5817_s21 }
 0xff4   :  { %v2492_v41 = vpop.permute.xlu2 %2491 }
 0xffc   :  { %v2662_v31 = vpop.permute.xlu2 %2661 }
0x1004   :  { %v2640_v40 = vpop.permute.xlu1 %2639 }
0x1005   :  { %v2642_v38 = vpop.permute.xlu0 %2641  ;;  %v2645_v10 = vadd.f32 %v2640_v40, %v2625_v42 }
0x1006   :  { %v2646_v57 = vadd.f32 %v2642_v38, %v2626_v39 }
0x1007   :  { %4761 = vtanh.f32 %v2645_v10  ;;  %v2684_v18 = vsub.f32 %v2645_v10, %v2620_v1 }
0x1008   :  { %v2685_v13 = vsub.f32 %v2646_v57, %v2622_v51 }
0x1009   :  { %v2688_v21 = vrot.slane %v2684_v18, 3 }
0x100a   :  { %v2689_v49 = vrot.slane %v2685_v13, 2 }
0x100c   :  { %v2472_v45 = vpop.permute.xlu1 %2471  ;;  %v2690_v24 = vsel %vm1647_vm2, %v2689_v49, %v2688_v21 }
0x100d   :  { %v4762_v46 = vpop.eup %4761  ;;  %v2490_v29 = vpop.permute.xlu0 %2489  ;;  %v2476_v8 = vmul.f32 %v2472_v45, %v6815_v28 }
0x100e   :  { %v2495_v60 = vadd.f32 %v2490_v29, %v2475_v19  ;;  %2651 = vrot.lane.b32.xlu1 %v4762_v46, %s5813_s22 }
0x100f   :  { %v2496_v27 = vadd.f32 %v2492_v41, %v2476_v8 }
0x1010   :  { %4763 = vtanh.f32 %v2495_v60  ;;  %v2534_v50 = vsub.f32 %v2495_v60, %v2470_v32 }
0x1011   :  { %4765 = vtanh.f32 %v2496_v27  ;;  %v2535_v34 = vsub.f32 %v2496_v27, %v2472_v45 }
0x1012   :  { %v2538_v44 = vrot.slane %v2534_v50, 3  ;;  %4767 = vtanh.f32 %v2646_v57 }
0x1013   :  { %v2539_v55 = vrot.slane %v2535_v34, 2 }
0x1014   :  { %v2664_v25 = vpop.permute.xlu1 %2663 }
0x1015   :  { %v2540_v59 = vsel %vm1647_vm2, %v2539_v55, %v2538_v44 }
0x1016   :  { %v4764_v56 = vpop.eup %4763  ;;  %2511 = vrot.lane.b32.xlu1 %v2509_v58, %s5817_s21 }
0x1017   :  { %v4766_v4 = vpop.eup %4765  ;;  %2501 = vrot.lane.b32.xlu0 %v4764_v56, %s5813_s22 }
0x1018   :  { %2503 = vrot.lane.b32.xlu2 %v4766_v4, %s5813_s22  ;;  %v4768_v48 = vpop.eup %4767 }
0x101f   :  { %2653 = vrot.lane.b32.xlu0 %v4768_v48, %s5813_s22 }
0x1020   :  { %4550 = vperm.xlu2 %4548, %v4549_v7  }
0x1027   :  { %2513 = vrot.lane.b32.xlu0 %v2510_v23, %s5817_s21 }
0x1028   :  { %2691 = vrot.lane.b32.xlu2 %v2690_v24, %s5816_s12 }
0x1072   :  { %v2504_v1 = vpop.permute.xlu2 %2503 }
0x1073   :  { %v2508_v10 = vmul.f32 %v2504_v1, %v6815_v28 }
0x1080   :  { %v2652_v26 = vpop.permute.xlu1 %2651 }
0x1081   :  { %v2657_v20 = vmul.f32 %v2652_v26, %v6801_v3 }
0x1083   :  { %v2667_v33 = vsub.f32 %v2657_v20, %v2662_v31 }
0x1085   :  { %v2676_v42 = vrot.slane %v2667_v33, 3 }
0x1088   :  { %v2512_v38 = vpop.permute.xlu1 %2511 }
0x1089   :  { %v2502_v52 = vpop.permute.xlu0 %2501 }
0x108a   :  { %v2507_v0 = vmul.f32 %v2502_v52, %v6817_v54  ;;  %v4551_v54 = vpop.permute.xlu2 %4550 }
0x108b   :  { %v4552_v8 = vunpack.i.l.bf16 %v4551_v54  ;;  %v4553_v27 = vunpack.i.h.bf16 %v4551_v54 }
0x108c   :  { %v2517_v32 = vsub.f32 %v2507_v0, %v2512_v38 }
0x108e   :  { %v2526_v46 = vrot.slane %v2517_v32, 3 }
0x1091   :  { %v2654_v11 = vpop.permute.xlu0 %2653 }
0x1092   :  { %v2658_v36 = vmul.f32 %v2654_v11, %v6803_v15  ;;  %v2692_v16 = vpop.permute.xlu2 %2691 }
0x1093   :  { %v2694_v48 = vmul.f32 %v4552_v8, %v2692_v16 }
0x1094   :  { %v2668_v51 = vsub.f32 %v2658_v36, %v2664_v25 }
0x1095   :  { %v6880_v18 = vadd.f32 %v2694_v48, %v6776_v30 }
0x1096   :  { %v2677_v40 = vrot.slane %v2668_v51, 2 }
0x1097   :  { %v2923_v23 = vrot.slane %v6880_v18, 4  ;;  %v2924_v52 = vrot.slane %v6880_v18, 5 }
0x1098   :  { %v2678_v19 = vsel %vm1647_vm2, %v2677_v40, %v2676_v42 }
0x1099   :  { %v2514_v45 = vpop.permute.xlu0 %2513  ;;  %2679 = vrot.lane.b32.xlu1 %v2678_v19, %s5815_s26 }
0x109a   :  { %v2518_v3 = vsub.f32 %v2508_v10, %v2514_v45 }
0x109c   :  { %v2527_v29 = vrot.slane %v2518_v3, 2 }
0x109e   :  { %v2528_v15 = vsel %vm1647_vm2, %v2527_v29, %v2526_v46 }
0x109f   :  { %2529 = vrot.lane.b32.xlu0 %v2528_v15, %s5815_s26 }
0x10a1   :  { %2541 = vrot.lane.b32.xlu1 %v2540_v59, %s5816_s12 }
0x110b   :  { %v2680_v41 = vpop.permute.xlu1 %2679 }
0x110c   :  { %v2682_v60 = vmul.f32 %v4552_v8, %v2680_v41 }
0x110e   :  { %v6864_v28 = vadd.f32 %v2682_v60, %v6767_v37 }
0x1110   :  { %4398 = vmatmul.msk.f32.vlgmr.msra.gmra.mxu3 %vm997_vm14, %v6864_v28 }
0x1111   :  { %v2530_v50 = vpop.permute.xlu0 %2529 }
0x1112   :  { %v2532_v34 = vmul.f32 %v4553_v27, %v2530_v50 }
0x1113   :  { %v2542_v24 = vpop.permute.xlu1 %2541 }
0x1114   :  { %v6869_v39 = vadd.f32 %v2532_v34, %v6760_v22  ;;  %v2544_v25 = vmul.f32 %v4553_v27, %v2542_v24 }
0x1116   :  { %4395 = vmatmul.msk.f32.vlgmr.msrb.gmra.mxu2 %vm997_vm14, %v6869_v39  ;;  %v6889_v26 = vadd.f32 %v2544_v25, %v6781_v6 }
0x1118   :  { %v2773_v30 = vrot.slane %v6889_v26, 4 }
0x1193   :  { %v2872_v44 = vpop.f32.mrf.mxu3 }
0x1194   :  { %v2876_v55 = vrot.slane %v2872_v44, 4  ;;  %v2877_v57 = vrot.slane %v2872_v44, 5 }
0x1196   :  { %v2880_v58 = vadd.f32 %v2876_v55, %v6537_v12  ;;  %v2881_v37 = vadd.f32 %v2877_v57, %v6539_v53 }
0x1198   :  { %4769 = vtanh.f32 %v2880_v58  ;;  %v4400_v31 = vmul.f32 -1.442695, %v2881_v37  ;;  %v4399_v36 = vmul.f32 -1.442695, %v2880_v58 }
0x1199   :  { %4771 = vtanh.f32 %v2881_v37  ;;  %v2722_v59 = vpop.f32.mrf.mxu2 }
0x119a   :  { %v2726_v56 = vrot.slane %v2722_v59, 4  ;;  %v2727_v4 = vrot.slane %v2722_v59, 5 }
0x119c   :  { %v2730_v63 = vadd.f32 %v2726_v56, %v6489_v47  ;;  %v2731_v22 = vadd.f32 %v2727_v4, %v6503_v62 }
0x119e   :  { %v4770_v7 = vpop.eup %4769  ;;  %4773 = vtanh.f32 %v2730_v63  ;;  %v4396_v51 = vmul.f32 -1.442695, %v2730_v63  ;;  %v4397_v42 = vmul.f32 -1.442695, %v2731_v22 }
0x119f   :  { %v4772_v13 = vpop.eup %4771  ;;  %2935 = vrot.lane.b32.xlu0 %v4770_v7, %s5811_s14  ;;  %4775 = vtanh.f32 %v2731_v22 }
0x11a0   :  { %2937 = vrot.lane.b32.xlu2 %v4772_v13, %s5811_s14  ;;  %4777 = vpow2.f32 %v4400_v31 }
0x11a4   :  { %v4774_v49 = vpop.eup %4773 }
0x11a5   :  { %2785 = vrot.lane.b32.xlu1 %v4774_v49, %s5811_s14  ;;  %v4776_v21 = vpop.eup %4775 }
0x11a6   :  { %v4778_v20 = vpop.eup %4777 }
0x11a7   :  { %2787 = vrot.lane.b32.xlu0 %v4776_v21, %s5811_s14  ;;  %v2889_v11 = vadd.f32 1.0, %v4778_v20 }
0x11a8   :  { %2925 = vrot.lane.b32.xlu2 %v2923_v23, %s5812_s18 }
0x11a9   :  { %4779 = vrcp.f32 %v2889_v11  ;;  %v2916_v19 = vand.u32 2147483648, %v2889_v11  ;;  %vm2910_vm8 = vweird.f32 %v2889_v11  ;;  %v2914_v45 = vand.u32 2147483647, %v2889_v11 }
0x11aa   :  { %4781 = vpow2.f32 %v4399_v36 }
0x11ab   :  { %4783 = vpow2.f32 %v4396_v51  ;;  %v2917_v15 = vor.u32 1.1754944e-38, %v2916_v19  ;;  %vm2915_vm10 = vcmp.eq.f32.partialorder %v2914_v45, 8.507059e+37  ;;  %v2965_v19 = vrot.slane %v6864_v28, 4 }
0x11ac   :  { %4785 = vpow2.f32 %v4397_v42 }
0x11ad   :  { %2927 = vrot.lane.b32.xlu1 %v2924_v52, %s5812_s18 }
0x11af   :  { %v4780_v33 = vpop.eup %4779 }
0x11b0   :  { %v2906_v0 = vmul.f32 %v4780_v33, %v2889_v11  ;;  %v4782_v40 = vpop.eup %4781  ;;  %vm2911_vm7 = vweird.f32 %v4780_v33 }
0x11b1   :  { %v2888_v38 = vadd.f32 1.0, %v4782_v40  ;;  %v4784_v32 = vpop.eup %4783  ;;  %vm2912_vm9 = vmor %vm2910_vm8, %vm2911_vm7 }
0x11b2   :  { %v2907_v1 = vsub.f32 1.0, %v2906_v0  ;;  %v4786_v3 = vpop.eup %4785  ;;  %v2738_v46 = vadd.f32 1.0, %v4784_v32  ;;  %v2966_v32 = vrot.slane %v6864_v28, 5 }
0x11b3   :  { %4787 = vrcp.f32 %v2888_v38  ;;  %v2739_v54 = vadd.f32 1.0, %v4786_v3  ;;  %v2901_v16 = vand.u32 2147483648, %v2888_v38  ;;  %vm2895_vm12 = vweird.f32 %v2888_v38 }
0x11b4   :  { %v2908_v6 = vmul.f32 %v4780_v33, %v2907_v1  ;;  %4789 = vrcp.f32 %v2738_v46  ;;  %v2899_v63 = vand.u32 2147483647, %v2888_v38  ;;  %vm2745_vm3 = vweird.f32 %v2738_v46 }
0x11b5   :  { %2775 = vrot.lane.b32.xlu1 %v2773_v30, %s5812_s18  ;;  %4791 = vrcp.f32 %v2739_v54  ;;  %v2902_v13 = vor.u32 1.1754944e-38, %v2901_v16  ;;  %v2751_v24 = vand.u32 2147483648, %v2738_v46  ;;  %v2749_v52 = vand.u32 2147483647, %v2738_v46 }
0x11b6   :  { %v2909_v10 = vadd.f32 %v4780_v33, %v2908_v6  ;;  %vm2900_vm15 = vcmp.eq.f32.partialorder %v2899_v63, 8.507059e+37  ;;  %v2766_v31 = vand.u32 2147483648, %v2739_v54  ;;  %vm2760_vm6 = vweird.f32 %v2739_v54 }
0x11b7   :  { %v2764_v11 = vand.u32 2147483647, %v2739_v54  ;;  %vm2750_vm8 = vcmp.eq.f32.partialorder %v2749_v52, 8.507059e+37 }
0x11b8   :  { %v2913_v29 = vsel %vm2912_vm9, %v4780_v33, %v2909_v10  ;;  %v2752_v33 = vor.u32 1.1754944e-38, %v2751_v24  ;;  %v2767_v1 = vor.u32 1.1754944e-38, %v2766_v31  ;;  %v2774_v10 = vrot.slane %v6889_v26, 5 }
0x11b9   :  { %v6893_v41 = vsel %vm2915_vm10, %v2917_v15, %v2913_v29  ;;  %v4788_v60 = vpop.eup %4787  ;;  %vm2765_vm9 = vcmp.eq.f32.partialorder %v2764_v11, 8.507059e+37  ;;  %vm2696_vm10 = vcmp.gt.s32.totalorder %v6838_v61, 4 }
0x11ba   :  { %v2891_v50 = vmul.f32 %v4788_v60, %v2888_v38  ;;  %v4790_v34 = vpop.eup %4789  ;;  %vm2896_vm11 = vweird.f32 %v4788_v60  ;;  %v4393_v24 = vsel %vm2696_vm10, 1.0, %v5810_v2 }
0x11bb   :  { %v4792_v55 = vpop.eup %4791  ;;  %v2741_v57 = vmul.f32 %v4790_v34, %v2738_v46  ;;  %vm2897_vm13 = vmor %vm2895_vm12, %vm2896_vm11  ;;  %vm2746_vm1 = vweird.f32 %v4790_v34  ;;  %vm2699_vm11 = vcmp.gt.s32.totalorder %v6842_v35, 4 }
0x11bc   :  { %v2892_v44 = vsub.f32 1.0, %v2891_v50  ;;  %v2756_v37 = vmul.f32 %v4792_v55, %v2739_v54  ;;  %vm2761_vm4 = vweird.f32 %v4792_v55  ;;  %vm2747_vm5 = vmor %vm2745_vm3, %vm2746_vm1 }
0x11bd   :  { %v2742_v59 = vsub.f32 1.0, %v2741_v57  ;;  %vm2762_vm7 = vmor %vm2760_vm6, %vm2761_vm4 }
0x11be   :  { %v2893_v58 = vmul.f32 %v4788_v60, %v2892_v44  ;;  %v2757_v4 = vsub.f32 1.0, %v2756_v37 }
0x11bf   :  { %v2743_v22 = vmul.f32 %v4790_v34, %v2742_v59 }
0x11c0   :  { %v2894_v56 = vadd.f32 %v4788_v60, %v2893_v58  ;;  %v2758_v48 = vmul.f32 %v4792_v55, %v2757_v4  ;;  %v2816_v58 = vrot.slane %v6869_v39, 5 }
0x11c1   :  { %v2744_v49 = vadd.f32 %v4790_v34, %v2743_v22 }
0x11c2   :  { %v2898_v7 = vsel %vm2897_vm13, %v4788_v60, %v2894_v56  ;;  %v2759_v30 = vadd.f32 %v4792_v55, %v2758_v48 }
0x11c3   :  { %v6897_v21 = vsel %vm2900_vm15, %v2902_v13, %v2898_v7  ;;  %v2748_v20 = vsel %vm2747_vm5, %v4790_v34, %v2744_v49  ;;  %v2815_v13 = vrot.slane %v6869_v39, 4 }
0x11c4   :  { %v2763_v36 = vsel %vm2762_vm7, %v4792_v55, %v2759_v30  ;;  %v6901_v0 = vsel %vm2750_vm8, %v2752_v33, %v2748_v20 }
0x11c5   :  { %v6904_v40 = vsel %vm2765_vm9, %v2767_v1, %v2763_v36 }
0x11fa   :  { %v2938_v8 = vpop.permute.xlu2 %2937 }
0x11fb   :  { %v2942_v27 = vmul.f32 %v2938_v8, %v6893_v41 }
0x11fd   :  { %2947 = vrot.lane.b32.xlu2 %v2942_v27, %s5812_s18 }
0x1202   :  { %v2926_v45 = vpop.permute.xlu2 %2925 }
0x1203   :  { %v2931_v44 = vmul.f32 %v2926_v45, %v6897_v21 }
0x1211   :  { %v2936_v23 = vpop.permute.xlu0 %2935 }
0x1212   :  { %v2941_v25 = vmul.f32 %v2936_v23, %v6897_v21 }
0x1214   :  { %2945 = vrot.lane.b32.xlu0 %v2941_v25, %s5812_s18  ;;  %v4394_v25 = vsel %vm2699_vm11, 1.0, %v5810_v2 }
0x1215   :  { %v4554_v52 = vpack.i.bf16 %v4393_v24, %v4394_v25 }
0x1217   :  { %v2786_v51 = vpop.permute.xlu1 %2785 }
0x1218   :  { %v2791_v42 = vmul.f32 %v2786_v51, %v6901_v0 }
0x1219   :  { %v2788_v6 = vpop.permute.xlu0 %2787 }
0x121a   :  { %v2792_v38 = vmul.f32 %v2788_v6, %v6904_v40  ;;  %2795 = vrot.lane.b32.xlu2 %v2791_v42, %s5812_s18 }
0x121c   :  { %2777 = vrot.lane.b32.xlu0 %v2774_v10, %s5812_s18  ;;  %2797 = vrot.lane.b32.xlu1 %v2792_v38, %s5812_s18 }
0x121f   :  { %v2928_v3 = vpop.permute.xlu1 %2927 }
0x1220   :  { %v2932_v60 = vmul.f32 %v2928_v3, %v6893_v41 }
0x1224   :  { %2969 = vrot.lane.b32.xlu0 %v2966_v32, %s5817_s21  ;;  %2967 = vrot.lane.b32.xlu1 %v2965_v19, %s5817_s21 }
0x1227   :  { %v2776_v29 = vpop.permute.xlu1 %2775 }
0x1228   :  { %v2781_v15 = vmul.f32 %v2776_v29, %v6901_v0 }
0x1257   :  { %v2948_v46 = vpop.permute.xlu2 %2947 }
0x1258   :  { %v2952_v27 = vadd.f32 %v2948_v46, %v2932_v60 }
0x125a   :  { %v2991_v31 = vsub.f32 %v2952_v27, %v2928_v3 }
0x125c   :  { %v2995_v11 = vrot.slane %v2991_v31, 3 }
0x1274   :  { %v2796_v54 = vpop.permute.xlu2 %2795 }
0x1275   :  { %v2801_v8 = vadd.f32 %v2796_v54, %v2781_v15 }
0x1277   :  { %4793 = vtanh.f32 %v2801_v8  ;;  %v2840_v16 = vsub.f32 %v2801_v8, %v2776_v29 }
0x1278   :  { %4795 = vtanh.f32 %v2952_v27 }
0x1279   :  { %v2844_v7 = vrot.slane %v2840_v16, 4 }
0x127d   :  { %v4794_v50 = vpop.eup %4793 }
0x127e   :  { %2807 = vrot.lane.b32.xlu2 %v4794_v50, %s5813_s22  ;;  %v4796_v34 = vpop.eup %4795 }
0x1286   :  { %v2946_v55 = vpop.permute.xlu0 %2945  ;;  %2959 = vrot.lane.b32.xlu2 %v4796_v34, %s5813_s22 }
0x1287   :  { %v2951_v57 = vadd.f32 %v2946_v55, %v2931_v44 }
0x1289   :  { %4797 = vtanh.f32 %v2951_v57  ;;  %v2990_v30 = vsub.f32 %v2951_v57, %v2926_v45 }
0x128b   :  { %v2994_v20 = vrot.slane %v2990_v30, 4 }
0x128d   :  { %v2996_v33 = vsel %vm1647_vm2, %v2995_v11, %v2994_v20 }
0x128e   :  { %v2778_v37 = vpop.permute.xlu0 %2777  ;;  %2819 = vrot.lane.b32.xlu2 %v2816_v58, %s5817_s21  ;;  %v2798_v4 = vpop.permute.xlu1 %2797 }
0x128f   :  { %v4798_v59 = vpop.eup %4797  ;;  %v2782_v56 = vmul.f32 %v2778_v37, %v6904_v40 }
0x1290   :  { %2957 = vrot.lane.b32.xlu0 %v4798_v59, %s5813_s22 }
0x1291   :  { %v2802_v63 = vadd.f32 %v2798_v4, %v2782_v56 }
0x1293   :  { %4799 = vtanh.f32 %v2802_v63  ;;  %v2841_v22 = vsub.f32 %v2802_v63, %v2778_v37 }
0x1295   :  { %v2845_v48 = vrot.slane %v2841_v22, 3 }
0x1296   :  { %v2970_v51 = vpop.permute.xlu0 %2969  ;;  %v2968_v32 = vpop.permute.xlu1 %2967 }
0x1297   :  { %v2846_v49 = vsel %vm1647_vm2, %v2845_v48, %v2844_v7 }
0x1298   :  { %2817 = vrot.lane.b32.xlu0 %v2815_v13, %s5817_s21 }
0x1299   :  { %v4800_v23 = vpop.eup %4799 }
0x129a   :  { %2809 = vrot.lane.b32.xlu1 %v4800_v23, %s5813_s22 }
0x12a2   :  { %4555 = vperm.xlu1 %4537, %v4554_v52  }
0x12aa   :  { %2997 = vrot.lane.b32.xlu1 %v2996_v33, %s5816_s12 }
0x12d8   :  { %v2808_v36 = vpop.permute.xlu2 %2807 }
0x12d9   :  { %v2813_v15 = vmul.f32 %v2808_v36, %v6901_v0 }
0x12e0   :  { %v2960_v1 = vpop.permute.xlu2 %2959 }
0x12e1   :  { %v2964_v42 = vmul.f32 %v2960_v1, %v6893_v41 }
0x12e3   :  { %v2974_v38 = vsub.f32 %v2964_v42, %v2970_v51 }
0x12e5   :  { %v2983_v45 = vrot.slane %v2974_v38, 3 }
0x12e8   :  { %v2820_v41 = vpop.permute.xlu2 %2819 }
0x1302   :  { %v2958_v6 = vpop.permute.xlu0 %2957 }
0x1303   :  { %v2963_v10 = vmul.f32 %v2958_v6, %v6897_v21 }
0x1305   :  { %v2973_v19 = vsub.f32 %v2963_v10, %v2968_v32 }
0x1307   :  { %v2982_v46 = vrot.slane %v2973_v19, 4 }
0x1309   :  { %v2984_v3 = vsel %vm1647_vm2, %v2983_v45, %v2982_v46 }
0x130a   :  { %v2818_v29 = vpop.permute.xlu0 %2817  ;;  %2985 = vrot.lane.b32.xlu0 %v2984_v3, %s5815_s26 }
0x130b   :  { %v2823_v8 = vsub.f32 %v2813_v15, %v2818_v29 }
0x130c   :  { %v2810_v54 = vpop.permute.xlu1 %2809 }
0x130d   :  { %v2814_v60 = vmul.f32 %v2810_v54, %v6904_v40  ;;  %v2832_v50 = vrot.slane %v2823_v8, 4 }
0x130f   :  { %v2824_v27 = vsub.f32 %v2814_v60, %v2820_v41 }
0x1311   :  { %v2833_v34 = vrot.slane %v2824_v27, 3 }
0x1312   :  { %2847 = vrot.lane.b32.xlu0 %v2846_v49, %s5816_s12 }
0x1313   :  { %v2834_v21 = vsel %vm1647_vm2, %v2833_v34, %v2832_v50 }
0x1314   :  { %2835 = vrot.lane.b32.xlu2 %v2834_v21, %s5815_s26  ;;  %v4556_v44 = vpop.permute.xlu1 %4555 }
0x1315   :  { %v4558_v55 = vunpack.i.h.bf16 %v4556_v44  ;;  %v4557_v40 = vunpack.i.l.bf16 %v4556_v44 }
0x131c   :  { %v2998_v22 = vpop.permute.xlu1 %2997 }
0x136e   :  { %v2836_v57 = vpop.permute.xlu2 %2835 }
0x136f   :  { %v2838_v58 = vmul.f32 %v4558_v55, %v2836_v57 }
0x1371   :  { %v6944_v0 = vadd.f32 %v2838_v58, %v6869_v39  ;;  %v3000_v39 = vmul.f32 %v4557_v40, %v2998_v22 }
0x1373   :  { %4403 = vmatmul.msk.f32.vlgmr.msrb.gmra.mxu0 %vm997_vm14, %v6944_v0  ;;  %v6956_v48 = vadd.f32 %v3000_v39, %v6880_v18 }
0x1375   :  { %v3230_v30 = vrot.slane %v6956_v48, 4  ;;  %v3229_v1 = vrot.slane %v6956_v48, 3 }
0x137c   :  { %v2986_v37 = vpop.permute.xlu0 %2985 }
0x137d   :  { %v2988_v59 = vmul.f32 %v4557_v40, %v2986_v37 }
0x137f   :  { %v6949_v56 = vadd.f32 %v2988_v59, %v6864_v28 }
0x1381   :  { %4406 = vmatmul.msk.f32.vlgmr.msra.gmra.mxu1 %vm997_vm14, %v6949_v56 }
0x1384   :  { %v2848_v49 = vpop.permute.xlu0 %2847 }
0x1385   :  { %v2850_v52 = vmul.f32 %v4558_v55, %v2848_v49 }
0x1387   :  { %v6963_v20 = vadd.f32 %v2850_v52, %v6889_v26 }
0x1389   :  { %v3079_v36 = vrot.slane %v6963_v20, 3 }
0x13f0   :  { %v3028_v4 = vpop.f32.mrf.mxu0 }
0x13f1   :  { %v3032_v16 = vrot.slane %v3028_v4, 3  ;;  %v3033_v31 = vrot.slane %v3028_v4, 4 }
0x13f3   :  { %v3036_v63 = vadd.f32 %v3032_v16, %v6489_v47  ;;  %v3037_v18 = vadd.f32 %v3033_v31, %v6503_v62 }
0x13f5   :  { %4801 = vtanh.f32 %v3036_v63  ;;  %v4405_v42 = vmul.f32 -1.442695, %v3037_v18  ;;  %v4404_v15 = vmul.f32 -1.442695, %v3036_v63 }
0x13fb   :  { %v4802_v7 = vpop.eup %4801 }
0x13fc   :  { %3091 = vrot.lane.b32.xlu0 %v4802_v7, %s5811_s14 }
0x13fe   :  { %v3178_v13 = vpop.f32.mrf.mxu1 }
0x13ff   :  { %v3182_v28 = vrot.slane %v3178_v13, 3  ;;  %v3183_v23 = vrot.slane %v3178_v13, 4 }
0x1401   :  { %v3186_v24 = vadd.f32 %v3182_v28, %v6537_v12  ;;  %v3187_v25 = vadd.f32 %v3183_v23, %v6539_v53 }
0x1403   :  { %4803 = vtanh.f32 %v3186_v24  ;;  %v4407_v26 = vmul.f32 -1.442695, %v3186_v24  ;;  %v4408_v45 = vmul.f32 -1.442695, %v3187_v25  ;;  %v3080_v24 = vrot.slane %v6963_v20, 4 }
0x1404   :  { %4805 = vtanh.f32 %v3187_v25  ;;  %3233 = vrot.lane.b32.xlu0 %v3230_v30, %s5812_s18 }
0x1405   :  { %4807 = vtanh.f32 %v3037_v18 }
0x1406   :  { %4809 = vpow2.f32 %v4407_v26 }
0x1407   :  { %4811 = vpow2.f32 %v4405_v42 }
0x1409   :  { %v4804_v11 = vpop.eup %4803 }
0x140a   :  { %v4806_v33 = vpop.eup %4805  ;;  %3241 = vrot.lane.b32.xlu2 %v4804_v11, %s5811_s14  ;;  %v3272_v11 = vrot.slane %v6949_v56, 4 }
0x140b   :  { %3243 = vrot.lane.b32.xlu1 %v4806_v33, %s5811_s14  ;;  %v4808_v51 = vpop.eup %4807  ;;  %v3271_v33 = vrot.slane %v6949_v56, 3 }
0x140c   :  { %3081 = vrot.lane.b32.xlu0 %v3079_v36, %s5812_s18  ;;  %v4810_v6 = vpop.eup %4809 }
0x140d   :  { %v3194_v38 = vadd.f32 1.0, %v4810_v6  ;;  %v4812_v10 = vpop.eup %4811 }
0x140e   :  { %v3045_v32 = vadd.f32 1.0, %v4812_v10 }
0x140f   :  { %4813 = vrcp.f32 %v3194_v38  ;;  %v3207_v34 = vand.u32 2147483648, %v3194_v38  ;;  %vm3201_vm13 = vweird.f32 %v3194_v38  ;;  %v3205_v21 = vand.u32 2147483647, %v3194_v38 }
0x1410   :  { %4815 = vrcp.f32 %v3045_v32  ;;  %v3072_v63 = vand.u32 2147483648, %v3045_v32  ;;  %vm3066_vm4 = vweird.f32 %v3045_v32  ;;  %v3070_v39 = vand.u32 2147483647, %v3045_v32 }
0x1411   :  { %4817 = vpow2.f32 %v4408_v45  ;;  %v3208_v58 = vor.u32 1.1754944e-38, %v3207_v34  ;;  %vm3206_vm1 = vcmp.eq.f32.partialorder %v3205_v21, 8.507059e+37 }
0x1412   :  { %3093 = vrot.lane.b32.xlu2 %v4808_v51, %s5811_s14  ;;  %4819 = vpow2.f32 %v4404_v15  ;;  %v3073_v13 = vor.u32 1.1754944e-38, %v3072_v63  ;;  %vm3071_vm6 = vcmp.eq.f32.partialorder %v3070_v39, 8.507059e+37 }
0x1413   :  { %3231 = vrot.lane.b32.xlu1 %v3229_v1, %s5812_s18 }
0x1415   :  { %v4814_v19 = vpop.eup %4813 }
0x1416   :  { %v3197_v46 = vmul.f32 %v4814_v19, %v3194_v38  ;;  %v4816_v29 = vpop.eup %4815  ;;  %vm3202_vm12 = vweird.f32 %v4814_v19 }
0x1417   :  { %v3062_v8 = vmul.f32 %v4816_v29, %v3045_v32  ;;  %v4818_v60 = vpop.eup %4817  ;;  %vm3203_vm15 = vmor %vm3201_vm13, %vm3202_vm12  ;;  %vm3067_vm3 = vweird.f32 %v4816_v29 }
0x1418   :  { %v3198_v3 = vsub.f32 1.0, %v3197_v46  ;;  %v3195_v41 = vadd.f32 1.0, %v4818_v60  ;;  %v4820_v57 = vpop.eup %4819  ;;  %vm3068_vm5 = vmor %vm3066_vm4, %vm3067_vm3  ;;  %vm3005_vm3 = vcmp.gt.s32.totalorder %v6842_v35, 5 }
0x1419   :  { %v3063_v50 = vsub.f32 1.0, %v3062_v8  ;;  %v3044_v59 = vadd.f32 1.0, %v4820_v57  ;;  %v4402_v39 = vsel %vm3005_vm3, 1.0, %v5810_v2 }
0x141a   :  { %v3199_v54 = vmul.f32 %v4814_v19, %v3198_v3  ;;  %4821 = vrcp.f32 %v3195_v41  ;;  %v3222_v1 = vand.u32 2147483648, %v3195_v41  ;;  %vm3216_vm8 = vweird.f32 %v3195_v41 }
0x141b   :  { %v3064_v55 = vmul.f32 %v4816_v29, %v3063_v50  ;;  %4823 = vrcp.f32 %v3044_v59  ;;  %v3220_v26 = vand.u32 2147483647, %v3195_v41  ;;  %v3057_v46 = vand.u32 2147483648, %v3044_v59 }
0x141c   :  { %v3200_v27 = vadd.f32 %v4814_v19, %v3199_v54  ;;  %v3223_v38 = vor.u32 1.1754944e-38, %v3222_v1  ;;  %vm3051_vm12 = vweird.f32 %v3044_v59  ;;  %v3055_v3 = vand.u32 2147483647, %v3044_v59 }
0x141d   :  { %v3065_v16 = vadd.f32 %v4816_v29, %v3064_v55  ;;  %vm3221_vm10 = vcmp.eq.f32.partialorder %v3220_v26, 8.507059e+37  ;;  %v3058_v54 = vor.u32 1.1754944e-38, %v3057_v46  ;;  %v3121_v55 = vrot.slane %v6944_v0, 3 }
0x141e   :  { %v3204_v44 = vsel %vm3203_vm15, %v4814_v19, %v3200_v27  ;;  %vm3056_vm15 = vcmp.eq.f32.partialorder %v3055_v3, 8.507059e+37 }
0x141f   :  { %v6973_v37 = vsel %vm3206_vm1, %v3208_v58, %v3204_v44  ;;  %v3069_v7 = vsel %vm3068_vm5, %v4816_v29, %v3065_v16  ;;  %vm3002_vm1 = vcmp.gt.s32.totalorder %v6838_v61, 5 }
0x1420   :  { %v4822_v22 = vpop.eup %4821  ;;  %v6977_v23 = vsel %vm3071_vm6, %v3073_v13, %v3069_v7 }
0x1421   :  { %v3212_v49 = vmul.f32 %v4822_v22, %v3195_v41  ;;  %v4824_v30 = vpop.eup %4823  ;;  %vm3217_vm7 = vweird.f32 %v4822_v22 }
0x1422   :  { %v3047_v31 = vmul.f32 %v4824_v30, %v3044_v59  ;;  %vm3218_vm9 = vmor %vm3216_vm8, %vm3217_vm7  ;;  %vm3052_vm11 = vweird.f32 %v4824_v30 }
0x1423   :  { %v3213_v52 = vsub.f32 1.0, %v3212_v49  ;;  %vm3053_vm13 = vmor %vm3051_vm12, %vm3052_vm11 }
0x1424   :  { %v3048_v36 = vsub.f32 1.0, %v3047_v31 }
0x1425   :  { %v3214_v18 = vmul.f32 %v4822_v22, %v3213_v52 }
0x1426   :  { %v3049_v42 = vmul.f32 %v4824_v30, %v3048_v36 }
0x1427   :  { %v3215_v51 = vadd.f32 %v4822_v22, %v3214_v18 }
0x1428   :  { %v3050_v19 = vadd.f32 %v4824_v30, %v3049_v42  ;;  %v3122_v42 = vrot.slane %v6944_v0, 4 }
0x1429   :  { %v3219_v6 = vsel %vm3218_vm9, %v4822_v22, %v3215_v51  ;;  %v4401_v22 = vsel %vm3002_vm1, 1.0, %v5810_v2 }
0x142a   :  { %v6987_v10 = vsel %vm3221_vm10, %v3223_v38, %v3219_v6  ;;  %v3054_v29 = vsel %vm3053_vm13, %v4824_v30, %v3050_v19  ;;  %v4559_v7 = vpack.i.bf16 %v4401_v22, %v4402_v39 }
0x142b   :  { %v3059_v8 = vsel %vm3056_vm15, %v3058_v54, %v3054_v29 }
0x1464   :  { %v3242_v40 = vpop.permute.xlu2 %3241 }
0x1465   :  { %v3247_v4 = vmul.f32 %v3242_v40, %v6973_v37 }
0x1467   :  { %3251 = vrot.lane.b32.xlu2 %v3247_v4, %s5812_s18 }
0x146c   :  { %v3094_v28 = vpop.permute.xlu2 %3093 }
0x146d   :  { %v3098_v25 = vmul.f32 %v3094_v28, %v6977_v23 }
0x146e   :  { %v3092_v15 = vpop.permute.xlu0 %3091 }
0x146f   :  { %3083 = vrot.lane.b32.xlu2 %v3080_v24, %s5812_s18  ;;  %3103 = vrot.lane.b32.xlu0 %v3098_v25, %s5812_s18  ;;  %v3097_v60 = vmul.f32 %v3092_v15, %v3059_v8 }
0x1476   :  { %v3234_v44 = vpop.permute.xlu0 %3233 }
0x1477   :  { %3275 = vrot.lane.b32.xlu2 %v3272_v11, %s5817_s21  ;;  %3273 = vrot.lane.b32.xlu0 %v3271_v33, %s5817_s21  ;;  %v3238_v13 = vmul.f32 %v3234_v44, %v6987_v10 }
0x147d   :  { %v3244_v32 = vpop.permute.xlu1 %3243 }
0x147e   :  { %v3248_v45 = vmul.f32 %v3244_v32, %v6987_v10  ;;  %v3082_v57 = vpop.permute.xlu0 %3081 }
0x147f   :  { %v3087_v61 = vmul.f32 %v3082_v57, %v3059_v8 }
0x1480   :  { %3253 = vrot.lane.b32.xlu1 %v3248_v45, %s5812_s18 }
0x1485   :  { %v3232_v41 = vpop.permute.xlu1 %3231 }
0x1486   :  { %v3237_v27 = vmul.f32 %v3232_v41, %v6973_v37 }
0x1488   :  { %3101 = vrot.lane.b32.xlu1 %v3097_v60, %s5812_s18 }
0x14c1   :  { %v3252_v50 = vpop.permute.xlu2 %3251 }
0x14c2   :  { %v3257_v34 = vadd.f32 %v3252_v50, %v3237_v27 }
0x14c4   :  { %4825 = vtanh.f32 %v3257_v34  ;;  %v3296_v24 = vsub.f32 %v3257_v34, %v3232_v41 }
0x14c6   :  { %v3300_v30 = vrot.slane %v3296_v24, 5 }
0x14c9   :  { %v3084_v58 = vpop.permute.xlu2 %3083 }
0x14ca   :  { %v4826_v21 = vpop.eup %4825  ;;  %v3088_v40 = vmul.f32 %v3084_v58, %v6977_v23 }
0x14cb   :  { %3263 = vrot.lane.b32.xlu2 %v4826_v21, %s5813_s22 }
0x14d1   :  { %v3276_v6 = vpop.permute.xlu2 %3275 }
0x14d3   :  { %3123 = vrot.lane.b32.xlu2 %v3121_v55, %s5817_s21 }
0x14e1   :  { %v3104_v59 = vpop.permute.xlu0 %3103 }
0x14e2   :  { %v3108_v4 = vadd.f32 %v3104_v59, %v3088_v40 }
0x14e4   :  { %4827 = vtanh.f32 %v3108_v4  ;;  %v3147_v16 = vsub.f32 %v3108_v4, %v3084_v58 }
0x14e6   :  { %v3151_v33 = vrot.slane %v3147_v16, 4 }
0x14e9   :  { %v3274_v19 = vpop.permute.xlu0 %3273 }
0x14ea   :  { %v4828_v63 = vpop.eup %4827 }
0x14eb   :  { %3115 = vrot.lane.b32.xlu0 %v4828_v63, %s5813_s22 }
0x14f2   :  { %v3254_v49 = vpop.permute.xlu1 %3253 }
0x14f3   :  { %v3258_v28 = vadd.f32 %v3254_v49, %v3238_v13  ;;  %4560 = vperm.xlu0 %4531, %v4559_v7  }
0x14f5   :  { %v3297_v25 = vsub.f32 %v3258_v28, %v3234_v44 }
0x14f7   :  { %v3301_v52 = vrot.slane %v3297_v25, 4 }
0x14f9   :  { %v3302_v35 = vsel %vm1647_vm2, %v3301_v52, %v3300_v30 }
0x14fa   :  { %v3102_v31 = vpop.permute.xlu1 %3101 }
0x14fb   :  { %v3107_v18 = vadd.f32 %v3102_v31, %v3087_v61  ;;  %3303 = vrot.lane.b32.xlu0 %v3302_v35, %s5816_s12 }
0x14fd   :  { %4829 = vtanh.f32 %v3107_v18  ;;  %v3146_v11 = vsub.f32 %v3107_v18, %v3082_v57 }
0x14fe   :  { %4831 = vtanh.f32 %v3258_v28 }
0x14ff   :  { %v3150_v36 = vrot.slane %v3146_v11, 5 }
0x1501   :  { %v3152_v51 = vsel %vm1647_vm2, %v3151_v33, %v3150_v36 }
0x1503   :  { %v4830_v1 = vpop.eup %4829 }
0x1504   :  { %3113 = vrot.lane.b32.xlu1 %v4830_v1, %s5813_s22  ;;  %v4832_v26 = vpop.eup %4831 }
0x150c   :  { %3265 = vrot.lane.b32.xlu1 %v4832_v26, %s5813_s22 }
0x1514   :  { %3125 = vrot.lane.b32.xlu1 %v3122_v42, %s5817_s21 }
0x1525   :  { %v3264_v32 = vpop.permute.xlu2 %3263 }
0x1526   :  { %v3269_v45 = vmul.f32 %v3264_v32, %v6973_v37 }
0x1528   :  { %v3279_v3 = vsub.f32 %v3269_v45, %v3274_v19 }
0x152a   :  { %v3288_v41 = vrot.slane %v3279_v3, 5 }
0x152d   :  { %v3124_v50 = vpop.permute.xlu2 %3123 }
0x155d   :  { %v3116_v60 = vpop.permute.xlu0 %3115 }
0x155e   :  { %v3120_v34 = vmul.f32 %v3116_v60, %v6977_v23 }
0x1576   :  { %v3114_v38 = vpop.permute.xlu1 %3113 }
0x1577   :  { %v3119_v15 = vmul.f32 %v3114_v38, %v3059_v8 }
0x1579   :  { %v3129_v21 = vsub.f32 %v3119_v15, %v3124_v50 }
0x157b   :  { %v3138_v37 = vrot.slane %v3129_v21, 5 }
0x157e   :  { %v3266_v46 = vpop.permute.xlu1 %3265 }
0x157f   :  { %v3270_v29 = vmul.f32 %v3266_v46, %v6987_v10  ;;  %v4561_v10 = vpop.permute.xlu0 %4560 }
0x1580   :  { %v4562_v8 = vunpack.i.l.bf16 %v4561_v10  ;;  %v4563_v16 = vunpack.i.h.bf16 %v4561_v10 }
0x1581   :  { %v3280_v54 = vsub.f32 %v3270_v29, %v3276_v6 }
0x1583   :  { %v3289_v27 = vrot.slane %v3280_v54, 4 }
0x1585   :  { %v3290_v44 = vsel %vm1647_vm2, %v3289_v27, %v3288_v41 }
0x1586   :  { %3291 = vrot.lane.b32.xlu2 %v3290_v44, %s5815_s26  ;;  %v3126_v55 = vpop.permute.xlu1 %3125 }
0x1587   :  { %v3130_v57 = vsub.f32 %v3120_v34, %v3126_v55  ;;  %v3304_v24 = vpop.permute.xlu0 %3303 }
0x1588   :  { %v3306_v52 = vmul.f32 %v4562_v8, %v3304_v24 }
0x1589   :  { %v3139_v58 = vrot.slane %v3130_v57, 4 }
0x158b   :  { %v3140_v40 = vsel %vm1647_vm2, %v3139_v58, %v3138_v37 }
0x158c   :  { %3141 = vrot.lane.b32.xlu1 %v3140_v40, %s5815_s26 }
0x158e   :  { %3153 = vrot.lane.b32.xlu2 %v3152_v51, %s5816_s12 }
0x15e0   :  { %v3292_v59 = vpop.permute.xlu2 %3291 }
0x15e1   :  { %v3294_v4 = vmul.f32 %v4562_v8, %v3292_v59 }
0x15e3   :  { %v7019_v23 = vadd.f32 %v3294_v4, %v6949_v56 }
0x15e5   :  { %4414 = vmatmul.msk.f32.vlgmr.msrb.gmra.mxu3 %vm997_vm14, %v7019_v23 }
0x15fe   :  { %v3142_v63 = vpop.permute.xlu1 %3141 }
0x15ff   :  { %v3144_v22 = vmul.f32 %v4563_v16, %v3142_v63 }
0x1601   :  { %v7024_v39 = vadd.f32 %v3144_v22, %v6944_v0  ;;  %v7033_v0 = vadd.f32 %v3306_v52, %v6956_v48  ;;  %v3154_v48 = vpop.permute.xlu2 %3153 }
0x1602   :  { %v3156_v26 = vmul.f32 %v4563_v16, %v3154_v48 }
0x1603   :  { %4411 = vmatmul.msk.f32.vlgmr.msra.gmra.mxu2 %vm997_vm14, %v7024_v39  ;;  %v3535_v61 = vrot.slane %v7033_v0, 2  ;;  %v3536_v1 = vrot.slane %v7033_v0, 3 }
0x1604   :  { %v7044_v42 = vadd.f32 %v3156_v26, %v6963_v20 }
0x1606   :  { %v3385_v6 = vrot.slane %v7044_v42, 2 }
0x1668   :  { %v3484_v7 = vpop.f32.mrf.mxu3 }
0x1669   :  { %v3488_v13 = vrot.slane %v3484_v7, 2  ;;  %v3489_v49 = vrot.slane %v3484_v7, 3 }
0x166b   :  { %v3492_v28 = vadd.f32 %v3488_v13, %v6537_v12  ;;  %v3493_v56 = vadd.f32 %v3489_v49, %v6539_v53 }
0x166d   :  { %4833 = vtanh.f32 %v3492_v28  ;;  %v4415_v38 = vmul.f32 -1.442695, %v3492_v28  ;;  %v4416_v32 = vmul.f32 -1.442695, %v3493_v56 }
0x166e   :  { %4835 = vtanh.f32 %v3493_v56 }
0x1673   :  { %v4834_v25 = vpop.eup %4833 }
0x1674   :  { %v4836_v30 = vpop.eup %4835  ;;  %3547 = vrot.lane.b32.xlu1 %v4834_v25, %s5811_s14 }
0x1675   :  { %3549 = vrot.lane.b32.xlu0 %v4836_v30, %s5811_s14 }
0x167d   :  { %3537 = vrot.lane.b32.xlu0 %v3535_v61, %s5812_s18 }
0x1686   :  { %v3334_v31 = vpop.f32.mrf.mxu2 }
0x1687   :  { %v3338_v35 = vrot.slane %v3334_v31, 2  ;;  %v3339_v18 = vrot.slane %v3334_v31, 3 }
0x1689   :  { %v3342_v11 = vadd.f32 %v3338_v35, %v6489_v47  ;;  %v3343_v33 = vadd.f32 %v3339_v18, %v6503_v62 }
0x168b   :  { %4837 = vtanh.f32 %v3342_v11  ;;  %v4412_v19 = vmul.f32 -1.442695, %v3342_v11  ;;  %v4413_v34 = vmul.f32 -1.442695, %v3343_v33 }
0x168c   :  { %4839 = vtanh.f32 %v3343_v33 }
0x168d   :  { %4841 = vpow2.f32 %v4415_v38 }
0x168e   :  { %4843 = vpow2.f32 %v4416_v32 }
0x168f   :  { %4845 = vpow2.f32 %v4412_v19  ;;  %v3578_v19 = vrot.slane %v7019_v23, 3 }
0x1691   :  { %v4838_v36 = vpop.eup %4837 }
0x1692   :  { %v4840_v51 = vpop.eup %4839  ;;  %3397 = vrot.lane.b32.xlu2 %v4838_v36, %s5811_s14 }
0x1693   :  { %3399 = vrot.lane.b32.xlu1 %v4840_v51, %s5811_s14  ;;  %v4842_v45 = vpop.eup %4841 }
0x1694   :  { %v4844_v46 = vpop.eup %4843  ;;  %v3500_v3 = vadd.f32 1.0, %v4842_v45 }
0x1695   :  { %v3501_v29 = vadd.f32 1.0, %v4844_v46  ;;  %v4846_v15 = vpop.eup %4845 }
0x1696   :  { %4847 = vrcp.f32 %v3500_v3  ;;  %v3350_v54 = vadd.f32 1.0, %v4846_v15  ;;  %v3513_v10 = vand.u32 2147483648, %v3500_v3  ;;  %vm3507_vm6 = vweird.f32 %v3500_v3 }
0x1697   :  { %4849 = vrcp.f32 %v3501_v29  ;;  %v3528_v59 = vand.u32 2147483648, %v3501_v29  ;;  %v3511_v4 = vand.u32 2147483647, %v3500_v3  ;;  %vm3522_vm7 = vweird.f32 %v3501_v29 }
0x1698   :  { %4851 = vrcp.f32 %v3350_v54  ;;  %v3526_v63 = vand.u32 2147483647, %v3501_v29  ;;  %v3514_v13 = vor.u32 1.1754944e-38, %v3513_v10  ;;  %v3363_v18 = vand.u32 2147483648, %v3350_v54 }
0x1699   :  { %4853 = vpow2.f32 %v4413_v34  ;;  %v3529_v56 = vor.u32 1.1754944e-38, %v3528_v59  ;;  %vm3512_vm10 = vcmp.eq.f32.partialorder %v3511_v4, 8.507059e+37  ;;  %vm3357_vm13 = vweird.f32 %v3350_v54 }
0x169a   :  { %3539 = vrot.lane.b32.xlu2 %v3536_v1, %s5812_s18  ;;  %vm3527_vm11 = vcmp.eq.f32.partialorder %v3526_v63, 8.507059e+37  ;;  %v3361_v11 = vand.u32 2147483647, %v3350_v54  ;;  %v3364_v51 = vor.u32 1.1754944e-38, %v3363_v18  ;;  %v3386_v1 = vrot.slane %v7044_v42, 3 }
0x169b   :  { %v3427_v18 = vrot.slane %v7024_v39, 2 }
0x169c   :  { %v4848_v20 = vpop.eup %4847  ;;  %vm3362_vm1 = vcmp.eq.f32.partialorder %v3361_v11, 8.507059e+37 }
0x169d   :  { %v4850_v60 = vpop.eup %4849  ;;  %v3503_v41 = vmul.f32 %v4848_v20, %v3500_v3  ;;  %vm3508_vm4 = vweird.f32 %v4848_v20 }
0x169e   :  { %v3518_v27 = vmul.f32 %v4850_v60, %v3501_v29  ;;  %v4852_v44 = vpop.eup %4851  ;;  %vm3523_vm5 = vweird.f32 %v4850_v60  ;;  %vm3509_vm8 = vmor %vm3507_vm6, %vm3508_vm4 }
0x169f   :  { %v3504_v50 = vsub.f32 1.0, %v3503_v41  ;;  %v3353_v37 = vmul.f32 %v4852_v44, %v3350_v54  ;;  %v4854_v16 = vpop.eup %4853  ;;  %vm3524_vm9 = vmor %vm3522_vm7, %vm3523_vm5  ;;  %vm3358_vm12 = vweird.f32 %v4852_v44 }
0x16a0   :  { %v3519_v21 = vsub.f32 1.0, %v3518_v27  ;;  %v3351_v28 = vadd.f32 1.0, %v4854_v16  ;;  %vm3359_vm15 = vmor %vm3357_vm13, %vm3358_vm12  ;;  %v3577_v27 = vrot.slane %v7019_v23, 2 }
0x16a1   :  { %v3505_v55 = vmul.f32 %v4848_v20, %v3504_v50  ;;  %v3354_v8 = vsub.f32 1.0, %v3353_v37 }
0x16a2   :  { %3387 = vrot.lane.b32.xlu2 %v3385_v6, %s5812_s18  ;;  %v3520_v57 = vmul.f32 %v4850_v60, %v3519_v21  ;;  %4855 = vrcp.f32 %v3351_v28  ;;  %v3378_v3 = vand.u32 2147483648, %v3351_v28  ;;  %vm3372_vm4 = vweird.f32 %v3351_v28 }
0x16a3   :  { %v3506_v58 = vadd.f32 %v4848_v20, %v3505_v55  ;;  %v3355_v49 = vmul.f32 %v4852_v44, %v3354_v8  ;;  %v3376_v29 = vand.u32 2147483647, %v3351_v28 }
0x16a4   :  { %v3521_v40 = vadd.f32 %v4850_v60, %v3520_v57  ;;  %v3379_v54 = vor.u32 1.1754944e-38, %v3378_v3 }
0x16a5   :  { %v3510_v22 = vsel %vm3509_vm8, %v4848_v20, %v3506_v58  ;;  %v3356_v35 = vadd.f32 %v4852_v44, %v3355_v49  ;;  %vm3377_vm6 = vcmp.eq.f32.partialorder %v3376_v29, 8.507059e+37 }
0x16a6   :  { %v3525_v7 = vsel %vm3524_vm9, %v4850_v60, %v3521_v40  ;;  %v7048_v24 = vsel %vm3512_vm10, %v3514_v13, %v3510_v22 }
0x16a7   :  { %v7050_v30 = vsel %vm3527_vm11, %v3529_v56, %v3525_v7  ;;  %v3360_v33 = vsel %vm3359_vm15, %v4852_v44, %v3356_v35 }
0x16a8   :  { %v4856_v48 = vpop.eup %4855  ;;  %v7057_v26 = vsel %vm3362_vm1, %v3364_v51, %v3360_v33  ;;  %v7086_v51 = vld [vmem:[%s7337_s25] sm:$0x3] }
0x16a9   :  { %v3368_v38 = vmul.f32 %v4856_v48, %v3351_v28  ;;  %vm3373_vm3 = vweird.f32 %v4856_v48  ;;  %vm3311_vm8 = vcmp.gt.s32.totalorder %v7086_v51, 6 }
0x16aa   :  { %vm3374_vm5 = vmor %vm3372_vm4, %vm3373_vm3 }
0x16ab   :  { %v3369_v32 = vsub.f32 1.0, %v3368_v38 }
0x16ad   :  { %v3370_v45 = vmul.f32 %v4856_v48, %v3369_v32 }
0x16af   :  { %v3371_v46 = vadd.f32 %v4856_v48, %v3370_v45  ;;  %v4921_v45 = vld [vmem:[#allocation13] ss:$0 sm:$0xff] }
0x16b1   :  { %v3375_v15 = vsel %vm3374_vm5, %v4856_v48, %v3371_v46  ;;  %v1385_v46 = vadd.f32 %v4921_v45, %v6562_v43 }
0x16b2   :  { %v7064_v20 = vsel %vm3377_vm6, %v3379_v54, %v3375_v15 }
0x16b3   :  { %v1390_v3 = vadd.f32 %v1385_v46, %v6509_v9 }
0x16b5   :  { %v1394_v29 = vsel %vm674_vm0, %v1390_v3, 0.0 }
0x16e6   :  { %v3548_v25 = vpop.permute.xlu1 %3547 }
0x16e7   :  { %v3550_v52 = vpop.permute.xlu0 %3549  ;;  %v3553_v61 = vmul.f32 %v3548_v25, %v7048_v24 }
0x16e8   :  { %v3554_v31 = vmul.f32 %v3550_v52, %v7050_v30 }
0x16e9   :  { %3557 = vrot.lane.b32.xlu1 %v3553_v61, %s5812_s18 }
0x16ea   :  { %3559 = vrot.lane.b32.xlu0 %v3554_v31, %s5812_s18 }
0x16ec   :  { %v3398_v36 = vpop.permute.xlu2 %3397 }
0x16ed   :  { %v3403_v6 = vmul.f32 %v3398_v36, %v7057_v26  ;;  %v7082_v36 = vld [vmem:[%s7336_s23] sm:$0x3] }
0x16ee   :  { %vm3308_vm7 = vcmp.gt.s32.totalorder %v7082_v36, 6 }
0x16ef   :  { %v3538_v34 = vpop.permute.xlu0 %3537 }
0x16f0   :  { %v3543_v21 = vmul.f32 %v3538_v34, %v7048_v24 }
0x16f1   :  { %3389 = vrot.lane.b32.xlu1 %v3386_v1, %s5812_s18  ;;  %v4409_v1 = vsel %vm3308_vm7, 1.0, %v5810_v2 }
0x16f2   :  { %3407 = vrot.lane.b32.xlu0 %v3403_v6, %s5812_s18  ;;  %v4410_v6 = vsel %vm3311_vm8, 1.0, %v5810_v2 }
0x16f3   :  { %v4564_v38 = vpack.i.bf16 %v4409_v1, %v4410_v6 }
0x16f4   :  { %v3540_v50 = vpop.permute.xlu2 %3539 }
0x16f5   :  { %v3544_v44 = vmul.f32 %v3540_v50, %v7050_v30 }
0x16f9   :  { %3581 = vrot.lane.b32.xlu1 %v3578_v19, %s5817_s21  ;;  %v3428_v19 = vrot.slane %v7024_v39, 3 }
0x16fc   :  { %v3388_v58 = vpop.permute.xlu2 %3387 }
0x16fd   :  { %v3393_v16 = vmul.f32 %v3388_v58, %v7057_v26 }
0x1705   :  { %v3400_v60 = vpop.permute.xlu1 %3399 }
0x1706   :  { %v3404_v41 = vmul.f32 %v3400_v60, %v7064_v20 }
0x1708   :  { %3409 = vrot.lane.b32.xlu2 %v3404_v41, %s5812_s18 }
0x1710   :  { %3579 = vrot.lane.b32.xlu2 %v3577_v27, %s5817_s21 }
0x175b   :  { %v3558_v55 = vpop.permute.xlu1 %3557 }
0x175c   :  { %v3560_v57 = vpop.permute.xlu0 %3559  ;;  %v3563_v37 = vadd.f32 %v3558_v55, %v3543_v21 }
0x175d   :  { %v3564_v40 = vadd.f32 %v3560_v57, %v3544_v44 }
0x175e   :  { %4857 = vtanh.f32 %v3563_v37  ;;  %v3602_v10 = vsub.f32 %v3563_v37, %v3538_v34 }
0x175f   :  { %v3603_v8 = vsub.f32 %v3564_v40, %v3540_v50 }
0x1760   :  { %v3606_v59 = vrot.slane %v3602_v10, 6 }
0x1761   :  { %v3607_v4 = vrot.slane %v3603_v8, 5 }
0x1762   :  { %v3410_v28 = vpop.permute.xlu2 %3409 }
0x1763   :  { %v3390_v63 = vpop.permute.xlu1 %3389  ;;  %v7074_v22 = vsel %vm1647_vm2, %v3607_v4, %v3606_v59 }
0x1764   :  { %v4858_v7 = vpop.eup %4857  ;;  %v3408_v13 = vpop.permute.xlu0 %3407  ;;  %v3394_v49 = vmul.f32 %v3390_v63, %v7064_v20 }
0x1765   :  { %v3413_v56 = vadd.f32 %v3408_v13, %v3393_v16  ;;  %3569 = vrot.lane.b32.xlu1 %v4858_v7, %s5813_s22 }
0x1766   :  { %v3414_v25 = vadd.f32 %v3410_v28, %v3394_v49 }
0x1767   :  { %4859 = vtanh.f32 %v3413_v56  ;;  %v3452_v52 = vsub.f32 %v3413_v56, %v3388_v58 }
0x1768   :  { %4861 = vtanh.f32 %v3414_v25  ;;  %v3453_v61 = vsub.f32 %v3414_v25, %v3390_v63 }
0x1769   :  { %v3456_v31 = vrot.slane %v3452_v52, 6  ;;  %4863 = vtanh.f32 %v3564_v40 }
0x176a   :  { %v3457_v35 = vrot.slane %v3453_v61, 5  ;;  %v3580_v41 = vpop.permute.xlu2 %3579 }
0x176b   :  { %v3582_v15 = vpop.permute.xlu1 %3581 }
0x176c   :  { %v3458_v11 = vsel %vm1647_vm2, %v3457_v35, %v3456_v31 }
0x176d   :  { %v4860_v33 = vpop.eup %4859  ;;  %3429 = vrot.lane.b32.xlu1 %v3427_v18, %s5817_s21 }
0x176e   :  { %v4862_v48 = vpop.eup %4861  ;;  %3419 = vrot.lane.b32.xlu0 %v4860_v33, %s5813_s22 }
0x176f   :  { %3421 = vrot.lane.b32.xlu2 %v4862_v48, %s5813_s22  ;;  %v4864_v32 = vpop.eup %4863 }
0x1776   :  { %3571 = vrot.lane.b32.xlu0 %v4864_v32, %s5813_s22 }
0x1777   :  { %4565 = vperm.xlu2 %4548, %v4564_v38  }
0x177e   :  { %3431 = vrot.lane.b32.xlu0 %v3428_v19, %s5817_s21 }
0x17a0   :  { %1395 = vadd.xlane.f32.xlu2 %v1394_v29 }
0x17c9   :  { %v3422_v57 = vpop.permute.xlu2 %3421 }
0x17ca   :  { %v3426_v58 = vmul.f32 %v3422_v57, %v7064_v20  ;;  %v1389_v20 = vadd.f32 %v6552_v17, %v6478_v5  ;;  %v3957_v57 = vld [vmem:[#allocation35 + $0x18] sm:$0xff] }
0x17cb   :  { %3980 = vmatpush.msrb.mxu0 %v3957_v57 }
0x17cc   :  { %v1391_v13 = vsel %vm674_vm0, %v1389_v20, 0.0 }
0x17d7   :  { %v3570_v60 = vpop.permute.xlu1 %3569 }
0x17d8   :  { %v3575_v27 = vmul.f32 %v3570_v60, %v7048_v24 }
0x17da   :  { %v3585_v34 = vsub.f32 %v3575_v27, %v3580_v41 }
0x17dc   :  { %v3594_v43 = vrot.slane %v3585_v34, 6 }
0x17df   :  { %v3430_v9 = vpop.permute.xlu1 %3429 }
0x17e0   :  { %v3420_v54 = vpop.permute.xlu0 %3419 }
0x17e1   :  { %v3425_v44 = vmul.f32 %v3420_v54, %v7057_v26  ;;  %v4566_v26 = vpop.permute.xlu2 %4565 }
0x17e2   :  { %v4567_v56 = vunpack.i.l.bf16 %v4566_v26  ;;  %v4568_v17 = vunpack.i.h.bf16 %v4566_v26 }
0x17e3   :  { %v3435_v40 = vsub.f32 %v3425_v44, %v3430_v9  ;;  %v3955_v9 = vld [vmem:[#allocation35 + $0x8] sm:$0xff] }
0x17e5   :  { %v3444_v59 = vrot.slane %v3435_v40, 6 }
0x17e8   :  { %v3572_v50 = vpop.permute.xlu0 %3571 }
0x17e9   :  { %v3576_v21 = vmul.f32 %v3572_v50, %v7050_v30 }
0x17eb   :  { %v3586_v55 = vsub.f32 %v3576_v21, %v3582_v15 }
0x17ed   :  { %v3595_v37 = vrot.slane %v3586_v55, 5 }
0x17ef   :  { %v3596_v10 = vsel %vm1647_vm2, %v3595_v37, %v3594_v43  ;;  %v3956_v37 = vld [vmem:[#allocation35 + $0x10] sm:$0xff] }
0x17f0   :  { %v3432_v8 = vpop.permute.xlu0 %3431  ;;  %3597 = vrot.lane.b32.xlu1 %v3596_v10, %s5815_s26  ;;  %3981 = vmatpush.msrb.mxu0 %v3956_v37 }
0x17f1   :  { %v3436_v24 = vsub.f32 %v3426_v58, %v3432_v8  ;;  %v3954_v58 = vld [vmem:[#allocation35] sm:$0xff] }
0x17f2   :  { %3982 = vmatpush.msrb.mxu0 %v3955_v9 }
0x17f3   :  { %v3445_v4 = vrot.slane %v3436_v24, 5 }
0x17f4   :  { %3983 = vmatpush.msrb.mxu0 %v3954_v58 }
0x17f5   :  { %v3446_v30 = vsel %vm1647_vm2, %v3445_v4, %v3444_v59 }
0x17f6   :  { %3447 = vrot.lane.b32.xlu0 %v3446_v30, %s5815_s26 }
0x1813   :  { %v1396_v16 = vpop.xlane.xlu2 %1395 }
0x1814   :  { %v1398_v63 = vmul.f32 %v1396_v16, %v6309_v14 }
0x1816   :  { %v7110_v7 = vsub.f32 %v1390_v3, %v1398_v63 }
0x1818   :  { %v1402_v49 = vmul.f32 %v7110_v7, %v7110_v7 }
0x181a   :  { %1392 = vadd.xlane.f32.xlu1 %v1391_v13  ;;  %v1406_v28 = vsel %vm674_vm0, %v1402_v49, 0.0  ;;  %v4586_v13 = vld [vmem:[#allocation14] ss:$0 sm:$0xff] }
0x1820   :  { %1407 = vadd.xlane.f32.xlu0 %v1406_v28 }
0x1833   :  { %3609 = vrot.lane.b32.xlu1 %v7074_v22, %s5816_s12 }
0x1834   :  { %3459 = vrot.lane.b32.xlu0 %v3458_v11, %s5816_s12 }
0x1862   :  { %v3598_v25 = vpop.permute.xlu1 %3597 }
0x1863   :  { %v3600_v52 = vmul.f32 %v4567_v56, %v3598_v25 }
0x1865   :  { %v7120_v5 = vadd.f32 %v3600_v52, %v7019_v23  ;;  %v4587_v52 = vld [vmem:[#allocation16] ss:$0 sm:$0xff] }
0x1867   :  { %4422 = vmatmul.msk.f32.vlgmr.msrb.gmra.mxu1 %vm997_vm14, %v7120_v5 }
0x1868   :  { %v3448_v61 = vpop.permute.xlu0 %3447 }
0x1869   :  { %v3450_v31 = vmul.f32 %v4568_v17, %v3448_v61 }
0x186b   :  { %v7125_v35 = vadd.f32 %v3450_v31, %v7024_v39 }
0x186d   :  { %4419 = vmatmul.msk.f32.vlgmr.msra.gmra.mxu0 %vm997_vm14, %v7125_v35 }
0x188d   :  { %v1393_v22 = vpop.xlane.xlu1 %1392 }
0x188e   :  { %v1397_v18 = vmul.f32 %v1393_v22, %v6309_v14 }
0x1890   :  { %v7130_v11 = vsub.f32 %v1389_v20, %v1397_v18 }
0x1892   :  { %v1401_v23 = vmul.f32 %v7130_v11, %v7130_v11 }
0x1893   :  { %v1408_v46 = vpop.xlane.xlu0 %1407 }
0x1894   :  { %v1403_v33 = vsel %vm674_vm0, %v1401_v23, 0.0  ;;  %v1410_v54 = vmul.f32 %v1408_v46, %v6309_v14 }
0x1895   :  { %1404 = vadd.xlane.f32.xlu2 %v1403_v33 }
0x1896   :  { %v1412_v41 = vadd.f32 1e-12, %v1410_v54 }
0x1898   :  { %vm1429_vm10 = vweird.f32 %v1412_v41 }
0x18a5   :  { %v3610_v3 = vpop.permute.xlu1 %3609 }
0x18a6   :  { %v3460_v34 = vpop.permute.xlu0 %3459 }
0x18a7   :  { %v3462_v44 = vmul.f32 %v4568_v17, %v3460_v34 }
0x18e4   :  { %v3778_v48 = vpop.f32.mrf.mxu1 }
0x18e5   :  { %v3782_v1 = vrot.slane %v3778_v48, 1  ;;  %v3783_v6 = vrot.slane %v3778_v48, 2 }
0x18e7   :  { %v7136_v39 = vadd.f32 %v3782_v1, %v6537_v12  ;;  %v7139_v38 = vadd.f32 %v3783_v6, %v6539_v53  ;;  %v3612_v53 = vmul.f32 %v4567_v56, %v3610_v3 }
0x18e9   :  { %4865 = vtanh.f32 %v7136_v39  ;;  %v4423_v17 = vmul.f32 -1.442695, %v7136_v39 }
0x18ea   :  { %4867 = vtanh.f32 %v7139_v38  ;;  %v3640_v32 = vpop.f32.mrf.mxu0 }
0x18eb   :  { %v3644_v19 = vrot.slane %v3640_v32, 1  ;;  %v3645_v45 = vrot.slane %v3640_v32, 2 }
0x18ed   :  { %v7144_v29 = vadd.f32 %v3644_v19, %v6489_v47  ;;  %v7147_v15 = vadd.f32 %v3645_v45, %v6503_v62  ;;  %v3613_v47 = vadd.f32 %v3612_v53, %v7033_v0  ;;  %v7160_v0 = vadd.f32 %v3462_v44, %v7044_v42 }
0x18ef   :  { %v4866_v12 = vpop.eup %4865  ;;  %4869 = vtanh.f32 %v7144_v29  ;;  %v3829_v50 = vrot.slane %v3613_v47, 1  ;;  %v3830_v21 = vrot.slane %v3613_v47, 2  ;;  %v3691_v10 = vrot.slane %v7160_v0, 1 }
0x18f0   :  { %v4868_v60 = vpop.eup %4867  ;;  %3841 = vrot.lane.b32.xlu2 %v4866_v12, %s5811_s14  ;;  %4871 = vtanh.f32 %v7147_v15 }
0x18f1   :  { %3843 = vrot.lane.b32.xlu0 %v4868_v60, %s5811_s14  ;;  %4873 = vrsqrt.f32 %v1412_v41 }
0x18f5   :  { %v4870_v27 = vpop.eup %4869 }
0x18f6   :  { %3703 = vrot.lane.b32.xlu1 %v4870_v27, %s5811_s14  ;;  %v4872_v62 = vpop.eup %4871 }
0x18f7   :  { %v4874_v55 = vpop.eup %4873 }
0x18f8   :  { %3705 = vrot.lane.b32.xlu2 %v4872_v62, %s5811_s14  ;;  %v1424_v43 = vmul.f32 %v4874_v55, %v1412_v41  ;;  %vm1430_vm9 = vweird.f32 %v4874_v55 }
0x18f9   :  { %3831 = vrot.lane.b32.xlu0 %v3829_v50, %s5812_s18  ;;  %vm1431_vm11 = vmor %vm1429_vm10, %vm1430_vm9 }
0x18fa   :  { %v1425_v40 = vmul.f32 %v4874_v55, %v1424_v43 }
0x18fc   :  { %v1426_v8 = vmul.f32 0.5, %v1425_v40 }
0x18fe   :  { %3833 = vrot.lane.b32.xlu1 %v3830_v21, %s5812_s18  ;;  %v1427_v30 = vsub.f32 1.5, %v1426_v8 }
0x1900   :  { %v1428_v42 = vmul.f32 %v4874_v55, %v1427_v30 }
0x1902   :  { %v1432_v16 = vsel %vm1431_vm11, %v4874_v55, %v1428_v42 }
0x1903   :  { %v1434_v49 = vmul.f32 %v1432_v16, %v7110_v7  ;;  %v4421_v7 = vmul.f32 -1.442695, %v7147_v15  ;;  %v4420_v15 = vmul.f32 -1.442695, %v7144_v29 }
0x1905   :  { %v1440_v25 = vmul.f32 %v4586_v13, %v1434_v49 }
0x1906   :  { %3693 = vrot.lane.b32.xlu1 %v3691_v10, %s5812_s18 }
0x1907   :  { %v1446_v22 = vadd.f32 %v4587_v52, %v1440_v25 }
0x1908   :  { %v1405_v24 = vpop.xlane.xlu2 %1404 }
0x1909   :  { %v1409_v59 = vmul.f32 %v1405_v24, %v6309_v14  ;;  %v3964_v33 = vrot.slane %v1446_v22, 7 }
0x190b   :  { %v1411_v4 = vadd.f32 1e-12, %v1409_v59 }
0x190d   :  { %4875 = vrsqrt.f32 %v1411_v4  ;;  %vm1419_vm13 = vweird.f32 %v1411_v4 }
0x190e   :  { %4877 = vpow2.f32 %v4423_v17 }
0x190f   :  { %4879 = vpow2.f32 %v4421_v7 }
0x1913   :  { %v4876_v26 = vpop.eup %4875 }
0x1914   :  { %v1414_v63 = vmul.f32 %v4876_v26, %v1411_v4  ;;  %vm1420_vm12 = vweird.f32 %v4876_v26  ;;  %v4878_v1 = vpop.eup %4877  ;;  %v3692_v4 = vrot.slane %v7160_v0, 2 }
0x1915   :  { %vm1421_vm15 = vmor %vm1419_vm13, %vm1420_vm12  ;;  %v3794_v6 = vadd.f32 1.0, %v4878_v1  ;;  %v4880_v39 = vpop.eup %4879 }
0x1916   :  { %v1415_v20 = vmul.f32 %v4876_v26, %v1414_v63  ;;  %v3657_v32 = vadd.f32 1.0, %v4880_v39  ;;  %v3992_v39 = vld [vmem:[%s7338_s28 + $0x18] sm:$0xff] }
0x1917   :  { %4881 = vrcp.f32 %v3794_v6  ;;  %v3807_v27 = vand.u32 2147483648, %v3794_v6  ;;  %vm3801_vm3 = vweird.f32 %v3794_v6  ;;  %v3805_v62 = vand.u32 2147483647, %v3794_v6  ;;  %4012 = vmatpush.msra.mxu1 %v3992_v39  ;;  %v3896_v39 = vld [vmem:[#allocation23] sm:$0xff] }
0x1918   :  { %v1416_v28 = vmul.f32 0.5, %v1415_v20  ;;  %4883 = vrcp.f32 %v3657_v32  ;;  %v3684_v37 = vand.u32 2147483648, %v3657_v32  ;;  %vm3678_vm7 = vweird.f32 %v3657_v32 }
0x1919   :  { %v3808_v21 = vor.u32 1.1754944e-38, %v3807_v27  ;;  %vm3806_vm5 = vcmp.eq.f32.partialorder %v3805_v62, 8.507059e+37  ;;  %v3682_v58 = vand.u32 2147483647, %v3657_v32  ;;  %v3872_v20 = vrot.slane %v7120_v5, 2 }
0x191a   :  { %v1417_v56 = vsub.f32 1.5, %v1416_v28  ;;  %v3685_v10 = vor.u32 1.1754944e-38, %v3684_v37  ;;  %v3733_v27 = vrot.slane %v7125_v35, 1 }
0x191b   :  { %vm3683_vm9 = vcmp.eq.f32.partialorder %v3682_v58, 8.507059e+37 }
0x191c   :  { %v1418_v14 = vmul.f32 %v4876_v26, %v1417_v56 }
0x191d   :  { %v4882_v19 = vpop.eup %4881 }
0x191e   :  { %v1422_v61 = vsel %vm1421_vm15, %v4876_v26, %v1418_v14  ;;  %v3797_v45 = vmul.f32 %v4882_v19, %v3794_v6  ;;  %v4884_v3 = vpop.eup %4883  ;;  %vm3802_vm1 = vweird.f32 %v4882_v19 }
0x191f   :  { %v1433_v31 = vmul.f32 %v1422_v61, %v7130_v11  ;;  %v4424_v11 = vmul.f32 -1.442695, %v7139_v38  ;;  %v3674_v54 = vmul.f32 %v4884_v3, %v3657_v32  ;;  %vm3803_vm4 = vmor %vm3801_vm3, %vm3802_vm1  ;;  %vm3679_vm6 = vweird.f32 %v4884_v3  ;;  %v3991_v32 = vld [vmem:[%s7338_s28 + $0x10] sm:$0xff] }
0x1920   :  { %v3798_v46 = vsub.f32 1.0, %v3797_v45  ;;  %vm3680_vm8 = vmor %vm3678_vm7, %vm3679_vm6  ;;  %4013 = vmatpush.msra.mxu1 %v3991_v32  ;;  %v4588_v45 = vld [vmem:[#allocation37] ss:$0 sm:$0xff]  ;;  %vm3617_vm6 = vcmp.gt.s32.totalorder %v7086_v51, 7 }
0x1921   :  { %v1439_v18 = vmul.f32 %v4586_v13, %v1433_v31  ;;  %4885 = vpow2.f32 %v4424_v11  ;;  %v3675_v47 = vsub.f32 1.0, %v3674_v54  ;;  %v3871_v13 = vrot.slane %v7120_v5, 1  ;;  %v3989_v11 = vld [vmem:[%s7338_s28] sm:$0xff] }
0x1922   :  { %v3799_v12 = vmul.f32 %v4882_v19, %v3798_v46  ;;  %4887 = vpow2.f32 %v4420_v15 }
0x1923   :  { %v1445_v23 = vadd.f32 %v4587_v52, %v1439_v18  ;;  %v3676_v50 = vmul.f32 %v4884_v3, %v3675_v47 }
0x1924   :  { %v3800_v41 = vadd.f32 %v4882_v19, %v3799_v12 }
0x1925   :  { %v3965_v48 = vsel %vm1647_vm2, %v3964_v33, %v1445_v23  ;;  %v3677_v43 = vadd.f32 %v4884_v3, %v3676_v50 }
0x1926   :  { %4427 = vmatmul.msk.f32.vlgmr.msrb.gmra.mxu0 %vm674_vm0, %v3965_v48  ;;  %v3804_v38 = vsel %vm3803_vm4, %v4882_v19, %v3800_v41  ;;  %v3990_v19 = vld [vmem:[%s7338_s28 + $0x8] sm:$0xff] }
0x1927   :  { %v4886_v53 = vpop.eup %4885  ;;  %v7173_v44 = vsel %vm3806_vm5, %v3808_v21, %v3804_v38  ;;  %v3681_v40 = vsel %vm3680_vm8, %v4884_v3, %v3677_v43  ;;  %4014 = vmatpush.msra.mxu1 %v3990_v19  ;;  %vm3614_vm5 = vcmp.gt.s32.totalorder %v7082_v36, 7  ;;  %v4024_v19 = vld [vmem:[#allocation40 + $0x18] sm:$0xff] }
0x1928   :  { %v3795_v60 = vadd.f32 1.0, %v4886_v53  ;;  %v4888_v34 = vpop.eup %4887  ;;  %v7177_v24 = vsel %vm3683_vm9, %v3685_v10, %v3681_v40 }
0x1929   :  { %v3656_v55 = vadd.f32 1.0, %v4888_v34  ;;  %4015 = vmatpush.msra.mxu1 %v3989_v11  ;;  %v4023_v11 = vld [vmem:[#allocation40 + $0x10] sm:$0xff] }
0x192a   :  { %4889 = vrcp.f32 %v3795_v60  ;;  %v3822_v0 = vand.u32 2147483648, %v3795_v60  ;;  %vm3816_vm11 = vweird.f32 %v3795_v60  ;;  %v3820_v56 = vand.u32 2147483647, %v3795_v60 }
0x192b   :  { %4891 = vrcp.f32 %v3656_v55  ;;  %v3669_v18 = vand.u32 2147483648, %v3656_v55  ;;  %vm3663_vm1 = vweird.f32 %v3656_v55  ;;  %v3667_v23 = vand.u32 2147483647, %v3656_v55 }
0x192c   :  { %v3823_v14 = vor.u32 1.1754944e-38, %v3822_v0  ;;  %vm3821_vm13 = vcmp.eq.f32.partialorder %v3820_v56, 8.507059e+37 }
0x192d   :  { %v3670_v7 = vor.u32 1.1754944e-38, %v3669_v18  ;;  %vm3668_vm4 = vcmp.eq.f32.partialorder %v3667_v23, 8.507059e+37  ;;  %v3926_v23 = vld [vmem:[#allocation32 + $0x8] sm:$0xff] }
0x192e   :  { %3948 = vmatpush.msra.mxu3 %v3926_v23  ;;  %v4592_v23 = vld [vmem:[%s7342_s7] ss:$0 sm:$0xff] }
0x1930   :  { %v4890_v9 = vpop.eup %4889 }
0x1931   :  { %v3812_v8 = vmul.f32 %v4890_v9, %v3795_v60  ;;  %v4892_v26 = vpop.eup %4891  ;;  %vm3817_vm10 = vweird.f32 %v4890_v9 }
0x1932   :  { %v3659_v63 = vmul.f32 %v4892_v26, %v3656_v55  ;;  %vm3818_vm12 = vmor %vm3816_vm11, %vm3817_vm10  ;;  %vm3664_vm15 = vweird.f32 %v4892_v26  ;;  %v4417_v55 = vsel %vm3614_vm5, 1.0, %v5810_v2 }
0x1933   :  { %v3813_v42 = vsub.f32 1.0, %v3812_v8  ;;  %vm3665_vm3 = vmor %vm3663_vm1, %vm3664_vm15 }
0x1934   :  { %v3660_v28 = vsub.f32 1.0, %v3659_v63 }
0x1935   :  { %v3814_v16 = vmul.f32 %v4890_v9, %v3813_v42 }
0x1936   :  { %v3661_v52 = vmul.f32 %v4892_v26, %v3660_v28 }
0x1937   :  { %v3815_v49 = vadd.f32 %v4890_v9, %v3814_v16 }
0x1938   :  { %v3662_v22 = vadd.f32 %v4892_v26, %v3661_v52 }
0x1939   :  { %v3819_v25 = vsel %vm3818_vm12, %v4890_v9, %v3815_v49 }
0x193a   :  { %v7187_v17 = vsel %vm3821_vm13, %v3823_v14, %v3819_v25  ;;  %v3666_v33 = vsel %vm3665_vm3, %v4892_v26, %v3662_v22 }
0x193b   :  { %v7191_v1 = vsel %vm3668_vm4, %v3670_v7, %v3666_v33  ;;  %v3925_v33 = vld [vmem:[#allocation32] sm:$0xff] }
0x193c   :  { %3949 = vmatpush.msra.mxu3 %v3925_v33  ;;  %v4598_v33 = vld [vmem:[%s7343_s10] ss:$0 sm:$0xff] }
0x194a   :  { %v3842_v29 = vpop.permute.xlu2 %3841 }
0x194b   :  { %v3847_v57 = vmul.f32 %v3842_v29, %v7173_v44 }
0x194d   :  { %3851 = vrot.lane.b32.xlu2 %v3847_v57, %s5812_s18  ;;  %v4418_v57 = vsel %vm3617_vm6, 1.0, %v5810_v2  ;;  %v3734_v2 = vrot.slane %v7125_v35, 2 }
0x194e   :  { %v4569_v43 = vpack.i.bf16 %v4417_v55, %v4418_v57  ;;  %v4179_v57 = vld [vmem:[#allocation47 + $0x18] sm:$0xff] }
0x1952   :  { %v3706_v59 = vpop.permute.xlu2 %3705 }
0x1953   :  { %v3710_v30 = vmul.f32 %v3706_v59, %v7177_v24 }
0x1955   :  { %3695 = vrot.lane.b32.xlu2 %v3692_v4, %s5812_s18  ;;  %3715 = vrot.lane.b32.xlu1 %v3710_v30, %s5812_s18 }
0x195d   :  { %3875 = vrot.lane.b32.xlu2 %v3872_v20, %s5817_s21  ;;  %3873 = vrot.lane.b32.xlu1 %v3871_v13, %s5817_s21 }
0x1963   :  { %v3844_v61 = vpop.permute.xlu0 %3843 }
0x1964   :  { %v3848_v31 = vmul.f32 %v3844_v61, %v7187_v17 }
0x1966   :  { %3853 = vrot.lane.b32.xlu0 %v3848_v31, %s5812_s18 }
0x1968   :  { %v3704_v48 = vpop.permute.xlu1 %3703 }
0x1969   :  { %v3709_v6 = vmul.f32 %v3704_v48, %v7191_v1 }
0x196b   :  { %v3832_v46 = vpop.permute.xlu0 %3831 }
0x196c   :  { %v3837_v12 = vmul.f32 %v3832_v46, %v7173_v44  ;;  %v4021_v46 = vld [vmem:[#allocation40] sm:$0xff] }
0x196e   :  { %3713 = vrot.lane.b32.xlu0 %v3709_v6, %s5812_s18 }
0x1970   :  { %v3834_v47 = vpop.permute.xlu1 %3833 }
0x1971   :  { %v3838_v10 = vmul.f32 %v3834_v47, %v7187_v17  ;;  %v4147_v47 = vld [vmem:[#allocation46 + $0x8] sm:$0xff] }
0x1978   :  { %v3694_v62 = vpop.permute.xlu1 %3693 }
0x1979   :  { %v3699_v9 = vmul.f32 %v3694_v62, %v7191_v1  ;;  %v4590_v62 = vld [vmem:[#allocation34] ss:$0 sm:$0xff] }
0x19a3   :  { %v3985_v3 = vpop.f32.mrf.mxu0 }
0x19a4   :  { %v3986_v15 = vadd.f32 %v4588_v45, %v3985_v3  ;;  %v4022_v45 = vld [vmem:[#allocation40 + $0x8] sm:$0xff]  ;;  %v4589_v3 = vld [vmem:[#allocation38] ss:$0 sm:$0xff] }
0x19a6   :  { %4893 = vtanh.f32 %v3986_v15 }
0x19a7   :  { %v3852_v54 = vpop.permute.xlu2 %3851 }
0x19a8   :  { %v3857_v53 = vadd.f32 %v3852_v54, %v3837_v12 }
0x19aa   :  { %4895 = vtanh.f32 %v3857_v53 }
0x19ac   :  { %v4894_v60 = vpop.eup %4893 }
0x19ad   :  { %4428 = vmatmul.msk.f32.vlgmr.msra.gmra.mxu1 %vm674_vm0, %v4894_v60 }
0x19af   :  { %v3696_v38 = vpop.permute.xlu2 %3695 }
0x19b0   :  { %v4896_v41 = vpop.eup %4895  ;;  %v3700_v50 = vmul.f32 %v3696_v38, %v7177_v24  ;;  %v4053_v38 = vld [vmem:[#allocation41 + $0x8] sm:$0xff] }
0x19b1   :  { %3863 = vrot.lane.b32.xlu2 %v4896_v41, %s5813_s22  ;;  %4075 = vmatpush.msrb.mxu3 %v4053_v38 }
0x19b7   :  { %v3876_v59 = vpop.permute.xlu2 %3875 }
0x19b9   :  { %3735 = vrot.lane.b32.xlu2 %v3733_v27, %s5817_s21  ;;  %v4146_v27 = vld [vmem:[#allocation46] sm:$0xff] }
0x19c7   :  { %v3716_v34 = vpop.permute.xlu1 %3715 }
0x19c8   :  { %v3720_v21 = vadd.f32 %v3716_v34, %v3700_v50  ;;  %v4052_v50 = vld [vmem:[#allocation41] sm:$0xff] }
0x19c9   :  { %4076 = vmatpush.msrb.mxu3 %v4052_v50 }
0x19ca   :  { %4897 = vtanh.f32 %v3720_v21 }
0x19cf   :  { %v3874_v42 = vpop.permute.xlu1 %3873 }
0x19d0   :  { %v4898_v29 = vpop.eup %4897 }
0x19d1   :  { %3727 = vrot.lane.b32.xlu1 %v4898_v29, %s5813_s22 }
0x19d8   :  { %v3854_v37 = vpop.permute.xlu0 %3853 }
0x19d9   :  { %4570 = vperm.xlu1 %4537, %v4569_v43   ;;  %v3858_v36 = vadd.f32 %v3854_v37, %v3838_v10  ;;  %v4178_v43 = vld [vmem:[#allocation47 + $0x10] sm:$0xff]  ;;  %v4177_v37 = vld [vmem:[#allocation47 + $0x8] sm:$0xff] }
0x19e0   :  { %v3714_v58 = vpop.permute.xlu0 %3713 }
0x19e1   :  { %v3719_v40 = vadd.f32 %v3714_v58, %v3699_v9  ;;  %v4176_v9 = vld [vmem:[#allocation47] sm:$0xff] }
0x19e3   :  { %4899 = vtanh.f32 %v3719_v40  ;;  %v4593_v40 = vld [vmem:[%s7339_s30] ss:$0 sm:$0xff] }
0x19e4   :  { %4901 = vtanh.f32 %v3858_v36 }
0x19e9   :  { %v4900_v8 = vpop.eup %4899 }
0x19ea   :  { %3725 = vrot.lane.b32.xlu0 %v4900_v8, %s5813_s22  ;;  %v4902_v51 = vpop.eup %4901  ;;  %v4085_v8 = vld [vmem:[#allocation43 + $0x18] sm:$0xff] }
0x19eb   :  { %4105 = vmatpush.msra.mxu0 %v4085_v8 }
0x19f2   :  { %3865 = vrot.lane.b32.xlu0 %v4902_v51, %s5813_s22  ;;  %v4084_v51 = vld [vmem:[#allocation43 + $0x10] sm:$0xff] }
0x19f3   :  { %4106 = vmatpush.msra.mxu0 %v4084_v51 }
0x19fa   :  { %3737 = vrot.lane.b32.xlu0 %v3734_v2, %s5817_s21  ;;  %v4083_v2 = vld [vmem:[#allocation43 + $0x8] sm:$0xff] }
0x19fb   :  { %4107 = vmatpush.msra.mxu0 %v4083_v2 }
0x1a0b   :  { %v3864_v30 = vpop.permute.xlu2 %3863 }
0x1a0c   :  { %v3869_v26 = vmul.f32 %v3864_v30, %v7173_v44  ;;  %v4594_v30 = vld [vmem:[%s7340_s1] ss:$0 sm:$0xff] }
0x1a0e   :  { %v3879_v63 = vsub.f32 %v3869_v26, %v3874_v42 }
0x1a10   :  { %v3888_v0 = vrot.slane %v3879_v63, 7  ;;  %v4211_v63 = vld [vmem:[#allocation49 + $0x18] sm:$0xff] }
0x1a13   :  { %v3736_v25 = vpop.permute.xlu2 %3735 }
0x1a2a   :  { %v4017_v15 = vpop.f32.mrf.mxu1 }
0x1a2b   :  { %v4018_v60 = vadd.f32 %v4589_v3, %v4017_v15 }
0x1a2d   :  { %4903 = vtanh.f32 %v4018_v60 }
0x1a43   :  { %v3728_v28 = vpop.permute.xlu1 %3727 }
0x1a44   :  { %v3732_v52 = vmul.f32 %v3728_v28, %v7177_v24  ;;  %v4117_v28 = vld [vmem:[#allocation44 + $0x18] sm:$0xff] }
0x1a45   :  { %4137 = vmatpush.msrb.mxu1 %v4117_v28 }
0x1a4b   :  { %v4571_v7 = vpop.permute.xlu1 %4570 }
0x1a4c   :  { %v4572_v48 = vunpack.i.l.bf16 %v4571_v7  ;;  %v4573_v12 = vunpack.i.h.bf16 %v4571_v7  ;;  %v4597_v7 = vld [vmem:[%s6082_s19] ss:$0 sm:$0xff]  ;;  %s5682_s19 = scalar_lea.hbm %s6087_s24, 2 }
0x1a4d   :  { %p5684_p3 = scmp.lt.s32.totalorder %s5682_s19, %s5680_s13 }
0x1a4f   :  { %p5685_p4 = por %p5684_p3, %p5683_p2 }
0x1a51   :  { %p5686_p5 = pnand %p5685_p4, %p5681_p1 }
0x1a5c   :  { %v3726_v4 = vpop.permute.xlu0 %3725 }
0x1a5d   :  { %v3731_v13 = vmul.f32 %v3726_v4, %v7191_v1  ;;  %v3897_v1 = vld [vmem:[#allocation23 + $0x8] sm:$0xff] }
0x1a5e   :  { %3919 = vmatpush.msrb.mxu2 %v3897_v1 }
0x1a5f   :  { %v3741_v14 = vsub.f32 %v3731_v13, %v3736_v25  ;;  %v4209_v13 = vld [vmem:[#allocation49 + $0x8] sm:$0xff]  ;;  %v4115_v25 = vld [vmem:[#allocation44 + $0x8] sm:$0xff] }
0x1a60   :  { %3920 = vmatpush.msrb.mxu2 %v3896_v39 }
0x1a61   :  { %v3750_v22 = vrot.slane %v3741_v14, 7 }
0x1a62   :  { %4044 = vmatpush.msra.mxu2 %v4024_v19 }
0x1a64   :  { %v3866_v16 = vpop.permute.xlu0 %3865  ;;  %4045 = vmatpush.msra.mxu2 %v4023_v11 }
0x1a65   :  { %v3870_v20 = vmul.f32 %v3866_v16, %v7187_v17 }
0x1a66   :  { %4046 = vmatpush.msra.mxu2 %v4022_v45 }
0x1a67   :  { %v3880_v49 = vsub.f32 %v3870_v20, %v3876_v59  ;;  %v4082_v59 = vld [vmem:[#allocation43] sm:$0xff] }
0x1a68   :  { %4047 = vmatpush.msra.mxu2 %v4021_v46  ;;  %4108 = vmatpush.msra.mxu0 %v4082_v59  ;;  %v4210_v20 = vld [vmem:[#allocation49 + $0x10] sm:$0xff] }
0x1a69   :  { %v3889_v56 = vrot.slane %v3880_v49, 6  ;;  %v4208_v49 = vld [vmem:[#allocation49] sm:$0xff] }
0x1a6a   :  { %4231 = vmatpush.msrb.mxu0 %v4211_v63 }
0x1a6b   :  { %v3890_v61 = vsel %vm1647_vm2, %v3889_v56, %v3888_v0  ;;  %v4116_v0 = vld [vmem:[#allocation44 + $0x10] sm:$0xff] }
0x1a6c   :  { %v3738_v31 = vpop.permute.xlu0 %3737  ;;  %3891 = vrot.lane.b32.xlu2 %v3890_v61, %s5815_s26  ;;  %4232 = vmatpush.msrb.mxu0 %v4210_v20  ;;  %v4595_v56 = vld [vmem:[%s6072_s27] ss:$0 sm:$0xff]  ;;  %s5818_s27 = smov [#allocation50]  }
0x1a6d   :  { %v3742_v44 = vsub.f32 %v3732_v52, %v3738_v31  ;;  %4138 = vmatpush.msrb.mxu1 %v4116_v0  ;;  %v4114_v52 = vld [vmem:[#allocation44] sm:$0xff]  ;;  %s4247_s8 = sshll.u32 %s5818_s27, 4  ;;  %s4248_s8 = int_to_ptr.vmem [resolvable:$true] %s4247_s8 }
0x1a6e   :  { %4233 = vmatpush.msrb.mxu0 %v4209_v13 }
0x1a6f   :  { %v3751_v18 = vrot.slane %v3742_v44, 6  ;;  %4139 = vmatpush.msrb.mxu1 %v4115_v25  ;;  %v4596_v44 = vld [vmem:[%s7341_s3] ss:$0 sm:$0xff] }
0x1a70   :  { %4234 = vmatpush.msrb.mxu0 %v4208_v49 }
0x1a71   :  { %v3752_v17 = vsel %vm1647_vm2, %v3751_v18, %v3750_v22  ;;  %4140 = vmatpush.msrb.mxu1 %v4114_v52 }
0x1a72   :  { %3753 = vrot.lane.b32.xlu0 %v3752_v17, %s5815_s26 }
0x1ac6   :  { %v3892_v24 = vpop.permute.xlu2 %3891 }
0x1ac7   :  { %v3894_v6 = vmul.f32 %v4572_v48, %v3892_v24 }
0x1ac9   :  { %v3895_v32 = vadd.f32 %v3894_v6, %v7120_v5  ;;  %v4904_v5 = vpop.eup %4903 }
0x1acb   :  { %4426 = vmatmul.msk.f32.vlgmr.msra.gmra.mxu3 %vm997_vm14, %v3895_v32 }
0x1acc   :  { %4199 = vmatpush.msra.mxu3 %v4179_v57 }
0x1ace   :  { %4200 = vmatpush.msra.mxu3 %v4178_v43 }
0x1ad0   :  { %4201 = vmatpush.msra.mxu3 %v4177_v37 }
0x1ad2   :  { %4202 = vmatpush.msra.mxu3 %v4176_v9 }
0x1ae4   :  { %v3754_v54 = vpop.permute.xlu0 %3753 }
0x1ae5   :  { %v3756_v53 = vmul.f32 %v4573_v12, %v3754_v54 }
0x1ae7   :  { %v3757_v41 = vadd.f32 %v3756_v53, %v7125_v35  ;;  %v4591_v35 = vld [vmem:[#allocation25] ss:$0 sm:$0xff] }
0x1ae9   :  { %4425 = vmatmul.msk.f32.vlgmr.msrb.gmra.mxu2 %vm997_vm14, %v3757_v41 }
0x1aea   :  { %4169 = vmatpush.msrb.mxu2 %v4147_v47 }
0x1aec   :  { %4170 = vmatpush.msrb.mxu2 %v4146_v27 }
0x1af1   :  { %4429 = vmatmul.msk.f32.vlgmr.msra.gmra.mxu2 %vm674_vm0, %v4904_v5 }
0x1b4e   :  { %v3951_v34 = vpop.f32.mrf.mxu3 }
0x1b4f   :  { %v3952_v21 = vadd.f32 %v4590_v62, %v3951_v34 }
0x1b51   :  { %4433 = vmatmul.msk.f32.vlgmr.msrb.gmra.mxu2 %vm997_vm14, %v3952_v21 }
0x1b6c   :  { %v3922_v29 = vpop.f32.mrf.mxu2 }
0x1b6d   :  { %v3923_v55 = vadd.f32 %v4591_v35, %v3922_v29 }
0x1b6f   :  { %4430 = vmatmul.msk.f32.vlgmr.msrb.gmra.mxu3 %vm997_vm14, %v3923_v55 }
0x1b74   :  { %v4049_v58 = vpop.f32.mrf.mxu2 }
0x1b75   :  { %v4050_v1 = vadd.f32 %v4592_v23, %v4049_v58 }
0x1bd4   :  { %v4172_v10 = vpop.f32.mrf.mxu2 }
0x1bd5   :  { %v4173_v36 = vadd.f32 %v4593_v40, %v4172_v10 }
0x1bd7   :  { %4905 = vtanh.f32 %v4173_v36 }
0x1bdd   :  { %v4906_v4 = vpop.eup %4905 }
0x1bde   :  { %4434 = vmatmul.msk.f32.vlgmr.msra.gmra.mxu3 %vm674_vm0, %v4906_v4 }
0x1bf2   :  { %v4078_v42 = vpop.f32.mrf.mxu3 }
0x1bf3   :  { %v4079_v26 = vadd.f32 %v4594_v30, %v4078_v42 }
0x1bf5   :  { %4907 = vtanh.f32 %v4079_v26 }
0x1bfb   :  { %v4908_v16 = vpop.eup %4907 }
0x1bfc   :  { %4431 = vmatmul.msk.f32.vlgmr.msra.gmra.mxu0 %vm674_vm0, %v4908_v16 }
0x1c61   :  { %v4204_v14 = vpop.f32.mrf.mxu3 }
0x1c62   :  { %v4205_v61 = vadd.f32 %v4595_v56, %v4204_v14 }
0x1c64   :  { %4909 = vtanh.f32 %v4205_v61 }
0x1c6a   :  { %v4910_v31 = vpop.eup %4909 }
0x1c6b   :  { %4435 = vmatmul.msk.f32.vlgmr.msrb.gmra.mxu0 %vm674_vm0, %v4910_v31 }
0x1c79   :  { %v4110_v22 = vpop.f32.mrf.mxu0 }
0x1c7a   :  { %v4111_v18 = vadd.f32 %v4596_v44, %v4110_v22 }
0x1c7c   :  { %4911 = vtanh.f32 %v4111_v18 }
0x1c82   :  { %v4912_v17 = vpop.eup %4911 }
0x1c83   :  { %4432 = vmatmul.msk.f32.vlgmr.msrb.gmra.mxu1 %vm674_vm0, %v4912_v17 }
0x1ce8   :  { %v4236_v48 = vpop.f32.mrf.mxu0 }
0x1ce9   :  { %v4237_v39 = vadd.f32 %v4597_v7, %v4236_v48 }
0x1d00   :  { %v4142_v24 = vpop.f32.mrf.mxu1 }
0x1d01   :  { %v4143_v6 = vadd.f32 %v4598_v33, %v4142_v24 }
0x1d03   :  { %v4145_v32 = vadd.f32 %v4143_v6, %v4050_v1 }
0x1d05   :  { %v4239_v19 = vadd.f32 %v4237_v39, %v4145_v32 }
0x1d07   :  { %v4240_v11 = vmul.f32 0.33333334, %v4239_v19 }
0x1d09   :  { %4241 = vst [vmem:[#allocation50] sm:$0x3] %v4240_v11 }
0x1d0a   :  { %5689 = shalt.err (!%p5686_p5)
}
0x1d0b   :  { %4252 = dma.vmem_to_hbm [thread:$0]  %s4248_s8, 32, %s4250_s17, [#allocation4]  }
0x1d0c   :  { %5722 = dma.done.wait [#allocation4], 32  }
0x1d0d   :  { %5723 = vsyncadd [#allocation4], 4294967264 }
0x1d0e   :  { %4257 = vsyncpa [#allocation3], 1 }
0x1d0f   :  { %4258 = vsyncpa [#allocation6], 1 }
0x1d10   :  { %4259 = vsyncpa [#allocation9], 1 }
0x1d11   :  { %4260 = vsyncpa [#allocation12], 1 }
0x1d12   :  { %4261 = vsyncpa [#allocation15], 1 }
0x1d13   :  { %4262 = vsyncpa [#allocation18], 1 }
0x1d14   :  { %4263 = vsyncpa [#allocation21], 1 }
0x1d15   :  { %4264 = vsyncpa [#allocation24], 1 }
0x1d16   :  { %4265 = vsyncpa [#allocation27], 1 }
0x1d17   :  { %4266 = vsyncpa [#allocation30], 1 }
0x1d18   :  { %4267 = vsyncpa [#allocation33], 1 }
0x1d19   :  { %4268 = vsyncpa [#allocation36], 1 }
0x1d1a   :  { %4269 = vsyncpa [#allocation39], 1 }
0x1d1b   :  { %4270 = vsyncpa [#allocation42], 1 }
0x1d1c   :  { %4271 = vsyncpa [#allocation45], 1 }
0x1d1d   :  { %4272 = vsyncpa [#allocation48], 1 }
0x1d1e   :  { %4273 = vsyncpa [#allocation4], 1 }

</bundles_post_ra>
